<compile_context>
chip_gen: v5e
topology: v5e:2x2
jax: 0.10.0
libtpu: 0.0.40
codegen_flags: <defaults>
</compile_context>

<pallas_src>
import functools

import jax
import jax.numpy as jnp
from jax.experimental import pallas as pl
from jax.experimental.pallas import tpu as pltpu


def _mlp_kernel(x_ref,
                w1_ref, b1_ref,
                w2_ref, b2_ref,
                w3_ref, b3_ref,
                w4_ref, b4_ref,
                o_ref):
    # x_ref: (bm, 35) f32; w* bf16 stored (in, out); b1..b3 f32 (1, out) in VMEM;
    # b4 f32 (1, 1) in SMEM; o_ref (bm, 1) f32.
    x = x_ref[...].astype(jnp.bfloat16)                                    # cast in-kernel (no HBM round trip)
    h = jnp.dot(x, w1_ref[...], preferred_element_type=jnp.float32)       # (bm, 512)
    h = jnp.maximum(h + b1_ref[...], 0.0)
    h = jnp.dot(h.astype(jnp.bfloat16), w2_ref[...],
                preferred_element_type=jnp.float32)                       # (bm, 256)
    h = jnp.maximum(h + b2_ref[...], 0.0)
    h = jnp.dot(h.astype(jnp.bfloat16), w3_ref[...],
                preferred_element_type=jnp.float32)                       # (bm, 128)
    h = jnp.maximum(h + b3_ref[...], 0.0)

    # Natural (M,K)@(K,1) final layer: no (bm,128) operand transpose.
    logits = jnp.dot(h.astype(jnp.bfloat16), w4_ref[...],
                     preferred_element_type=jnp.float32)                  # (bm, 1)
    o_ref[...] = jax.nn.sigmoid(logits + b4_ref[0, 0]).astype(o_ref.dtype)


def _round_up(n, m):
    return ((n + m - 1) // m) * m


@functools.partial(jax.jit, static_argnames=("block_m",))
def net_adam_forward(x, prep, *, block_m=1024):
    """x: (B, 35) float32.  prep: output of prepare_params().

    block_m must be a multiple of 128 (use multiples of 256 on v6e/v7x); keep <= 1024 on v5e.
    The batch is never padded/copied: Pallas handles the ragged last block and masks its writes.
    """
    assert block_m % 128 == 0, "block_m must be a multiple of 128 (256-multiples preferred on v6e/v7x)"
    B, d_in = x.shape
    bm = min(block_m, _round_up(B, 256))          # shrink for small batches; stays a multiple of 128
    num_blocks = pl.cdiv(B, bm)

    w1, b1 = prep["w1"], prep["b1"]
    w2, b2 = prep["w2"], prep["b2"]
    w3, b3 = prep["w3"], prep["b3"]
    w4, b4 = prep["w4"], prep["b4"]

    flops = 2 * B * (d_in * 512 + 512 * 256 + 256 * 128 + 128 * 1)
    bytes_accessed = (x.size * 4
                      + (w1.size + w2.size + w3.size + w4.size) * 2
                      + (b1.size + b2.size + b3.size + b4.size) * 4
                      + B * 4)
    cost = pl.CostEstimate(flops=flops, transcendentals=4 * B, bytes_accessed=bytes_accessed)

    def x_map(i):
        return (i, 0)

    def rep_map(i):          # weights/biases resident across the whole grid
        return (0, 0)

    out = pl.pallas_call(
        _mlp_kernel,
        out_shape=jax.ShapeDtypeStruct((B, 1), jnp.float32),
        grid=(num_blocks,),
        in_specs=[
            pl.BlockSpec((bm, d_in), x_map),                       # x: (bm, 35) f32, 35 == full dim
            pl.BlockSpec(w1.shape, rep_map),                       # (35, 512) bf16
            pl.BlockSpec(b1.shape, rep_map),                       # (1, 512) f32
            pl.BlockSpec(w2.shape, rep_map),                       # (512, 256) bf16
            pl.BlockSpec(b2.shape, rep_map),                       # (1, 256) f32
            pl.BlockSpec(w3.shape, rep_map),                       # (256, 128) bf16
            pl.BlockSpec(b3.shape, rep_map),                       # (1, 128) f32
            pl.BlockSpec(w4.shape, rep_map),                       # (128, 1) bf16
            pl.BlockSpec(memory_space=pltpu.MemorySpace.SMEM),     # b4 scalar (1, 1) f32 via SMEM
        ],
        out_specs=pl.BlockSpec((bm, 1), lambda i: (i, 0)),
        compiler_params=pltpu.CompilerParams(
            dimension_semantics=("parallel",),
            vmem_limit_bytes=32 * 1024 * 1024,
        ),
        cost_estimate=cost,
    )(x, w1, b1, w2, b2, w3, b3, w4, b4)
    return out


def prepare_params(params):
    """One-time parameter prep (hoisted out of the forward path): bf16 weight casts, w4/b4 reshape."""
    return {
        "w1": params["w1"].astype(jnp.bfloat16),                    # (35, 512)
        "b1": params["b1"].astype(jnp.float32),                     # (1, 512)
        "w2": params["w2"].astype(jnp.bfloat16),                    # (512, 256)
        "b2": params["b2"].astype(jnp.float32),                     # (1, 256)
        "w3": params["w3"].astype(jnp.bfloat16),                    # (256, 128)
        "b3": params["b3"].astype(jnp.float32),                     # (1, 128)
        "w4": params["w4"].reshape(128, 1).astype(jnp.bfloat16),    # (128, 1)
        "b4": params["b4"].reshape(1, 1).astype(jnp.float32),       # (1, 1) -> SMEM scalar
    }


def init_params(key):
    """Deterministic init mirroring PyTorch nn.Linear default U(-1/sqrt(fan_in), 1/sqrt(fan_in)).
    Weights are stored transposed vs PyTorch, i.e. (in_features, out_features)."""
    dims = [(35, 512), (512, 256), (256, 128), (128, 1)]
    params = {}
    keys = jax.random.split(key, 2 * len(dims))
    for idx, (fan_in, fan_out) in enumerate(dims):
        bound = 1.0 / jnp.sqrt(jnp.float32(fan_in))
        w = jax.random.uniform(keys[2 * idx], (fan_in, fan_out),
                               minval=-bound, maxval=bound, dtype=jnp.float32)
        b = jax.random.uniform(keys[2 * idx + 1], (1, fan_out),
                               minval=-bound, maxval=bound, dtype=jnp.float32)
        params[f"w{idx + 1}"] = w
        params[f"b{idx + 1}"] = b
    return params


def reference_forward(x, params):
    h = jnp.maximum(x @ params["w1"] + params["b1"], 0.0)
    h = jnp.maximum(h @ params["w2"] + params["b2"], 0.0)
    h = jnp.maximum(h @ params["w3"] + params["b3"], 0.0)
    return jax.nn.sigmoid(h @ params["w4"] + params["b4"])


if __name__ == "__main__":
    key = jax.random.PRNGKey(0)
    k_params, k_x = jax.random.split(key)
    params = init_params(k_params)
    prep = prepare_params(params)

    B = 300  # deliberately not a multiple of any block size -> exercises ragged boundary blocks
    x = jax.random.normal(k_x, (B, 35), dtype=jnp.float32)

    out = jax.block_until_ready(net_adam_forward(x, prep))                      # default block_m (single ragged block)
    out_multi = jax.block_until_ready(net_adam_forward(x, prep, block_m=256))   # multi-block grid, ragged last block

    ref = reference_forward(x, params)
    assert out.shape == (B, 1)
    # bf16 matmul operands (f32 accumulation) -> slightly looser tolerance vs f32 reference.
    for o in (out, out_multi):
        err = float(jnp.max(jnp.abs(o - ref)))
        assert jnp.allclose(o, ref, atol=2e-2, rtol=2e-2), f"mismatch vs reference, max abs err={err}"

    print("KERNEL_OK")
</pallas_src>

<mosaic_0001>
module attributes {stable_mosaic.version = 11 : i64} {
  func.func @_mlp_kernel(%arg0: i32, %arg1: memref<512x35xf32, #tpu.memory_space<vmem>>, %arg2: memref<35x512xbf16, #tpu.memory_space<vmem>>, %arg3: memref<1x512xf32, #tpu.memory_space<vmem>>, %arg4: memref<512x256xbf16, #tpu.memory_space<vmem>>, %arg5: memref<1x256xf32, #tpu.memory_space<vmem>>, %arg6: memref<256x128xbf16, #tpu.memory_space<vmem>>, %arg7: memref<1x128xf32, #tpu.memory_space<vmem>>, %arg8: memref<128x1xbf16, #tpu.memory_space<vmem>>, %arg9: memref<1x1xf32, #tpu.memory_space<smem>>, %arg10: memref<512x1xf32, #tpu.memory_space<vmem>>) attributes {dimension_semantics = [#tpu.dimension_semantics<parallel>], iteration_bounds = array<i64: 1>, scalar_prefetch = 0 : i64, scratch_operands = 0 : i64, tpu.core_type = #tpu.core_type<tc>, window_params = [{transform_indices = @transform_0, window_bounds = array<i64: 512, 35>}, {pipeline_mode = #tpu.pipeline_mode<synchronous>, transform_indices = @transform_1, window_bounds = array<i64: 35, 512>}, {pipeline_mode = #tpu.pipeline_mode<synchronous>, transform_indices = @transform_2, window_bounds = array<i64: 1, 512>}, {pipeline_mode = #tpu.pipeline_mode<synchronous>, transform_indices = @transform_3, window_bounds = array<i64: 512, 256>}, {pipeline_mode = #tpu.pipeline_mode<synchronous>, transform_indices = @transform_4, window_bounds = array<i64: 1, 256>}, {pipeline_mode = #tpu.pipeline_mode<synchronous>, transform_indices = @transform_5, window_bounds = array<i64: 256, 128>}, {pipeline_mode = #tpu.pipeline_mode<synchronous>, transform_indices = @transform_6, window_bounds = array<i64: 1, 128>}, {pipeline_mode = #tpu.pipeline_mode<synchronous>, transform_indices = @transform_7, window_bounds = array<i64: 128, 1>}, {transform_indices = @transform_8, window_bounds = array<i64: 1, 1>}, {transform_indices = @transform_9, window_bounds = array<i64: 512, 1>}]} {
    %c0 = arith.constant 0 : index
    %c0_0 = arith.constant 0 : index
    %0 = vector.load %arg1[%c0, %c0_0] : memref<512x35xf32, #tpu.memory_space<vmem>>, vector<512x35xf32>
    %1 = arith.truncf %0 : vector<512x35xf32> to vector<512x35xbf16>
    %c0_1 = arith.constant 0 : index
    %c0_2 = arith.constant 0 : index
    %2 = vector.load %arg2[%c0_1, %c0_2] : memref<35x512xbf16, #tpu.memory_space<vmem>>, vector<35x512xbf16>
    %cst = arith.constant dense<0.000000e+00> : vector<512x512xf32>
    %3 = tpu.matmul %1, %2, %cst {dimension_numbers = #tpu.dot_dimension_numbers<[1], [0], [0], [1], [0, 0, 1, 1], [], []>} : vector<512x35xbf16>, vector<35x512xbf16>, vector<512x512xf32> -> vector<512x512xf32>
    %c0_3 = arith.constant 0 : index
    %c0_4 = arith.constant 0 : index
    %4 = vector.load %arg3[%c0_3, %c0_4] : memref<1x512xf32, #tpu.memory_space<vmem>>, vector<1x512xf32>
    %5 = vector.broadcast %4 : vector<1x512xf32> to vector<512x512xf32>
    %6 = arith.addf %3, %5 : vector<512x512xf32>
    %cst_5 = arith.constant 0.000000e+00 : f32
    %7 = vector.broadcast %cst_5 : f32 to vector<512x512xf32>
    %8 = arith.maximumf %6, %7 : vector<512x512xf32>
    %9 = arith.truncf %8 : vector<512x512xf32> to vector<512x512xbf16>
    %c0_6 = arith.constant 0 : index
    %c0_7 = arith.constant 0 : index
    %10 = vector.load %arg4[%c0_6, %c0_7] : memref<512x256xbf16, #tpu.memory_space<vmem>>, vector<512x256xbf16>
    %cst_8 = arith.constant dense<0.000000e+00> : vector<512x256xf32>
    %11 = tpu.matmul %9, %10, %cst_8 {dimension_numbers = #tpu.dot_dimension_numbers<[1], [0], [0], [1], [0, 0, 1, 1], [], []>} : vector<512x512xbf16>, vector<512x256xbf16>, vector<512x256xf32> -> vector<512x256xf32>
    %c0_9 = arith.constant 0 : index
    %c0_10 = arith.constant 0 : index
    %12 = vector.load %arg5[%c0_9, %c0_10] : memref<1x256xf32, #tpu.memory_space<vmem>>, vector<1x256xf32>
    %13 = vector.broadcast %12 : vector<1x256xf32> to vector<512x256xf32>
    %14 = arith.addf %11, %13 : vector<512x256xf32>
    %cst_11 = arith.constant 0.000000e+00 : f32
    %15 = vector.broadcast %cst_11 : f32 to vector<512x256xf32>
    %16 = arith.maximumf %14, %15 : vector<512x256xf32>
    %17 = arith.truncf %16 : vector<512x256xf32> to vector<512x256xbf16>
    %c0_12 = arith.constant 0 : index
    %c0_13 = arith.constant 0 : index
    %18 = vector.load %arg6[%c0_12, %c0_13] : memref<256x128xbf16, #tpu.memory_space<vmem>>, vector<256x128xbf16>
    %cst_14 = arith.constant dense<0.000000e+00> : vector<512x128xf32>
    %19 = tpu.matmul %17, %18, %cst_14 {dimension_numbers = #tpu.dot_dimension_numbers<[1], [0], [0], [1], [0, 0, 1, 1], [], []>} : vector<512x256xbf16>, vector<256x128xbf16>, vector<512x128xf32> -> vector<512x128xf32>
    %c0_15 = arith.constant 0 : index
    %c0_16 = arith.constant 0 : index
    %20 = vector.load %arg7[%c0_15, %c0_16] : memref<1x128xf32, #tpu.memory_space<vmem>>, vector<1x128xf32>
    %21 = vector.broadcast %20 : vector<1x128xf32> to vector<512x128xf32>
    %22 = arith.addf %19, %21 : vector<512x128xf32>
    %cst_17 = arith.constant 0.000000e+00 : f32
    %23 = vector.broadcast %cst_17 : f32 to vector<512x128xf32>
    %24 = arith.maximumf %22, %23 : vector<512x128xf32>
    %25 = arith.truncf %24 : vector<512x128xf32> to vector<512x128xbf16>
    %c0_18 = arith.constant 0 : index
    %c0_19 = arith.constant 0 : index
    %26 = vector.load %arg8[%c0_18, %c0_19] : memref<128x1xbf16, #tpu.memory_space<vmem>>, vector<128x1xbf16>
    %cst_20 = arith.constant dense<0.000000e+00> : vector<512x1xf32>
    %27 = tpu.matmul %25, %26, %cst_20 {dimension_numbers = #tpu.dot_dimension_numbers<[1], [0], [0], [1], [0, 0, 1, 1], [], []>} : vector<512x128xbf16>, vector<128x1xbf16>, vector<512x1xf32> -> vector<512x1xf32>
    %c0_21 = arith.constant 0 : index
    %c0_22 = arith.constant 0 : index
    %28 = memref.load %arg9[%c0_21, %c0_22] : memref<1x1xf32, #tpu.memory_space<smem>>
    %29 = vector.broadcast %28 : f32 to vector<512x1xf32>
    %30 = arith.addf %27, %29 : vector<512x1xf32>
    %31 = arith.negf %30 : vector<512x1xf32>
    %32 = math.exp %31 : vector<512x1xf32>
    %cst_23 = arith.constant 1.000000e+00 : f32
    %33 = vector.broadcast %cst_23 : f32 to vector<512x1xf32>
    %34 = arith.addf %33, %32 : vector<512x1xf32>
    %35 = arith.divf %33, %34 : vector<512x1xf32>
    %c0_24 = arith.constant 0 : index
    %c0_25 = arith.constant 0 : index
    %36 = vector.load %arg10[%c0_24, %c0_25] : memref<512x1xf32, #tpu.memory_space<vmem>>, vector<512x1xf32>
    tpu.vector_store %arg10[%c0_24, %c0_25], %35 {strides = array<i32>} : memref<512x1xf32, #tpu.memory_space<vmem>>, vector<512x1xf32>,
    return
  }
  func.func @transform_0(%arg0: i32) -> (i32, i32) {
    %c0_i32 = arith.constant 0 : i32
    %c0_i32_0 = arith.constant 0 : i32
    return %arg0, %c0_i32 : i32, i32
  }
  func.func @transform_1(%arg0: i32) -> (i32, i32) {
    %c0_i32 = arith.constant 0 : i32
    %c0_i32_0 = arith.constant 0 : i32
    %c0_i32_1 = arith.constant 0 : i32
    return %c0_i32, %c0_i32_0 : i32, i32
  }
  func.func @transform_2(%arg0: i32) -> (i32, i32) {
    %c0_i32 = arith.constant 0 : i32
    %c0_i32_0 = arith.constant 0 : i32
    %c0_i32_1 = arith.constant 0 : i32
    return %c0_i32, %c0_i32_0 : i32, i32
  }
  func.func @transform_3(%arg0: i32) -> (i32, i32) {
    %c0_i32 = arith.constant 0 : i32
    %c0_i32_0 = arith.constant 0 : i32
    %c0_i32_1 = arith.constant 0 : i32
    return %c0_i32, %c0_i32_0 : i32, i32
  }
  func.func @transform_4(%arg0: i32) -> (i32, i32) {
    %c0_i32 = arith.constant 0 : i32
    %c0_i32_0 = arith.constant 0 : i32
    %c0_i32_1 = arith.constant 0 : i32
    return %c0_i32, %c0_i32_0 : i32, i32
  }
  func.func @transform_5(%arg0: i32) -> (i32, i32) {
    %c0_i32 = arith.constant 0 : i32
    %c0_i32_0 = arith.constant 0 : i32
    %c0_i32_1 = arith.constant 0 : i32
    return %c0_i32, %c0_i32_0 : i32, i32
  }
  func.func @transform_6(%arg0: i32) -> (i32, i32) {
    %c0_i32 = arith.constant 0 : i32
    %c0_i32_0 = arith.constant 0 : i32
    %c0_i32_1 = arith.constant 0 : i32
    return %c0_i32, %c0_i32_0 : i32, i32
  }
  func.func @transform_7(%arg0: i32) -> (i32, i32) {
    %c0_i32 = arith.constant 0 : i32
    %c0_i32_0 = arith.constant 0 : i32
    %c0_i32_1 = arith.constant 0 : i32
    return %c0_i32, %c0_i32_0 : i32, i32
  }
  func.func @transform_8(%arg0: i32) -> (i32, i32) {
    %c0_i32 = arith.constant 0 : i32
    %c0_i32_0 = arith.constant 0 : i32
    %c0_i32_1 = arith.constant 0 : i32
    return %c0_i32, %c0_i32_0 : i32, i32
  }
  func.func @transform_9(%arg0: i32) -> (i32, i32) {
    %c0_i32 = arith.constant 0 : i32
    %c0_i32_0 = arith.constant 0 : i32
    return %arg0, %c0_i32 : i32, i32
  }
}

</mosaic_0001>

<bundles_post_ra>
// kernel: net_adam_forward.1
= control target key start
LH: loop header
LB: loop body
LE: loop exit
PB: predicated region body
PF: predicated region fallthrough
CT: control target
= control target key end

     0   :  { %15 = vsyncpa [#allocation4], 0  ;;  %s6568_s12 = smov [#allocation3]   ;;  %s6569_s14 = smov 128   ;;  %s9858_s0 = inlined_call_operand.vmem [shape: f32[300,35], index: 0, kind: input, shape index: {}]   ;;  %s9859_s1 = inlined_call_operand.vmem [shape: bf16[35,512], index: 1, kind: input, shape index: {}]   ;;  %s9860_s2 = inlined_call_operand.vmem [shape: f32[1,512], index: 2, kind: input, shape index: {}]   ;;  %s9861_s3 = inlined_call_operand.hbm [shape: bf16[512,256], index: 3, kind: input, shape index: {}]   ;;  %s9862_s4 = inlined_call_operand.vmem [shape: f32[1,256], index: 4, kind: input, shape index: {}]   ;;  %s9863_s5 = inlined_call_operand.vmem [shape: bf16[256,128], index: 5, kind: input, shape index: {}]   ;;  %s9864_s6 = inlined_call_operand.vmem [shape: f32[1,128], index: 6, kind: input, shape index: {}]   ;;  %s9865_s7 = inlined_call_operand.vmem [shape: bf16[128,1], index: 7, kind: input, shape index: {}]   ;;  %s9866_s8 = inlined_call_operand.<no memory space> [shape: f32[1,1], index: 8, kind: input, shape index: {}]   ;;  %s9867_s9 = inlined_call_operand.vmem [shape: f32[300,1], index: 9, kind: output, shape index: {}]  }
   0x1   :  { %s26_s11 = sshll.u32 %s9861_s3, 4  ;;  %s28_s13 = sshll.u32 %s6568_s12, 4  ;;  %s27_s11 = int_to_ptr.hbm [resolvable:$true] %s26_s11  ;;  %s29_s13 = int_to_ptr.vmem [resolvable:$true] %s28_s13 }
   0x2   :  { %s6570_s15 = smov 8  }
   0x3   :  { %34 = dma.hbm_to_vmem [thread:$0]  %s27_s11, 8192, %s29_s13, [#allocation4], %s6569_s14, %s6569_s14, %s6570_s15  }
   0x4   :  { %6566 = dma.done.wait [#allocation4], 8192  }
   0x5   :  { %6567 = vsyncadd [#allocation4], 4294959104  ;;  %vm313_vm0 = vcmask 1040384   ;;  %vm314_vm1 = vcmask 1041408   ;;  %v6571_v0 = vmov 65535   ;;  %v50_v29 = vld [vmem:[%s9858_s0] sm:$0xff] }
   0x6   :  { %v315_v1 = vsel %vm313_vm0, 4294967295, %v6571_v0  ;;  %v154_v2 = vld [vmem:[%s9859_s1 + $0x40] sm:$0x33]  ;;  %v6631_v3 = vld [vmem:[%s9859_s1 + $0x48] sm:$0x33]  ;;  %vm216_vm2 = vcmask 285696  }
   0x7   :  { %v192_v4 = vunpack.c.l.b16 %v154_v2  ;;  %v193_v5 = vunpack.c.h.b16 %v154_v2  ;;  %v194_v6 = vunpack.c.l.b16 %v6631_v3  ;;  %v6634_v7 = vsel %vm314_vm1, %v315_v1, 0  ;;  %v5613_v11 = vld [vmem:[%s9859_s1 + $0x20] sm:$0xf]  ;;  %v6177_v12 = vld [vmem:[%s9859_s1 + $0x2c] sm:$0xf0]  ;;  %v51_v31 = vld [vmem:[%s9858_s0 + $0x8] sm:$0xff] }
   0x8   :  { %v6175_v13 = vld [vmem:[%s9859_s1 + $0x24] sm:$0xf]  ;;  %v5615_v17 = vld [vmem:[%s9859_s1 + $0x30] sm:$0xf0]  ;;  %v5621_v18 = vld [vmem:[%s9859_s1 + $0x28] sm:$0xf]  ;;  %v5614_v20 = vor.u32 %v6177_v12, %v5613_v11  ;;  %v6687_v36 = vpack.c.bf16 %v51_v31, %v50_v29 }
   0x9   :  { %v204_v8 = vpack.c.b16 %v192_v4, %v192_v4  ;;  %v205_v9 = vpack.c.b16 %v193_v5, %v193_v5  ;;  %v206_v10 = vpack.c.b16 %v194_v6, %v194_v6  ;;  %v6178_v19 = vld [vmem:[%s9859_s1 + $0x34] sm:$0xf0]  ;;  %v5597_v21 = vld [vmem:[%s9859_s1] sm:$0xf]  ;;  %v5618_v22 = vor.u32 %v6175_v13, %v5615_v17  ;;  %v6173_v24 = vld [vmem:[%s9859_s1 + $0xc] sm:$0xf0] }
   0xa   :  { %v5622_v23 = vor.u32 %v6178_v19, %v5621_v18  ;;  %v6171_v25 = vld [vmem:[%s9859_s1 + $0x4] sm:$0xf]  ;;  %v5599_v26 = vld [vmem:[%s9859_s1 + $0x10] sm:$0xf0]  ;;  %v5605_v27 = vld [vmem:[%s9859_s1 + $0x8] sm:$0xf]  ;;  %v5598_v30 = vor.u32 %v6173_v24, %v5597_v21 }
   0xb   :  { %v318_v14 = vand.u32 %v6634_v7, %v204_v8  ;;  %v321_v15 = vand.u32 %v6634_v7, %v205_v9  ;;  %v324_v16 = vand.u32 %v6634_v7, %v206_v10  ;;  %v6174_v28 = vld [vmem:[%s9859_s1 + $0x14] sm:$0xf0]  ;;  %v98_v32 = vld [vmem:[%s9858_s0 + $0x180] sm:$0xff]  ;;  %v99_v33 = vld [vmem:[%s9858_s0 + $0x188] sm:$0xff]  ;;  %v5602_v34 = vor.u32 %v6171_v25, %v5599_v26 }
   0xc   :  { %v5606_v35 = vor.u32 %v6174_v28, %v5605_v27  ;;  %v6689_v37 = vpack.c.bf16 %v99_v33, %v98_v32  ;;  %v52_v38 = vld [vmem:[%s9858_s0 + $0x10] sm:$0xff]  ;;  %v53_v39 = vld [vmem:[%s9858_s0 + $0x18] sm:$0xff]  ;;  %v54_v44 = vld [vmem:[%s9858_s0 + $0x20] sm:$0xff]  ;;  %vm5340_vm6 = vcmask 7168  }
   0xd   :  { %334 = vmatpush.bf16.msra.mxu0 %v318_v14  ;;  %6267 = vmatpush.bf16.msra.mxu3 %v318_v14  ;;  %v100_v40 = vld [vmem:[%s9858_s0 + $0x190] sm:$0xff]  ;;  %v101_v41 = vld [vmem:[%s9858_s0 + $0x198] sm:$0xff]  ;;  %v6711_v42 = vpack.c.bf16 %v53_v39, %v52_v38  ;;  %v55_v45 = vld [vmem:[%s9858_s0 + $0x28] sm:$0xff] }
   0xe   :  { %503 = vmatpush.bf16.msra.mxu1 %v321_v15  ;;  %672 = vmatpush.bf16.msra.mxu2 %v324_v16  ;;  %10014 = vst [vmem:[#allocation7_spill] sm:$0xff] %v6689_v37  ;;  %v6713_v43 = vpack.c.bf16 %v101_v41, %v100_v40  ;;  %v102_v46 = vld [vmem:[%s9858_s0 + $0x1a0] sm:$0xff]  ;;  %v103_v47 = vld [vmem:[%s9858_s0 + $0x1a8] sm:$0xff]  ;;  %v6735_v48 = vpack.c.bf16 %v55_v45, %v54_v44  ;;  %v56_v50 = vld [vmem:[%s9858_s0 + $0x30] sm:$0xff] }
   0xf   :  { %10015 = vst [vmem:[#allocation8_spill] sm:$0xff] %v6711_v42  ;;  %v6737_v49 = vpack.c.bf16 %v103_v47, %v102_v46  ;;  %v57_v51 = vld [vmem:[%s9858_s0 + $0x38] sm:$0xff]  ;;  %v104_v52 = vld [vmem:[%s9858_s0 + $0x1b0] sm:$0xff]  ;;  %v58_v56 = vld [vmem:[%s9858_s0 + $0x40] sm:$0xff] }
  0x10   :  { %10016 = vst [vmem:[#allocation9_spill] sm:$0xff] %v6713_v43  ;;  %v105_v53 = vld [vmem:[%s9858_s0 + $0x1b8] sm:$0xff]  ;;  %v6759_v54 = vpack.c.bf16 %v57_v51, %v56_v50  ;;  %v59_v57 = vld [vmem:[%s9858_s0 + $0x48] sm:$0xff]  ;;  %v106_v58 = vld [vmem:[%s9858_s0 + $0x1c0] sm:$0xff] }
  0x11   :  { %335 = vmatpush.bf16.msra.mxu0 %v5614_v20  ;;  %6268 = vmatpush.bf16.msra.mxu3 %v5614_v20  ;;  %10017 = vst [vmem:[#allocation10_spill] sm:$0xff] %v6735_v48  ;;  %v6761_v55 = vpack.c.bf16 %v105_v53, %v104_v52  ;;  %v107_v59 = vld [vmem:[%s9858_s0 + $0x1c8] sm:$0xff]  ;;  %v6783_v60 = vpack.c.bf16 %v59_v57, %v58_v56  ;;  %v60_v62 = vld [vmem:[%s9858_s0 + $0x50] sm:$0xff]  ;;  %v61_v63 = vld [vmem:[%s9858_s0 + $0x58] sm:$0xff] }
  0x12   :  { %504 = vmatpush.bf16.msra.mxu1 %v5618_v22  ;;  %673 = vmatpush.bf16.msra.mxu2 %v5622_v23  ;;  %10018 = vst [vmem:[#allocation11_spill] sm:$0xff] %v6737_v49  ;;  %v6785_v61 = vpack.c.bf16 %v107_v59, %v106_v58  ;;  %v108_v0 = vld [vmem:[%s9858_s0 + $0x1d0] sm:$0xff]  ;;  %v109_v1 = vld [vmem:[%s9858_s0 + $0x1d8] sm:$0xff]  ;;  %v6807_v2 = vpack.c.bf16 %v61_v63, %v60_v62  ;;  %v62_v5 = vld [vmem:[%s9858_s0 + $0x60] sm:$0xff] }
  0x13   :  { %10019 = vst [vmem:[#allocation12_spill] sm:$0xff] %v6759_v54  ;;  %v6809_v4 = vpack.c.bf16 %v109_v1, %v108_v0  ;;  %v63_v6 = vld [vmem:[%s9858_s0 + $0x68] sm:$0xff]  ;;  %v110_v8 = vld [vmem:[%s9858_s0 + $0x1e0] sm:$0xff]  ;;  %v64_v12 = vld [vmem:[%s9858_s0 + $0x70] sm:$0xff] }
  0x14   :  { %10020 = vst [vmem:[#allocation13_spill] sm:$0xff] %v6761_v55  ;;  %v111_v9 = vld [vmem:[%s9858_s0 + $0x1e8] sm:$0xff]  ;;  %v6831_v10 = vpack.c.bf16 %v63_v6, %v62_v5  ;;  %v65_v13 = vld [vmem:[%s9858_s0 + $0x78] sm:$0xff]  ;;  %v112_v14 = vld [vmem:[%s9858_s0 + $0x1f0] sm:$0xff] }
  0x15   :  { %336 = vmatpush.bf16.msra.mxu0 %v5598_v30  ;;  %6269 = vmatpush.bf16.msra.mxu3 %v5598_v30  ;;  %10021 = vst [vmem:[#allocation14_spill] sm:$0xff] %v6783_v60  ;;  %v6833_v11 = vpack.c.bf16 %v111_v9, %v110_v8  ;;  %v5813_v18 = vld [vmem:[#allocation3 + $0x70] sm:$0xf]  ;;  %v6194_v19 = vld [vmem:[#allocation3 + $0x74] sm:$0xf0]  ;;  %v66_v24 = vld [vmem:[%s9858_s0 + $0x80] sm:$0xff] }
  0x16   :  { %505 = vmatpush.bf16.msra.mxu1 %v5602_v34  ;;  %674 = vmatpush.bf16.msra.mxu2 %v5606_v35  ;;  %10022 = vst [vmem:[#allocation15_spill] sm:$0xff] %v6785_v61  ;;  %v5877_v20 = vld [vmem:[#allocation3 + $0xf0] sm:$0xf]  ;;  %v5814_v21 = vor.u32 %v6194_v19, %v5813_v18  ;;  %v67_v25 = vld [vmem:[%s9858_s0 + $0x88] sm:$0xff]  ;;  %v156_v27 = vld [vmem:[%s9860_s2] sm:$0xf] }
  0x17   :  { %10023 = vst [vmem:[#allocation16_spill] sm:$0xff] %v6807_v2  ;;  %v6873_v26 = vpack.c.bf16 %v67_v25, %v66_v24  ;;  %v6878_v30 = vperm.slane %v156_v27, 0  ;;  %v6884_v31 = vperm.slane %v156_v27, 1  ;;  %v6892_v38 = vperm.slane %v156_v27, 2  ;;  %v68_v52 = vld [vmem:[%s9858_s0 + $0x90] sm:$0xff]  ;;  %v69_v53 = vld [vmem:[%s9858_s0 + $0x98] sm:$0xff] }
  0x18   :  { %5627 = vmatmul.msk.bf16.vlgmr.msra.gmra.mxu0 %vm216_vm2, %v6687_v36  ;;  %5651 = vmatmul.msk.bf16.vlgmr.msra.gmra.mxu3 %vm216_vm2, %v6689_v37  ;;  %10024 = vst [vmem:[#allocation17_spill] sm:$0xff] %v6809_v4  ;;  %v6909_v0 = vpack.c.bf16 %v69_v53, %v68_v52 }
  0x19   :  { %6270 = vmatpush.bf16.msrb.mxu3 %v321_v15  ;;  %5659 = vmatmul.msk.bf16.vlgmr.msra.gmra.mxu1 %vm216_vm2, %v6687_v36  ;;  %10025 = vst [vmem:[#allocation18_spill] sm:$0xff] %v6831_v10  ;;  %v113_v15 = vld [vmem:[%s9858_s0 + $0x1f8] sm:$0xff] }
  0x1a   :  { %5691 = vmatmul.msk.bf16.vlgmr.msra.gmra.mxu2 %vm216_vm2, %v6687_v36  ;;  %10026 = vst [vmem:[#allocation19_spill] sm:$0xff] %v6833_v11  ;;  %v6857_v17 = vpack.c.bf16 %v113_v15, %v112_v14  ;;  %1779 = vmatpush.bf16.msrb.mxu0 %v5814_v21 }
  0x1b   :  { %10029 = vst [vmem:[#allocation22_spill] sm:$0xff] %v6873_v26 }
  0x1c   :  { %10028 = vst [vmem:[#allocation21_spill] sm:$0xff] %v6857_v17 }
  0x1d   :  { %6271 = vmatpush.bf16.msrb.mxu3 %v5618_v22  ;;  %v6210_v22 = vld [vmem:[#allocation3 + $0xf4] sm:$0xf0]  ;;  %10032 = vst [vmem:[#allocation25_spill] sm:$0xff] %v6909_v0 }
  0x21   :  { %6272 = vmatpush.bf16.msrb.mxu3 %v5602_v34 }
  0x25   :  { %6273 = vmatpush.bf16.msra.mxu3 %v324_v16  ;;  %v6855_v16 = vpack.c.bf16 %v65_v13, %v64_v12 }
  0x27   :  { %10027 = vst [vmem:[#allocation20_spill] sm:$0xff] %v6855_v16 }
  0x28   :  { %5628 = vmatmul.msk.bf16.gmra.mxu0 %vm216_vm2, %v6711_v42  ;;  %5652 = vmatmul.msk.bf16.gmra.mxu3 %vm216_vm2, %v6713_v43 }
  0x29   :  { %6274 = vmatpush.bf16.msra.mxu3 %v5622_v23  ;;  %5660 = vmatmul.msk.bf16.gmra.mxu1 %vm216_vm2, %v6711_v42  ;;  %v5878_v23 = vor.u32 %v6210_v22, %v5877_v20  ;;  %v70_v22 = vld [vmem:[%s9858_s0 + $0xa0] sm:$0xff] }
  0x2a   :  { %5692 = vmatmul.msk.bf16.gmra.mxu2 %vm216_vm2, %v6711_v42 }
  0x2b   :  { %1948 = vmatpush.bf16.msrb.mxu1 %v5878_v23  ;;  %v71_v23 = vld [vmem:[%s9858_s0 + $0xa8] sm:$0xff] }
  0x2d   :  { %6275 = vmatpush.bf16.msra.mxu3 %v5606_v35 }
  0x38   :  { %5629 = vmatmul.msk.bf16.gmra.mxu0 %vm216_vm2, %v6735_v48  ;;  %5653 = vmatmul.msk.bf16.gmra.mxu3 %vm216_vm2, %v6737_v49 }
  0x39   :  { %5661 = vmatmul.msk.bf16.gmra.mxu1 %vm216_vm2, %v6735_v48 }
  0x3a   :  { %5693 = vmatmul.msk.bf16.gmra.mxu2 %vm216_vm2, %v6735_v48 }
  0x48   :  { %5630 = vmatmul.msk.bf16.gmra.mxu0 %vm216_vm2, %v6759_v54  ;;  %5654 = vmatmul.msk.bf16.gmra.mxu3 %vm216_vm2, %v6761_v55 }
  0x49   :  { %5662 = vmatmul.msk.bf16.gmra.mxu1 %vm216_vm2, %v6759_v54 }
  0x4a   :  { %5694 = vmatmul.msk.bf16.gmra.mxu2 %vm216_vm2, %v6759_v54 }
  0x58   :  { %5631 = vmatmul.msk.bf16.gmra.mxu0 %vm216_vm2, %v6783_v60  ;;  %5655 = vmatmul.msk.bf16.gmra.mxu3 %vm216_vm2, %v6785_v61 }
  0x59   :  { %5663 = vmatmul.msk.bf16.gmra.mxu1 %vm216_vm2, %v6783_v60 }
  0x5a   :  { %5695 = vmatmul.msk.bf16.gmra.mxu2 %vm216_vm2, %v6783_v60 }
  0x68   :  { %5632 = vmatmul.msk.bf16.gmra.mxu0 %vm216_vm2, %v6807_v2  ;;  %5656 = vmatmul.msk.bf16.gmra.mxu3 %vm216_vm2, %v6809_v4 }
  0x69   :  { %5664 = vmatmul.msk.bf16.gmra.mxu1 %vm216_vm2, %v6807_v2 }
  0x6a   :  { %5696 = vmatmul.msk.bf16.gmra.mxu2 %vm216_vm2, %v6807_v2 }
  0x78   :  { %5633 = vmatmul.msk.bf16.gmra.mxu0 %vm216_vm2, %v6831_v10  ;;  %5657 = vmatmul.msk.bf16.gmra.mxu3 %vm216_vm2, %v6833_v11 }
  0x79   :  { %5665 = vmatmul.msk.bf16.gmra.mxu1 %vm216_vm2, %v6831_v10 }
  0x7a   :  { %5697 = vmatmul.msk.bf16.gmra.mxu2 %vm216_vm2, %v6831_v10 }
  0x88   :  { %5634 = vmatmul.msk.bf16.gmra.mxu0 %vm216_vm2, %v6855_v16  ;;  %5658 = vmatmul.msk.bf16.gmra.mxu3 %vm216_vm2, %v6857_v17 }
  0x89   :  { %5666 = vmatmul.msk.bf16.gmra.mxu1 %vm216_vm2, %v6855_v16 }
  0x8a   :  { %5698 = vmatmul.msk.bf16.gmra.mxu2 %vm216_vm2, %v6855_v16 }
  0x95   :  { %v338_v28 = vpop.f32.mrf.mxu0 }
  0x96   :  { %v507_v29 = vpop.f32.mrf.mxu1  ;;  %v339_v32 = vadd.f32 %v338_v28, %v6878_v30 }
  0x97   :  { %v508_v33 = vadd.f32 %v507_v29, %v6884_v31  ;;  %v6944_v29 = vpack.c.bf16 %v71_v23, %v70_v22 }
  0x98   :  { %5635 = vmatmul.msk.bf16.gmra.mxu0 %vm216_vm2, %v6873_v26  ;;  %5683 = vmatmul.msk.bf16.vlgmr.msrb.gmra.mxu3 %vm216_vm2, %v6689_v37  ;;  %v1005_v40 = vmax.f32 %v339_v32, 0.0 }
  0x99   :  { %5667 = vmatmul.msk.bf16.gmra.mxu1 %vm216_vm2, %v6873_v26  ;;  %v1006_v45 = vmax.f32 %v508_v33, 0.0  ;;  %10035 = vst [vmem:[#allocation28_spill] sm:$0xff] %v6944_v29 }
  0x9a   :  { %5699 = vmatmul.msk.bf16.gmra.mxu2 %vm216_vm2, %v6873_v26 }
  0x9b   :  { %v458_v34 = vpop.f32.mrf.mxu3 }
  0x9c   :  { %v459_v56 = vadd.f32 %v458_v34, %v6878_v30 }
  0x9d   :  { %v676_v35 = vpop.f32.mrf.mxu2  ;;  %v340_v39 = vpop.f32.mrf.mxu0 }
  0x9e   :  { %v341_v41 = vadd.f32 %v340_v39, %v6878_v30  ;;  %v509_v44 = vpop.f32.mrf.mxu1  ;;  %v677_v50 = vadd.f32 %v676_v35, %v6892_v38  ;;  %v1197_v8 = vmax.f32 %v459_v56, 0.0  ;;  %v72_v56 = vld [vmem:[%s9858_s0 + $0xb0] sm:$0xff] }
  0x9f   :  { %v510_v46 = vadd.f32 %v509_v44, %v6884_v31 }
  0xa0   :  { %v1009_v47 = vmax.f32 %v341_v41, 0.0  ;;  %v1007_v1 = vmax.f32 %v677_v50, 0.0  ;;  %v6192_v41 = vld [vmem:[#allocation3 + $0x64] sm:$0xf0] }
  0xa1   :  { %v1010_v51 = vmax.f32 %v510_v46, 0.0  ;;  %v6208_v46 = vld [vmem:[#allocation3 + $0xe4] sm:$0xf0] }
  0xa2   :  { %v6904_v57 = vpack.c.bf16 %v1009_v47, %v1005_v40  ;;  %v5805_v40 = vld [vmem:[#allocation3 + $0x60] sm:$0xf] }
  0xa3   :  { %v6906_v58 = vpack.c.bf16 %v1010_v51, %v1006_v45  ;;  %v460_v59 = vpop.f32.mrf.mxu3  ;;  %v5806_v44 = vor.u32 %v6192_v41, %v5805_v40  ;;  %v5869_v45 = vld [vmem:[#allocation3 + $0xe0] sm:$0xf]  ;;  %v75_v40 = vld [vmem:[%s9858_s0 + $0xc8] sm:$0xff] }
  0xa4   :  { %10030 = vst [vmem:[#allocation23_spill] sm:$0xff] %v6904_v57  ;;  %v461_v62 = vadd.f32 %v460_v59, %v6878_v30  ;;  %v5870_v50 = vor.u32 %v6208_v46, %v5869_v45  ;;  %v73_v59 = vld [vmem:[%s9858_s0 + $0xb8] sm:$0xff] }
  0xa5   :  { %10031 = vst [vmem:[#allocation24_spill] sm:$0xff] %v6906_v58  ;;  %v678_v63 = vpop.f32.mrf.mxu2  ;;  %v6912_v6 = vpop.f32.mrf.mxu0  ;;  %1780 = vmatpush.bf16.msrb.mxu0 %v5806_v44 }
  0xa6   :  { %v679_v5 = vadd.f32 %v678_v63, %v6892_v38  ;;  %v1201_v9 = vmax.f32 %v461_v62, 0.0  ;;  %v6914_v12 = vpop.f32.mrf.mxu1  ;;  %1949 = vmatpush.bf16.msrb.mxu1 %v5870_v50 }
  0xa8   :  { %v1011_v13 = vmax.f32 %v679_v5, 0.0  ;;  %5636 = vmatmul.msk.bf16.gmra.mxu0 %vm216_vm2, %v6909_v0  ;;  %5684 = vmatmul.msk.bf16.gmra.mxu3 %vm216_vm2, %v6713_v43  ;;  %v6920_v14 = vpack.c.bf16 %v1201_v9, %v1197_v8  ;;  %v6976_v8 = vpack.c.bf16 %v73_v59, %v72_v56 }
  0xa9   :  { %5668 = vmatmul.msk.bf16.gmra.mxu1 %vm216_vm2, %v6909_v0 }
  0xaa   :  { %10033 = vst [vmem:[#allocation26_spill] sm:$0xff] %v6920_v14  ;;  %v6922_v15 = vpack.c.bf16 %v1011_v13, %v1007_v1  ;;  %5700 = vmatmul.msk.bf16.gmra.mxu2 %vm216_vm2, %v6909_v0 }
  0xab   :  { %v463_v18 = vpop.f32.mrf.mxu3  ;;  %10037 = vst [vmem:[#allocation30_spill] sm:$0xff] %v6976_v8 }
  0xac   :  { %10034 = vst [vmem:[#allocation27_spill] sm:$0xff] %v6922_v15  ;;  %v464_v24 = vadd.f32 %v463_v18, %v6878_v30 }
  0xad   :  { %v6928_v19 = vpop.f32.mrf.mxu2  ;;  %v6930_v20 = vpop.f32.mrf.mxu0 }
  0xae   :  { %v6932_v21 = vpop.f32.mrf.mxu1  ;;  %v1205_v33 = vmax.f32 %v464_v24, 0.0 }
  0xaf   :  { %v515_v48 = vadd.f32 %v6932_v21, %v6884_v31  ;;  %v5941_v21 = vld [vmem:[#allocation3 + $0x170] sm:$0xf] }
  0xb3   :  { %v465_v25 = vpop.f32.mrf.mxu3 }
  0xb4   :  { %v466_v27 = vadd.f32 %v465_v25, %v6878_v30 }
  0xb5   :  { %v6942_v28 = vpop.f32.mrf.mxu2  ;;  %v6946_v32 = vpop.f32.mrf.mxu0 }
  0xb6   :  { %v1209_v34 = vmax.f32 %v466_v27, 0.0  ;;  %v6948_v35 = vpop.f32.mrf.mxu1 }
  0xb8   :  { %5637 = vmatmul.msk.bf16.gmra.mxu0 %vm216_vm2, %v6944_v29  ;;  %5685 = vmatmul.msk.bf16.gmra.mxu3 %vm216_vm2, %v6737_v49  ;;  %v6954_v39 = vpack.c.bf16 %v1209_v34, %v1205_v33  ;;  %v74_v34 = vld [vmem:[%s9858_s0 + $0xc0] sm:$0xff] }
  0xb9   :  { %5669 = vmatmul.msk.bf16.gmra.mxu1 %vm216_vm2, %v6944_v29 }
  0xba   :  { %10036 = vst [vmem:[#allocation29_spill] sm:$0xff] %v6954_v39  ;;  %5701 = vmatmul.msk.bf16.gmra.mxu2 %vm216_vm2, %v6944_v29 }
  0xbb   :  { %v468_v47 = vpop.f32.mrf.mxu3 }
  0xbc   :  { %v469_v62 = vadd.f32 %v468_v47, %v6878_v30  ;;  %v7008_v47 = vpack.c.bf16 %v75_v40, %v74_v34  ;;  %v76_v34 = vld [vmem:[%s9858_s0 + $0xd0] sm:$0xff]  ;;  %v77_v40 = vld [vmem:[%s9858_s0 + $0xd8] sm:$0xff] }
  0xbd   :  { %v6960_v51 = vpop.f32.mrf.mxu2  ;;  %v6962_v52 = vpop.f32.mrf.mxu0 }
  0xbe   :  { %v6964_v53 = vpop.f32.mrf.mxu1  ;;  %v1213_v13 = vmax.f32 %v469_v62, 0.0  ;;  %10041 = vst [vmem:[#allocation34_spill] sm:$0xff] %v7008_v47 }
  0xc3   :  { %v470_v63 = vpop.f32.mrf.mxu3 }
  0xc4   :  { %v471_v1 = vadd.f32 %v470_v63, %v6878_v30 }
  0xc5   :  { %v6974_v5 = vpop.f32.mrf.mxu2  ;;  %v6978_v9 = vpop.f32.mrf.mxu0 }
  0xc6   :  { %v1217_v18 = vmax.f32 %v471_v1, 0.0  ;;  %v6980_v22 = vpop.f32.mrf.mxu1 }
  0xc8   :  { %5638 = vmatmul.msk.bf16.gmra.mxu0 %vm216_vm2, %v6976_v8  ;;  %5686 = vmatmul.msk.bf16.gmra.mxu3 %vm216_vm2, %v6761_v55  ;;  %v6986_v23 = vpack.c.bf16 %v1217_v18, %v1213_v13 }
  0xc9   :  { %5670 = vmatmul.msk.bf16.gmra.mxu1 %vm216_vm2, %v6976_v8 }
  0xca   :  { %10038 = vst [vmem:[#allocation31_spill] sm:$0xff] %v6986_v23  ;;  %5702 = vmatmul.msk.bf16.gmra.mxu2 %vm216_vm2, %v6976_v8 }
  0xcb   :  { %v473_v24 = vpop.f32.mrf.mxu3 }
  0xcc   :  { %v474_v41 = vadd.f32 %v473_v24, %v6878_v30 }
  0xcd   :  { %v6992_v25 = vpop.f32.mrf.mxu2  ;;  %v6994_v27 = vpop.f32.mrf.mxu0 }
  0xce   :  { %10039 = vst [vmem:[#allocation32_spill] sm:$0xff] %v6992_v25  ;;  %v6996_v33 = vpop.f32.mrf.mxu1  ;;  %v1221_v56 = vmax.f32 %v474_v41, 0.0  ;;  %v6204_v25 = vld [vmem:[#allocation3 + $0xc4] sm:$0xf0] }
  0xd3   :  { %v475_v44 = vpop.f32.mrf.mxu3 }
  0xd4   :  { %v476_v45 = vadd.f32 %v475_v44, %v6878_v30 }
  0xd5   :  { %v7006_v46 = vpop.f32.mrf.mxu2  ;;  %v7010_v50 = vpop.f32.mrf.mxu0 }
  0xd6   :  { %10040 = vst [vmem:[#allocation33_spill] sm:$0xff] %v7006_v46  ;;  %v1225_v59 = vmax.f32 %v476_v45, 0.0  ;;  %v7012_v62 = vpop.f32.mrf.mxu1 }
  0xd8   :  { %5639 = vmatmul.msk.bf16.gmra.mxu0 %vm216_vm2, %v7008_v47  ;;  %5687 = vmatmul.msk.bf16.gmra.mxu3 %vm216_vm2, %v6785_v61  ;;  %v7018_v63 = vpack.c.bf16 %v1225_v59, %v1221_v56  ;;  %v7040_v59 = vpack.c.bf16 %v77_v40, %v76_v34  ;;  %v5797_v34 = vld [vmem:[#allocation3 + $0x50] sm:$0xf]  ;;  %v6190_v40 = vld [vmem:[#allocation3 + $0x54] sm:$0xf0] }
  0xd9   :  { %5671 = vmatmul.msk.bf16.gmra.mxu1 %vm216_vm2, %v7008_v47 }
  0xda   :  { %10042 = vst [vmem:[#allocation35_spill] sm:$0xff] %v7018_v63  ;;  %5703 = vmatmul.msk.bf16.gmra.mxu2 %vm216_vm2, %v7008_v47 }
  0xdb   :  { %v478_v1 = vpop.f32.mrf.mxu3  ;;  %10045 = vst [vmem:[#allocation38_spill] sm:$0xff] %v7040_v59 }
  0xdc   :  { %v479_v41 = vadd.f32 %v478_v1, %v6878_v30 }
  0xdd   :  { %v7024_v13 = vpop.f32.mrf.mxu2  ;;  %v7026_v18 = vpop.f32.mrf.mxu0 }
  0xde   :  { %10043 = vst [vmem:[#allocation36_spill] sm:$0xff] %v7024_v13  ;;  %v7028_v24 = vpop.f32.mrf.mxu1  ;;  %v1229_v23 = vmax.f32 %v479_v41, 0.0  ;;  %v5798_v41 = vor.u32 %v6190_v40, %v5797_v34  ;;  %v79_v34 = vld [vmem:[%s9858_s0 + $0xe8] sm:$0xff] }
  0xe0   :  { %1781 = vmatpush.bf16.msrb.mxu0 %v5798_v41 }
  0xe3   :  { %v480_v44 = vpop.f32.mrf.mxu3 }
  0xe4   :  { %v481_v45 = vadd.f32 %v480_v44, %v6878_v30  ;;  %v5861_v44 = vld [vmem:[#allocation3 + $0xd0] sm:$0xf] }
  0xe5   :  { %v7038_v56 = vpop.f32.mrf.mxu2  ;;  %v7042_v63 = vpop.f32.mrf.mxu0 }
  0xe6   :  { %10044 = vst [vmem:[#allocation37_spill] sm:$0xff] %v7038_v56  ;;  %v1233_v39 = vmax.f32 %v481_v45, 0.0  ;;  %v7044_v14 = vpop.f32.mrf.mxu1  ;;  %v6206_v45 = vld [vmem:[#allocation3 + $0xd4] sm:$0xf0] }
  0xe7   :  { %v5862_v8 = vor.u32 %v6206_v45, %v5861_v44 }
  0xe8   :  { %5640 = vmatmul.msk.bf16.gmra.mxu0 %vm216_vm2, %v7040_v59  ;;  %5688 = vmatmul.msk.bf16.gmra.mxu3 %vm216_vm2, %v6809_v4  ;;  %v7050_v1 = vpack.c.bf16 %v1233_v39, %v1229_v23  ;;  %v195_v23 = vunpack.c.h.b16 %v6631_v3 }
  0xe9   :  { %5672 = vmatmul.msk.bf16.gmra.mxu1 %vm216_vm2, %v7040_v59 }
  0xea   :  { %10046 = vst [vmem:[#allocation39_spill] sm:$0xff] %v7050_v1  ;;  %5704 = vmatmul.msk.bf16.gmra.mxu2 %vm216_vm2, %v7040_v59  ;;  %1950 = vmatpush.bf16.msrb.mxu1 %v5862_v8  ;;  %v78_v1 = vld [vmem:[%s9858_s0 + $0xe0] sm:$0xff]  ;;  %v207_v59 = vpack.c.b16 %v195_v23, %v195_v23 }
  0xeb   :  { %v483_v47 = vpop.f32.mrf.mxu3  ;;  %v7073_v8 = vpack.c.bf16 %v79_v34, %v78_v1 }
  0xec   :  { %v484_v40 = vadd.f32 %v483_v47, %v6878_v30  ;;  %v327_v1 = vand.u32 %v6634_v7, %v207_v59 }
  0xed   :  { %v7056_v29 = vpop.f32.mrf.mxu2  ;;  %v7058_v0 = vpop.f32.mrf.mxu0  ;;  %10049 = vst [vmem:[#allocation42_spill] sm:$0xff] %v7073_v8 }
  0xee   :  { %10047 = vst [vmem:[#allocation40_spill] sm:$0xff] %v7056_v29  ;;  %v7060_v39 = vpop.f32.mrf.mxu1  ;;  %v1237_v3 = vmax.f32 %v484_v40, 0.0  ;;  %841 = vmatpush.bf16.msrb.mxu3 %v327_v1  ;;  %v513_v29 = vadd.f32 %v6914_v12, %v6884_v31 }
  0xf0   :  { %v1014_v12 = vmax.f32 %v513_v29, 0.0 }
  0xf3   :  { %v485_v44 = vpop.f32.mrf.mxu3 }
  0xf4   :  { %v486_v41 = vadd.f32 %v485_v44, %v6878_v30 }
  0xf5   :  { %v7071_v45 = vpop.f32.mrf.mxu2  ;;  %v7075_v26 = vpop.f32.mrf.mxu0 }
  0xf6   :  { %10048 = vst [vmem:[#allocation41_spill] sm:$0xff] %v7071_v45  ;;  %v1241_v16 = vmax.f32 %v486_v41, 0.0  ;;  %v7077_v10 = vpop.f32.mrf.mxu1  ;;  %v81_v41 = vld [vmem:[%s9858_s0 + $0xf8] sm:$0xff] }
  0xf8   :  { %5641 = vmatmul.msk.bf16.gmra.mxu0 %vm216_vm2, %v7073_v8  ;;  %5689 = vmatmul.msk.bf16.gmra.mxu3 %vm216_vm2, %v6833_v11  ;;  %v7083_v47 = vpack.c.bf16 %v1241_v16, %v1237_v3  ;;  %v80_v16 = vld [vmem:[%s9858_s0 + $0xf0] sm:$0xff] }
  0xf9   :  { %5673 = vmatmul.msk.bf16.gmra.mxu1 %vm216_vm2, %v7073_v8  ;;  %v7106_v1 = vpack.c.bf16 %v81_v41, %v80_v16 }
  0xfa   :  { %10050 = vst [vmem:[#allocation43_spill] sm:$0xff] %v7083_v47  ;;  %5705 = vmatmul.msk.bf16.gmra.mxu2 %vm216_vm2, %v7073_v8 }
  0xfb   :  { %v488_v23 = vpop.f32.mrf.mxu3  ;;  %10053 = vst [vmem:[#allocation46_spill] sm:$0xff] %v7106_v1 }
  0xfc   :  { %v489_v3 = vadd.f32 %v488_v23, %v6878_v30 }
  0xfd   :  { %v7090_v34 = vpop.f32.mrf.mxu2  ;;  %v7092_v40 = vpop.f32.mrf.mxu0 }
  0xfe   :  { %10051 = vst [vmem:[#allocation44_spill] sm:$0xff] %v7090_v34  ;;  %v7094_v44 = vpop.f32.mrf.mxu1  ;;  %v1245_v2 = vmax.f32 %v489_v3, 0.0 }
 0x103   :  { %v490_v47 = vpop.f32.mrf.mxu3 }
 0x104   :  { %v491_v7 = vadd.f32 %v490_v47, %v6878_v30 }
 0x105   :  { %v7104_v59 = vpop.f32.mrf.mxu2  ;;  %v7108_v8 = vpop.f32.mrf.mxu0 }
 0x106   :  { %10052 = vst [vmem:[#allocation45_spill] sm:$0xff] %v7104_v59  ;;  %v1249_v60 = vmax.f32 %v491_v7, 0.0  ;;  %v7110_v34 = vpop.f32.mrf.mxu1  ;;  %v82_v7 = vld [vmem:[%s9858_s0 + $0x100] sm:$0xff] }
 0x108   :  { %5642 = vmatmul.msk.bf16.gmra.mxu0 %vm216_vm2, %v7106_v1  ;;  %5690 = vmatmul.msk.bf16.gmra.mxu3 %vm216_vm2, %v6857_v17  ;;  %v7116_v23 = vpack.c.bf16 %v1249_v60, %v1245_v2  ;;  %v83_v60 = vld [vmem:[%s9858_s0 + $0x108] sm:$0xff] }
 0x109   :  { %5674 = vmatmul.msk.bf16.gmra.mxu1 %vm216_vm2, %v7106_v1  ;;  %v7142_v45 = vpack.c.bf16 %v83_v60, %v82_v7  ;;  %v1018_v7 = vmax.f32 %v515_v48, 0.0  ;;  %v6188_v60 = vld [vmem:[#allocation3 + $0x44] sm:$0xf0] }
 0x10a   :  { %10054 = vst [vmem:[#allocation47_spill] sm:$0xff] %v7116_v23  ;;  %5706 = vmatmul.msk.bf16.gmra.mxu2 %vm216_vm2, %v7106_v1  ;;  %v344_v23 = vadd.f32 %v6912_v6, %v6878_v30  ;;  %v346_v1 = vadd.f32 %v6930_v20, %v6878_v30 }
 0x10b   :  { %v493_v47 = vpop.f32.mrf.mxu3  ;;  %10057 = vst [vmem:[#allocation50_spill] sm:$0xff] %v7142_v45 }
 0x10c   :  { %v494_v2 = vadd.f32 %v493_v47, %v6878_v30  ;;  %v1013_v20 = vmax.f32 %v344_v23, 0.0  ;;  %v1017_v42 = vmax.f32 %v346_v1, 0.0  ;;  %v5789_v1 = vld [vmem:[#allocation3 + $0x40] sm:$0xf] }
 0x10d   :  { %v7122_v16 = vpop.f32.mrf.mxu2  ;;  %v7124_v41 = vpop.f32.mrf.mxu0  ;;  %v5790_v46 = vor.u32 %v6188_v60, %v5789_v1  ;;  %v518_v1 = vadd.f32 %v6948_v35, %v6884_v31  ;;  %v520_v60 = vadd.f32 %v6964_v53, %v6884_v31 }
 0x10e   :  { %10055 = vst [vmem:[#allocation48_spill] sm:$0xff] %v7122_v16  ;;  %v7126_v3 = vpop.f32.mrf.mxu1  ;;  %v1253_v56 = vmax.f32 %v494_v2, 0.0  ;;  %v5853_v2 = vld [vmem:[#allocation3 + $0xc0] sm:$0xf] }
 0x10f   :  { %v5854_v48 = vor.u32 %v6204_v25, %v5853_v2  ;;  %1782 = vmatpush.bf16.msrb.mxu0 %v5790_v46  ;;  %v349_v25 = vadd.f32 %v6946_v32, %v6878_v30  ;;  %v351_v46 = vadd.f32 %v6962_v52, %v6878_v30 }
 0x111   :  { %1951 = vmatpush.bf16.msrb.mxu1 %v5854_v48  ;;  %v1021_v52 = vmax.f32 %v349_v25, 0.0 }
 0x113   :  { %v495_v16 = vpop.f32.mrf.mxu3 }
 0x114   :  { %v496_v59 = vadd.f32 %v495_v16, %v6878_v30 }
 0x115   :  { %v7140_v54 = vpop.f32.mrf.mxu2  ;;  %v7148_v47 = vpop.f32.mrf.mxu0 }
 0x116   :  { %10056 = vst [vmem:[#allocation49_spill] sm:$0xff] %v7140_v54  ;;  %v1257_v6 = vmax.f32 %v496_v59, 0.0  ;;  %v7150_v13 = vpop.f32.mrf.mxu1  ;;  %v6226_v59 = vld [vmem:[#allocation3 + $0x174] sm:$0xf0] }
 0x117   :  { %v5942_v23 = vor.u32 %v6226_v59, %v5941_v21  ;;  %v84_v21 = vld [vmem:[%s9858_s0 + $0x110] sm:$0xff] }
 0x118   :  { %5643 = vmatmul.msk.bf16.gmra.mxu0 %vm216_vm2, %v7142_v45  ;;  %5715 = vmatmul.msk.bf16.vlgmr.msra.gmra.mxu3 %vm216_vm2, %v6689_v37  ;;  %v7156_v16 = vpack.c.bf16 %v1257_v6, %v1253_v56  ;;  %v7162_v37 = vpack.c.bf16 %v1017_v42, %v1013_v20  ;;  %v7168_v6 = vpack.c.bf16 %v1018_v7, %v1014_v12  ;;  %v85_v42 = vld [vmem:[%s9858_s0 + $0x118] sm:$0xff] }
 0x119   :  { %5675 = vmatmul.msk.bf16.gmra.mxu1 %vm216_vm2, %v7142_v45  ;;  %2117 = vmatpush.bf16.msrb.mxu2 %v5942_v23  ;;  %v7186_v23 = vpack.c.bf16 %v85_v42, %v84_v21  ;;  %v5623_v21 = vld [vmem:[%s9859_s1 + $0x38] sm:$0xf0]  ;;  %v1022_v42 = vmax.f32 %v518_v1, 0.0  ;;  %v86_v1 = vld [vmem:[%s9858_s0 + $0x120] sm:$0xff] }
 0x11a   :  { %10058 = vst [vmem:[#allocation51_spill] sm:$0xff] %v7156_v16  ;;  %5707 = vmatmul.msk.bf16.gmra.mxu2 %vm216_vm2, %v7142_v45  ;;  %v1025_v45 = vmax.f32 %v351_v46, 0.0 }
 0x11b   :  { %v627_v54 = vpop.f32.mrf.mxu3  ;;  %10059 = vst [vmem:[#allocation52_spill] sm:$0xff] %v7162_v37 }
 0x11c   :  { %10061 = vst [vmem:[#allocation54_spill] sm:$0xff] %v7168_v6  ;;  %v628_v20 = vadd.f32 %v627_v54, %v6884_v31  ;;  %v7212_v46 = vpack.c.bf16 %v1025_v45, %v1021_v52  ;;  %v354_v45 = vadd.f32 %v6978_v9, %v6878_v30  ;;  %v356_v52 = vadd.f32 %v6994_v27, %v6878_v30 }
 0x11d   :  { %v7164_v56 = vpop.f32.mrf.mxu2  ;;  %v7166_v29 = vpop.f32.mrf.mxu0  ;;  %10063 = vst [vmem:[#allocation56_spill] sm:$0xff] %v7186_v23 }
 0x11e   :  { %10060 = vst [vmem:[#allocation53_spill] sm:$0xff] %v7164_v56  ;;  %v7170_v16 = vpop.f32.mrf.mxu1  ;;  %v1198_v2 = vmax.f32 %v628_v20, 0.0  ;;  %v1026_v20 = vmax.f32 %v520_v60, 0.0  ;;  %v87_v60 = vld [vmem:[%s9858_s0 + $0x128] sm:$0xff]  ;;  %v1029_v27 = vmax.f32 %v354_v45, 0.0  ;;  %v1033_v56 = vmax.f32 %v356_v52, 0.0 }
 0x11f   :  { %10065 = vst [vmem:[#allocation58_spill] sm:$0xff] %v7212_v46 }
 0x123   :  { %v629_v12 = vpop.f32.mrf.mxu3 }
 0x124   :  { %v630_v7 = vadd.f32 %v629_v12, %v6884_v31  ;;  %v6176_v12 = vld [vmem:[%s9859_s1 + $0x2c] sm:$0xf] }
 0x125   :  { %v7184_v59 = vpop.f32.mrf.mxu2  ;;  %v7192_v54 = vpop.f32.mrf.mxu0  ;;  %v5626_v35 = vor.u32 %v6176_v12, %v5623_v21 }
 0x126   :  { %10062 = vst [vmem:[#allocation55_spill] sm:$0xff] %v7184_v59  ;;  %v1202_v32 = vmax.f32 %v630_v7, 0.0  ;;  %v7194_v48 = vpop.f32.mrf.mxu1 }
 0x127   :  { %842 = vmatpush.bf16.msrb.mxu3 %v5626_v35 }
 0x128   :  { %5644 = vmatmul.msk.bf16.gmra.mxu0 %vm216_vm2, %v7186_v23  ;;  %5716 = vmatmul.msk.bf16.gmra.mxu3 %vm216_vm2, %v6713_v43  ;;  %v7206_v53 = vpack.c.bf16 %v1202_v32, %v1198_v2  ;;  %v7218_v43 = vpack.c.bf16 %v1026_v20, %v1022_v42  ;;  %v7236_v42 = vpack.c.bf16 %v87_v60, %v86_v1 }
 0x129   :  { %5676 = vmatmul.msk.bf16.gmra.mxu1 %vm216_vm2, %v7186_v23  ;;  %v523_v20 = vadd.f32 %v6980_v22, %v6884_v31 }
 0x12a   :  { %10064 = vst [vmem:[#allocation57_spill] sm:$0xff] %v7206_v53  ;;  %5708 = vmatmul.msk.bf16.gmra.mxu2 %vm216_vm2, %v7186_v23  ;;  %v525_v53 = vadd.f32 %v6996_v33, %v6884_v31 }
 0x12b   :  { %v632_v25 = vpop.f32.mrf.mxu3  ;;  %10067 = vst [vmem:[#allocation60_spill] sm:$0xff] %v7218_v43  ;;  %v1030_v22 = vmax.f32 %v523_v20, 0.0  ;;  %v6202_v43 = vld [vmem:[#allocation3 + $0xb4] sm:$0xf0] }
 0x12c   :  { %v633_v32 = vadd.f32 %v632_v25, %v6884_v31  ;;  %10069 = vst [vmem:[#allocation62_spill] sm:$0xff] %v7236_v42  ;;  %v1034_v60 = vmax.f32 %v525_v53, 0.0  ;;  %v89_v53 = vld [vmem:[%s9858_s0 + $0x138] sm:$0xff] }
 0x12d   :  { %v7214_v7 = vpop.f32.mrf.mxu2  ;;  %v7216_v59 = vpop.f32.mrf.mxu0 }
 0x12e   :  { %10066 = vst [vmem:[#allocation59_spill] sm:$0xff] %v7214_v7  ;;  %v7220_v2 = vpop.f32.mrf.mxu1  ;;  %v1206_v23 = vmax.f32 %v633_v32, 0.0  ;;  %v7256_v32 = vpack.c.bf16 %v1033_v56, %v1029_v27  ;;  %v359_v56 = vadd.f32 %v7010_v50, %v6878_v30 }
 0x130   :  { %10071 = vst [vmem:[#allocation64_spill] sm:$0xff] %v7256_v32 }
 0x133   :  { %v634_v12 = vpop.f32.mrf.mxu3 }
 0x134   :  { %v635_v21 = vadd.f32 %v634_v12, %v6884_v31  ;;  %v7262_v12 = vpack.c.bf16 %v1034_v60, %v1030_v22 }
 0x135   :  { %v7234_v35 = vpop.f32.mrf.mxu2  ;;  %v7242_v25 = vpop.f32.mrf.mxu0 }
 0x136   :  { %10068 = vst [vmem:[#allocation61_spill] sm:$0xff] %v7234_v35  ;;  %v1210_v9 = vmax.f32 %v635_v21, 0.0  ;;  %v7244_v7 = vpop.f32.mrf.mxu1 }
 0x137   :  { %10073 = vst [vmem:[#allocation66_spill] sm:$0xff] %v7262_v12 }
 0x138   :  { %5645 = vmatmul.msk.bf16.gmra.mxu0 %vm216_vm2, %v7236_v42  ;;  %5717 = vmatmul.msk.bf16.gmra.mxu3 %vm216_vm2, %v6737_v49  ;;  %v7250_v1 = vpack.c.bf16 %v1210_v9, %v1206_v23  ;;  %v88_v23 = vld [vmem:[%s9858_s0 + $0x130] sm:$0xff]  ;;  %v361_v9 = vadd.f32 %v7026_v18, %v6878_v30  ;;  %v1037_v18 = vmax.f32 %v359_v56, 0.0 }
 0x139   :  { %5677 = vmatmul.msk.bf16.gmra.mxu1 %vm216_vm2, %v7236_v42  ;;  %v7280_v49 = vpack.c.bf16 %v89_v53, %v88_v23 }
 0x13a   :  { %10070 = vst [vmem:[#allocation63_spill] sm:$0xff] %v7250_v1  ;;  %5709 = vmatmul.msk.bf16.gmra.mxu2 %vm216_vm2, %v7236_v42  ;;  %v528_v1 = vadd.f32 %v7012_v62, %v6884_v31  ;;  %v530_v42 = vadd.f32 %v7028_v24, %v6884_v31  ;;  %v1041_v12 = vmax.f32 %v361_v9, 0.0  ;;  %v5933_v24 = vld [vmem:[#allocation3 + $0x160] sm:$0xf]  ;;  %v5781_v9 = vld [vmem:[#allocation3 + $0x30] sm:$0xf] }
 0x13b   :  { %v637_v33 = vpop.f32.mrf.mxu3  ;;  %10075 = vst [vmem:[#allocation68_spill] sm:$0xff] %v7280_v49 }
 0x13c   :  { %v638_v20 = vadd.f32 %v637_v33, %v6884_v31  ;;  %v1038_v62 = vmax.f32 %v528_v1, 0.0  ;;  %v1042_v53 = vmax.f32 %v530_v42, 0.0 }
 0x13d   :  { %v7258_v45 = vpop.f32.mrf.mxu2  ;;  %v7260_v52 = vpop.f32.mrf.mxu0 }
 0x13e   :  { %10072 = vst [vmem:[#allocation65_spill] sm:$0xff] %v7258_v45  ;;  %v7264_v21 = vpop.f32.mrf.mxu1  ;;  %v1214_v45 = vmax.f32 %v638_v20, 0.0  ;;  %v6224_v20 = vld [vmem:[#allocation3 + $0x164] sm:$0xf0] }
 0x13f   :  { %v5934_v56 = vor.u32 %v6224_v20, %v5933_v24  ;;  %v90_v24 = vld [vmem:[%s9858_s0 + $0x140] sm:$0xff]  ;;  %v366_v20 = vadd.f32 %v7058_v0, %v6878_v30 }
 0x141   :  { %2118 = vmatpush.bf16.msrb.mxu2 %v5934_v56 }
 0x143   :  { %v639_v27 = vpop.f32.mrf.mxu3 }
 0x144   :  { %v640_v22 = vadd.f32 %v639_v27, %v6884_v31  ;;  %v6186_v27 = vld [vmem:[#allocation3 + $0x34] sm:$0xf0] }
 0x145   :  { %v7278_v60 = vpop.f32.mrf.mxu2  ;;  %v7286_v33 = vpop.f32.mrf.mxu0  ;;  %v5782_v32 = vor.u32 %v6186_v27, %v5781_v9 }
 0x146   :  { %10074 = vst [vmem:[#allocation67_spill] sm:$0xff] %v7278_v60  ;;  %v1218_v50 = vmax.f32 %v640_v22, 0.0  ;;  %v7288_v35 = vpop.f32.mrf.mxu1  ;;  %v5845_v22 = vld [vmem:[#allocation3 + $0xb0] sm:$0xf] }
 0x147   :  { %v5846_v42 = vor.u32 %v6202_v43, %v5845_v22  ;;  %1783 = vmatpush.bf16.msrb.mxu0 %v5782_v32  ;;  %v6172_v43 = vld [vmem:[%s9859_s1 + $0xc] sm:$0xf]  ;;  %v5607_v32 = vld [vmem:[%s9859_s1 + $0x18] sm:$0xf0] }
 0x148   :  { %5646 = vmatmul.msk.bf16.gmra.mxu0 %vm216_vm2, %v7280_v49  ;;  %5718 = vmatmul.msk.bf16.gmra.mxu3 %vm216_vm2, %v6761_v55  ;;  %v7294_v23 = vpack.c.bf16 %v1218_v50, %v1214_v45  ;;  %v7300_v55 = vpack.c.bf16 %v1041_v12, %v1037_v18  ;;  %v7306_v50 = vpack.c.bf16 %v1042_v53, %v1038_v62  ;;  %v91_v12 = vld [vmem:[%s9858_s0 + $0x148] sm:$0xff] }
 0x149   :  { %5678 = vmatmul.msk.bf16.gmra.mxu1 %vm216_vm2, %v7280_v49  ;;  %v5610_v62 = vor.u32 %v6172_v43, %v5607_v32  ;;  %v364_v53 = vadd.f32 %v7042_v63, %v6878_v30  ;;  %v7330_v22 = vpack.c.bf16 %v91_v12, %v90_v24 }
 0x14a   :  { %10076 = vst [vmem:[#allocation69_spill] sm:$0xff] %v7294_v23  ;;  %5710 = vmatmul.msk.bf16.gmra.mxu2 %vm216_vm2, %v7280_v49  ;;  %1952 = vmatpush.bf16.msrb.mxu1 %v5846_v42  ;;  %v533_v42 = vadd.f32 %v7044_v14, %v6884_v31 }
 0x14b   :  { %v642_v60 = vpop.f32.mrf.mxu3  ;;  %10077 = vst [vmem:[#allocation70_spill] sm:$0xff] %v7300_v55  ;;  %843 = vmatpush.bf16.msrb.mxu3 %v5610_v62  ;;  %v1045_v0 = vmax.f32 %v364_v53, 0.0 }
 0x14c   :  { %10079 = vst [vmem:[#allocation72_spill] sm:$0xff] %v7306_v50  ;;  %v643_v18 = vadd.f32 %v642_v60, %v6884_v31  ;;  %v535_v60 = vadd.f32 %v7060_v39, %v6884_v31  ;;  %v1046_v14 = vmax.f32 %v533_v42, 0.0  ;;  %v6222_v42 = vld [vmem:[#allocation3 + $0x154] sm:$0xf0]  ;;  %v5909_v50 = vld [vmem:[#allocation3 + $0x130] sm:$0xf] }
 0x14d   :  { %v7302_v45 = vpop.f32.mrf.mxu2  ;;  %v7304_v1 = vpop.f32.mrf.mxu0  ;;  %10081 = vst [vmem:[#allocation74_spill] sm:$0xff] %v7330_v22 }
 0x14e   :  { %10078 = vst [vmem:[#allocation71_spill] sm:$0xff] %v7302_v45  ;;  %v7308_v23 = vpop.f32.mrf.mxu1  ;;  %v1222_v63 = vmax.f32 %v643_v18, 0.0  ;;  %v1049_v45 = vmax.f32 %v366_v20, 0.0  ;;  %v1050_v12 = vmax.f32 %v535_v60, 0.0 }
 0x150   :  { %v7350_v18 = vpack.c.bf16 %v1049_v45, %v1045_v0  ;;  %v7356_v20 = vpack.c.bf16 %v1050_v12, %v1046_v14  ;;  %v93_v45 = vld [vmem:[%s9858_s0 + $0x158] sm:$0xff]  ;;  %v369_v0 = vadd.f32 %v7075_v26, %v6878_v30  ;;  %v371_v14 = vadd.f32 %v7092_v40, %v6878_v30 }
 0x152   :  { %10083 = vst [vmem:[#allocation76_spill] sm:$0xff] %v7350_v18  ;;  %v1053_v18 = vmax.f32 %v369_v0, 0.0  ;;  %v5837_v0 = vld [vmem:[#allocation3 + $0xa0] sm:$0xf] }
 0x153   :  { %v644_v56 = vpop.f32.mrf.mxu3  ;;  %10085 = vst [vmem:[#allocation78_spill] sm:$0xff] %v7356_v20 }
 0x154   :  { %v645_v9 = vadd.f32 %v644_v56, %v6884_v31 }
 0x155   :  { %v7328_v27 = vpop.f32.mrf.mxu2  ;;  %v7336_v43 = vpop.f32.mrf.mxu0 }
 0x156   :  { %10080 = vst [vmem:[#allocation73_spill] sm:$0xff] %v7328_v27  ;;  %v1226_v32 = vmax.f32 %v645_v9, 0.0  ;;  %v7338_v49 = vpop.f32.mrf.mxu1  ;;  %v5925_v9 = vld [vmem:[#allocation3 + $0x150] sm:$0xf] }
 0x157   :  { %v5926_v60 = vor.u32 %v6222_v42, %v5925_v9  ;;  %v6220_v9 = vld [vmem:[#allocation3 + $0x144] sm:$0xf0] }
 0x158   :  { %5647 = vmatmul.msk.bf16.gmra.mxu0 %vm216_vm2, %v7330_v22  ;;  %5719 = vmatmul.msk.bf16.gmra.mxu3 %vm216_vm2, %v6785_v61  ;;  %v7344_v24 = vpack.c.bf16 %v1226_v32, %v1222_v63  ;;  %v92_v63 = vld [vmem:[%s9858_s0 + $0x150] sm:$0xff]  ;;  %v5917_v61 = vld [vmem:[#allocation3 + $0x140] sm:$0xf] }
 0x159   :  { %5679 = vmatmul.msk.bf16.gmra.mxu1 %vm216_vm2, %v7330_v22  ;;  %2119 = vmatpush.bf16.msrb.mxu2 %v5926_v60  ;;  %v540_v60 = vadd.f32 %v7094_v44, %v6884_v31 }
 0x15a   :  { %10082 = vst [vmem:[#allocation75_spill] sm:$0xff] %v7344_v24  ;;  %5711 = vmatmul.msk.bf16.gmra.mxu2 %vm216_vm2, %v7330_v22  ;;  %v7374_v22 = vpack.c.bf16 %v93_v45, %v92_v63  ;;  %v5773_v45 = vld [vmem:[#allocation3 + $0x20] sm:$0xf] }
 0x15b   :  { %v647_v39 = vpop.f32.mrf.mxu3  ;;  %v1058_v63 = vmax.f32 %v540_v60, 0.0 }
 0x15c   :  { %v648_v32 = vadd.f32 %v647_v39, %v6884_v31  ;;  %10087 = vst [vmem:[#allocation80_spill] sm:$0xff] %v7374_v22  ;;  %v538_v39 = vadd.f32 %v7077_v10, %v6884_v31 }
 0x15d   :  { %v7352_v62 = vpop.f32.mrf.mxu2  ;;  %v7354_v53 = vpop.f32.mrf.mxu0 }
 0x15e   :  { %10084 = vst [vmem:[#allocation77_spill] sm:$0xff] %v7352_v62  ;;  %v7358_v56 = vpop.f32.mrf.mxu1  ;;  %v5918_v62 = vor.u32 %v6220_v9, %v5917_v61  ;;  %v1230_v27 = vmax.f32 %v648_v32, 0.0  ;;  %v1054_v44 = vmax.f32 %v538_v39, 0.0  ;;  %v6184_v32 = vld [vmem:[#allocation3 + $0x24] sm:$0xf0] }
 0x160   :  { %2120 = vmatpush.bf16.msrb.mxu2 %v5918_v62 }
 0x163   :  { %v649_v12 = vpop.f32.mrf.mxu3 }
 0x164   :  { %v650_v42 = vadd.f32 %v649_v12, %v6884_v31  ;;  %v1057_v12 = vmax.f32 %v371_v14, 0.0 }
 0x165   :  { %v7372_v24 = vpop.f32.mrf.mxu2  ;;  %v7380_v26 = vpop.f32.mrf.mxu0 }
 0x166   :  { %10086 = vst [vmem:[#allocation79_spill] sm:$0xff] %v7372_v24  ;;  %v1234_v40 = vmax.f32 %v650_v42, 0.0  ;;  %v7382_v20 = vpop.f32.mrf.mxu1  ;;  %v6218_v24 = vld [vmem:[#allocation3 + $0x134] sm:$0xf0]  ;;  %v7394_v14 = vpack.c.bf16 %v1057_v12, %v1053_v18  ;;  %v6216_v42 = vld [vmem:[#allocation3 + $0x124] sm:$0xf0] }
 0x167   :  { %v5910_v61 = vor.u32 %v6218_v24, %v5909_v50  ;;  %v5774_v50 = vor.u32 %v6184_v32, %v5773_v45  ;;  %v5901_v24 = vld [vmem:[#allocation3 + $0x120] sm:$0xf]  ;;  %v6182_v18 = vld [vmem:[#allocation3 + $0x14] sm:$0xf0]  ;;  %v5829_v32 = vld [vmem:[#allocation3 + $0x90] sm:$0xf] }
 0x168   :  { %5648 = vmatmul.msk.bf16.gmra.mxu0 %vm216_vm2, %v7374_v22  ;;  %5720 = vmatmul.msk.bf16.gmra.mxu3 %vm216_vm2, %v6809_v4  ;;  %v7388_v10 = vpack.c.bf16 %v1234_v40, %v1230_v27  ;;  %10089 = vst [vmem:[#allocation82_spill] sm:$0xff] %v7394_v14  ;;  %v6200_v27 = vld [vmem:[#allocation3 + $0xa4] sm:$0xf0]  ;;  %v5902_v40 = vor.u32 %v6216_v42, %v5901_v24  ;;  %v94_v12 = vld [vmem:[%s9858_s0 + $0x160] sm:$0xff] }
 0x169   :  { %5680 = vmatmul.msk.bf16.gmra.mxu1 %vm216_vm2, %v7374_v22  ;;  %2121 = vmatpush.bf16.msrb.mxu2 %v5910_v61  ;;  %v5838_v60 = vor.u32 %v6200_v27, %v5837_v0  ;;  %v7400_v4 = vpack.c.bf16 %v1058_v63, %v1054_v44  ;;  %v5765_v61 = vld [vmem:[#allocation3 + $0x10] sm:$0xf]  ;;  %v95_v0 = vld [vmem:[%s9858_s0 + $0x168] sm:$0xff]  ;;  %v6214_v27 = vld [vmem:[#allocation3 + $0x114] sm:$0xf0]  ;;  %v374_v42 = vadd.f32 %v7108_v8, %v6878_v30 }
 0x16a   :  { %10088 = vst [vmem:[#allocation81_spill] sm:$0xff] %v7388_v10  ;;  %5712 = vmatmul.msk.bf16.gmra.mxu2 %vm216_vm2, %v7374_v22  ;;  %1784 = vmatpush.bf16.msrb.mxu0 %v5774_v50  ;;  %v5766_v45 = vor.u32 %v6182_v18, %v5765_v61  ;;  %v6198_v22 = vld [vmem:[#allocation3 + $0x94] sm:$0xf0]  ;;  %v5893_v63 = vld [vmem:[#allocation3 + $0x110] sm:$0xf]  ;;  %v543_v8 = vadd.f32 %v7110_v34, %v6884_v31 }
 0x16b   :  { %v652_v62 = vpop.f32.mrf.mxu3  ;;  %10091 = vst [vmem:[#allocation84_spill] sm:$0xff] %v7400_v4  ;;  %1953 = vmatpush.bf16.msrb.mxu1 %v5838_v60  ;;  %v5830_v44 = vor.u32 %v6198_v22, %v5829_v32  ;;  %v5894_v24 = vor.u32 %v6214_v27, %v5893_v63  ;;  %v376_v60 = vadd.f32 %v7124_v41, %v6878_v30  ;;  %v5757_v61 = vld [vmem:[#allocation3] sm:$0xf]  ;;  %v6180_v18 = vld [vmem:[#allocation3 + $0x4] sm:$0xf0] }
 0x16c   :  { %v653_v50 = vadd.f32 %v652_v62, %v6884_v31  ;;  %v7418_v32 = vpack.c.bf16 %v95_v0, %v94_v12  ;;  %v5758_v62 = vor.u32 %v6180_v18, %v5757_v61  ;;  %v5885_v63 = vld [vmem:[#allocation3 + $0x100] sm:$0xf]  ;;  %v6212_v27 = vld [vmem:[#allocation3 + $0x104] sm:$0xf0]  ;;  %v545_v41 = vadd.f32 %v7126_v3, %v6884_v31 }
 0x16d   :  { %v7396_v9 = vpop.f32.mrf.mxu2  ;;  %v7398_v39 = vpop.f32.mrf.mxu0  ;;  %2122 = vmatpush.bf16.msrb.mxu2 %v5902_v40  ;;  %v5886_v12 = vor.u32 %v6212_v27, %v5885_v63  ;;  %v1061_v0 = vmax.f32 %v374_v42, 0.0  ;;  %v1062_v3 = vmax.f32 %v543_v8, 0.0  ;;  %v684_v63 = vadd.f32 %v6942_v28, %v6892_v38  ;;  %v96_v27 = vld [vmem:[%s9858_s0 + $0x170] sm:$0xff]  ;;  %v97_v8 = vld [vmem:[%s9858_s0 + $0x178] sm:$0xff] }
 0x16e   :  { %10090 = vst [vmem:[#allocation83_spill] sm:$0xff] %v7396_v9  ;;  %v7402_v10 = vpop.f32.mrf.mxu1  ;;  %1785 = vmatpush.bf16.msrb.mxu0 %v5766_v45  ;;  %v5821_v9 = vld [vmem:[#allocation3 + $0x80] sm:$0xf]  ;;  %v6196_v45 = vld [vmem:[#allocation3 + $0x84] sm:$0xf0]  ;;  %v1238_v55 = vmax.f32 %v653_v50, 0.0 }
 0x16f   :  { %10092 = vst [vmem:[#allocation85_spill] sm:$0xff] %v7402_v10  ;;  %1954 = vmatpush.bf16.msrb.mxu1 %v5830_v44  ;;  %v5822_v14 = vor.u32 %v6196_v45, %v5821_v9  ;;  %v1066_v61 = vmax.f32 %v545_v41, 0.0  ;;  %v6242_v9 = vld [vmem:[#allocation3 + $0x1f4] sm:$0xf0]  ;;  %v682_v45 = vadd.f32 %v6928_v19, %v6892_v38  ;;  %v381_v19 = vadd.f32 %v7166_v29, %v6878_v30 }
 0x170   :  { %10093 = vst [vmem:[#allocation86_spill] sm:$0xff] %v7418_v32 }
 0x171   :  { %2123 = vmatpush.bf16.msrb.mxu2 %v5894_v24  ;;  %v1065_v24 = vmax.f32 %v376_v60, 0.0  ;;  %v7444_v18 = vpack.c.bf16 %v1066_v61, %v1062_v3  ;;  %v7466_v61 = vpack.c.bf16 %v97_v8, %v96_v27 }
 0x172   :  { %1786 = vmatpush.bf16.msrb.mxu0 %v5758_v62 }
 0x173   :  { %v654_v40 = vpop.f32.mrf.mxu3  ;;  %1955 = vmatpush.bf16.msrb.mxu1 %v5822_v14  ;;  %v7438_v42 = vpack.c.bf16 %v1065_v24, %v1061_v0  ;;  %10096 = vst [vmem:[#allocation89_spill] sm:$0xff] %v7444_v18  ;;  %v379_v0 = vadd.f32 %v7148_v47, %v6878_v30 }
 0x174   :  { %v655_v4 = vadd.f32 %v654_v40, %v6884_v31  ;;  %10097 = vst [vmem:[#allocation90_spill] sm:$0xff] %v7466_v61 }
 0x175   :  { %v7416_v22 = vpop.f32.mrf.mxu2  ;;  %v7424_v44 = vpop.f32.mrf.mxu0  ;;  %2124 = vmatpush.bf16.msrb.mxu2 %v5886_v12  ;;  %10095 = vst [vmem:[#allocation88_spill] sm:$0xff] %v7438_v42  ;;  %v1019_v12 = vmax.f32 %v684_v63, 0.0  ;;  %v1069_v29 = vmax.f32 %v379_v0, 0.0  ;;  %v1073_v63 = vmax.f32 %v381_v19, 0.0 }
 0x176   :  { %v1242_v40 = vmax.f32 %v655_v4, 0.0  ;;  %v7426_v10 = vpop.f32.mrf.mxu1  ;;  %v6005_v4 = vld [vmem:[#allocation3 + $0x1f0] sm:$0xf] }
 0x177   :  { %v6006_v14 = vor.u32 %v6242_v9, %v6005_v4  ;;  %v548_v4 = vadd.f32 %v7150_v13, %v6884_v31  ;;  %v550_v9 = vadd.f32 %v7170_v16, %v6884_v31 }
 0x178   :  { %5649 = vmatmul.msk.bf16.gmra.mxu0 %vm216_vm2, %v7418_v32  ;;  %5721 = vmatmul.msk.bf16.gmra.mxu3 %vm216_vm2, %v6833_v11  ;;  %v7432_v34 = vpack.c.bf16 %v1242_v40, %v1238_v55  ;;  %v1015_v40 = vmax.f32 %v682_v45, 0.0 }
 0x179   :  { %5681 = vmatmul.msk.bf16.gmra.mxu1 %vm216_vm2, %v7418_v32  ;;  %2286 = vmatpush.bf16.msra.mxu3 %v6006_v14  ;;  %v1070_v27 = vmax.f32 %v548_v4, 0.0  ;;  %v1074_v16 = vmax.f32 %v550_v9, 0.0 }
 0x17a   :  { %10094 = vst [vmem:[#allocation87_spill] sm:$0xff] %v7432_v34  ;;  %5713 = vmatmul.msk.bf16.gmra.mxu2 %vm216_vm2, %v7418_v32  ;;  %v7476_v11 = vpack.c.bf16 %v1019_v12, %v1015_v40 }
 0x17b   :  { %v657_v50 = vpop.f32.mrf.mxu3  ;;  %v7494_v0 = vpack.c.bf16 %v1074_v16, %v1070_v27 }
 0x17c   :  { %v658_v41 = vadd.f32 %v657_v50, %v6884_v31  ;;  %10098 = vst [vmem:[#allocation91_spill] sm:$0xff] %v7476_v11 }
 0x17d   :  { %v7440_v60 = vpop.f32.mrf.mxu2  ;;  %v7442_v55 = vpop.f32.mrf.mxu0  ;;  %10102 = vst [vmem:[#allocation95_spill] sm:$0xff] %v7494_v0 }
 0x17e   :  { %v7446_v62 = vpop.f32.mrf.mxu1  ;;  %v1246_v50 = vmax.f32 %v658_v41, 0.0  ;;  %v7488_v41 = vpack.c.bf16 %v1073_v63, %v1069_v29  ;;  %v386_v29 = vadd.f32 %v7216_v59, %v6878_v30 }
 0x180   :  { %10100 = vst [vmem:[#allocation93_spill] sm:$0xff] %v7488_v41 }
 0x183   :  { %v659_v24 = vpop.f32.mrf.mxu3 }
 0x184   :  { %v660_v28 = vadd.f32 %v659_v24, %v6884_v31  ;;  %v687_v24 = vadd.f32 %v6960_v51, %v6892_v38  ;;  %v553_v51 = vadd.f32 %v7194_v48, %v6884_v31 }
 0x185   :  { %v7464_v3 = vpop.f32.mrf.mxu2  ;;  %v7472_v14 = vpop.f32.mrf.mxu0 }
 0x186   :  { %v1250_v47 = vmax.f32 %v660_v28, 0.0  ;;  %v7474_v45 = vpop.f32.mrf.mxu1  ;;  %v689_v28 = vadd.f32 %v6974_v5, %v6892_v38  ;;  %v1023_v9 = vmax.f32 %v687_v24, 0.0  ;;  %v555_v5 = vadd.f32 %v7220_v2, %v6884_v31 }
 0x187   :  { %v1078_v48 = vmax.f32 %v553_v51, 0.0  ;;  %v10108_v51 = vld [vmem:[#allocation33_spill] sm:$0xff] }
 0x188   :  { %5650 = vmatmul.msk.bf16.gmra.mxu0 %vm216_vm2, %v7466_v61  ;;  %5722 = vmatmul.msk.bf16.gmra.mxu3 %vm216_vm2, %v6857_v17  ;;  %v7482_v13 = vpack.c.bf16 %v1250_v47, %v1246_v50  ;;  %v1027_v50 = vmax.f32 %v689_v28, 0.0  ;;  %v384_v47 = vadd.f32 %v7192_v54, %v6878_v30  ;;  %v1082_v34 = vmax.f32 %v555_v5, 0.0 }
 0x189   :  { %5682 = vmatmul.msk.bf16.gmra.mxu1 %vm216_vm2, %v7466_v61  ;;  %v694_v5 = vadd.f32 %v10108_v51, %v6892_v38  ;;  %v560_v51 = vadd.f32 %v7264_v21, %v6884_v31 }
 0x18a   :  { %10099 = vst [vmem:[#allocation92_spill] sm:$0xff] %v7482_v13  ;;  %5714 = vmatmul.msk.bf16.gmra.mxu2 %vm216_vm2, %v7466_v61  ;;  %v1077_v54 = vmax.f32 %v384_v47, 0.0  ;;  %v1081_v13 = vmax.f32 %v386_v29, 0.0  ;;  %v7518_v59 = vpack.c.bf16 %v1027_v50, %v1023_v9  ;;  %v7533_v50 = vpack.c.bf16 %v1082_v34, %v1078_v48  ;;  %v10107_v29 = vld [vmem:[#allocation32_spill] sm:$0xff] }
 0x18b   :  { %v662_v8 = vpop.f32.mrf.mxu3  ;;  %v10111_v61 = vld [vmem:[#allocation8_spill] sm:$0xff]  ;;  %v1090_v32 = vmax.f32 %v560_v51, 0.0 }
 0x18c   :  { %v663_v4 = vadd.f32 %v662_v8, %v6884_v31  ;;  %10104 = vst [vmem:[#allocation97_spill] sm:$0xff] %v7518_v59 }
 0x18d   :  { %v7490_v40 = vpop.f32.mrf.mxu2  ;;  %v7492_v12 = vpop.f32.mrf.mxu0 }
 0x18e   :  { %10101 = vst [vmem:[#allocation94_spill] sm:$0xff] %v7490_v40  ;;  %v7496_v19 = vpop.f32.mrf.mxu1  ;;  %v1254_v24 = vmax.f32 %v663_v4, 0.0  ;;  %v7527_v4 = vpack.c.bf16 %v1081_v13, %v1077_v54  ;;  %v389_v13 = vadd.f32 %v7242_v25, %v6878_v30  ;;  %v391_v54 = vadd.f32 %v7260_v52, %v6878_v30  ;;  %v10138_v40 = vld [vmem:[#allocation14_spill] sm:$0xff] }
 0x190   :  { %v1085_v25 = vmax.f32 %v389_v13, 0.0  ;;  %v10115_v13 = vld [vmem:[#allocation36_spill] sm:$0xff] }
 0x193   :  { %v664_v63 = vpop.f32.mrf.mxu3 }
 0x194   :  { %v665_v27 = vadd.f32 %v664_v63, %v6884_v31 }
 0x195   :  { %v7508_v16 = vpop.f32.mrf.mxu2  ;;  %v7514_v8 = vpop.f32.mrf.mxu0 }
 0x196   :  { %10103 = vst [vmem:[#allocation96_spill] sm:$0xff] %v7508_v16  ;;  %v1258_v28 = vmax.f32 %v665_v27, 0.0  ;;  %v7516_v17 = vpop.f32.mrf.mxu1  ;;  %v692_v27 = vadd.f32 %v10107_v29, %v6892_v38  ;;  %v558_v29 = vadd.f32 %v7244_v7, %v6884_v31 }
 0x198   :  { %5723 = vmatmul.msk.bf16.vlgmr.msrb.gmra.mxu3 %vm216_vm2, %v6687_v36  ;;  %1787 = vmatmul.bf16.vlgmr.msrb.gmra.mxu0 %v6904_v57  ;;  %v7523_v63 = vpack.c.bf16 %v1258_v28, %v1254_v24  ;;  %v1031_v28 = vmax.f32 %v692_v27, 0.0  ;;  %v1086_v7 = vmax.f32 %v558_v29, 0.0  ;;  %v10116_v29 = vld [vmem:[#allocation37_spill] sm:$0xff] }
 0x199   :  { %1956 = vmatmul.bf16.vlgmr.msrb.gmra.mxu1 %v6906_v58  ;;  %v699_v51 = vadd.f32 %v10116_v29, %v6892_v38  ;;  %v565_v29 = vadd.f32 %v7308_v23, %v6884_v31  ;;  %v10121_v23 = vld [vmem:[#allocation60_spill] sm:$0xff] }
 0x19a   :  { %10105 = vst [vmem:[#allocation98_spill] sm:$0xff] %v7523_v63  ;;  %2125 = vmatmul.bf16.vlgmr.msrb.gmra.mxu2 %v6922_v15  ;;  %v1035_v15 = vmax.f32 %v694_v5, 0.0  ;;  %v1089_v63 = vmax.f32 %v391_v54, 0.0  ;;  %v697_v54 = vadd.f32 %v10115_v13, %v6892_v38  ;;  %v563_v13 = vadd.f32 %v7288_v35, %v6884_v31 }
 0x19b   :  { %v796_v2 = vpop.f32.mrf.mxu3 }
 0x19c   :  { %v797_v24 = vadd.f32 %v796_v2, %v6892_v38  ;;  %v7557_v52 = vpack.c.bf16 %v1035_v15, %v1031_v28  ;;  %v7566_v21 = vpack.c.bf16 %v1089_v63, %v1085_v25  ;;  %v7572_v28 = vpack.c.bf16 %v1090_v32, %v1086_v7 }
 0x19d   :  { %v7529_v47 = vpop.f32.mrf.mxu2  ;;  %v7531_v9 = vpop.f32.mrf.mxu0  ;;  %v394_v63 = vadd.f32 %v7286_v33, %v6878_v30  ;;  %v396_v25 = vadd.f32 %v7304_v1, %v6878_v30  ;;  %v1094_v35 = vmax.f32 %v563_v13, 0.0  ;;  %v10123_v13 = vld [vmem:[#allocation40_spill] sm:$0xff] }
 0x19e   :  { %10106 = vst [vmem:[#allocation99_spill] sm:$0xff] %v7529_v47  ;;  %v7535_v36 = vpop.f32.mrf.mxu1  ;;  %v1199_v27 = vmax.f32 %v797_v24, 0.0 }
 0x19f   :  { %10110 = vst [vmem:[#allocation33_spill] sm:$0xff] %v7557_v52  ;;  %v1093_v33 = vmax.f32 %v394_v63, 0.0 }
 0x1a0   :  { %10114 = vst [vmem:[#allocation101_spill] sm:$0xff] %v7572_v28 }
 0x1a3   :  { %v798_v34 = vpop.f32.mrf.mxu3 }
 0x1a4   :  { %v799_v58 = vadd.f32 %v798_v34, %v6892_v38 }
 0x1a5   :  { %v7546_v48 = vpop.f32.mrf.mxu2  ;;  %v7553_v2 = vpop.f32.mrf.mxu0 }
 0x1a6   :  { %10109 = vst [vmem:[#allocation32_spill] sm:$0xff] %v7546_v48  ;;  %v1203_v5 = vmax.f32 %v799_v58, 0.0  ;;  %v7555_v57 = vpop.f32.mrf.mxu1 }
 0x1a8   :  { %5724 = vmatmul.msk.bf16.gmra.mxu3 %vm216_vm2, %v10111_v61  ;;  %1792 = vmatmul.bf16.gmra.mxu0 %v7162_v37  ;;  %v7562_v34 = vpack.c.bf16 %v1203_v5, %v1199_v27  ;;  %v1039_v5 = vmax.f32 %v697_v54, 0.0 }
 0x1a9   :  { %1961 = vmatmul.bf16.gmra.mxu1 %v7168_v6 }
 0x1aa   :  { %10112 = vst [vmem:[#allocation8_spill] sm:$0xff] %v7562_v34  ;;  %2130 = vmatmul.bf16.gmra.mxu2 %v7476_v11  ;;  %v1043_v11 = vmax.f32 %v699_v51, 0.0  ;;  %v1097_v34 = vmax.f32 %v396_v25, 0.0 }
 0x1ab   :  { %v801_v58 = vpop.f32.mrf.mxu3 }
 0x1ac   :  { %v802_v27 = vadd.f32 %v801_v58, %v6892_v38  ;;  %v7596_v1 = vpack.c.bf16 %v1043_v11, %v1039_v5  ;;  %v7605_v25 = vpack.c.bf16 %v1097_v34, %v1093_v33  ;;  %v399_v33 = vadd.f32 %v7336_v43, %v6878_v30 }
 0x1ad   :  { %v7568_v24 = vpop.f32.mrf.mxu2  ;;  %v7570_v15 = vpop.f32.mrf.mxu0 }
 0x1ae   :  { %10113 = vst [vmem:[#allocation100_spill] sm:$0xff] %v7568_v24  ;;  %v7574_v61 = vpop.f32.mrf.mxu1  ;;  %v1207_v54 = vmax.f32 %v802_v27, 0.0  ;;  %v10119_v24 = vld [vmem:[#allocation10_spill] sm:$0xff]  ;;  %v6240_v27 = vld [vmem:[#allocation3 + $0x1e4] sm:$0xf0]  ;;  %v1101_v43 = vmax.f32 %v399_v33, 0.0 }
 0x1af   :  { %10118 = vst [vmem:[#allocation37_spill] sm:$0xff] %v7596_v1 }
 0x1b3   :  { %v803_v32 = vpop.f32.mrf.mxu3 }
 0x1b4   :  { %v804_v6 = vadd.f32 %v803_v32, %v6892_v38 }
 0x1b5   :  { %v7585_v7 = vpop.f32.mrf.mxu2  ;;  %v7592_v58 = vpop.f32.mrf.mxu0 }
 0x1b6   :  { %10117 = vst [vmem:[#allocation36_spill] sm:$0xff] %v7585_v7  ;;  %v1211_v51 = vmax.f32 %v804_v6, 0.0  ;;  %v7594_v37 = vpop.f32.mrf.mxu1  ;;  %v1098_v7 = vmax.f32 %v565_v29, 0.0  ;;  %v5997_v6 = vld [vmem:[#allocation3 + $0x1e0] sm:$0xf]  ;;  %v702_v29 = vadd.f32 %v10123_v13, %v6892_v38  ;;  %v568_v13 = vadd.f32 %v7338_v49, %v6884_v31 }
 0x1b7   :  { %v5998_v48 = vor.u32 %v6240_v27, %v5997_v6 }
 0x1b8   :  { %5725 = vmatmul.msk.bf16.gmra.mxu3 %vm216_vm2, %v10119_v24  ;;  %1797 = vmatmul.bf16.gmra.mxu0 %v7212_v46  ;;  %v7601_v32 = vpack.c.bf16 %v1211_v51, %v1207_v54  ;;  %v7611_v5 = vpack.c.bf16 %v1098_v7, %v1094_v35  ;;  %v10124_v51 = vld [vmem:[#allocation41_spill] sm:$0xff]  ;;  %v1047_v27 = vmax.f32 %v702_v29, 0.0  ;;  %v1102_v49 = vmax.f32 %v568_v13, 0.0 }
 0x1b9   :  { %1966 = vmatmul.bf16.gmra.mxu1 %v10121_v23  ;;  %2287 = vmatpush.bf16.msra.mxu3 %v5998_v48  ;;  %v401_v48 = vadd.f32 %v7354_v53, %v6878_v30  ;;  %v10134_v13 = vld [vmem:[#allocation45_spill] sm:$0xff] }
 0x1ba   :  { %10120 = vst [vmem:[#allocation10_spill] sm:$0xff] %v7601_v32  ;;  %2135 = vmatmul.bf16.gmra.mxu2 %v7518_v59  ;;  %v704_v59 = vadd.f32 %v10124_v51, %v6892_v38  ;;  %v570_v51 = vadd.f32 %v7358_v56, %v6884_v31  ;;  %v10130_v56 = vld [vmem:[#allocation66_spill] sm:$0xff] }
 0x1bb   :  { %v806_v63 = vpop.f32.mrf.mxu3  ;;  %v1105_v32 = vmax.f32 %v401_v48, 0.0  ;;  %v10133_v48 = vld [vmem:[#allocation44_spill] sm:$0xff] }
 0x1bc   :  { %v807_v6 = vadd.f32 %v806_v63, %v6892_v38  ;;  %v1051_v34 = vmax.f32 %v704_v59, 0.0  ;;  %v1106_v47 = vmax.f32 %v570_v51, 0.0  ;;  %v709_v51 = vadd.f32 %v10134_v13, %v6892_v38  ;;  %v10136_v13 = vld [vmem:[#allocation85_spill] sm:$0xff] }
 0x1bd   :  { %v7607_v11 = vpop.f32.mrf.mxu2  ;;  %v7609_v24 = vpop.f32.mrf.mxu0 }
 0x1be   :  { %10122 = vst [vmem:[#allocation102_spill] sm:$0xff] %v7607_v11  ;;  %v7613_v54 = vpop.f32.mrf.mxu1  ;;  %v1215_v59 = vmax.f32 %v807_v6, 0.0  ;;  %v7635_v53 = vpack.c.bf16 %v1051_v34, %v1047_v27  ;;  %v10127_v11 = vld [vmem:[#allocation12_spill] sm:$0xff]  ;;  %v7644_v6 = vpack.c.bf16 %v1105_v32, %v1101_v43  ;;  %v7650_v34 = vpack.c.bf16 %v1106_v47, %v1102_v49 }
 0x1bf   :  { %v404_v32 = vadd.f32 %v7380_v26, %v6878_v30  ;;  %v406_v43 = vadd.f32 %v7398_v39, %v6878_v30 }
 0x1c0   :  { %10126 = vst [vmem:[#allocation41_spill] sm:$0xff] %v7635_v53 }
 0x1c1   :  { %10132 = vst [vmem:[#allocation104_spill] sm:$0xff] %v7650_v34  ;;  %v1109_v26 = vmax.f32 %v404_v32, 0.0  ;;  %v1113_v16 = vmax.f32 %v406_v43, 0.0  ;;  %v10145_v43 = vld [vmem:[#allocation48_spill] sm:$0xff] }
 0x1c3   :  { %v808_v7 = vpop.f32.mrf.mxu3 }
 0x1c4   :  { %v809_v23 = vadd.f32 %v808_v7, %v6892_v38  ;;  %v10128_v7 = vld [vmem:[#allocation64_spill] sm:$0xff] }
 0x1c5   :  { %v7624_v35 = vpop.f32.mrf.mxu2  ;;  %v7631_v63 = vpop.f32.mrf.mxu0 }
 0x1c6   :  { %10125 = vst [vmem:[#allocation40_spill] sm:$0xff] %v7624_v35  ;;  %v1219_v29 = vmax.f32 %v809_v23, 0.0  ;;  %v7633_v46 = vpop.f32.mrf.mxu1 }
 0x1c8   :  { %5726 = vmatmul.msk.bf16.gmra.mxu3 %vm216_vm2, %v10127_v11  ;;  %1802 = vmatmul.bf16.gmra.mxu0 %v10128_v7  ;;  %v7640_v35 = vpack.c.bf16 %v1219_v29, %v1215_v59  ;;  %v707_v59 = vadd.f32 %v10133_v48, %v6892_v38  ;;  %v573_v48 = vadd.f32 %v7382_v20, %v6884_v31 }
 0x1c9   :  { %1971 = vmatmul.bf16.gmra.mxu1 %v10130_v56  ;;  %v1059_v56 = vmax.f32 %v709_v51, 0.0 }
 0x1ca   :  { %10129 = vst [vmem:[#allocation12_spill] sm:$0xff] %v7640_v35  ;;  %2140 = vmatmul.bf16.gmra.mxu2 %v7557_v52  ;;  %v1055_v52 = vmax.f32 %v707_v59, 0.0  ;;  %v575_v35 = vadd.f32 %v10136_v13, %v6884_v31  ;;  %v1110_v20 = vmax.f32 %v573_v48, 0.0  ;;  %v10141_v13 = vld [vmem:[#allocation72_spill] sm:$0xff] }
 0x1cb   :  { %v811_v23 = vpop.f32.mrf.mxu3 }
 0x1cc   :  { %v812_v29 = vadd.f32 %v811_v23, %v6892_v38  ;;  %v7674_v39 = vpack.c.bf16 %v1059_v56, %v1055_v52  ;;  %v1114_v34 = vmax.f32 %v575_v35, 0.0  ;;  %v10146_v35 = vld [vmem:[#allocation49_spill] sm:$0xff] }
 0x1cd   :  { %v7646_v33 = vpop.f32.mrf.mxu2  ;;  %v7648_v27 = vpop.f32.mrf.mxu0  ;;  %v714_v48 = vadd.f32 %v10146_v35, %v6892_v38  ;;  %v580_v35 = vadd.f32 %v7446_v62, %v6884_v31  ;;  %v10152_v62 = vld [vmem:[#allocation78_spill] sm:$0xff] }
 0x1ce   :  { %10131 = vst [vmem:[#allocation103_spill] sm:$0xff] %v7646_v33  ;;  %v7652_v11 = vpop.f32.mrf.mxu1  ;;  %v1223_v59 = vmax.f32 %v812_v29, 0.0  ;;  %v7683_v29 = vpack.c.bf16 %v1113_v16, %v1109_v26  ;;  %v7689_v56 = vpack.c.bf16 %v1114_v34, %v1110_v20  ;;  %v409_v16 = vadd.f32 %v7424_v44, %v6878_v30 }
 0x1cf   :  { %10137 = vst [vmem:[#allocation45_spill] sm:$0xff] %v7674_v39  ;;  %v411_v26 = vadd.f32 %v7442_v55, %v6878_v30 }
 0x1d0   :  { %10142 = vst [vmem:[#allocation14_spill] sm:$0xff] %v7683_v29  ;;  %v1117_v44 = vmax.f32 %v409_v16, 0.0  ;;  %v1122_v29 = vmax.f32 %v580_v35, 0.0 }
 0x1d1   :  { %10144 = vst [vmem:[#allocation106_spill] sm:$0xff] %v7689_v56  ;;  %v10149_v56 = vld [vmem:[#allocation16_spill] sm:$0xff] }
 0x1d3   :  { %v813_v47 = vpop.f32.mrf.mxu3 }
 0x1d4   :  { %v814_v7 = vadd.f32 %v813_v47, %v6892_v38  ;;  %v10139_v47 = vld [vmem:[#allocation70_spill] sm:$0xff] }
 0x1d5   :  { %v7663_v49 = vpop.f32.mrf.mxu2  ;;  %v7670_v23 = vpop.f32.mrf.mxu0 }
 0x1d6   :  { %10135 = vst [vmem:[#allocation44_spill] sm:$0xff] %v7663_v49  ;;  %v1227_v51 = vmax.f32 %v814_v7, 0.0  ;;  %v7672_v33 = vpop.f32.mrf.mxu1 }
 0x1d8   :  { %5727 = vmatmul.msk.bf16.gmra.mxu3 %vm216_vm2, %v10138_v40  ;;  %1807 = vmatmul.bf16.gmra.mxu0 %v10139_v47  ;;  %v7679_v49 = vpack.c.bf16 %v1227_v51, %v1223_v59  ;;  %v712_v59 = vadd.f32 %v10145_v43, %v6892_v38  ;;  %v578_v43 = vadd.f32 %v7426_v10, %v6884_v31 }
 0x1d9   :  { %1976 = vmatmul.bf16.gmra.mxu1 %v10141_v13  ;;  %v1067_v13 = vmax.f32 %v714_v48, 0.0 }
 0x1da   :  { %10140 = vst [vmem:[#allocation85_spill] sm:$0xff] %v7679_v49  ;;  %2145 = vmatmul.bf16.gmra.mxu2 %v7596_v1  ;;  %v1063_v1 = vmax.f32 %v712_v59, 0.0  ;;  %v1118_v10 = vmax.f32 %v578_v43, 0.0  ;;  %v10157_v43 = vld [vmem:[#allocation55_spill] sm:$0xff] }
 0x1db   :  { %v816_v7 = vpop.f32.mrf.mxu3  ;;  %v719_v35 = vadd.f32 %v10157_v43, %v6892_v38  ;;  %v585_v43 = vadd.f32 %v7496_v19, %v6884_v31  ;;  %v10164_v19 = vld [vmem:[#allocation84_spill] sm:$0xff] }
 0x1dc   :  { %v817_v51 = vadd.f32 %v816_v7, %v6892_v38  ;;  %v7713_v55 = vpack.c.bf16 %v1067_v13, %v1063_v1  ;;  %v7728_v13 = vpack.c.bf16 %v1122_v29, %v1118_v10 }
 0x1dd   :  { %v7685_v32 = vpop.f32.mrf.mxu2  ;;  %v7687_v52 = vpop.f32.mrf.mxu0 }
 0x1de   :  { %10143 = vst [vmem:[#allocation105_spill] sm:$0xff] %v7685_v32  ;;  %v7691_v40 = vpop.f32.mrf.mxu1  ;;  %v1231_v59 = vmax.f32 %v817_v51, 0.0  ;;  %v1121_v32 = vmax.f32 %v411_v26, 0.0  ;;  %v10156_v26 = vld [vmem:[#allocation53_spill] sm:$0xff] }
 0x1df   :  { %10148 = vst [vmem:[#allocation49_spill] sm:$0xff] %v7713_v55 }
 0x1e0   :  { %v7722_v51 = vpack.c.bf16 %v1121_v32, %v1117_v44  ;;  %10155 = vst [vmem:[#allocation109_spill] sm:$0xff] %v7728_v13  ;;  %v414_v32 = vadd.f32 %v7472_v14, %v6878_v30  ;;  %v416_v44 = vadd.f32 %v7492_v12, %v6878_v30  ;;  %v10161_v13 = vld [vmem:[#allocation18_spill] sm:$0xff] }
 0x1e2   :  { %10153 = vst [vmem:[#allocation107_spill] sm:$0xff] %v7722_v51  ;;  %v1125_v14 = vmax.f32 %v414_v32, 0.0  ;;  %v1130_v51 = vmax.f32 %v585_v43, 0.0 }
 0x1e3   :  { %v818_v34 = vpop.f32.mrf.mxu3 }
 0x1e4   :  { %v819_v47 = vadd.f32 %v818_v34, %v6892_v38  ;;  %v10150_v34 = vld [vmem:[#allocation76_spill] sm:$0xff] }
 0x1e5   :  { %v7702_v20 = vpop.f32.mrf.mxu2  ;;  %v7709_v7 = vpop.f32.mrf.mxu0 }
 0x1e6   :  { %10147 = vst [vmem:[#allocation48_spill] sm:$0xff] %v7702_v20  ;;  %v1235_v48 = vmax.f32 %v819_v47, 0.0  ;;  %v7711_v49 = vpop.f32.mrf.mxu1 }
 0x1e8   :  { %5728 = vmatmul.msk.bf16.gmra.mxu3 %vm216_vm2, %v10149_v56  ;;  %1812 = vmatmul.bf16.gmra.mxu0 %v10150_v34  ;;  %v7718_v20 = vpack.c.bf16 %v1235_v48, %v1231_v59  ;;  %v717_v59 = vadd.f32 %v10156_v26, %v6892_v38  ;;  %v583_v26 = vadd.f32 %v7474_v45, %v6884_v31 }
 0x1e9   :  { %1981 = vmatmul.bf16.gmra.mxu1 %v10152_v62  ;;  %v1075_v62 = vmax.f32 %v719_v35, 0.0 }
 0x1ea   :  { %10151 = vst [vmem:[#allocation16_spill] sm:$0xff] %v7718_v20  ;;  %2150 = vmatmul.bf16.gmra.mxu2 %v7635_v53  ;;  %v1071_v53 = vmax.f32 %v717_v59, 0.0  ;;  %v1126_v45 = vmax.f32 %v583_v26, 0.0  ;;  %v10168_v26 = vld [vmem:[#allocation59_spill] sm:$0xff] }
 0x1eb   :  { %v821_v47 = vpop.f32.mrf.mxu3  ;;  %v722_v43 = vadd.f32 %v10168_v26, %v6892_v38  ;;  %v588_v26 = vadd.f32 %v7516_v17, %v6884_v31 }
 0x1ec   :  { %v822_v48 = vadd.f32 %v821_v47, %v6892_v38  ;;  %v7752_v12 = vpack.c.bf16 %v1075_v62, %v1071_v53 }
 0x1ed   :  { %v7724_v16 = vpop.f32.mrf.mxu2  ;;  %v7726_v1 = vpop.f32.mrf.mxu0  ;;  %v1134_v17 = vmax.f32 %v588_v26, 0.0 }
 0x1ee   :  { %10154 = vst [vmem:[#allocation108_spill] sm:$0xff] %v7724_v16  ;;  %v7730_v56 = vpop.f32.mrf.mxu1  ;;  %v1239_v59 = vmax.f32 %v822_v48, 0.0  ;;  %v1129_v16 = vmax.f32 %v416_v44, 0.0  ;;  %v6238_v48 = vld [vmem:[#allocation3 + $0x1d4] sm:$0xf0] }
 0x1ef   :  { %10160 = vst [vmem:[#allocation110_spill] sm:$0xff] %v7752_v12 }
 0x1f0   :  { %v7761_v44 = vpack.c.bf16 %v1129_v16, %v1125_v14  ;;  %v419_v14 = vadd.f32 %v7514_v8, %v6878_v30 }
 0x1f2   :  { %10165 = vst [vmem:[#allocation111_spill] sm:$0xff] %v7761_v44  ;;  %v1133_v8 = vmax.f32 %v419_v14, 0.0  ;;  %v6209_v14 = vld [vmem:[#allocation3 + $0xf4] sm:$0xf] }
 0x1f3   :  { %v823_v29 = vpop.f32.mrf.mxu3 }
 0x1f4   :  { %v824_v34 = vadd.f32 %v823_v29, %v6892_v38  ;;  %v10162_v29 = vld [vmem:[#allocation82_spill] sm:$0xff] }
 0x1f5   :  { %v7741_v10 = vpop.f32.mrf.mxu2  ;;  %v7748_v47 = vpop.f32.mrf.mxu0 }
 0x1f6   :  { %10158 = vst [vmem:[#allocation53_spill] sm:$0xff] %v7741_v10  ;;  %v1243_v35 = vmax.f32 %v824_v34, 0.0  ;;  %v7750_v20 = vpop.f32.mrf.mxu1  ;;  %v5989_v34 = vld [vmem:[#allocation3 + $0x1d0] sm:$0xf] }
 0x1f7   :  { %10159 = vst [vmem:[#allocation55_spill] sm:$0xff] %v7750_v20  ;;  %v5990_v20 = vor.u32 %v6238_v48, %v5989_v34  ;;  %v1079_v48 = vmax.f32 %v722_v43, 0.0 }
 0x1f8   :  { %5729 = vmatmul.msk.bf16.gmra.mxu3 %vm216_vm2, %v10161_v13  ;;  %1817 = vmatmul.bf16.gmra.mxu0 %v10162_v29  ;;  %v7757_v10 = vpack.c.bf16 %v1243_v35, %v1239_v59  ;;  %v7767_v13 = vpack.c.bf16 %v1130_v51, %v1126_v45  ;;  %v10169_v35 = vld [vmem:[#allocation61_spill] sm:$0xff] }
 0x1f9   :  { %1986 = vmatmul.bf16.gmra.mxu1 %v10164_v19  ;;  %2288 = vmatpush.bf16.msra.mxu3 %v5990_v20  ;;  %v421_v20 = vadd.f32 %v7531_v9, %v6878_v30 }
 0x1fa   :  { %10163 = vst [vmem:[#allocation18_spill] sm:$0xff] %v7757_v10  ;;  %2155 = vmatmul.bf16.gmra.mxu2 %v7674_v39  ;;  %v724_v39 = vadd.f32 %v10169_v35, %v6892_v38  ;;  %v590_v35 = vadd.f32 %v7535_v36, %v6884_v31  ;;  %v6193_v36 = vld [vmem:[#allocation3 + $0x74] sm:$0xf] }
 0x1fb   :  { %v826_v32 = vpop.f32.mrf.mxu3  ;;  %10167 = vst [vmem:[#allocation113_spill] sm:$0xff] %v7767_v13  ;;  %v1137_v10 = vmax.f32 %v421_v20, 0.0  ;;  %v5879_v20 = vld [vmem:[#allocation3 + $0xf8] sm:$0xf0] }
 0x1fc   :  { %v827_v34 = vadd.f32 %v826_v32, %v6892_v38  ;;  %v1083_v16 = vmax.f32 %v724_v39, 0.0 }
 0x1fd   :  { %v7763_v53 = vpop.f32.mrf.mxu2  ;;  %v7765_v62 = vpop.f32.mrf.mxu0  ;;  %v7800_v13 = vpack.c.bf16 %v1137_v10, %v1133_v8  ;;  %v1453_v10 = vld [vmem:[%s9862_s4] sm:$0x3] }
 0x1fe   :  { %10166 = vst [vmem:[#allocation112_spill] sm:$0xff] %v7763_v53  ;;  %v7769_v59 = vpop.f32.mrf.mxu1  ;;  %v1247_v39 = vmax.f32 %v827_v34, 0.0  ;;  %v7791_v9 = vpack.c.bf16 %v1083_v16, %v1079_v48  ;;  %v10171_v53 = vld [vmem:[#allocation20_spill] sm:$0xff]  ;;  %v5882_v16 = vor.u32 %v6209_v14, %v5879_v20 }
 0x1ff   :  { %10173 = vst [vmem:[#allocation20_spill] sm:$0xff] %v7800_v13 }
 0x200   :  { %2624 = vmatpush.bf16.msra.mxu1 %v5882_v16 }
 0x203   :  { %v828_v51 = vpop.f32.mrf.mxu3 }
 0x204   :  { %v829_v19 = vadd.f32 %v828_v51, %v6892_v38 }
 0x205   :  { %v7780_v45 = vpop.f32.mrf.mxu2  ;;  %v7787_v32 = vpop.f32.mrf.mxu0 }
 0x206   :  { %10170 = vst [vmem:[#allocation59_spill] sm:$0xff] %v7780_v45  ;;  %v1251_v43 = vmax.f32 %v829_v19, 0.0  ;;  %v7789_v29 = vpop.f32.mrf.mxu1  ;;  %v1138_v45 = vmax.f32 %v590_v35, 0.0  ;;  %v5815_v19 = vld [vmem:[#allocation3 + $0x78] sm:$0xf0] }
 0x207   :  { %v5818_v34 = vor.u32 %v6193_v36, %v5815_v19  ;;  %v10177_v36 = vld [vmem:[#allocation67_spill] sm:$0xff] }
 0x208   :  { %5730 = vmatmul.msk.bf16.gmra.mxu3 %vm216_vm2, %v10171_v53  ;;  %1822 = vmatmul.bf16.gmra.mxu0 %v7438_v42  ;;  %v7796_v51 = vpack.c.bf16 %v1251_v43, %v1247_v39  ;;  %v7806_v26 = vpack.c.bf16 %v1138_v45, %v1134_v17  ;;  %v10176_v43 = vld [vmem:[#allocation65_spill] sm:$0xff]  ;;  %v729_v19 = vadd.f32 %v10177_v36, %v6892_v38 }
 0x209   :  { %1991 = vmatmul.bf16.gmra.mxu1 %v7444_v18  ;;  %2455 = vmatpush.bf16.msra.mxu0 %v5818_v34  ;;  %v7818_v34 = vperm.slane %v1453_v10, 0  ;;  %v424_v45 = vadd.f32 %v7553_v2, %v6878_v30  ;;  %v426_v17 = vadd.f32 %v7570_v15, %v6878_v30  ;;  %v593_v18 = vadd.f32 %v7555_v57, %v6884_v31 }
 0x20a   :  { %10172 = vst [vmem:[#allocation61_spill] sm:$0xff] %v7796_v51  ;;  %2160 = vmatmul.bf16.gmra.mxu2 %v7713_v55  ;;  %v727_v55 = vadd.f32 %v10176_v43, %v6892_v38  ;;  %v1091_v20 = vmax.f32 %v729_v19, 0.0 }
 0x20b   :  { %v831_v48 = vpop.f32.mrf.mxu3  ;;  %10175 = vst [vmem:[#allocation115_spill] sm:$0xff] %v7806_v26  ;;  %v1141_v51 = vmax.f32 %v424_v45, 0.0 }
 0x20c   :  { %v832_v8 = vadd.f32 %v831_v48, %v6892_v38  ;;  %v1087_v14 = vmax.f32 %v727_v55, 0.0  ;;  %v595_v48 = vadd.f32 %v7574_v61, %v6884_v31 }
 0x20d   :  { %v7802_v53 = vpop.f32.mrf.mxu2  ;;  %v7804_v39 = vpop.f32.mrf.mxu0 }
 0x20e   :  { %10174 = vst [vmem:[#allocation114_spill] sm:$0xff] %v7802_v53  ;;  %v7808_v35 = vpop.f32.mrf.mxu1  ;;  %v1255_v55 = vmax.f32 %v832_v8, 0.0  ;;  %v1145_v53 = vmax.f32 %v426_v17, 0.0  ;;  %v7832_v15 = vpack.c.bf16 %v1091_v20, %v1087_v14  ;;  %v1146_v61 = vmax.f32 %v595_v48, 0.0  ;;  %v6537_v17 = vld [vmem:[%s9860_s2] sm:$0xf] }
 0x210   :  { %10179 = vst [vmem:[#allocation67_spill] sm:$0xff] %v7832_v15 }
 0x213   :  { %v833_v16 = vpop.f32.mrf.mxu3 }
 0x214   :  { %v834_v36 = vadd.f32 %v833_v16, %v6892_v38  ;;  %v1142_v16 = vmax.f32 %v593_v18, 0.0 }
 0x215   :  { %v7824_v43 = vpop.f32.mrf.mxu2  ;;  %v1788_v10 = vpop.f32.mrf.mxu0 }
 0x216   :  { %10178 = vst [vmem:[#allocation65_spill] sm:$0xff] %v7824_v43  ;;  %v1259_v19 = vmax.f32 %v834_v36, 0.0  ;;  %v1789_v42 = vadd.f32 %v1788_v10, %v7818_v34  ;;  %v1957_v2 = vpop.f32.mrf.mxu1  ;;  %v10180_v43 = vld [vmem:[#allocation22_spill] sm:$0xff]  ;;  %v7841_v36 = vpack.c.bf16 %v1145_v53, %v1141_v51  ;;  %v7845_v20 = vpack.c.bf16 %v1146_v61, %v1142_v16  ;;  %v10185_v10 = vld [vmem:[#allocation71_spill] sm:$0xff]  ;;  %v10186_v51 = vld [vmem:[#allocation73_spill] sm:$0xff] }
 0x217   :  { %v734_v53 = vadd.f32 %v10186_v51, %v6892_v38  ;;  %v429_v61 = vadd.f32 %v7592_v58, %v6878_v30 }
 0x218   :  { %v1958_v26 = vadd.f32 %v1957_v2, %v1789_v42  ;;  %5731 = vmatmul.msk.bf16.gmra.mxu3 %vm216_vm2, %v10180_v43  ;;  %1827 = vmatmul.bf16.gmra.mxu0 %v7488_v41  ;;  %v7837_v57 = vpack.c.bf16 %v1259_v19, %v1255_v55  ;;  %10182 = vst [vmem:[#allocation116_spill] sm:$0xff] %v7841_v36  ;;  %v7850_v43 = vperm.slane %v6537_v17, 3 }
 0x219   :  { %1996 = vmatmul.bf16.gmra.mxu1 %v7494_v0  ;;  %10184 = vst [vmem:[#allocation118_spill] sm:$0xff] %v7845_v20  ;;  %v732_v55 = vadd.f32 %v10185_v10, %v6892_v38  ;;  %v1099_v16 = vmax.f32 %v734_v53, 0.0  ;;  %v598_v10 = vadd.f32 %v7594_v37, %v6884_v31 }
 0x21a   :  { %10181 = vst [vmem:[#allocation22_spill] sm:$0xff] %v7837_v57  ;;  %2165 = vmatmul.bf16.gmra.mxu2 %v7752_v12  ;;  %v1149_v12 = vmax.f32 %v429_v61, 0.0  ;;  %v10188_v57 = vld [vmem:[#allocation25_spill] sm:$0xff] }
 0x21b   :  { %v845_v8 = vpop.f32.mrf.mxu3  ;;  %v1095_v2 = vmax.f32 %v732_v55, 0.0  ;;  %v1150_v37 = vmax.f32 %v598_v10, 0.0 }
 0x21c   :  { %v846_v19 = vadd.f32 %v845_v8, %v7850_v43 }
 0x21d   :  { %v2126_v45 = vpop.f32.mrf.mxu2  ;;  %v1790_v42 = vpop.f32.mrf.mxu0  ;;  %v7870_v0 = vpack.c.bf16 %v1099_v16, %v1095_v2 }
 0x21e   :  { %v7843_v14 = vadd.f32 %v2126_v45, %v1958_v26  ;;  %v1791_v18 = vadd.f32 %v1790_v42, %v7818_v34  ;;  %v1959_v48 = vpop.f32.mrf.mxu1  ;;  %v431_v45 = vadd.f32 %v7609_v24, %v6878_v30  ;;  %v1008_v55 = vmax.f32 %v846_v19, 0.0 }
 0x220   :  { %10183 = vst [vmem:[#allocation117_spill] sm:$0xff] %v7843_v14  ;;  %v1960_v26 = vadd.f32 %v1959_v48, %v1791_v18  ;;  %v600_v18 = vadd.f32 %v7613_v54, %v6884_v31  ;;  %v1153_v24 = vmax.f32 %v431_v45, 0.0 }
 0x222   :  { %v1154_v54 = vmax.f32 %v600_v18, 0.0  ;;  %v10193_v18 = vld [vmem:[#allocation79_spill] sm:$0xff] }
 0x223   :  { %v847_v17 = vpop.f32.mrf.mxu3 }
 0x224   :  { %v848_v42 = vadd.f32 %v847_v17, %v7850_v43  ;;  %v7883_v61 = vpack.c.bf16 %v1154_v54, %v1150_v37 }
 0x225   :  { %v2128_v14 = vpop.f32.mrf.mxu2  ;;  %v1793_v8 = vpop.f32.mrf.mxu0 }
 0x226   :  { %v7867_v48 = vadd.f32 %v2128_v14, %v1960_v26  ;;  %v1012_v51 = vmax.f32 %v848_v42, 0.0  ;;  %v1794_v58 = vadd.f32 %v1793_v8, %v7818_v34  ;;  %v1962_v53 = vpop.f32.mrf.mxu1  ;;  %v7879_v26 = vpack.c.bf16 %v1153_v24, %v1149_v12  ;;  %10191 = vst [vmem:[#allocation119_spill] sm:$0xff] %v7883_v61  ;;  %v10192_v42 = vld [vmem:[#allocation77_spill] sm:$0xff] }
 0x227   :  { %v737_v10 = vadd.f32 %v10192_v42, %v6892_v38  ;;  %v739_v8 = vadd.f32 %v10193_v18, %v6892_v38 }
 0x228   :  { %v7872_v17 = vpack.c.bf16 %v1012_v51, %v1008_v55  ;;  %v1963_v41 = vadd.f32 %v1962_v53, %v1794_v58  ;;  %5732 = vmatmul.msk.bf16.gmra.mxu3 %vm216_vm2, %v10188_v57  ;;  %1832 = vmatmul.bf16.gmra.mxu0 %v7527_v4  ;;  %10189 = vst [vmem:[#allocation73_spill] sm:$0xff] %v7879_v26 }
 0x229   :  { %2001 = vmatmul.bf16.gmra.mxu1 %v7533_v50  ;;  %v1103_v12 = vmax.f32 %v737_v10, 0.0  ;;  %v1107_v58 = vmax.f32 %v739_v8, 0.0  ;;  %v436_v53 = vadd.f32 %v7648_v27, %v6878_v30 }
 0x22a   :  { %10187 = vst [vmem:[#allocation71_spill] sm:$0xff] %v7872_v17  ;;  %2170 = vmatmul.bf16.gmra.mxu2 %v7791_v9 }
 0x22b   :  { %v850_v14 = vpop.f32.mrf.mxu3  ;;  %v1161_v27 = vmax.f32 %v436_v53, 0.0  ;;  %v7903_v8 = vpack.c.bf16 %v1107_v58, %v1103_v12 }
 0x22c   :  { %v851_v51 = vadd.f32 %v850_v14, %v7850_v43 }
 0x22d   :  { %v2131_v19 = vpop.f32.mrf.mxu2  ;;  %v1795_v16 = vpop.f32.mrf.mxu0  ;;  %10194 = vst [vmem:[#allocation77_spill] sm:$0xff] %v7903_v8 }
 0x22e   :  { %v7881_v2 = vadd.f32 %v2131_v19, %v1963_v41  ;;  %v1796_v45 = vadd.f32 %v1795_v16, %v7818_v34  ;;  %v1964_v57 = vpop.f32.mrf.mxu1  ;;  %v434_v41 = vadd.f32 %v7631_v63, %v6878_v30  ;;  %v603_v19 = vadd.f32 %v7633_v46, %v6884_v31 }
 0x22f   :  { %v605_v16 = vadd.f32 %v7652_v11, %v6884_v31 }
 0x230   :  { %10190 = vst [vmem:[#allocation25_spill] sm:$0xff] %v7881_v2  ;;  %v1965_v55 = vadd.f32 %v1964_v57, %v1796_v45  ;;  %v1016_v57 = vmax.f32 %v851_v51, 0.0  ;;  %v1157_v18 = vmax.f32 %v434_v41, 0.0  ;;  %v10195_v2 = vld [vmem:[#allocation28_spill] sm:$0xff]  ;;  %v1158_v11 = vmax.f32 %v603_v19, 0.0 }
 0x231   :  { %v5981_v51 = vld [vmem:[#allocation3 + $0x1c0] sm:$0xf] }
 0x232   :  { %v7912_v12 = vpack.c.bf16 %v1161_v27, %v1157_v18 }
 0x233   :  { %v852_v24 = vpop.f32.mrf.mxu3 }
 0x234   :  { %v853_v37 = vadd.f32 %v852_v24, %v7850_v43  ;;  %10197 = vst [vmem:[#allocation28_spill] sm:$0xff] %v7912_v12 }
 0x235   :  { %v2133_v54 = vpop.f32.mrf.mxu2  ;;  %v1798_v14 = vpop.f32.mrf.mxu0 }
 0x236   :  { %v7900_v45 = vadd.f32 %v2133_v54, %v1965_v55  ;;  %v1020_v42 = vmax.f32 %v853_v37, 0.0  ;;  %v1799_v63 = vadd.f32 %v1798_v14, %v7818_v34  ;;  %v1967_v10 = vpop.f32.mrf.mxu1  ;;  %v1162_v55 = vmax.f32 %v605_v16, 0.0  ;;  %v6236_v37 = vld [vmem:[#allocation3 + $0x1c4] sm:$0xf0] }
 0x237   :  { %v5982_v41 = vor.u32 %v6236_v37, %v5981_v51  ;;  %v608_v37 = vadd.f32 %v7672_v33, %v6884_v31 }
 0x238   :  { %v1968_v24 = vadd.f32 %v1967_v10, %v1799_v63  ;;  %5733 = vmatmul.msk.bf16.gmra.mxu3 %vm216_vm2, %v10195_v2  ;;  %1837 = vmatmul.bf16.gmra.mxu0 %v7566_v21  ;;  %v7908_v46 = vpack.c.bf16 %v1020_v42, %v1016_v57  ;;  %v7916_v14 = vpack.c.bf16 %v1162_v55, %v1158_v11  ;;  %v10200_v57 = vld [vmem:[#allocation83_spill] sm:$0xff] }
 0x239   :  { %2006 = vmatmul.bf16.gmra.mxu1 %v7572_v28  ;;  %2289 = vmatpush.bf16.msra.mxu3 %v5982_v41  ;;  %v742_v42 = vadd.f32 %v10200_v57, %v6892_v38  ;;  %v744_v63 = vadd.f32 %v7416_v22, %v6892_v38  ;;  %v441_v11 = vadd.f32 %v7687_v52, %v6878_v30  ;;  %v10202_v28 = vld [vmem:[#allocation30_spill] sm:$0xff] }
 0x23a   :  { %10196 = vst [vmem:[#allocation79_spill] sm:$0xff] %v7908_v46  ;;  %2175 = vmatmul.bf16.gmra.mxu2 %v7832_v15  ;;  %v610_v41 = vadd.f32 %v7691_v40, %v6884_v31 }
 0x23b   :  { %v855_v53 = vpop.f32.mrf.mxu3  ;;  %10199 = vst [vmem:[#allocation121_spill] sm:$0xff] %v7916_v14  ;;  %v1111_v27 = vmax.f32 %v742_v42, 0.0  ;;  %v1115_v51 = vmax.f32 %v744_v63, 0.0  ;;  %v1169_v52 = vmax.f32 %v441_v11, 0.0 }
 0x23c   :  { %v856_v18 = vadd.f32 %v855_v53, %v7850_v43  ;;  %v1170_v33 = vmax.f32 %v610_v41, 0.0 }
 0x23d   :  { %v2136_v58 = vpop.f32.mrf.mxu2  ;;  %v1800_v2 = vpop.f32.mrf.mxu0  ;;  %v7936_v63 = vpack.c.bf16 %v1115_v51, %v1111_v27  ;;  %v5871_v27 = vld [vmem:[#allocation3 + $0xe8] sm:$0xf0] }
 0x23e   :  { %v7914_v54 = vadd.f32 %v2136_v58, %v1968_v24  ;;  %v1801_v19 = vadd.f32 %v1800_v2, %v7818_v34  ;;  %v1969_v16 = vpop.f32.mrf.mxu1  ;;  %v439_v24 = vadd.f32 %v7670_v23, %v6878_v30 }
 0x23f   :  { %10201 = vst [vmem:[#allocation83_spill] sm:$0xff] %v7936_v63 }
 0x240   :  { %10198 = vst [vmem:[#allocation120_spill] sm:$0xff] %v7914_v54  ;;  %v1970_v10 = vadd.f32 %v1969_v16, %v1801_v19  ;;  %v1024_v19 = vmax.f32 %v856_v18, 0.0  ;;  %v1165_v42 = vmax.f32 %v439_v24, 0.0  ;;  %v1166_v54 = vmax.f32 %v608_v37, 0.0  ;;  %v5807_v18 = vld [vmem:[#allocation3 + $0x68] sm:$0xf0] }
 0x241   :  { %v6207_v24 = vld [vmem:[#allocation3 + $0xe4] sm:$0xf] }
 0x242   :  { %v7945_v37 = vpack.c.bf16 %v1169_v52, %v1165_v42 }
 0x243   :  { %v857_v55 = vpop.f32.mrf.mxu3 }
 0x244   :  { %v858_v22 = vadd.f32 %v857_v55, %v7850_v43  ;;  %v5874_v55 = vor.u32 %v6207_v24, %v5871_v27  ;;  %10204 = vst [vmem:[#allocation122_spill] sm:$0xff] %v7945_v37 }
 0x245   :  { %v2138_v58 = vpop.f32.mrf.mxu2  ;;  %v1803_v53 = vpop.f32.mrf.mxu0 }
 0x246   :  { %v7933_v2 = vadd.f32 %v2138_v58, %v1970_v10  ;;  %v1028_v16 = vmax.f32 %v858_v22, 0.0  ;;  %v1804_v23 = vadd.f32 %v1803_v53, %v7818_v34  ;;  %v1972_v57 = vpop.f32.mrf.mxu1  ;;  %v6191_v10 = vld [vmem:[#allocation3 + $0x64] sm:$0xf]  ;;  %2625 = vmatpush.bf16.msra.mxu1 %v5874_v55  ;;  %v7949_v58 = vpack.c.bf16 %v1170_v33, %v1166_v54 }
 0x247   :  { %v5810_v11 = vor.u32 %v6191_v10, %v5807_v18  ;;  %v446_v54 = vadd.f32 %v7726_v1, %v6878_v30 }
 0x248   :  { %v1973_v15 = vadd.f32 %v1972_v57, %v1804_v23  ;;  %5734 = vmatmul.msk.bf16.gmra.mxu3 %vm216_vm2, %v10202_v28  ;;  %1842 = vmatmul.bf16.gmra.mxu0 %v7605_v25  ;;  %v7941_v40 = vpack.c.bf16 %v1028_v16, %v1024_v19  ;;  %10205 = vst [vmem:[#allocation123_spill] sm:$0xff] %v7949_v58 }
 0x249   :  { %2011 = vmatmul.bf16.gmra.mxu1 %v7611_v5  ;;  %2456 = vmatpush.bf16.msra.mxu0 %v5810_v11  ;;  %v747_v16 = vadd.f32 %v7440_v60, %v6892_v38  ;;  %v749_v23 = vadd.f32 %v7464_v3, %v6892_v38  ;;  %v613_v60 = vadd.f32 %v7711_v49, %v6884_v31  ;;  %v1177_v1 = vmax.f32 %v446_v54, 0.0 }
 0x24a   :  { %10203 = vst [vmem:[#allocation30_spill] sm:$0xff] %v7941_v40  ;;  %2180 = vmatmul.bf16.gmra.mxu2 %v7870_v0  ;;  %v615_v3 = vadd.f32 %v7730_v56, %v6884_v31 }
 0x24b   :  { %v860_v51 = vpop.f32.mrf.mxu3  ;;  %v1119_v52 = vmax.f32 %v747_v16, 0.0  ;;  %v1123_v10 = vmax.f32 %v749_v23, 0.0  ;;  %v10207_v16 = vld [vmem:[#allocation34_spill] sm:$0xff]  ;;  %v1174_v56 = vmax.f32 %v613_v60, 0.0 }
 0x24c   :  { %v861_v42 = vadd.f32 %v860_v51, %v7850_v43  ;;  %v1178_v23 = vmax.f32 %v615_v3, 0.0  ;;  %v10214_v3 = vld [vmem:[#allocation96_spill] sm:$0xff] }
 0x24d   :  { %v2141_v41 = vpop.f32.mrf.mxu2  ;;  %v1805_v22 = vpop.f32.mrf.mxu0 }
 0x24e   :  { %v7947_v28 = vadd.f32 %v2141_v41, %v1973_v15  ;;  %v1806_v53 = vadd.f32 %v1805_v22, %v7818_v34  ;;  %v1974_v19 = vpop.f32.mrf.mxu1  ;;  %v444_v15 = vadd.f32 %v7709_v7, %v6878_v30  ;;  %v1032_v51 = vmax.f32 %v861_v42, 0.0 }
 0x24f   :  { %v7982_v54 = vpack.c.bf16 %v1178_v23, %v1174_v56 }
 0x250   :  { %v1975_v57 = vadd.f32 %v1974_v19, %v1806_v53  ;;  %v1173_v22 = vmax.f32 %v444_v15, 0.0  ;;  %v7969_v53 = vpack.c.bf16 %v1123_v10, %v1119_v52 }
 0x251   :  { %10212 = vst [vmem:[#allocation127_spill] sm:$0xff] %v7982_v54 }
 0x252   :  { %10206 = vst [vmem:[#allocation124_spill] sm:$0xff] %v7969_v53 }
 0x253   :  { %v862_v33 = vpop.f32.mrf.mxu3 }
 0x254   :  { %v863_v18 = vadd.f32 %v862_v33, %v7850_v43  ;;  %v7978_v33 = vpack.c.bf16 %v1177_v1, %v1173_v22  ;;  %v449_v1 = vadd.f32 %v7748_v47, %v6878_v30 }
 0x255   :  { %v2143_v24 = vpop.f32.mrf.mxu2  ;;  %v1808_v27 = vpop.f32.mrf.mxu0 }
 0x256   :  { %v7966_v11 = vadd.f32 %v2143_v24, %v1975_v57  ;;  %v1036_v55 = vmax.f32 %v863_v18, 0.0  ;;  %v1809_v7 = vadd.f32 %v1808_v27, %v7818_v34  ;;  %v1977_v41 = vpop.f32.mrf.mxu1  ;;  %v10209_v57 = vld [vmem:[#allocation104_spill] sm:$0xff]  ;;  %10210 = vst [vmem:[#allocation125_spill] sm:$0xff] %v7978_v33  ;;  %v10213_v27 = vld [vmem:[#allocation94_spill] sm:$0xff] }
 0x257   :  { %v752_v60 = vadd.f32 %v10213_v27, %v6892_v38 }
 0x258   :  { %v1978_v19 = vadd.f32 %v1977_v41, %v1809_v7  ;;  %5735 = vmatmul.msk.bf16.gmra.mxu3 %vm216_vm2, %v10207_v16  ;;  %1847 = vmatmul.bf16.gmra.mxu0 %v7644_v6  ;;  %v7974_v49 = vpack.c.bf16 %v1036_v55, %v1032_v51  ;;  %v754_v51 = vadd.f32 %v10214_v3, %v6892_v38 }
 0x259   :  { %2016 = vmatmul.bf16.gmra.mxu1 %v10209_v57  ;;  %v1127_v41 = vmax.f32 %v752_v60, 0.0 }
 0x25a   :  { %10208 = vst [vmem:[#allocation34_spill] sm:$0xff] %v7974_v49  ;;  %2185 = vmatmul.bf16.gmra.mxu2 %v7903_v8  ;;  %v1131_v22 = vmax.f32 %v754_v51, 0.0  ;;  %v1181_v51 = vmax.f32 %v449_v1, 0.0  ;;  %v10217_v8 = vld [vmem:[#allocation38_spill] sm:$0xff] }
 0x25b   :  { %v865_v42 = vpop.f32.mrf.mxu3 }
 0x25c   :  { %v866_v7 = vadd.f32 %v865_v42, %v7850_v43 }
 0x25d   :  { %v2146_v15 = vpop.f32.mrf.mxu2  ;;  %v1810_v10 = vpop.f32.mrf.mxu0 }
 0x25e   :  { %v7980_v52 = vadd.f32 %v2146_v15, %v1978_v19  ;;  %v1811_v18 = vadd.f32 %v1810_v10, %v7818_v34  ;;  %v1979_v24 = vpop.f32.mrf.mxu1  ;;  %v451_v19 = vadd.f32 %v7765_v62, %v6878_v30  ;;  %v10215_v15 = vld [vmem:[#allocation55_spill] sm:$0xff]  ;;  %v1040_v27 = vmax.f32 %v866_v7, 0.0 }
 0x25f   :  { %v618_v10 = vadd.f32 %v10215_v15, %v6884_v31  ;;  %v10218_v15 = vld [vmem:[#allocation14_spill] sm:$0xff] }
 0x260   :  { %10211 = vst [vmem:[#allocation126_spill] sm:$0xff] %v7980_v52  ;;  %v1980_v55 = vadd.f32 %v1979_v24, %v1811_v18  ;;  %v620_v18 = vadd.f32 %v7769_v59, %v6884_v31  ;;  %v1185_v62 = vmax.f32 %v451_v19, 0.0  ;;  %v8002_v52 = vpack.c.bf16 %v1131_v22, %v1127_v41 }
 0x261   :  { %v1182_v59 = vmax.f32 %v618_v10, 0.0 }
 0x262   :  { %10216 = vst [vmem:[#allocation94_spill] sm:$0xff] %v8002_v52 }
 0x263   :  { %v867_v16 = vpop.f32.mrf.mxu3 }
 0x264   :  { %v868_v56 = vadd.f32 %v867_v16, %v7850_v43 }
 0x265   :  { %v2148_v23 = vpop.f32.mrf.mxu2  ;;  %v1813_v42 = vpop.f32.mrf.mxu0 }
 0x266   :  { %v7999_v24 = vadd.f32 %v2148_v23, %v1980_v55  ;;  %v1044_v60 = vmax.f32 %v868_v56, 0.0  ;;  %v1814_v47 = vadd.f32 %v1813_v42, %v7818_v34  ;;  %v1982_v3 = vpop.f32.mrf.mxu1  ;;  %v1186_v55 = vmax.f32 %v620_v18, 0.0  ;;  %v10220_v23 = vld [vmem:[#allocation106_spill] sm:$0xff]  ;;  %v10225_v18 = vld [vmem:[#allocation32_spill] sm:$0xff] }
 0x267   :  { %v8011_v56 = vpack.c.bf16 %v1185_v62, %v1181_v51 }
 0x268   :  { %v1983_v16 = vadd.f32 %v1982_v3, %v1814_v47  ;;  %5736 = vmatmul.msk.bf16.gmra.mxu3 %vm216_vm2, %v10217_v8  ;;  %1852 = vmatmul.bf16.gmra.mxu0 %v10218_v15  ;;  %v8007_v57 = vpack.c.bf16 %v1044_v60, %v1040_v27  ;;  %v8015_v19 = vpack.c.bf16 %v1186_v55, %v1182_v59  ;;  %v10224_v27 = vld [vmem:[#allocation99_spill] sm:$0xff] }
 0x269   :  { %2021 = vmatmul.bf16.gmra.mxu1 %v10220_v23  ;;  %10221 = vst [vmem:[#allocation55_spill] sm:$0xff] %v8011_v56  ;;  %v757_v10 = vadd.f32 %v10224_v27, %v6892_v38  ;;  %v759_v60 = vadd.f32 %v10225_v18, %v6892_v38  ;;  %v456_v59 = vadd.f32 %v7804_v39, %v6878_v30 }
 0x26a   :  { %10219 = vst [vmem:[#allocation96_spill] sm:$0xff] %v8007_v57  ;;  %2190 = vmatmul.bf16.gmra.mxu2 %v7936_v63  ;;  %v623_v27 = vadd.f32 %v7789_v29, %v6884_v31  ;;  %v10227_v63 = vld [vmem:[#allocation42_spill] sm:$0xff]  ;;  %v10228_v29 = vld [vmem:[#allocation107_spill] sm:$0xff] }
 0x26b   :  { %v870_v7 = vpop.f32.mrf.mxu3  ;;  %10223 = vst [vmem:[#allocation14_spill] sm:$0xff] %v8015_v19  ;;  %v1135_v51 = vmax.f32 %v757_v10, 0.0  ;;  %v1139_v62 = vmax.f32 %v759_v60, 0.0 }
 0x26c   :  { %v871_v3 = vadd.f32 %v870_v7, %v7850_v43 }
 0x26d   :  { %v2151_v1 = vpop.f32.mrf.mxu2  ;;  %v1815_v22 = vpop.f32.mrf.mxu0  ;;  %v8035_v39 = vpack.c.bf16 %v1139_v62, %v1135_v51 }
 0x26e   :  { %v8013_v41 = vadd.f32 %v2151_v1, %v1983_v16  ;;  %v1816_v8 = vadd.f32 %v1815_v22, %v7818_v34  ;;  %v1984_v42 = vpop.f32.mrf.mxu1  ;;  %v454_v16 = vadd.f32 %v7787_v32, %v6878_v30  ;;  %v1048_v10 = vmax.f32 %v871_v3, 0.0  ;;  %v5973_v3 = vld [vmem:[#allocation3 + $0x1b0] sm:$0xf] }
 0x26f   :  { %v1193_v30 = vmax.f32 %v456_v59, 0.0  ;;  %10226 = vst [vmem:[#allocation99_spill] sm:$0xff] %v8035_v39 }
 0x270   :  { %10222 = vst [vmem:[#allocation38_spill] sm:$0xff] %v8013_v41  ;;  %v1985_v47 = vadd.f32 %v1984_v42, %v1816_v8  ;;  %v625_v8 = vadd.f32 %v7808_v35, %v6884_v31  ;;  %v1189_v41 = vmax.f32 %v454_v16, 0.0  ;;  %v1190_v31 = vmax.f32 %v623_v27, 0.0 }
 0x272   :  { %v1194_v35 = vmax.f32 %v625_v8, 0.0  ;;  %v8044_v51 = vpack.c.bf16 %v1193_v30, %v1189_v41 }
 0x273   :  { %v872_v55 = vpop.f32.mrf.mxu3 }
 0x274   :  { %v873_v1 = vadd.f32 %v872_v55, %v7850_v43  ;;  %10231 = vst [vmem:[#allocation42_spill] sm:$0xff] %v8044_v51 }
 0x275   :  { %v2153_v22 = vpop.f32.mrf.mxu2  ;;  %v1818_v7 = vpop.f32.mrf.mxu0 }
 0x276   :  { %v8032_v42 = vadd.f32 %v2153_v22, %v1985_v47  ;;  %v1052_v18 = vmax.f32 %v873_v1, 0.0  ;;  %v1819_v32 = vadd.f32 %v1818_v7, %v7818_v34  ;;  %v1987_v60 = vpop.f32.mrf.mxu1  ;;  %v10230_v47 = vld [vmem:[#allocation109_spill] sm:$0xff]  ;;  %v6234_v1 = vld [vmem:[#allocation3 + $0x1b4] sm:$0xf0]  ;;  %v8048_v7 = vpack.c.bf16 %v1194_v35, %v1190_v31 }
 0x277   :  { %v5974_v16 = vor.u32 %v6234_v1, %v5973_v3 }
 0x278   :  { %v1988_v55 = vadd.f32 %v1987_v60, %v1819_v32  ;;  %5737 = vmatmul.msk.bf16.gmra.mxu3 %vm216_vm2, %v10227_v63  ;;  %1857 = vmatmul.bf16.gmra.mxu0 %v10228_v29  ;;  %v8040_v23 = vpack.c.bf16 %v1052_v18, %v1048_v10  ;;  %10233 = vst [vmem:[#allocation128_spill] sm:$0xff] %v8048_v7  ;;  %v10234_v10 = vld [vmem:[#allocation100_spill] sm:$0xff] }
 0x279   :  { %2026 = vmatmul.bf16.gmra.mxu1 %v10230_v47  ;;  %2290 = vmatpush.bf16.msra.mxu3 %v5974_v16  ;;  %v762_v18 = vadd.f32 %v10234_v10, %v6892_v38  ;;  %v10235_v32 = vld [vmem:[#allocation36_spill] sm:$0xff] }
 0x27a   :  { %10229 = vst [vmem:[#allocation32_spill] sm:$0xff] %v8040_v23  ;;  %2195 = vmatmul.bf16.gmra.mxu2 %v7969_v53  ;;  %v764_v60 = vadd.f32 %v10235_v32, %v6892_v38 }
 0x27b   :  { %v875_v59 = vpop.f32.mrf.mxu3  ;;  %v1143_v30 = vmax.f32 %v762_v18, 0.0  ;;  %v6189_v18 = vld [vmem:[#allocation3 + $0x54] sm:$0xf] }
 0x27c   :  { %v876_v41 = vadd.f32 %v875_v59, %v7850_v43  ;;  %v1147_v1 = vmax.f32 %v764_v60, 0.0  ;;  %v5799_v60 = vld [vmem:[#allocation3 + $0x58] sm:$0xf0] }
 0x27d   :  { %v2156_v62 = vpop.f32.mrf.mxu2  ;;  %v1820_v63 = vpop.f32.mrf.mxu0 }
 0x27e   :  { %v8046_v22 = vadd.f32 %v2156_v62, %v1988_v55  ;;  %v1821_v27 = vadd.f32 %v1820_v63, %v7818_v34  ;;  %v1989_v8 = vpop.f32.mrf.mxu1  ;;  %v1056_v63 = vmax.f32 %v876_v41, 0.0  ;;  %v8060_v47 = vpack.c.bf16 %v1147_v1, %v1143_v30 }
 0x27f   :  { %v5802_v41 = vor.u32 %v6189_v18, %v5799_v60 }
 0x280   :  { %10232 = vst [vmem:[#allocation107_spill] sm:$0xff] %v8046_v22  ;;  %v1990_v3 = vadd.f32 %v1989_v8, %v1821_v27  ;;  %v10238_v27 = vld [vmem:[#allocation46_spill] sm:$0xff]  ;;  %v10240_v8 = vld [vmem:[#allocation113_spill] sm:$0xff] }
 0x281   :  { %10237 = vst [vmem:[#allocation36_spill] sm:$0xff] %v8060_v47  ;;  %2457 = vmatpush.bf16.msra.mxu0 %v5802_v41 }
 0x283   :  { %v877_v16 = vpop.f32.mrf.mxu3 }
 0x284   :  { %v878_v55 = vadd.f32 %v877_v16, %v7850_v43  ;;  %v5863_v16 = vld [vmem:[#allocation3 + $0xd8] sm:$0xf0] }
 0x285   :  { %v2158_v62 = vpop.f32.mrf.mxu2  ;;  %v1823_v35 = vpop.f32.mrf.mxu0 }
 0x286   :  { %v8057_v31 = vadd.f32 %v2158_v62, %v1990_v3  ;;  %v1060_v22 = vmax.f32 %v878_v55, 0.0  ;;  %v1824_v53 = vadd.f32 %v1823_v35, %v7818_v34  ;;  %v1992_v10 = vpop.f32.mrf.mxu1  ;;  %v6205_v3 = vld [vmem:[#allocation3 + $0xd4] sm:$0xf] }
 0x287   :  { %v5866_v30 = vor.u32 %v6205_v3, %v5863_v16 }
 0x288   :  { %10236 = vst [vmem:[#allocation100_spill] sm:$0xff] %v8057_v31  ;;  %v1993_v32 = vadd.f32 %v1992_v10, %v1824_v53  ;;  %5738 = vmatmul.msk.bf16.gmra.mxu3 %vm216_vm2, %v10238_v27  ;;  %1862 = vmatmul.bf16.gmra.mxu0 %v7761_v44  ;;  %v8065_v59 = vpack.c.bf16 %v1060_v22, %v1056_v63  ;;  %v10242_v63 = vld [vmem:[#allocation102_spill] sm:$0xff]  ;;  %v10243_v27 = vld [vmem:[#allocation40_spill] sm:$0xff] }
 0x289   :  { %2031 = vmatmul.bf16.gmra.mxu1 %v10240_v8  ;;  %v767_v10 = vadd.f32 %v10242_v63, %v6892_v38 }
 0x28a   :  { %10239 = vst [vmem:[#allocation46_spill] sm:$0xff] %v8065_v59  ;;  %2200 = vmatmul.bf16.gmra.mxu2 %v8002_v52  ;;  %2626 = vmatpush.bf16.msra.mxu1 %v5866_v30  ;;  %v769_v52 = vadd.f32 %v10243_v27, %v6892_v38 }
 0x28b   :  { %v880_v55 = vpop.f32.mrf.mxu3  ;;  %v1151_v60 = vmax.f32 %v767_v10, 0.0 }
 0x28c   :  { %v881_v18 = vadd.f32 %v880_v55, %v7850_v43  ;;  %v1155_v3 = vmax.f32 %v769_v52, 0.0  ;;  %v6225_v52 = vld [vmem:[#allocation3 + $0x174] sm:$0xf]  ;;  %v5943_v55 = vld [vmem:[#allocation3 + $0x178] sm:$0xf0] }
 0x28d   :  { %v2161_v1 = vpop.f32.mrf.mxu2  ;;  %v1825_v62 = vpop.f32.mrf.mxu0  ;;  %v5946_v10 = vor.u32 %v6225_v52, %v5943_v55 }
 0x28e   :  { %v8069_v53 = vadd.f32 %v2161_v1, %v1993_v32  ;;  %v1826_v22 = vadd.f32 %v1825_v62, %v7818_v34  ;;  %v1994_v35 = vpop.f32.mrf.mxu1  ;;  %v1064_v62 = vmax.f32 %v881_v18, 0.0  ;;  %v8081_v31 = vpack.c.bf16 %v1155_v3, %v1151_v60 }
 0x28f   :  { %2793 = vmatpush.bf16.msra.mxu2 %v5946_v10 }
 0x290   :  { %10241 = vst [vmem:[#allocation129_spill] sm:$0xff] %v8069_v53  ;;  %v1995_v8 = vadd.f32 %v1994_v35, %v1826_v22  ;;  %v10246_v22 = vld [vmem:[#allocation50_spill] sm:$0xff] }
 0x291   :  { %10245 = vst [vmem:[#allocation40_spill] sm:$0xff] %v8081_v31 }
 0x293   :  { %v882_v16 = vpop.f32.mrf.mxu3 }
 0x294   :  { %v883_v32 = vadd.f32 %v882_v16, %v7850_v43 }
 0x295   :  { %v2163_v41 = vpop.f32.mrf.mxu2  ;;  %v1828_v30 = vpop.f32.mrf.mxu0 }
 0x296   :  { %v8078_v1 = vadd.f32 %v2163_v41, %v1995_v8  ;;  %v1068_v53 = vmax.f32 %v883_v32, 0.0  ;;  %v1829_v44 = vadd.f32 %v1828_v30, %v7818_v34  ;;  %v1997_v63 = vpop.f32.mrf.mxu1  ;;  %v10248_v8 = vld [vmem:[#allocation115_spill] sm:$0xff] }
 0x297   :  { %v10250_v41 = vld [vmem:[#allocation103_spill] sm:$0xff] }
 0x298   :  { %10244 = vst [vmem:[#allocation102_spill] sm:$0xff] %v8078_v1  ;;  %v1998_v27 = vadd.f32 %v1997_v63, %v1829_v44  ;;  %5739 = vmatmul.msk.bf16.gmra.mxu3 %vm216_vm2, %v10246_v22  ;;  %1867 = vmatmul.bf16.gmra.mxu0 %v7800_v13  ;;  %v8086_v35 = vpack.c.bf16 %v1068_v53, %v1064_v62  ;;  %v10251_v53 = vld [vmem:[#allocation44_spill] sm:$0xff] }
 0x299   :  { %2036 = vmatmul.bf16.gmra.mxu1 %v10248_v8  ;;  %v772_v30 = vadd.f32 %v10250_v41, %v6892_v38  ;;  %v774_v62 = vadd.f32 %v10251_v53, %v6892_v38 }
 0x29a   :  { %10247 = vst [vmem:[#allocation50_spill] sm:$0xff] %v8086_v35  ;;  %2205 = vmatmul.bf16.gmra.mxu2 %v8035_v39 }
 0x29b   :  { %v885_v18 = vpop.f32.mrf.mxu3  ;;  %v1159_v39 = vmax.f32 %v772_v30, 0.0  ;;  %v1163_v52 = vmax.f32 %v774_v62, 0.0 }
 0x29c   :  { %v886_v22 = vadd.f32 %v885_v18, %v7850_v43 }
 0x29d   :  { %v2166_v16 = vpop.f32.mrf.mxu2  ;;  %v1830_v44 = vpop.f32.mrf.mxu0  ;;  %v8102_v1 = vpack.c.bf16 %v1163_v52, %v1159_v39  ;;  %v10257_v52 = vld [vmem:[#allocation48_spill] sm:$0xff] }
 0x29e   :  { %v8090_v60 = vadd.f32 %v2166_v16, %v1998_v27  ;;  %v1831_v3 = vadd.f32 %v1830_v44, %v7818_v34  ;;  %v1999_v32 = vpop.f32.mrf.mxu1  ;;  %v1072_v44 = vmax.f32 %v886_v22, 0.0 }
 0x29f   :  { %10252 = vst [vmem:[#allocation103_spill] sm:$0xff] %v8102_v1 }
 0x2a0   :  { %10249 = vst [vmem:[#allocation130_spill] sm:$0xff] %v8090_v60  ;;  %v2000_v63 = vadd.f32 %v1999_v32, %v1831_v3  ;;  %v10253_v3 = vld [vmem:[#allocation56_spill] sm:$0xff] }
 0x2a3   :  { %v887_v55 = vpop.f32.mrf.mxu3 }
 0x2a4   :  { %v888_v10 = vadd.f32 %v887_v55, %v7850_v43  ;;  %v779_v55 = vadd.f32 %v10257_v52, %v6892_v38 }
 0x2a5   :  { %v2168_v27 = vpop.f32.mrf.mxu2  ;;  %v1833_v60 = vpop.f32.mrf.mxu0 }
 0x2a6   :  { %v8099_v16 = vadd.f32 %v2168_v27, %v2000_v63  ;;  %v1076_v8 = vmax.f32 %v888_v10, 0.0  ;;  %v1834_v13 = vadd.f32 %v1833_v60, %v7818_v34  ;;  %v2002_v41 = vpop.f32.mrf.mxu1 }
 0x2a8   :  { %v2003_v53 = vadd.f32 %v2002_v41, %v1834_v13  ;;  %5740 = vmatmul.msk.bf16.gmra.mxu3 %vm216_vm2, %v10253_v3  ;;  %1872 = vmatmul.bf16.gmra.mxu0 %v7841_v36  ;;  %v8107_v18 = vpack.c.bf16 %v1076_v8, %v1072_v44  ;;  %v10256_v13 = vld [vmem:[#allocation105_spill] sm:$0xff]  ;;  %v1171_v44 = vmax.f32 %v779_v55, 0.0 }
 0x2a9   :  { %2041 = vmatmul.bf16.gmra.mxu1 %v7845_v20  ;;  %v777_v22 = vadd.f32 %v10256_v13, %v6892_v38 }
 0x2aa   :  { %10254 = vst [vmem:[#allocation44_spill] sm:$0xff] %v8107_v18  ;;  %2210 = vmatmul.bf16.gmra.mxu2 %v8060_v47 }
 0x2ab   :  { %v890_v32 = vpop.f32.mrf.mxu3  ;;  %v1167_v27 = vmax.f32 %v777_v22, 0.0  ;;  %v6232_v22 = vld [vmem:[#allocation3 + $0x1a4] sm:$0xf0] }
 0x2ac   :  { %v891_v10 = vadd.f32 %v890_v32, %v7850_v43 }
 0x2ad   :  { %v2171_v30 = vpop.f32.mrf.mxu2  ;;  %v1835_v60 = vpop.f32.mrf.mxu0  ;;  %v8123_v36 = vpack.c.bf16 %v1171_v44, %v1167_v27 }
 0x2ae   :  { %v8111_v62 = vadd.f32 %v2171_v30, %v2003_v53  ;;  %v1836_v39 = vadd.f32 %v1835_v60, %v7818_v34  ;;  %v2004_v63 = vpop.f32.mrf.mxu1  ;;  %v1080_v60 = vmax.f32 %v891_v10, 0.0 }
 0x2af   :  { %10258 = vst [vmem:[#allocation105_spill] sm:$0xff] %v8123_v36 }
 0x2b0   :  { %10255 = vst [vmem:[#allocation56_spill] sm:$0xff] %v8111_v62  ;;  %v2005_v8 = vadd.f32 %v2004_v63, %v1836_v39  ;;  %v10259_v39 = vld [vmem:[#allocation62_spill] sm:$0xff]  ;;  %v5965_v63 = vld [vmem:[#allocation3 + $0x1a0] sm:$0xf] }
 0x2b1   :  { %v5966_v55 = vor.u32 %v6232_v22, %v5965_v63 }
 0x2b3   :  { %v892_v41 = vpop.f32.mrf.mxu3  ;;  %2291 = vmatpush.bf16.msra.mxu3 %v5966_v55 }
 0x2b4   :  { %v893_v3 = vadd.f32 %v892_v41, %v7850_v43  ;;  %v10261_v41 = vld [vmem:[#allocation108_spill] sm:$0xff] }
 0x2b5   :  { %v2173_v53 = vpop.f32.mrf.mxu2  ;;  %v1838_v62 = vpop.f32.mrf.mxu0 }
 0x2b6   :  { %v8120_v30 = vadd.f32 %v2173_v53, %v2005_v8  ;;  %v1084_v47 = vmax.f32 %v893_v3, 0.0  ;;  %v1839_v20 = vadd.f32 %v1838_v62, %v7818_v34  ;;  %v2007_v13 = vpop.f32.mrf.mxu1  ;;  %v10262_v3 = vld [vmem:[#allocation53_spill] sm:$0xff] }
 0x2b7   :  { %v784_v53 = vadd.f32 %v10262_v3, %v6892_v38 }
 0x2b8   :  { %v2008_v52 = vadd.f32 %v2007_v13, %v1839_v20  ;;  %5741 = vmatmul.msk.bf16.gmra.mxu3 %vm216_vm2, %v10259_v39  ;;  %1877 = vmatmul.bf16.gmra.mxu0 %v7879_v26  ;;  %v8128_v32 = vpack.c.bf16 %v1084_v47, %v1080_v60  ;;  %v782_v47 = vadd.f32 %v10261_v41, %v6892_v38 }
 0x2b9   :  { %2046 = vmatmul.bf16.gmra.mxu1 %v7883_v61  ;;  %v1179_v63 = vmax.f32 %v784_v53, 0.0  ;;  %v6203_v53 = vld [vmem:[#allocation3 + $0xc4] sm:$0xf] }
 0x2ba   :  { %2215 = vmatmul.bf16.gmra.mxu2 %v8081_v31  ;;  %v1175_v39 = vmax.f32 %v782_v47, 0.0  ;;  %v5791_v47 = vld [vmem:[#allocation3 + $0x48] sm:$0xf0] }
 0x2bb   :  { %v895_v8 = vpop.f32.mrf.mxu3 }
 0x2bc   :  { %v896_v13 = vadd.f32 %v895_v8, %v7850_v43  ;;  %v8144_v26 = vpack.c.bf16 %v1179_v63, %v1175_v39 }
 0x2bd   :  { %v2176_v62 = vpop.f32.mrf.mxu2  ;;  %v1840_v20 = vpop.f32.mrf.mxu0 }
 0x2be   :  { %v8132_v10 = vadd.f32 %v2176_v62, %v2008_v52  ;;  %v1841_v27 = vadd.f32 %v1840_v20, %v7818_v34  ;;  %v2009_v44 = vpop.f32.mrf.mxu1  ;;  %v1088_v20 = vmax.f32 %v896_v13, 0.0  ;;  %10263 = vst [vmem:[#allocation62_spill] sm:$0xff] %v8144_v26 }
 0x2c0   :  { %10260 = vst [vmem:[#allocation48_spill] sm:$0xff] %v8132_v10  ;;  %v2010_v60 = vadd.f32 %v2009_v44, %v1841_v27  ;;  %v10264_v27 = vld [vmem:[#allocation68_spill] sm:$0xff]  ;;  %v6187_v44 = vld [vmem:[#allocation3 + $0x44] sm:$0xf] }
 0x2c3   :  { %v897_v22 = vpop.f32.mrf.mxu3 }
 0x2c4   :  { %v898_v55 = vadd.f32 %v897_v22, %v7850_v43 }
 0x2c5   :  { %v2178_v52 = vpop.f32.mrf.mxu2  ;;  %v1843_v10 = vpop.f32.mrf.mxu0 }
 0x2c6   :  { %v8141_v62 = vadd.f32 %v2178_v52, %v2010_v60  ;;  %v1092_v31 = vmax.f32 %v898_v55, 0.0  ;;  %v1844_v61 = vadd.f32 %v1843_v10, %v7818_v34  ;;  %v2012_v41 = vpop.f32.mrf.mxu1  ;;  %v5794_v60 = vor.u32 %v6187_v44, %v5791_v47  ;;  %v5855_v10 = vld [vmem:[#allocation3 + $0xc8] sm:$0xf0] }
 0x2c7   :  { %v5858_v39 = vor.u32 %v6203_v53, %v5855_v10  ;;  %v10266_v52 = vld [vmem:[#allocation112_spill] sm:$0xff] }
 0x2c8   :  { %v2013_v3 = vadd.f32 %v2012_v41, %v1844_v61  ;;  %5742 = vmatmul.msk.bf16.gmra.mxu3 %vm216_vm2, %v10264_v27  ;;  %1882 = vmatmul.bf16.gmra.mxu0 %v7912_v12  ;;  %v8149_v8 = vpack.c.bf16 %v1092_v31, %v1088_v20  ;;  %v787_v20 = vadd.f32 %v10266_v52, %v6892_v38  ;;  %v10267_v41 = vld [vmem:[#allocation59_spill] sm:$0xff] }
 0x2c9   :  { %2051 = vmatmul.bf16.gmra.mxu1 %v7916_v14  ;;  %2458 = vmatpush.bf16.msra.mxu0 %v5794_v60  ;;  %v789_v27 = vadd.f32 %v10267_v41, %v6892_v38 }
 0x2ca   :  { %2220 = vmatmul.bf16.gmra.mxu2 %v8102_v1  ;;  %2627 = vmatpush.bf16.msra.mxu1 %v5858_v39  ;;  %v1183_v47 = vmax.f32 %v787_v20, 0.0 }
 0x2cb   :  { %v900_v13 = vpop.f32.mrf.mxu3  ;;  %v1187_v53 = vmax.f32 %v789_v27, 0.0 }
 0x2cc   :  { %v901_v44 = vadd.f32 %v900_v13, %v7850_v43  ;;  %v6223_v13 = vld [vmem:[#allocation3 + $0x164] sm:$0xf] }
 0x2cd   :  { %v2181_v63 = vpop.f32.mrf.mxu2  ;;  %v1845_v22 = vpop.f32.mrf.mxu0  ;;  %v8165_v12 = vpack.c.bf16 %v1187_v53, %v1183_v47 }
 0x2ce   :  { %v8153_v61 = vadd.f32 %v2181_v63, %v2013_v3  ;;  %v1846_v31 = vadd.f32 %v1845_v22, %v7818_v34  ;;  %v2014_v55 = vpop.f32.mrf.mxu1  ;;  %v1096_v22 = vmax.f32 %v901_v44, 0.0 }
 0x2cf   :  { %10268 = vst [vmem:[#allocation53_spill] sm:$0xff] %v8165_v12 }
 0x2d0   :  { %10265 = vst [vmem:[#allocation108_spill] sm:$0xff] %v8153_v61  ;;  %v2015_v1 = vadd.f32 %v2014_v55, %v1846_v31  ;;  %v10269_v31 = vld [vmem:[#allocation74_spill] sm:$0xff]  ;;  %v5935_v55 = vld [vmem:[#allocation3 + $0x168] sm:$0xf0] }
 0x2d3   :  { %v902_v10 = vpop.f32.mrf.mxu3 }
 0x2d4   :  { %v903_v3 = vadd.f32 %v902_v10, %v7850_v43 }
 0x2d5   :  { %v2183_v60 = vpop.f32.mrf.mxu2  ;;  %v1848_v39 = vpop.f32.mrf.mxu0 }
 0x2d6   :  { %v8162_v63 = vadd.f32 %v2183_v60, %v2015_v1  ;;  %v1100_v61 = vmax.f32 %v903_v3, 0.0  ;;  %v1849_v14 = vadd.f32 %v1848_v39, %v7818_v34  ;;  %v2017_v52 = vpop.f32.mrf.mxu1  ;;  %v5938_v1 = vor.u32 %v6223_v13, %v5935_v55  ;;  %v10271_v3 = vld [vmem:[#allocation114_spill] sm:$0xff] }
 0x2d7   :  { %v792_v60 = vadd.f32 %v10271_v3, %v6892_v38 }
 0x2d8   :  { %v2018_v41 = vadd.f32 %v2017_v52, %v1849_v14  ;;  %5743 = vmatmul.msk.bf16.gmra.mxu3 %vm216_vm2, %v10269_v31  ;;  %1887 = vmatmul.bf16.gmra.mxu0 %v7945_v37  ;;  %v8170_v20 = vpack.c.bf16 %v1100_v61, %v1096_v22  ;;  %v10272_v61 = vld [vmem:[#allocation65_spill] sm:$0xff] }
 0x2d9   :  { %2056 = vmatmul.bf16.gmra.mxu1 %v7949_v58  ;;  %2794 = vmatpush.bf16.msra.mxu2 %v5938_v1  ;;  %v794_v39 = vadd.f32 %v10272_v61, %v6892_v38  ;;  %v1191_v31 = vmax.f32 %v792_v60, 0.0 }
 0x2da   :  { %2225 = vmatmul.bf16.gmra.mxu2 %v8123_v36 }
 0x2db   :  { %v905_v27 = vpop.f32.mrf.mxu3  ;;  %v1195_v13 = vmax.f32 %v794_v39, 0.0 }
 0x2dc   :  { %v906_v52 = vadd.f32 %v905_v27, %v7850_v43 }
 0x2dd   :  { %v2186_v44 = vpop.f32.mrf.mxu2  ;;  %v1850_v14 = vpop.f32.mrf.mxu0  ;;  %v8186_v37 = vpack.c.bf16 %v1195_v13, %v1191_v31 }
 0x2de   :  { %v8174_v47 = vadd.f32 %v2186_v44, %v2018_v41  ;;  %v1851_v53 = vadd.f32 %v1850_v14, %v7818_v34  ;;  %v2019_v10 = vpop.f32.mrf.mxu1  ;;  %v1104_v14 = vmax.f32 %v906_v52, 0.0 }
 0x2df   :  { %10274 = vst [vmem:[#allocation59_spill] sm:$0xff] %v8186_v37 }
 0x2e0   :  { %10270 = vst [vmem:[#allocation68_spill] sm:$0xff] %v8174_v47  ;;  %v2020_v22 = vadd.f32 %v2019_v10, %v1851_v53  ;;  %v10275_v53 = vld [vmem:[#allocation80_spill] sm:$0xff] }
 0x2e3   :  { %v907_v55 = vpop.f32.mrf.mxu3 }
 0x2e4   :  { %v908_v1 = vadd.f32 %v907_v55, %v7850_v43 }
 0x2e5   :  { %v2188_v41 = vpop.f32.mrf.mxu2  ;;  %v1853_v47 = vpop.f32.mrf.mxu0 }
 0x2e6   :  { %v8183_v44 = vadd.f32 %v2188_v41, %v2020_v22  ;;  %v1108_v36 = vmax.f32 %v908_v1, 0.0  ;;  %v1854_v58 = vadd.f32 %v1853_v47, %v7818_v34  ;;  %v2022_v3 = vpop.f32.mrf.mxu1 }
 0x2e8   :  { %10273 = vst [vmem:[#allocation112_spill] sm:$0xff] %v8183_v44  ;;  %v2023_v38 = vadd.f32 %v2022_v3, %v1854_v58  ;;  %5744 = vmatmul.msk.bf16.gmra.mxu3 %vm216_vm2, %v10275_v53  ;;  %1892 = vmatmul.bf16.gmra.mxu0 %v7978_v33  ;;  %v8191_v27 = vpack.c.bf16 %v1108_v36, %v1104_v14 }
 0x2e9   :  { %2061 = vmatmul.bf16.gmra.mxu1 %v7982_v54 }
 0x2ea   :  { %2230 = vmatmul.bf16.gmra.mxu2 %v8144_v26 }
 0x2eb   :  { %v910_v10 = vpop.f32.mrf.mxu3 }
 0x2ec   :  { %v911_v52 = vadd.f32 %v910_v10, %v7850_v43  ;;  %v5957_v10 = vld [vmem:[#allocation3 + $0x190] sm:$0xf] }
 0x2ed   :  { %v2191_v60 = vpop.f32.mrf.mxu2  ;;  %v1855_v47 = vpop.f32.mrf.mxu0 }
 0x2ee   :  { %v8195_v61 = vadd.f32 %v2191_v60, %v2023_v38  ;;  %v1856_v39 = vadd.f32 %v1855_v47, %v7818_v34  ;;  %v2024_v22 = vpop.f32.mrf.mxu1  ;;  %v1112_v41 = vmax.f32 %v911_v52, 0.0  ;;  %v10278_v60 = vld [vmem:[#allocation86_spill] sm:$0xff] }
 0x2f0   :  { %10276 = vst [vmem:[#allocation74_spill] sm:$0xff] %v8195_v61  ;;  %v2025_v58 = vadd.f32 %v2024_v22, %v1856_v39  ;;  %v6230_v39 = vld [vmem:[#allocation3 + $0x194] sm:$0xf0] }
 0x2f1   :  { %v5958_v22 = vor.u32 %v6230_v39, %v5957_v10 }
 0x2f3   :  { %v912_v31 = vpop.f32.mrf.mxu3  ;;  %2292 = vmatpush.bf16.msra.mxu3 %v5958_v22 }
 0x2f4   :  { %v913_v13 = vadd.f32 %v912_v31, %v7850_v43 }
 0x2f5   :  { %v2193_v36 = vpop.f32.mrf.mxu2  ;;  %v1858_v1 = vpop.f32.mrf.mxu0 }
 0x2f6   :  { %v8200_v55 = vadd.f32 %v2193_v36, %v2025_v58  ;;  %v1116_v14 = vmax.f32 %v913_v13, 0.0  ;;  %v1859_v3 = vadd.f32 %v1858_v1, %v7818_v34  ;;  %v2027_v38 = vpop.f32.mrf.mxu1 }
 0x2f8   :  { %10277 = vst [vmem:[#allocation114_spill] sm:$0xff] %v8200_v55  ;;  %v2028_v53 = vadd.f32 %v2027_v38, %v1859_v3  ;;  %5745 = vmatmul.msk.bf16.gmra.mxu3 %vm216_vm2, %v10278_v60  ;;  %1897 = vmatmul.bf16.gmra.mxu0 %v8011_v56  ;;  %v8206_v47 = vpack.c.bf16 %v1116_v14, %v1112_v41 }
 0x2f9   :  { %2066 = vmatmul.bf16.gmra.mxu1 %v8015_v19 }
 0x2fa   :  { %2235 = vmatmul.bf16.gmra.mxu2 %v8165_v12 }
 0x2fb   :  { %v915_v58 = vpop.f32.mrf.mxu3 }
 0x2fc   :  { %v916_v41 = vadd.f32 %v915_v58, %v7850_v43  ;;  %v6185_v58 = vld [vmem:[#allocation3 + $0x34] sm:$0xf] }
 0x2fd   :  { %v2196_v52 = vpop.f32.mrf.mxu2  ;;  %v1860_v13 = vpop.f32.mrf.mxu0 }
 0x2fe   :  { %v8210_v31 = vadd.f32 %v2196_v52, %v2028_v53  ;;  %v1861_v36 = vadd.f32 %v1860_v13, %v7818_v34  ;;  %v2029_v1 = vpop.f32.mrf.mxu1  ;;  %v1120_v10 = vmax.f32 %v916_v41, 0.0  ;;  %v5847_v41 = vld [vmem:[#allocation3 + $0xb8] sm:$0xf0] }
 0x300   :  { %10279 = vst [vmem:[#allocation65_spill] sm:$0xff] %v8210_v31  ;;  %v2030_v3 = vadd.f32 %v2029_v1, %v1861_v36  ;;  %v10281_v31 = vld [vmem:[#allocation90_spill] sm:$0xff]  ;;  %v6201_v1 = vld [vmem:[#allocation3 + $0xb4] sm:$0xf] }
 0x301   :  { %v5783_v36 = vld [vmem:[#allocation3 + $0x38] sm:$0xf0] }
 0x303   :  { %v917_v14 = vpop.f32.mrf.mxu3 }
 0x304   :  { %v918_v38 = vadd.f32 %v917_v14, %v7850_v43 }
 0x305   :  { %v2198_v60 = vpop.f32.mrf.mxu2  ;;  %v1863_v19 = vpop.f32.mrf.mxu0 }
 0x306   :  { %v8215_v12 = vadd.f32 %v2198_v60, %v2030_v3  ;;  %v1124_v39 = vmax.f32 %v918_v38, 0.0  ;;  %v1864_v22 = vadd.f32 %v1863_v19, %v7818_v34  ;;  %v2032_v53 = vpop.f32.mrf.mxu1  ;;  %v5786_v3 = vor.u32 %v6185_v58, %v5783_v36 }
 0x307   :  { %v5850_v19 = vor.u32 %v6201_v1, %v5847_v41 }
 0x308   :  { %10280 = vst [vmem:[#allocation80_spill] sm:$0xff] %v8215_v12  ;;  %v2033_v52 = vadd.f32 %v2032_v53, %v1864_v22  ;;  %5746 = vmatmul.msk.bf16.gmra.mxu3 %vm216_vm2, %v10281_v31  ;;  %1902 = vmatmul.bf16.gmra.mxu0 %v8044_v51  ;;  %v8221_v13 = vpack.c.bf16 %v1124_v39, %v1120_v10 }
 0x309   :  { %2071 = vmatmul.bf16.gmra.mxu1 %v8048_v7  ;;  %2459 = vmatpush.bf16.msra.mxu0 %v5786_v3 }
 0x30a   :  { %10282 = vst [vmem:[#allocation86_spill] sm:$0xff] %v8221_v13  ;;  %2240 = vmatmul.bf16.gmra.mxu2 %v8186_v37  ;;  %2628 = vmatpush.bf16.msra.mxu1 %v5850_v19  ;;  %v10285_v19 = vld [vmem:[#allocation7_spill] sm:$0xff] }
 0x30b   :  { %v920_v14 = vpop.f32.mrf.mxu3 }
 0x30c   :  { %v921_v53 = vadd.f32 %v920_v14, %v7850_v43  ;;  %v5927_v14 = vld [vmem:[#allocation3 + $0x158] sm:$0xf0] }
 0x30d   :  { %v2201_v38 = vpop.f32.mrf.mxu2  ;;  %v1865_v31 = vpop.f32.mrf.mxu0 }
 0x30e   :  { %v8225_v60 = vadd.f32 %v2201_v38, %v2033_v52  ;;  %v1866_v10 = vadd.f32 %v1865_v31, %v7818_v34  ;;  %v2034_v39 = vpop.f32.mrf.mxu1  ;;  %v1128_v1 = vmax.f32 %v921_v53, 0.0  ;;  %v10286_v31 = vld [vmem:[#allocation26_spill] sm:$0xff] }
 0x310   :  { %10283 = vst [vmem:[#allocation90_spill] sm:$0xff] %v8225_v60  ;;  %v2035_v22 = vadd.f32 %v2034_v39, %v1866_v10  ;;  %v6221_v10 = vld [vmem:[#allocation3 + $0x154] sm:$0xf] }
 0x313   :  { %v922_v37 = vpop.f32.mrf.mxu3 }
 0x314   :  { %v923_v7 = vadd.f32 %v922_v37, %v7850_v43  ;;  %v10288_v37 = vld [vmem:[#allocation57_spill] sm:$0xff] }
 0x315   :  { %v2203_v51 = vpop.f32.mrf.mxu2  ;;  %v1868_v36 = vpop.f32.mrf.mxu0 }
 0x316   :  { %v8230_v58 = vadd.f32 %v2203_v51, %v2035_v22  ;;  %v1132_v41 = vmax.f32 %v923_v7, 0.0  ;;  %v1869_v52 = vadd.f32 %v1868_v36, %v7818_v34  ;;  %v2037_v3 = vpop.f32.mrf.mxu1  ;;  %v10289_v51 = vld [vmem:[#allocation8_spill] sm:$0xff]  ;;  %v5930_v22 = vor.u32 %v6221_v10, %v5927_v14 }
 0x318   :  { %10284 = vst [vmem:[#allocation131_spill] sm:$0xff] %v8230_v58  ;;  %v2038_v38 = vadd.f32 %v2037_v3, %v1869_v52  ;;  %5747 = vmatmul.msk.bf16.gmra.mxu3 %vm216_vm2, %v10285_v19  ;;  %1907 = vmatmul.bf16.gmra.mxu0 %v10286_v31  ;;  %v8236_v39 = vpack.c.bf16 %v1132_v41, %v1128_v1 }
 0x319   :  { %2076 = vmatmul.bf16.gmra.mxu1 %v10288_v37  ;;  %2795 = vmatpush.bf16.msra.mxu2 %v5930_v22 }
 0x31a   :  { %10287 = vst [vmem:[#allocation7_spill] sm:$0xff] %v8236_v39  ;;  %2245 = vmatmul.bf16.gmra.mxu2 %v10289_v51 }
 0x31b   :  { %v925_v53 = vpop.f32.mrf.mxu3 }
 0x31c   :  { %v926_v31 = vadd.f32 %v925_v53, %v7850_v43  ;;  %v10295_v53 = vld [vmem:[#allocation63_spill] sm:$0xff] }
 0x31d   :  { %v2206_v7 = vpop.f32.mrf.mxu2  ;;  %v1870_v52 = vpop.f32.mrf.mxu0 }
 0x31e   :  { %v8240_v36 = vadd.f32 %v2206_v7, %v2038_v38  ;;  %v1871_v3 = vadd.f32 %v1870_v52, %v7818_v34  ;;  %v2039_v19 = vpop.f32.mrf.mxu1  ;;  %v1136_v10 = vmax.f32 %v926_v31, 0.0  ;;  %v10293_v52 = vld [vmem:[#allocation29_spill] sm:$0xff] }
 0x320   :  { %10290 = vst [vmem:[#allocation132_spill] sm:$0xff] %v8240_v36  ;;  %v2040_v58 = vadd.f32 %v2039_v19, %v1871_v3  ;;  %v10292_v36 = vld [vmem:[#allocation9_spill] sm:$0xff] }
 0x323   :  { %v927_v60 = vpop.f32.mrf.mxu3 }
 0x324   :  { %v928_v1 = vadd.f32 %v927_v60, %v7850_v43  ;;  %v10296_v60 = vld [vmem:[#allocation10_spill] sm:$0xff] }
 0x325   :  { %v2208_v41 = vpop.f32.mrf.mxu2  ;;  %v1873_v51 = vpop.f32.mrf.mxu0 }
 0x326   :  { %v8245_v37 = vadd.f32 %v2208_v41, %v2040_v58  ;;  %v1140_v14 = vmax.f32 %v928_v1, 0.0  ;;  %v1874_v22 = vadd.f32 %v1873_v51, %v7818_v34  ;;  %v2042_v38 = vpop.f32.mrf.mxu1 }
 0x328   :  { %10291 = vst [vmem:[#allocation133_spill] sm:$0xff] %v8245_v37  ;;  %v2043_v7 = vadd.f32 %v2042_v38, %v1874_v22  ;;  %5748 = vmatmul.msk.bf16.gmra.mxu3 %vm216_vm2, %v10292_v36  ;;  %1912 = vmatmul.bf16.gmra.mxu0 %v10293_v52  ;;  %v8251_v3 = vpack.c.bf16 %v1140_v14, %v1136_v10 }
 0x329   :  { %2081 = vmatmul.bf16.gmra.mxu1 %v10295_v53 }
 0x32a   :  { %10294 = vst [vmem:[#allocation9_spill] sm:$0xff] %v8251_v3  ;;  %2250 = vmatmul.bf16.gmra.mxu2 %v10296_v60 }
 0x32b   :  { %v930_v58 = vpop.f32.mrf.mxu3 }
 0x32c   :  { %v931_v38 = vadd.f32 %v930_v58, %v7850_v43  ;;  %v10302_v58 = vld [vmem:[#allocation69_spill] sm:$0xff] }
 0x32d   :  { %v2211_v19 = vpop.f32.mrf.mxu2  ;;  %v1875_v31 = vpop.f32.mrf.mxu0 }
 0x32e   :  { %v8255_v41 = vadd.f32 %v2211_v19, %v2043_v7  ;;  %v1876_v51 = vadd.f32 %v1875_v31, %v7818_v34  ;;  %v2044_v1 = vpop.f32.mrf.mxu1  ;;  %v1144_v37 = vmax.f32 %v931_v38, 0.0  ;;  %v10300_v31 = vld [vmem:[#allocation31_spill] sm:$0xff] }
 0x330   :  { %10297 = vst [vmem:[#allocation134_spill] sm:$0xff] %v8255_v41  ;;  %v2045_v22 = vadd.f32 %v2044_v1, %v1876_v51  ;;  %v10299_v41 = vld [vmem:[#allocation11_spill] sm:$0xff]  ;;  %v10303_v1 = vld [vmem:[#allocation12_spill] sm:$0xff] }
 0x333   :  { %v932_v36 = vpop.f32.mrf.mxu3 }
 0x334   :  { %v933_v52 = vadd.f32 %v932_v36, %v7850_v43  ;;  %v6228_v36 = vld [vmem:[#allocation3 + $0x184] sm:$0xf0] }
 0x335   :  { %v2213_v10 = vpop.f32.mrf.mxu2  ;;  %v1878_v53 = vpop.f32.mrf.mxu0 }
 0x336   :  { %v8260_v14 = vadd.f32 %v2213_v10, %v2045_v22  ;;  %v1148_v60 = vmax.f32 %v933_v52, 0.0  ;;  %v1879_v12 = vadd.f32 %v1878_v53, %v7818_v34  ;;  %v2047_v7 = vpop.f32.mrf.mxu1  ;;  %v5949_v22 = vld [vmem:[#allocation3 + $0x180] sm:$0xf] }
 0x337   :  { %v5950_v10 = vor.u32 %v6228_v36, %v5949_v22 }
 0x338   :  { %10298 = vst [vmem:[#allocation135_spill] sm:$0xff] %v8260_v14  ;;  %v2048_v19 = vadd.f32 %v2047_v7, %v1879_v12  ;;  %5749 = vmatmul.msk.bf16.gmra.mxu3 %vm216_vm2, %v10299_v41  ;;  %1917 = vmatmul.bf16.gmra.mxu0 %v10300_v31  ;;  %v8266_v51 = vpack.c.bf16 %v1148_v60, %v1144_v37 }
 0x339   :  { %2086 = vmatmul.bf16.gmra.mxu1 %v10302_v58  ;;  %2293 = vmatpush.bf16.msra.mxu3 %v5950_v10 }
 0x33a   :  { %10301 = vst [vmem:[#allocation11_spill] sm:$0xff] %v8266_v51  ;;  %2255 = vmatmul.bf16.gmra.mxu2 %v10303_v1 }
 0x33b   :  { %v935_v38 = vpop.f32.mrf.mxu3 }
 0x33c   :  { %v936_v37 = vadd.f32 %v935_v38, %v7850_v43  ;;  %v10309_v38 = vld [vmem:[#allocation75_spill] sm:$0xff] }
 0x33d   :  { %v2216_v52 = vpop.f32.mrf.mxu2  ;;  %v1880_v12 = vpop.f32.mrf.mxu0 }
 0x33e   :  { %v8270_v53 = vadd.f32 %v2216_v52, %v2048_v19  ;;  %v1881_v7 = vadd.f32 %v1880_v12, %v7818_v34  ;;  %v2049_v41 = vpop.f32.mrf.mxu1  ;;  %v1152_v22 = vmax.f32 %v936_v37, 0.0  ;;  %v10307_v12 = vld [vmem:[#allocation35_spill] sm:$0xff] }
 0x340   :  { %10304 = vst [vmem:[#allocation136_spill] sm:$0xff] %v8270_v53  ;;  %v2050_v14 = vadd.f32 %v2049_v41, %v1881_v7  ;;  %v10306_v53 = vld [vmem:[#allocation13_spill] sm:$0xff] }
 0x341   :  { %v10310_v41 = vld [vmem:[#allocation85_spill] sm:$0xff] }
 0x343   :  { %v937_v60 = vpop.f32.mrf.mxu3 }
 0x344   :  { %v938_v58 = vadd.f32 %v937_v60, %v7850_v43  ;;  %v6199_v60 = vld [vmem:[#allocation3 + $0xa4] sm:$0xf] }
 0x345   :  { %v2218_v31 = vpop.f32.mrf.mxu2  ;;  %v1883_v56 = vpop.f32.mrf.mxu0 }
 0x346   :  { %v8275_v1 = vadd.f32 %v2218_v31, %v2050_v14  ;;  %v1156_v36 = vmax.f32 %v938_v58, 0.0  ;;  %v1884_v10 = vadd.f32 %v1883_v56, %v7818_v34  ;;  %v2052_v19 = vpop.f32.mrf.mxu1  ;;  %v6183_v14 = vld [vmem:[#allocation3 + $0x24] sm:$0xf]  ;;  %v5775_v31 = vld [vmem:[#allocation3 + $0x28] sm:$0xf0] }
 0x347   :  { %v5778_v37 = vor.u32 %v6183_v14, %v5775_v31  ;;  %v5839_v58 = vld [vmem:[#allocation3 + $0xa8] sm:$0xf0] }
 0x348   :  { %10305 = vst [vmem:[#allocation137_spill] sm:$0xff] %v8275_v1  ;;  %v2053_v52 = vadd.f32 %v2052_v19, %v1884_v10  ;;  %5750 = vmatmul.msk.bf16.gmra.mxu3 %vm216_vm2, %v10306_v53  ;;  %1922 = vmatmul.bf16.gmra.mxu0 %v10307_v12  ;;  %v8281_v7 = vpack.c.bf16 %v1156_v36, %v1152_v22 }
 0x349   :  { %2091 = vmatmul.bf16.gmra.mxu1 %v10309_v38  ;;  %v5842_v56 = vor.u32 %v6199_v60, %v5839_v58  ;;  %2460 = vmatpush.bf16.msra.mxu0 %v5778_v37 }
 0x34a   :  { %10308 = vst [vmem:[#allocation13_spill] sm:$0xff] %v8281_v7  ;;  %2260 = vmatmul.bf16.gmra.mxu2 %v10310_v41 }
 0x34b   :  { %v940_v1 = vpop.f32.mrf.mxu3  ;;  %2629 = vmatpush.bf16.msra.mxu1 %v5842_v56  ;;  %v10313_v56 = vld [vmem:[#allocation15_spill] sm:$0xff] }
 0x34c   :  { %v941_v38 = vadd.f32 %v940_v1, %v7850_v43  ;;  %v5919_v1 = vld [vmem:[#allocation3 + $0x148] sm:$0xf0] }
 0x34d   :  { %v2221_v55 = vpop.f32.mrf.mxu2  ;;  %v1885_v53 = vpop.f32.mrf.mxu0 }
 0x34e   :  { %v8285_v10 = vadd.f32 %v2221_v55, %v2053_v52  ;;  %v1886_v22 = vadd.f32 %v1885_v53, %v7818_v34  ;;  %v2054_v36 = vpop.f32.mrf.mxu1  ;;  %v1160_v60 = vmax.f32 %v941_v38, 0.0  ;;  %v10314_v53 = vld [vmem:[#allocation39_spill] sm:$0xff] }
 0x350   :  { %10311 = vst [vmem:[#allocation138_spill] sm:$0xff] %v8285_v10  ;;  %v2055_v19 = vadd.f32 %v2054_v36, %v1886_v22  ;;  %v6219_v22 = vld [vmem:[#allocation3 + $0x144] sm:$0xf] }
 0x353   :  { %v942_v41 = vpop.f32.mrf.mxu3 }
 0x354   :  { %v943_v12 = vadd.f32 %v942_v41, %v7850_v43  ;;  %v10316_v41 = vld [vmem:[#allocation81_spill] sm:$0xff] }
 0x355   :  { %v2223_v61 = vpop.f32.mrf.mxu2  ;;  %v1888_v31 = vpop.f32.mrf.mxu0 }
 0x356   :  { %v8290_v14 = vadd.f32 %v2223_v61, %v2055_v19  ;;  %v1164_v58 = vmax.f32 %v943_v12, 0.0  ;;  %v1889_v55 = vadd.f32 %v1888_v31, %v7818_v34  ;;  %v2057_v52 = vpop.f32.mrf.mxu1  ;;  %v10317_v61 = vld [vmem:[#allocation16_spill] sm:$0xff]  ;;  %v5922_v19 = vor.u32 %v6219_v22, %v5919_v1 }
 0x358   :  { %10312 = vst [vmem:[#allocation139_spill] sm:$0xff] %v8290_v14  ;;  %v2058_v37 = vadd.f32 %v2057_v52, %v1889_v55  ;;  %5751 = vmatmul.msk.bf16.gmra.mxu3 %vm216_vm2, %v10313_v56  ;;  %1927 = vmatmul.bf16.gmra.mxu0 %v10314_v53  ;;  %v8296_v36 = vpack.c.bf16 %v1164_v58, %v1160_v60 }
 0x359   :  { %2096 = vmatmul.bf16.gmra.mxu1 %v10316_v41  ;;  %2796 = vmatpush.bf16.msra.mxu2 %v5922_v19 }
 0x35a   :  { %10315 = vst [vmem:[#allocation15_spill] sm:$0xff] %v8296_v36  ;;  %2265 = vmatmul.bf16.gmra.mxu2 %v10317_v61 }
 0x35b   :  { %v945_v38 = vpop.f32.mrf.mxu3 }
 0x35c   :  { %v946_v53 = vadd.f32 %v945_v38, %v7850_v43 }
 0x35d   :  { %v2226_v12 = vpop.f32.mrf.mxu2  ;;  %v1890_v55 = vpop.f32.mrf.mxu0 }
 0x35e   :  { %v8300_v31 = vadd.f32 %v2226_v12, %v2058_v37  ;;  %v1891_v52 = vadd.f32 %v1890_v55, %v7818_v34  ;;  %v2059_v56 = vpop.f32.mrf.mxu1  ;;  %v1168_v22 = vmax.f32 %v946_v53, 0.0  ;;  %v6217_v12 = vld [vmem:[#allocation3 + $0x134] sm:$0xf] }
 0x35f   :  { %v10320_v55 = vld [vmem:[#allocation17_spill] sm:$0xff] }
 0x360   :  { %10318 = vst [vmem:[#allocation140_spill] sm:$0xff] %v8300_v31  ;;  %v2060_v14 = vadd.f32 %v2059_v56, %v1891_v52  ;;  %v5911_v31 = vld [vmem:[#allocation3 + $0x138] sm:$0xf0]  ;;  %v10321_v52 = vld [vmem:[#allocation43_spill] sm:$0xff] }
 0x361   :  { %v5914_v38 = vor.u32 %v6217_v12, %v5911_v31  ;;  %v6181_v31 = vld [vmem:[#allocation3 + $0x14] sm:$0xf] }
 0x363   :  { %v947_v10 = vpop.f32.mrf.mxu3  ;;  %2797 = vmatpush.bf16.msra.mxu2 %v5914_v38  ;;  %v5895_v38 = vld [vmem:[#allocation3 + $0x118] sm:$0xf0] }
 0x364   :  { %v948_v60 = vadd.f32 %v947_v10, %v7850_v43  ;;  %v10323_v10 = vld [vmem:[#allocation87_spill] sm:$0xff] }
 0x365   :  { %v2228_v58 = vpop.f32.mrf.mxu2  ;;  %v1893_v61 = vpop.f32.mrf.mxu0 }
 0x366   :  { %v8305_v41 = vadd.f32 %v2228_v58, %v2060_v14  ;;  %v1172_v1 = vmax.f32 %v948_v60, 0.0  ;;  %v1894_v19 = vadd.f32 %v1893_v61, %v7818_v34  ;;  %v2062_v37 = vpop.f32.mrf.mxu1  ;;  %v10324_v14 = vld [vmem:[#allocation18_spill] sm:$0xff]  ;;  %v6215_v60 = vld [vmem:[#allocation3 + $0x124] sm:$0xf]  ;;  %v5903_v61 = vld [vmem:[#allocation3 + $0x128] sm:$0xf0] }
 0x368   :  { %10319 = vst [vmem:[#allocation141_spill] sm:$0xff] %v8305_v41  ;;  %v2063_v26 = vadd.f32 %v2062_v37, %v1894_v19  ;;  %5752 = vmatmul.msk.bf16.gmra.mxu3 %vm216_vm2, %v10320_v55  ;;  %1932 = vmatmul.bf16.gmra.mxu0 %v10321_v52  ;;  %v8311_v56 = vpack.c.bf16 %v1172_v1, %v1168_v22  ;;  %v5767_v22 = vld [vmem:[#allocation3 + $0x18] sm:$0xf0]  ;;  %v6197_v1 = vld [vmem:[#allocation3 + $0x94] sm:$0xf] }
 0x369   :  { %2101 = vmatmul.bf16.gmra.mxu1 %v10323_v10  ;;  %v5906_v41 = vor.u32 %v6215_v60, %v5903_v61  ;;  %v5770_v10 = vor.u32 %v6181_v31, %v5767_v22  ;;  %v5831_v52 = vld [vmem:[#allocation3 + $0x98] sm:$0xf0]  ;;  %v6179_v60 = vld [vmem:[#allocation3 + $0x4] sm:$0xf]  ;;  %v5759_v61 = vld [vmem:[#allocation3 + $0x8] sm:$0xf0] }
 0x36a   :  { %10322 = vst [vmem:[#allocation17_spill] sm:$0xff] %v8311_v56  ;;  %2270 = vmatmul.bf16.gmra.mxu2 %v10324_v14  ;;  %v6213_v14 = vld [vmem:[#allocation3 + $0x114] sm:$0xf]  ;;  %v5834_v33 = vor.u32 %v6197_v1, %v5831_v52  ;;  %v5887_v31 = vld [vmem:[#allocation3 + $0x108] sm:$0xf0] }
 0x36b   :  { %v950_v53 = vpop.f32.mrf.mxu3  ;;  %2798 = vmatpush.bf16.msra.mxu2 %v5906_v41  ;;  %v5898_v44 = vor.u32 %v6213_v14, %v5895_v38  ;;  %2461 = vmatpush.bf16.msra.mxu0 %v5770_v10 }
 0x36c   :  { %v951_v56 = vadd.f32 %v950_v53, %v7850_v43  ;;  %2630 = vmatpush.bf16.msra.mxu1 %v5834_v33 }
 0x36d   :  { %v2231_v58 = vpop.f32.mrf.mxu2  ;;  %v1895_v19 = vpop.f32.mrf.mxu0 }
 0x36e   :  { %v8315_v54 = vadd.f32 %v2231_v58, %v2063_v26  ;;  %v1896_v37 = vadd.f32 %v1895_v19, %v7818_v34  ;;  %v2064_v55 = vpop.f32.mrf.mxu1  ;;  %v6195_v58 = vld [vmem:[#allocation3 + $0x84] sm:$0xf]  ;;  %v1176_v53 = vmax.f32 %v951_v56, 0.0  ;;  %v6241_v56 = vld [vmem:[#allocation3 + $0x1f4] sm:$0xf] }
 0x36f   :  { %2799 = vmatpush.bf16.msra.mxu2 %v5898_v44 }
 0x370   :  { %10325 = vst [vmem:[#allocation142_spill] sm:$0xff] %v8315_v54  ;;  %v2065_v12 = vadd.f32 %v2064_v55, %v1896_v37  ;;  %v5762_v54 = vor.u32 %v6179_v60, %v5759_v61  ;;  %v5823_v37 = vld [vmem:[#allocation3 + $0x88] sm:$0xf0]  ;;  %v6211_v55 = vld [vmem:[#allocation3 + $0x104] sm:$0xf] }
 0x371   :  { %v5826_v14 = vor.u32 %v6195_v58, %v5823_v37  ;;  %v5890_v1 = vor.u32 %v6211_v55, %v5887_v31  ;;  %v10327_v60 = vld [vmem:[#allocation47_spill] sm:$0xff]  ;;  %v10330_v58 = vld [vmem:[#allocation61_spill] sm:$0xff] }
 0x372   :  { %2462 = vmatpush.bf16.msra.mxu0 %v5762_v54 }
 0x373   :  { %v952_v26 = vpop.f32.mrf.mxu3  ;;  %2631 = vmatpush.bf16.msra.mxu1 %v5826_v14  ;;  %2800 = vmatpush.bf16.msra.mxu2 %v5890_v1 }
 0x374   :  { %v953_v41 = vadd.f32 %v952_v26, %v7850_v43  ;;  %v10326_v26 = vld [vmem:[#allocation19_spill] sm:$0xff] }
 0x375   :  { %v2233_v19 = vpop.f32.mrf.mxu2  ;;  %v1898_v52 = vpop.f32.mrf.mxu0 }
 0x376   :  { %v8320_v22 = vadd.f32 %v2233_v19, %v2065_v12  ;;  %v1180_v10 = vmax.f32 %v953_v41, 0.0  ;;  %v1899_v33 = vadd.f32 %v1898_v52, %v7818_v34  ;;  %v2067_v44 = vpop.f32.mrf.mxu1  ;;  %v10329_v12 = vld [vmem:[#allocation92_spill] sm:$0xff]  ;;  %v6007_v41 = vld [vmem:[#allocation3 + $0x1f8] sm:$0xf0] }
 0x377   :  { %v6010_v19 = vor.u32 %v6241_v56, %v6007_v41 }
 0x378   :  { %v2068_v38 = vadd.f32 %v2067_v44, %v1899_v33  ;;  %5753 = vmatmul.msk.bf16.gmra.mxu3 %vm216_vm2, %v10326_v26  ;;  %1937 = vmatmul.bf16.gmra.mxu0 %v10327_v60  ;;  %v8326_v61 = vpack.c.bf16 %v1180_v10, %v1176_v53 }
 0x379   :  { %2106 = vmatmul.bf16.gmra.mxu1 %v10329_v12  ;;  %2962 = vmatpush.bf16.msrb.mxu3 %v6010_v19 }
 0x37a   :  { %10328 = vst [vmem:[#allocation19_spill] sm:$0xff] %v8326_v61  ;;  %2275 = vmatmul.bf16.gmra.mxu2 %v10330_v58 }
 0x37b   :  { %v955_v37 = vpop.f32.mrf.mxu3 }
 0x37c   :  { %v956_v53 = vadd.f32 %v955_v37, %v7850_v43  ;;  %v10336_v37 = vld [vmem:[#allocation98_spill] sm:$0xff] }
 0x37d   :  { %v2236_v55 = vpop.f32.mrf.mxu2  ;;  %v1900_v31 = vpop.f32.mrf.mxu0 }
 0x37e   :  { %v8330_v54 = vadd.f32 %v2236_v55, %v2068_v38  ;;  %v1901_v52 = vadd.f32 %v1900_v31, %v7818_v34  ;;  %v2069_v14 = vpop.f32.mrf.mxu1  ;;  %v1184_v56 = vmax.f32 %v956_v53, 0.0  ;;  %v10334_v31 = vld [vmem:[#allocation51_spill] sm:$0xff] }
 0x380   :  { %10331 = vst [vmem:[#allocation47_spill] sm:$0xff] %v8330_v54  ;;  %v2070_v1 = vadd.f32 %v2069_v14, %v1901_v52  ;;  %v10333_v54 = vld [vmem:[#allocation21_spill] sm:$0xff]  ;;  %v10337_v14 = vld [vmem:[#allocation22_spill] sm:$0xff] }
 0x383   :  { %v957_v10 = vpop.f32.mrf.mxu3 }
 0x384   :  { %v958_v33 = vadd.f32 %v957_v10, %v7850_v43 }
 0x385   :  { %v2238_v44 = vpop.f32.mrf.mxu2  ;;  %v1903_v58 = vpop.f32.mrf.mxu0 }
 0x386   :  { %v8335_v26 = vadd.f32 %v2238_v44, %v2070_v1  ;;  %v1188_v41 = vmax.f32 %v958_v33, 0.0  ;;  %v1904_v19 = vadd.f32 %v1903_v58, %v7818_v34  ;;  %v2072_v38 = vpop.f32.mrf.mxu1 }
 0x388   :  { %10332 = vst [vmem:[#allocation143_spill] sm:$0xff] %v8335_v26  ;;  %v2073_v55 = vadd.f32 %v2072_v38, %v1904_v19  ;;  %5754 = vmatmul.msk.bf16.gmra.mxu3 %vm216_vm2, %v10333_v54  ;;  %1942 = vmatmul.bf16.gmra.mxu0 %v10334_v31  ;;  %v8341_v52 = vpack.c.bf16 %v1188_v41, %v1184_v56 }
 0x389   :  { %2111 = vmatmul.bf16.gmra.mxu1 %v10336_v37 }
 0x38a   :  { %10335 = vst [vmem:[#allocation21_spill] sm:$0xff] %v8341_v52  ;;  %2280 = vmatmul.bf16.gmra.mxu2 %v10337_v14 }
 0x38b   :  { %v960_v1 = vpop.f32.mrf.mxu3 }
 0x38c   :  { %v961_v38 = vadd.f32 %v960_v1, %v7850_v43  ;;  %v10342_v1 = vld [vmem:[#allocation24_spill] sm:$0xff] }
 0x38d   :  { %v2241_v10 = vpop.f32.mrf.mxu2  ;;  %v1905_v53 = vpop.f32.mrf.mxu0 }
 0x38e   :  { %v8345_v44 = vadd.f32 %v2241_v10, %v2073_v55  ;;  %v1906_v58 = vadd.f32 %v1905_v53, %v7818_v34  ;;  %v2074_v33 = vpop.f32.mrf.mxu1  ;;  %v1192_v26 = vmax.f32 %v961_v38, 0.0  ;;  %v10340_v53 = vld [vmem:[#allocation23_spill] sm:$0xff] }
 0x390   :  { %10338 = vst [vmem:[#allocation144_spill] sm:$0xff] %v8345_v44  ;;  %v2075_v19 = vadd.f32 %v2074_v33, %v1906_v58  ;;  %v10343_v33 = vld [vmem:[#allocation27_spill] sm:$0xff] }
 0x393   :  { %v962_v54 = vpop.f32.mrf.mxu3 }
 0x394   :  { %v963_v31 = vadd.f32 %v962_v54, %v7850_v43 }
 0x395   :  { %v2243_v56 = vpop.f32.mrf.mxu2  ;;  %v1908_v37 = vpop.f32.mrf.mxu0 }
 0x396   :  { %v8350_v41 = vadd.f32 %v2243_v56, %v2075_v19  ;;  %v1196_v14 = vmax.f32 %v963_v31, 0.0  ;;  %v1909_v12 = vadd.f32 %v1908_v37, %v7818_v34  ;;  %v2077_v55 = vpop.f32.mrf.mxu1 }
 0x398   :  { %10339 = vst [vmem:[#allocation145_spill] sm:$0xff] %v8350_v41  ;;  %v2078_v10 = vadd.f32 %v2077_v55, %v1909_v12  ;;  %2294 = vmatmul.bf16.vlgmr.msra.gmra.mxu3 %v7872_v17  ;;  %2463 = vmatmul.bf16.vlgmr.msra.gmra.mxu0 %v10340_v53  ;;  %v8355_v58 = vpack.c.bf16 %v1196_v14, %v1192_v26 }
 0x399   :  { %2632 = vmatmul.bf16.vlgmr.msra.gmra.mxu1 %v10342_v1 }
 0x39a   :  { %10341 = vst [vmem:[#allocation23_spill] sm:$0xff] %v8355_v58  ;;  %2801 = vmatmul.bf16.vlgmr.msra.gmra.mxu2 %v10343_v33 }
 0x39b   :  { %v965_v54 = vpop.f32.mrf.mxu3 }
 0x39c   :  { %v966_v12 = vadd.f32 %v965_v54, %v7850_v43  ;;  %v10348_v54 = vld [vmem:[#allocation54_spill] sm:$0xff] }
 0x39d   :  { %v2246_v19 = vpop.f32.mrf.mxu2  ;;  %v1910_v38 = vpop.f32.mrf.mxu0 }
 0x39e   :  { %v8359_v56 = vadd.f32 %v2246_v19, %v2078_v10  ;;  %v1911_v31 = vadd.f32 %v1910_v38, %v7818_v34  ;;  %v2079_v37 = vpop.f32.mrf.mxu1  ;;  %v1200_v17 = vmax.f32 %v966_v12, 0.0  ;;  %v10346_v38 = vld [vmem:[#allocation52_spill] sm:$0xff] }
 0x3a0   :  { %10344 = vst [vmem:[#allocation24_spill] sm:$0xff] %v8359_v56  ;;  %v2080_v41 = vadd.f32 %v2079_v37, %v1911_v31  ;;  %v10349_v37 = vld [vmem:[#allocation91_spill] sm:$0xff] }
 0x3a3   :  { %v967_v55 = vpop.f32.mrf.mxu3 }
 0x3a4   :  { %v968_v53 = vadd.f32 %v967_v55, %v7850_v43 }
 0x3a5   :  { %v2248_v26 = vpop.f32.mrf.mxu2  ;;  %v1913_v1 = vpop.f32.mrf.mxu0 }
 0x3a6   :  { %v8364_v14 = vadd.f32 %v2248_v26, %v2080_v41  ;;  %v1204_v33 = vmax.f32 %v968_v53, 0.0  ;;  %v1914_v44 = vadd.f32 %v1913_v1, %v7818_v34  ;;  %v2082_v10 = vpop.f32.mrf.mxu1 }
 0x3a8   :  { %10345 = vst [vmem:[#allocation27_spill] sm:$0xff] %v8364_v14  ;;  %v2083_v19 = vadd.f32 %v2082_v10, %v1914_v44  ;;  %2299 = vmatmul.bf16.gmra.mxu3 %v7908_v46  ;;  %2468 = vmatmul.bf16.gmra.mxu0 %v10346_v38  ;;  %v8369_v31 = vpack.c.bf16 %v1204_v33, %v1200_v17 }
 0x3a9   :  { %2637 = vmatmul.bf16.gmra.mxu1 %v10348_v54 }
 0x3aa   :  { %10347 = vst [vmem:[#allocation52_spill] sm:$0xff] %v8369_v31  ;;  %2806 = vmatmul.bf16.gmra.mxu2 %v10349_v37 }
 0x3ab   :  { %v970_v55 = vpop.f32.mrf.mxu3 }
 0x3ac   :  { %v971_v44 = vadd.f32 %v970_v55, %v7850_v43  ;;  %v10354_v55 = vld [vmem:[#allocation60_spill] sm:$0xff] }
 0x3ad   :  { %v2251_v41 = vpop.f32.mrf.mxu2  ;;  %v1915_v12 = vpop.f32.mrf.mxu0 }
 0x3ae   :  { %v8373_v26 = vadd.f32 %v2251_v41, %v2083_v19  ;;  %v1916_v53 = vadd.f32 %v1915_v12, %v7818_v34  ;;  %v2084_v1 = vpop.f32.mrf.mxu1  ;;  %v1208_v46 = vmax.f32 %v971_v44, 0.0  ;;  %v10352_v12 = vld [vmem:[#allocation58_spill] sm:$0xff] }
 0x3b0   :  { %10350 = vst [vmem:[#allocation54_spill] sm:$0xff] %v8373_v26  ;;  %v2085_v14 = vadd.f32 %v2084_v1, %v1916_v53  ;;  %v10355_v1 = vld [vmem:[#allocation97_spill] sm:$0xff] }
 0x3b3   :  { %v972_v10 = vpop.f32.mrf.mxu3 }
 0x3b4   :  { %v973_v38 = vadd.f32 %v972_v10, %v7850_v43  ;;  %v6239_v10 = vld [vmem:[#allocation3 + $0x1e4] sm:$0xf] }
 0x3b5   :  { %v2253_v17 = vpop.f32.mrf.mxu2  ;;  %v1918_v54 = vpop.f32.mrf.mxu0 }
 0x3b6   :  { %v8378_v33 = vadd.f32 %v2253_v17, %v2085_v14  ;;  %v1212_v37 = vmax.f32 %v973_v38, 0.0  ;;  %v1919_v56 = vadd.f32 %v1918_v54, %v7818_v34  ;;  %v2087_v19 = vpop.f32.mrf.mxu1  ;;  %v5999_v14 = vld [vmem:[#allocation3 + $0x1e8] sm:$0xf0] }
 0x3b7   :  { %v6002_v17 = vor.u32 %v6239_v10, %v5999_v14 }
 0x3b8   :  { %10351 = vst [vmem:[#allocation91_spill] sm:$0xff] %v8378_v33  ;;  %v2088_v41 = vadd.f32 %v2087_v19, %v1919_v56  ;;  %2304 = vmatmul.bf16.gmra.mxu3 %v7941_v40  ;;  %2473 = vmatmul.bf16.gmra.mxu0 %v10352_v12  ;;  %v8383_v53 = vpack.c.bf16 %v1212_v37, %v1208_v46 }
 0x3b9   :  { %2642 = vmatmul.bf16.gmra.mxu1 %v10354_v55  ;;  %2963 = vmatpush.bf16.msrb.mxu3 %v6002_v17 }
 0x3ba   :  { %10353 = vst [vmem:[#allocation58_spill] sm:$0xff] %v8383_v53  ;;  %2811 = vmatmul.bf16.gmra.mxu2 %v10355_v1 }
 0x3bb   :  { %v975_v33 = vpop.f32.mrf.mxu3 }
 0x3bc   :  { %v976_v46 = vadd.f32 %v975_v33, %v7850_v43  ;;  %v10360_v33 = vld [vmem:[#allocation66_spill] sm:$0xff] }
 0x3bd   :  { %v2256_v44 = vpop.f32.mrf.mxu2  ;;  %v1920_v54 = vpop.f32.mrf.mxu0 }
 0x3be   :  { %v8387_v38 = vadd.f32 %v2256_v44, %v2088_v41  ;;  %v1921_v56 = vadd.f32 %v1920_v54, %v7818_v34  ;;  %v2089_v19 = vpop.f32.mrf.mxu1  ;;  %v1216_v10 = vmax.f32 %v976_v46, 0.0  ;;  %v10358_v54 = vld [vmem:[#allocation64_spill] sm:$0xff] }
 0x3c0   :  { %10356 = vst [vmem:[#allocation60_spill] sm:$0xff] %v8387_v38  ;;  %v2090_v40 = vadd.f32 %v2089_v19, %v1921_v56  ;;  %v10361_v19 = vld [vmem:[#allocation33_spill] sm:$0xff] }
 0x3c3   :  { %v977_v37 = vpop.f32.mrf.mxu3 }
 0x3c4   :  { %v978_v12 = vadd.f32 %v977_v37, %v7850_v43 }
 0x3c5   :  { %v2258_v55 = vpop.f32.mrf.mxu2  ;;  %v1923_v26 = vpop.f32.mrf.mxu0 }
 0x3c6   :  { %v8392_v1 = vadd.f32 %v2258_v55, %v2090_v40  ;;  %v1220_v14 = vmax.f32 %v978_v12, 0.0  ;;  %v1924_v17 = vadd.f32 %v1923_v26, %v7818_v34  ;;  %v2092_v41 = vpop.f32.mrf.mxu1 }
 0x3c8   :  { %10357 = vst [vmem:[#allocation97_spill] sm:$0xff] %v8392_v1  ;;  %v2093_v44 = vadd.f32 %v2092_v41, %v1924_v17  ;;  %2309 = vmatmul.bf16.gmra.mxu3 %v7974_v49  ;;  %2478 = vmatmul.bf16.gmra.mxu0 %v10358_v54  ;;  %v8397_v56 = vpack.c.bf16 %v1220_v14, %v1216_v10 }
 0x3c9   :  { %2647 = vmatmul.bf16.gmra.mxu1 %v10360_v33 }
 0x3ca   :  { %10359 = vst [vmem:[#allocation64_spill] sm:$0xff] %v8397_v56  ;;  %2816 = vmatmul.bf16.gmra.mxu2 %v10361_v19 }
 0x3cb   :  { %v980_v37 = vpop.f32.mrf.mxu3 }
 0x3cc   :  { %v981_v17 = vadd.f32 %v980_v37, %v7850_v43  ;;  %v10366_v37 = vld [vmem:[#allocation72_spill] sm:$0xff] }
 0x3cd   :  { %v2261_v40 = vpop.f32.mrf.mxu2  ;;  %v1925_v46 = vpop.f32.mrf.mxu0 }
 0x3ce   :  { %v8401_v55 = vadd.f32 %v2261_v40, %v2093_v44  ;;  %v1926_v12 = vadd.f32 %v1925_v46, %v7818_v34  ;;  %v2094_v26 = vpop.f32.mrf.mxu1  ;;  %v1224_v49 = vmax.f32 %v981_v17, 0.0  ;;  %v10364_v46 = vld [vmem:[#allocation70_spill] sm:$0xff] }
 0x3d0   :  { %10362 = vst [vmem:[#allocation66_spill] sm:$0xff] %v8401_v55  ;;  %v2095_v1 = vadd.f32 %v2094_v26, %v1926_v12  ;;  %v10367_v26 = vld [vmem:[#allocation37_spill] sm:$0xff] }
 0x3d3   :  { %v982_v41 = vpop.f32.mrf.mxu3 }
 0x3d4   :  { %v983_v54 = vadd.f32 %v982_v41, %v7850_v43 }
 0x3d5   :  { %v2263_v10 = vpop.f32.mrf.mxu2  ;;  %v1928_v33 = vpop.f32.mrf.mxu0 }
 0x3d6   :  { %v8406_v14 = vadd.f32 %v2263_v10, %v2095_v1  ;;  %v1228_v19 = vmax.f32 %v983_v54, 0.0  ;;  %v1929_v38 = vadd.f32 %v1928_v33, %v7818_v34  ;;  %v2097_v44 = vpop.f32.mrf.mxu1 }
 0x3d8   :  { %10363 = vst [vmem:[#allocation33_spill] sm:$0xff] %v8406_v14  ;;  %v2098_v40 = vadd.f32 %v2097_v44, %v1929_v38  ;;  %2314 = vmatmul.bf16.gmra.mxu3 %v8007_v57  ;;  %2483 = vmatmul.bf16.gmra.mxu0 %v10364_v46  ;;  %v8411_v12 = vpack.c.bf16 %v1228_v19, %v1224_v49 }
 0x3d9   :  { %2652 = vmatmul.bf16.gmra.mxu1 %v10366_v37 }
 0x3da   :  { %10365 = vst [vmem:[#allocation70_spill] sm:$0xff] %v8411_v12  ;;  %2821 = vmatmul.bf16.gmra.mxu2 %v10367_v26 }
 0x3db   :  { %v985_v41 = vpop.f32.mrf.mxu3 }
 0x3dc   :  { %v986_v38 = vadd.f32 %v985_v41, %v7850_v43  ;;  %v10372_v41 = vld [vmem:[#allocation78_spill] sm:$0xff] }
 0x3dd   :  { %v2266_v1 = vpop.f32.mrf.mxu2  ;;  %v1930_v17 = vpop.f32.mrf.mxu0 }
 0x3de   :  { %v8415_v10 = vadd.f32 %v2266_v1, %v2098_v40  ;;  %v1931_v54 = vadd.f32 %v1930_v17, %v7818_v34  ;;  %v2099_v33 = vpop.f32.mrf.mxu1  ;;  %v1232_v57 = vmax.f32 %v986_v38, 0.0  ;;  %v10370_v17 = vld [vmem:[#allocation76_spill] sm:$0xff] }
 0x3e0   :  { %10368 = vst [vmem:[#allocation72_spill] sm:$0xff] %v8415_v10  ;;  %v2100_v14 = vadd.f32 %v2099_v33, %v1931_v54  ;;  %v10373_v33 = vld [vmem:[#allocation41_spill] sm:$0xff] }
 0x3e3   :  { %v987_v44 = vpop.f32.mrf.mxu3 }
 0x3e4   :  { %v988_v46 = vadd.f32 %v987_v44, %v7850_v43 }
 0x3e5   :  { %v2268_v49 = vpop.f32.mrf.mxu2  ;;  %v1933_v37 = vpop.f32.mrf.mxu0 }
 0x3e6   :  { %v8420_v19 = vadd.f32 %v2268_v49, %v2100_v14  ;;  %v1236_v26 = vmax.f32 %v988_v46, 0.0  ;;  %v1934_v55 = vadd.f32 %v1933_v37, %v7818_v34  ;;  %v2102_v40 = vpop.f32.mrf.mxu1 }
 0x3e8   :  { %10369 = vst [vmem:[#allocation37_spill] sm:$0xff] %v8420_v19  ;;  %v2103_v1 = vadd.f32 %v2102_v40, %v1934_v55  ;;  %2319 = vmatmul.bf16.gmra.mxu3 %v8040_v23  ;;  %2488 = vmatmul.bf16.gmra.mxu0 %v10370_v17  ;;  %v8425_v54 = vpack.c.bf16 %v1236_v26, %v1232_v57 }
 0x3e9   :  { %2657 = vmatmul.bf16.gmra.mxu1 %v10372_v41 }
 0x3ea   :  { %10371 = vst [vmem:[#allocation76_spill] sm:$0xff] %v8425_v54  ;;  %2826 = vmatmul.bf16.gmra.mxu2 %v10373_v33 }
 0x3eb   :  { %v990_v44 = vpop.f32.mrf.mxu3 }
 0x3ec   :  { %v991_v55 = vadd.f32 %v990_v44, %v7850_v43  ;;  %v10378_v44 = vld [vmem:[#allocation84_spill] sm:$0xff] }
 0x3ed   :  { %v2271_v14 = vpop.f32.mrf.mxu2  ;;  %v1935_v38 = vpop.f32.mrf.mxu0 }
 0x3ee   :  { %v8429_v49 = vadd.f32 %v2271_v14, %v2103_v1  ;;  %v1936_v46 = vadd.f32 %v1935_v38, %v7818_v34  ;;  %v2104_v37 = vpop.f32.mrf.mxu1  ;;  %v1240_v23 = vmax.f32 %v991_v55, 0.0  ;;  %v10376_v38 = vld [vmem:[#allocation82_spill] sm:$0xff] }
 0x3f0   :  { %10374 = vst [vmem:[#allocation78_spill] sm:$0xff] %v8429_v49  ;;  %v2105_v19 = vadd.f32 %v2104_v37, %v1936_v46  ;;  %v10379_v37 = vld [vmem:[#allocation45_spill] sm:$0xff] }
 0x3f3   :  { %v992_v40 = vpop.f32.mrf.mxu3 }
 0x3f4   :  { %v993_v17 = vadd.f32 %v992_v40, %v7850_v43  ;;  %v6237_v40 = vld [vmem:[#allocation3 + $0x1d4] sm:$0xf] }
 0x3f5   :  { %v2273_v57 = vpop.f32.mrf.mxu2  ;;  %v1938_v41 = vpop.f32.mrf.mxu0 }
 0x3f6   :  { %v8434_v26 = vadd.f32 %v2273_v57, %v2105_v19  ;;  %v1244_v33 = vmax.f32 %v993_v17, 0.0  ;;  %v1939_v10 = vadd.f32 %v1938_v41, %v7818_v34  ;;  %v2107_v1 = vpop.f32.mrf.mxu1  ;;  %v5991_v19 = vld [vmem:[#allocation3 + $0x1d8] sm:$0xf0] }
 0x3f7   :  { %v5994_v57 = vor.u32 %v6237_v40, %v5991_v19 }
 0x3f8   :  { %10375 = vst [vmem:[#allocation41_spill] sm:$0xff] %v8434_v26  ;;  %v2108_v14 = vadd.f32 %v2107_v1, %v1939_v10  ;;  %2324 = vmatmul.bf16.gmra.mxu3 %v8065_v59  ;;  %2493 = vmatmul.bf16.gmra.mxu0 %v10376_v38  ;;  %v8439_v46 = vpack.c.bf16 %v1244_v33, %v1240_v23 }
 0x3f9   :  { %2662 = vmatmul.bf16.gmra.mxu1 %v10378_v44  ;;  %2964 = vmatpush.bf16.msrb.mxu3 %v5994_v57 }
 0x3fa   :  { %10377 = vst [vmem:[#allocation82_spill] sm:$0xff] %v8439_v46  ;;  %2831 = vmatmul.bf16.gmra.mxu2 %v10379_v37 }
 0x3fb   :  { %v995_v26 = vpop.f32.mrf.mxu3 }
 0x3fc   :  { %v996_v23 = vadd.f32 %v995_v26, %v7850_v43  ;;  %v10384_v26 = vld [vmem:[#allocation89_spill] sm:$0xff] }
 0x3fd   :  { %v2276_v55 = vpop.f32.mrf.mxu2  ;;  %v1940_v41 = vpop.f32.mrf.mxu0 }
 0x3fe   :  { %v8443_v17 = vadd.f32 %v2276_v55, %v2108_v14  ;;  %v1941_v10 = vadd.f32 %v1940_v41, %v7818_v34  ;;  %v2109_v1 = vpop.f32.mrf.mxu1  ;;  %v1248_v40 = vmax.f32 %v996_v23, 0.0  ;;  %v10382_v41 = vld [vmem:[#allocation88_spill] sm:$0xff] }
 0x400   :  { %10380 = vst [vmem:[#allocation84_spill] sm:$0xff] %v8443_v17  ;;  %v2110_v59 = vadd.f32 %v2109_v1, %v1941_v10  ;;  %v10385_v1 = vld [vmem:[#allocation49_spill] sm:$0xff] }
 0x403   :  { %v997_v33 = vpop.f32.mrf.mxu3 }
 0x404   :  { %v998_v38 = vadd.f32 %v997_v33, %v7850_v43 }
 0x405   :  { %v2278_v44 = vpop.f32.mrf.mxu2  ;;  %v1943_v49 = vpop.f32.mrf.mxu0 }
 0x406   :  { %v8448_v37 = vadd.f32 %v2278_v44, %v2110_v59  ;;  %v1252_v19 = vmax.f32 %v998_v38, 0.0  ;;  %v1944_v57 = vadd.f32 %v1943_v49, %v7818_v34  ;;  %v2112_v14 = vpop.f32.mrf.mxu1  ;;  %v6250_v59 = vld [vmem:[%s9863_s5 + $0x38] sm:$0xff] }
 0x407   :  { %v6258_v49 = vld [vmem:[%s9863_s5 + $0x78] sm:$0xff]  ;;  %3455 = vmatpush.bf16.msrb.mxu0 %v6250_v59 }
 0x408   :  { %10381 = vst [vmem:[#allocation45_spill] sm:$0xff] %v8448_v37  ;;  %v2113_v55 = vadd.f32 %v2112_v14, %v1944_v57  ;;  %2329 = vmatmul.bf16.gmra.mxu3 %v8086_v35  ;;  %2498 = vmatmul.bf16.gmra.mxu0 %v10382_v41  ;;  %v8453_v10 = vpack.c.bf16 %v1252_v19, %v1248_v40  ;;  %v6538_v41 = vld [vmem:[%s9862_s4] sm:$0x3]  ;;  %v10391_v37 = vld [vmem:[#allocation110_spill] sm:$0xff] }
 0x409   :  { %2667 = vmatmul.bf16.gmra.mxu1 %v10384_v26  ;;  %v8470_v26 = vperm.slane %v6538_v41, 1  ;;  %v10390_v41 = vld [vmem:[#allocation95_spill] sm:$0xff] }
 0x40a   :  { %10383 = vst [vmem:[#allocation88_spill] sm:$0xff] %v8453_v10  ;;  %2836 = vmatmul.bf16.gmra.mxu2 %v10385_v1  ;;  %3624 = vmatpush.bf16.msrb.mxu1 %v6258_v49 }
 0x40b   :  { %v1000_v23 = vpop.f32.mrf.mxu3 }
 0x40c   :  { %v1001_v14 = vadd.f32 %v1000_v23, %v7850_v43  ;;  %v10388_v23 = vld [vmem:[#allocation93_spill] sm:$0xff] }
 0x40d   :  { %v2281_v33 = vpop.f32.mrf.mxu2  ;;  %v1945_v44 = vpop.f32.mrf.mxu0 }
 0x40e   :  { %v8463_v38 = vadd.f32 %v2281_v33, %v2113_v55  ;;  %v1946_v40 = vadd.f32 %v1945_v44, %v7818_v34  ;;  %v2114_v19 = vpop.f32.mrf.mxu1  ;;  %v1256_v33 = vmax.f32 %v1001_v14, 0.0 }
 0x410   :  { %10386 = vst [vmem:[#allocation89_spill] sm:$0xff] %v8463_v38  ;;  %v2115_v57 = vadd.f32 %v2114_v19, %v1946_v40 }
 0x413   :  { %v1002_v1 = vpop.f32.mrf.mxu3 }
 0x414   :  { %v1003_v59 = vadd.f32 %v1002_v1, %v7850_v43 }
 0x415   :  { %v2283_v49 = vpop.f32.mrf.mxu2  ;;  %v2464_v55 = vpop.f32.mrf.mxu0 }
 0x416   :  { %v8473_v35 = vadd.f32 %v2283_v49, %v2115_v57  ;;  %v1260_v38 = vmax.f32 %v1003_v59, 0.0  ;;  %v2465_v34 = vadd.f32 %v2464_v55, %v8470_v26  ;;  %v2633_v44 = vpop.f32.mrf.mxu1  ;;  %v10392_v57 = vld [vmem:[#allocation117_spill] sm:$0xff] }
 0x418   :  { %10387 = vst [vmem:[#allocation49_spill] sm:$0xff] %v8473_v35  ;;  %v2634_v40 = vadd.f32 %v2633_v44, %v2465_v34  ;;  %2334 = vmatmul.bf16.gmra.mxu3 %v8107_v18  ;;  %2503 = vmatmul.bf16.gmra.mxu0 %v10388_v23  ;;  %v8478_v19 = vpack.c.bf16 %v1260_v38, %v1256_v33 }
 0x419   :  { %2672 = vmatmul.bf16.gmra.mxu1 %v10390_v41 }
 0x41a   :  { %10389 = vst [vmem:[#allocation93_spill] sm:$0xff] %v8478_v19  ;;  %2841 = vmatmul.bf16.gmra.mxu2 %v10391_v37 }
 0x41b   :  { %v2295_v43 = vpop.f32.mrf.mxu3 }
 0x41c   :  { %v2296_v1 = vadd.f32 %v2295_v43, %v10392_v57 }
 0x41d   :  { %v2802_v49 = vpop.f32.mrf.mxu2  ;;  %v2466_v59 = vpop.f32.mrf.mxu0 }
 0x41e   :  { %v8483_v14 = vadd.f32 %v2802_v49, %v2634_v40  ;;  %v2467_v55 = vadd.f32 %v2466_v59, %v8470_v26  ;;  %v2635_v34 = vpop.f32.mrf.mxu1  ;;  %v3131_v35 = vmax.f32 %v2296_v1, 0.0 }
 0x420   :  { %v2636_v44 = vadd.f32 %v2635_v34, %v2467_v55 }
 0x423   :  { %v2297_v18 = vpop.f32.mrf.mxu3 }
 0x424   :  { %v2298_v23 = vadd.f32 %v2297_v18, %v7867_v48  ;;  %v10393_v18 = vld [vmem:[#allocation25_spill] sm:$0xff] }
 0x425   :  { %v2804_v38 = vpop.f32.mrf.mxu2  ;;  %v2469_v41 = vpop.f32.mrf.mxu0 }
 0x426   :  { %v8487_v33 = vadd.f32 %v2804_v38, %v2636_v44  ;;  %v3133_v37 = vmax.f32 %v2298_v23, 0.0  ;;  %v2470_v17 = vadd.f32 %v2469_v41, %v8470_v26  ;;  %v2638_v43 = vpop.f32.mrf.mxu1 }
 0x428   :  { %v8490_v57 = vpack.c.bf16 %v3133_v37, %v3131_v35  ;;  %v2639_v40 = vadd.f32 %v2638_v43, %v2470_v17  ;;  %2339 = vmatmul.bf16.gmra.mxu3 %v8128_v32  ;;  %2508 = vmatmul.bf16.gmra.mxu0 %v7527_v4 }
 0x429   :  { %2677 = vmatmul.bf16.gmra.mxu1 %v7533_v50 }
 0x42a   :  { %2846 = vmatmul.bf16.gmra.mxu2 %v7791_v9 }
 0x42b   :  { %v2300_v48 = vpop.f32.mrf.mxu3 }
 0x42c   :  { %v2301_v49 = vadd.f32 %v2300_v48, %v10393_v18  ;;  %v10394_v18 = vld [vmem:[#allocation101_spill] sm:$0xff] }
 0x42d   :  { %v2807_v59 = vpop.f32.mrf.mxu2  ;;  %v2471_v55 = vpop.f32.mrf.mxu0 }
 0x42e   :  { %v8497_v1 = vadd.f32 %v2807_v59, %v2639_v40  ;;  %v2472_v34 = vadd.f32 %v2471_v55, %v8470_v26  ;;  %v2640_v35 = vpop.f32.mrf.mxu1  ;;  %v3135_v41 = vmax.f32 %v2301_v49, 0.0  ;;  %v10395_v59 = vld [vmem:[#allocation67_spill] sm:$0xff]  ;;  %v5983_v55 = vld [vmem:[#allocation3 + $0x1c8] sm:$0xf0] }
 0x42f   :  { %v10396_v49 = vld [vmem:[#allocation120_spill] sm:$0xff] }
 0x430   :  { %v2641_v44 = vadd.f32 %v2640_v35, %v2472_v34 }
 0x433   :  { %v2302_v17 = vpop.f32.mrf.mxu3 }
 0x434   :  { %v2303_v23 = vadd.f32 %v2302_v17, %v7900_v45  ;;  %v6235_v45 = vld [vmem:[#allocation3 + $0x1c4] sm:$0xf] }
 0x435   :  { %v2809_v38 = vpop.f32.mrf.mxu2  ;;  %v2474_v50 = vpop.f32.mrf.mxu0  ;;  %v5986_v34 = vor.u32 %v6235_v45, %v5983_v55 }
 0x436   :  { %v8501_v4 = vadd.f32 %v2809_v38, %v2641_v44  ;;  %v3137_v9 = vmax.f32 %v2303_v23, 0.0  ;;  %v2475_v37 = vadd.f32 %v2474_v50, %v8470_v26  ;;  %v2643_v43 = vpop.f32.mrf.mxu1 }
 0x437   :  { %2965 = vmatpush.bf16.msrb.mxu3 %v5986_v34 }
 0x438   :  { %v2644_v48 = vadd.f32 %v2643_v43, %v2475_v37  ;;  %2344 = vmatmul.bf16.gmra.mxu3 %v8149_v8  ;;  %2513 = vmatmul.bf16.gmra.mxu0 %v7566_v21  ;;  %v8506_v40 = vpack.c.bf16 %v3137_v9, %v3135_v41 }
 0x439   :  { %2682 = vmatmul.bf16.gmra.mxu1 %v10394_v18 }
 0x43a   :  { %2851 = vmatmul.bf16.gmra.mxu2 %v10395_v59 }
 0x43b   :  { %v2305_v35 = vpop.f32.mrf.mxu3 }
 0x43c   :  { %v2306_v44 = vadd.f32 %v2305_v35, %v10396_v49 }
 0x43d   :  { %v2812_v17 = vpop.f32.mrf.mxu2  ;;  %v2476_v38 = vpop.f32.mrf.mxu0 }
 0x43e   :  { %v8511_v23 = vadd.f32 %v2812_v17, %v2644_v48  ;;  %v2477_v50 = vadd.f32 %v2476_v38, %v8470_v26  ;;  %v2645_v21 = vpop.f32.mrf.mxu1  ;;  %v3139_v45 = vmax.f32 %v2306_v44, 0.0  ;;  %v6257_v44 = vld [vmem:[%s9863_s5 + $0x70] sm:$0xff] }
 0x43f   :  { %3625 = vmatpush.bf16.msrb.mxu1 %v6257_v44  ;;  %v10397_v44 = vld [vmem:[#allocation104_spill] sm:$0xff] }
 0x440   :  { %v2646_v41 = vadd.f32 %v2645_v21, %v2477_v50 }
 0x443   :  { %v2307_v9 = vpop.f32.mrf.mxu3 }
 0x444   :  { %v2308_v37 = vadd.f32 %v2307_v9, %v7933_v2  ;;  %v6249_v2 = vld [vmem:[%s9863_s5 + $0x30] sm:$0xff] }
 0x445   :  { %v2814_v43 = vpop.f32.mrf.mxu2  ;;  %v2479_v59 = vpop.f32.mrf.mxu0  ;;  %3456 = vmatpush.bf16.msrb.mxu0 %v6249_v2 }
 0x446   :  { %v8515_v18 = vadd.f32 %v2814_v43, %v2646_v41  ;;  %v3141_v55 = vmax.f32 %v2308_v37, 0.0  ;;  %v2480_v35 = vadd.f32 %v2479_v59, %v8470_v26  ;;  %v2648_v49 = vpop.f32.mrf.mxu1 }
 0x448   :  { %v2649_v34 = vadd.f32 %v2648_v49, %v2480_v35  ;;  %2349 = vmatmul.bf16.gmra.mxu3 %v8170_v20  ;;  %2518 = vmatmul.bf16.gmra.mxu0 %v7605_v25  ;;  %v8520_v48 = vpack.c.bf16 %v3141_v55, %v3139_v45 }
 0x449   :  { %2687 = vmatmul.bf16.gmra.mxu1 %v7611_v5 }
 0x44a   :  { %2856 = vmatmul.bf16.gmra.mxu2 %v7870_v0 }
 0x44b   :  { %v2310_v17 = vpop.f32.mrf.mxu3 }
 0x44c   :  { %v2311_v38 = vadd.f32 %v2310_v17, %v7947_v28  ;;  %v10398_v17 = vld [vmem:[#allocation77_spill] sm:$0xff] }
 0x44d   :  { %v2817_v25 = vpop.f32.mrf.mxu2  ;;  %v2481_v21 = vpop.f32.mrf.mxu0 }
 0x44e   :  { %v8531_v50 = vadd.f32 %v2817_v25, %v2649_v34  ;;  %v2482_v5 = vadd.f32 %v2481_v21, %v8470_v26  ;;  %v2650_v0 = vpop.f32.mrf.mxu1  ;;  %v3143_v55 = vmax.f32 %v2311_v38, 0.0  ;;  %v10399_v25 = vld [vmem:[#allocation126_spill] sm:$0xff] }
 0x450   :  { %v2651_v41 = vadd.f32 %v2650_v0, %v2482_v5 }
 0x453   :  { %v2312_v9 = vpop.f32.mrf.mxu3 }
 0x454   :  { %v2313_v37 = vadd.f32 %v2312_v9, %v7966_v11 }
 0x455   :  { %v2819_v43 = vpop.f32.mrf.mxu2  ;;  %v2484_v45 = vpop.f32.mrf.mxu0 }
 0x456   :  { %v8535_v59 = vadd.f32 %v2819_v43, %v2651_v41  ;;  %v3145_v35 = vmax.f32 %v2313_v37, 0.0  ;;  %v2485_v49 = vadd.f32 %v2484_v45, %v8470_v26  ;;  %v2653_v28 = vpop.f32.mrf.mxu1 }
 0x458   :  { %v2654_v2 = vadd.f32 %v2653_v28, %v2485_v49  ;;  %2354 = vmatmul.bf16.gmra.mxu3 %v8191_v27  ;;  %2523 = vmatmul.bf16.gmra.mxu0 %v7644_v6  ;;  %v8540_v34 = vpack.c.bf16 %v3145_v35, %v3143_v55 }
 0x459   :  { %2692 = vmatmul.bf16.gmra.mxu1 %v10397_v44 }
 0x45a   :  { %2861 = vmatmul.bf16.gmra.mxu2 %v10398_v17 }
 0x45b   :  { %v2315_v11 = vpop.f32.mrf.mxu3 }
 0x45c   :  { %v2316_v21 = vadd.f32 %v2315_v11, %v10399_v25  ;;  %v10400_v25 = vld [vmem:[#allocation106_spill] sm:$0xff] }
 0x45d   :  { %v2822_v5 = vpop.f32.mrf.mxu2  ;;  %v2486_v0 = vpop.f32.mrf.mxu0 }
 0x45e   :  { %v8545_v38 = vadd.f32 %v2822_v5, %v2654_v2  ;;  %v2487_v41 = vadd.f32 %v2486_v0, %v8470_v26  ;;  %v2655_v9 = vpop.f32.mrf.mxu1  ;;  %v3147_v49 = vmax.f32 %v2316_v21, 0.0  ;;  %v10401_v5 = vld [vmem:[#allocation83_spill] sm:$0xff]  ;;  %v10402_v0 = vld [vmem:[#allocation38_spill] sm:$0xff] }
 0x460   :  { %v2656_v37 = vadd.f32 %v2655_v9, %v2487_v41 }
 0x463   :  { %v2317_v43 = vpop.f32.mrf.mxu3 }
 0x464   :  { %v2318_v6 = vadd.f32 %v2317_v43, %v7999_v24 }
 0x465   :  { %v2824_v45 = vpop.f32.mrf.mxu2  ;;  %v2489_v35 = vpop.f32.mrf.mxu0 }
 0x466   :  { %v8549_v55 = vadd.f32 %v2824_v45, %v2656_v37  ;;  %v3149_v28 = vmax.f32 %v2318_v6, 0.0  ;;  %v2490_v44 = vadd.f32 %v2489_v35, %v8470_v26  ;;  %v2658_v17 = vpop.f32.mrf.mxu1 }
 0x468   :  { %v2659_v11 = vadd.f32 %v2658_v17, %v2490_v44  ;;  %2359 = vmatmul.bf16.gmra.mxu3 %v8206_v47  ;;  %2528 = vmatmul.bf16.gmra.mxu0 %v10218_v15  ;;  %v8554_v2 = vpack.c.bf16 %v3149_v28, %v3147_v49 }
 0x469   :  { %2697 = vmatmul.bf16.gmra.mxu1 %v10400_v25 }
 0x46a   :  { %2866 = vmatmul.bf16.gmra.mxu2 %v10401_v5 }
 0x46b   :  { %v2320_v24 = vpop.f32.mrf.mxu3 }
 0x46c   :  { %v2321_v41 = vadd.f32 %v2320_v24, %v10402_v0 }
 0x46d   :  { %v2827_v9 = vpop.f32.mrf.mxu2  ;;  %v2491_v37 = vpop.f32.mrf.mxu0 }
 0x46e   :  { %v8559_v21 = vadd.f32 %v2827_v9, %v2659_v11  ;;  %v2492_v43 = vadd.f32 %v2491_v37, %v8470_v26  ;;  %v2660_v6 = vpop.f32.mrf.mxu1  ;;  %v3151_v17 = vmax.f32 %v2321_v41, 0.0  ;;  %v10404_v9 = vld [vmem:[#allocation109_spill] sm:$0xff]  ;;  %v10405_v37 = vld [vmem:[#allocation124_spill] sm:$0xff]  ;;  %v10406_v41 = vld [vmem:[#allocation107_spill] sm:$0xff] }
 0x470   :  { %v2661_v45 = vadd.f32 %v2660_v6, %v2492_v43  ;;  %v5975_v43 = vld [vmem:[#allocation3 + $0x1b8] sm:$0xf0] }
 0x473   :  { %v2322_v35 = vpop.f32.mrf.mxu3 }
 0x474   :  { %v2323_v15 = vadd.f32 %v2322_v35, %v8032_v42  ;;  %v6233_v42 = vld [vmem:[#allocation3 + $0x1b4] sm:$0xf] }
 0x475   :  { %v2829_v49 = vpop.f32.mrf.mxu2  ;;  %v2494_v44 = vpop.f32.mrf.mxu0  ;;  %v5978_v6 = vor.u32 %v6233_v42, %v5975_v43 }
 0x476   :  { %v8563_v28 = vadd.f32 %v2829_v49, %v2661_v45  ;;  %v3153_v25 = vmax.f32 %v2323_v15, 0.0  ;;  %v2495_v5 = vadd.f32 %v2494_v44, %v8470_v26  ;;  %v2663_v24 = vpop.f32.mrf.mxu1 }
 0x477   :  { %2966 = vmatpush.bf16.msrb.mxu3 %v5978_v6 }
 0x478   :  { %10403 = vst [vmem:[#allocation95_spill] sm:$0xff] %v8563_v28  ;;  %v2664_v0 = vadd.f32 %v2663_v24, %v2495_v5  ;;  %2364 = vmatmul.bf16.gmra.mxu3 %v8221_v13  ;;  %2533 = vmatmul.bf16.gmra.mxu0 %v10228_v29  ;;  %v8568_v11 = vpack.c.bf16 %v3153_v25, %v3151_v17  ;;  %v10408_v24 = vld [vmem:[#allocation100_spill] sm:$0xff] }
 0x479   :  { %2702 = vmatmul.bf16.gmra.mxu1 %v10404_v9 }
 0x47a   :  { %2871 = vmatmul.bf16.gmra.mxu2 %v10405_v37 }
 0x47b   :  { %v2325_v45 = vpop.f32.mrf.mxu3 }
 0x47c   :  { %v2326_v35 = vadd.f32 %v2325_v45, %v10406_v41 }
 0x47d   :  { %v2832_v15 = vpop.f32.mrf.mxu2  ;;  %v2496_v44 = vpop.f32.mrf.mxu0 }
 0x47e   :  { %v8573_v49 = vadd.f32 %v2832_v15, %v2664_v0  ;;  %v2497_v5 = vadd.f32 %v2496_v44, %v8470_v26  ;;  %v2665_v29 = vpop.f32.mrf.mxu1  ;;  %v3155_v42 = vmax.f32 %v2326_v35, 0.0  ;;  %v10410_v0 = vld [vmem:[#allocation111_spill] sm:$0xff]  ;;  %v10411_v44 = vld [vmem:[#allocation113_spill] sm:$0xff] }
 0x480   :  { %10407 = vst [vmem:[#allocation110_spill] sm:$0xff] %v8573_v49  ;;  %v2666_v17 = vadd.f32 %v2665_v29, %v2497_v5  ;;  %v10412_v5 = vld [vmem:[#allocation94_spill] sm:$0xff]  ;;  %v10413_v29 = vld [vmem:[#allocation129_spill] sm:$0xff] }
 0x483   :  { %v2327_v25 = vpop.f32.mrf.mxu3 }
 0x484   :  { %v2328_v9 = vadd.f32 %v2327_v25, %v10408_v24 }
 0x485   :  { %v2834_v13 = vpop.f32.mrf.mxu2  ;;  %v2499_v28 = vpop.f32.mrf.mxu0 }
 0x486   :  { %v8577_v37 = vadd.f32 %v2834_v13, %v2666_v17  ;;  %v3157_v43 = vmax.f32 %v2328_v9, 0.0  ;;  %v2500_v45 = vadd.f32 %v2499_v28, %v8470_v26  ;;  %v2668_v41 = vpop.f32.mrf.mxu1  ;;  %v6248_v13 = vld [vmem:[%s9863_s5 + $0x28] sm:$0xff] }
 0x487   :  { %v6256_v28 = vld [vmem:[%s9863_s5 + $0x68] sm:$0xff]  ;;  %3457 = vmatpush.bf16.msrb.mxu0 %v6248_v13 }
 0x488   :  { %10409 = vst [vmem:[#allocation117_spill] sm:$0xff] %v8577_v37  ;;  %v2669_v6 = vadd.f32 %v2668_v41, %v2500_v45  ;;  %2369 = vmatmul.bf16.gmra.mxu3 %v8236_v39  ;;  %2538 = vmatmul.bf16.gmra.mxu0 %v10410_v0  ;;  %v8582_v15 = vpack.c.bf16 %v3157_v43, %v3155_v42  ;;  %v10414_v0 = vld [vmem:[#allocation102_spill] sm:$0xff] }
 0x489   :  { %2707 = vmatmul.bf16.gmra.mxu1 %v10411_v44 }
 0x48a   :  { %2876 = vmatmul.bf16.gmra.mxu2 %v10412_v5  ;;  %3626 = vmatpush.bf16.msrb.mxu1 %v6256_v28 }
 0x48b   :  { %v2330_v35 = vpop.f32.mrf.mxu3 }
 0x48c   :  { %v2331_v17 = vadd.f32 %v2330_v35, %v10413_v29 }
 0x48d   :  { %v2837_v25 = vpop.f32.mrf.mxu2  ;;  %v2501_v9 = vpop.f32.mrf.mxu0 }
 0x48e   :  { %v8593_v24 = vadd.f32 %v2837_v25, %v2669_v6  ;;  %v2502_v42 = vadd.f32 %v2501_v9, %v8470_v26  ;;  %v2670_v43 = vpop.f32.mrf.mxu1  ;;  %v3159_v49 = vmax.f32 %v2331_v17, 0.0  ;;  %v10416_v6 = vld [vmem:[#allocation20_spill] sm:$0xff]  ;;  %v6266_v25 = vld [vmem:[%s9865_s7 + $0x38] sm:$0xff] }
 0x48f   :  { %3955 = vmatpush.bf16.msrb.mxu2 %v6266_v25 }
 0x490   :  { %v2671_v45 = vadd.f32 %v2670_v43, %v2502_v42  ;;  %v10417_v42 = vld [vmem:[#allocation115_spill] sm:$0xff] }
 0x491   :  { %v10418_v43 = vld [vmem:[#allocation99_spill] sm:$0xff] }
 0x493   :  { %v2332_v41 = vpop.f32.mrf.mxu3 }
 0x494   :  { %v2333_v44 = vadd.f32 %v2332_v41, %v10414_v0 }
 0x495   :  { %v2839_v5 = vpop.f32.mrf.mxu2  ;;  %v2504_v37 = vpop.f32.mrf.mxu0 }
 0x496   :  { %v8597_v39 = vadd.f32 %v2839_v5, %v2671_v45  ;;  %v3161_v13 = vmax.f32 %v2333_v44, 0.0  ;;  %v2505_v28 = vadd.f32 %v2504_v37, %v8470_v26  ;;  %v2673_v35 = vpop.f32.mrf.mxu1  ;;  %v10419_v45 = vld [vmem:[#allocation130_spill] sm:$0xff] }
 0x498   :  { %10415 = vst [vmem:[#allocation25_spill] sm:$0xff] %v8597_v39  ;;  %v2674_v29 = vadd.f32 %v2673_v35, %v2505_v28  ;;  %2374 = vmatmul.bf16.gmra.mxu3 %v8251_v3  ;;  %2543 = vmatmul.bf16.gmra.mxu0 %v10416_v6  ;;  %v8605_v9 = vpack.c.bf16 %v3161_v13, %v3159_v49 }
 0x499   :  { %2712 = vmatmul.bf16.gmra.mxu1 %v10417_v42 }
 0x49a   :  { %2881 = vmatmul.bf16.gmra.mxu2 %v10418_v43 }
 0x49b   :  { %v2335_v17 = vpop.f32.mrf.mxu3 }
 0x49c   :  { %v2336_v37 = vadd.f32 %v2335_v17, %v10419_v45 }
 0x49d   :  { %v2842_v41 = vpop.f32.mrf.mxu2  ;;  %v2506_v44 = vpop.f32.mrf.mxu0 }
 0x49e   :  { %v8610_v0 = vadd.f32 %v2842_v41, %v2674_v29  ;;  %v2507_v5 = vadd.f32 %v2506_v44, %v8470_v26  ;;  %v2675_v28 = vpop.f32.mrf.mxu1  ;;  %v3163_v43 = vmax.f32 %v2336_v37, 0.0  ;;  %v10421_v29 = vld [vmem:[#allocation116_spill] sm:$0xff]  ;;  %v10422_v44 = vld [vmem:[#allocation118_spill] sm:$0xff] }
 0x4a0   :  { %v2676_v35 = vadd.f32 %v2675_v28, %v2507_v5  ;;  %v10423_v5 = vld [vmem:[#allocation36_spill] sm:$0xff] }
 0x4a1   :  { %v10424_v28 = vld [vmem:[#allocation56_spill] sm:$0xff] }
 0x4a3   :  { %v2337_v6 = vpop.f32.mrf.mxu3 }
 0x4a4   :  { %v2338_v49 = vadd.f32 %v2337_v6, %v8099_v16 }
 0x4a5   :  { %v2844_v13 = vpop.f32.mrf.mxu2  ;;  %v2509_v42 = vpop.f32.mrf.mxu0 }
 0x4a6   :  { %v8614_v3 = vadd.f32 %v2844_v13, %v2676_v35  ;;  %v3165_v25 = vmax.f32 %v2338_v49, 0.0  ;;  %v2510_v39 = vadd.f32 %v2509_v42, %v8470_v26  ;;  %v2678_v17 = vpop.f32.mrf.mxu1 }
 0x4a8   :  { %10420 = vst [vmem:[#allocation101_spill] sm:$0xff] %v8614_v3  ;;  %v2679_v45 = vadd.f32 %v2678_v17, %v2510_v39  ;;  %2379 = vmatmul.bf16.gmra.mxu3 %v8266_v51  ;;  %2548 = vmatmul.bf16.gmra.mxu0 %v10421_v29  ;;  %v8619_v41 = vpack.c.bf16 %v3165_v25, %v3163_v43 }
 0x4a9   :  { %2717 = vmatmul.bf16.gmra.mxu1 %v10422_v44 }
 0x4aa   :  { %2886 = vmatmul.bf16.gmra.mxu2 %v10423_v5 }
 0x4ab   :  { %v2340_v16 = vpop.f32.mrf.mxu3 }
 0x4ac   :  { %v2341_v35 = vadd.f32 %v2340_v16, %v10424_v28 }
 0x4ad   :  { %v2847_v6 = vpop.f32.mrf.mxu2  ;;  %v2511_v49 = vpop.f32.mrf.mxu0 }
 0x4ae   :  { %v8624_v37 = vadd.f32 %v2847_v6, %v2679_v45  ;;  %v2512_v13 = vadd.f32 %v2511_v49, %v8470_v26  ;;  %v2680_v39 = vpop.f32.mrf.mxu1  ;;  %v3167_v51 = vmax.f32 %v2341_v35, 0.0  ;;  %v10426_v45 = vld [vmem:[#allocation73_spill] sm:$0xff]  ;;  %v10427_v49 = vld [vmem:[#allocation119_spill] sm:$0xff]  ;;  %v10429_v35 = vld [vmem:[#allocation48_spill] sm:$0xff] }
 0x4b0   :  { %v2681_v42 = vadd.f32 %v2680_v39, %v2512_v13  ;;  %v10428_v13 = vld [vmem:[#allocation40_spill] sm:$0xff] }
 0x4b1   :  { %v5967_v39 = vld [vmem:[#allocation3 + $0x1a8] sm:$0xf0] }
 0x4b3   :  { %v2342_v17 = vpop.f32.mrf.mxu3 }
 0x4b4   :  { %v2343_v29 = vadd.f32 %v2342_v17, %v8120_v30  ;;  %v6231_v30 = vld [vmem:[#allocation3 + $0x1a4] sm:$0xf] }
 0x4b5   :  { %v2849_v43 = vpop.f32.mrf.mxu2  ;;  %v2514_v44 = vpop.f32.mrf.mxu0 }
 0x4b6   :  { %v8628_v25 = vadd.f32 %v2849_v43, %v2681_v42  ;;  %v3169_v5 = vmax.f32 %v2343_v29, 0.0  ;;  %v2515_v3 = vadd.f32 %v2514_v44, %v8470_v26  ;;  %v2683_v16 = vpop.f32.mrf.mxu1  ;;  %v5970_v42 = vor.u32 %v6231_v30, %v5967_v39 }
 0x4b8   :  { %10425 = vst [vmem:[#allocation67_spill] sm:$0xff] %v8628_v25  ;;  %v2684_v28 = vadd.f32 %v2683_v16, %v2515_v3  ;;  %2384 = vmatmul.bf16.gmra.mxu3 %v8281_v7  ;;  %2553 = vmatmul.bf16.gmra.mxu0 %v10426_v45  ;;  %v8633_v6 = vpack.c.bf16 %v3169_v5, %v3167_v51 }
 0x4b9   :  { %2722 = vmatmul.bf16.gmra.mxu1 %v10427_v49  ;;  %2967 = vmatpush.bf16.msrb.mxu3 %v5970_v42 }
 0x4ba   :  { %2891 = vmatmul.bf16.gmra.mxu2 %v10428_v13 }
 0x4bb   :  { %v2345_v17 = vpop.f32.mrf.mxu3 }
 0x4bc   :  { %v2346_v29 = vadd.f32 %v2345_v17, %v10429_v35 }
 0x4bd   :  { %v2852_v43 = vpop.f32.mrf.mxu2  ;;  %v2516_v3 = vpop.f32.mrf.mxu0 }
 0x4be   :  { %v8638_v44 = vadd.f32 %v2852_v43, %v2684_v28  ;;  %v2517_v16 = vadd.f32 %v2516_v3, %v8470_v26  ;;  %v2685_v45 = vpop.f32.mrf.mxu1  ;;  %v3171_v30 = vmax.f32 %v2346_v29, 0.0  ;;  %v10432_v28 = vld [vmem:[#allocation28_spill] sm:$0xff]  ;;  %v10433_v3 = vld [vmem:[#allocation121_spill] sm:$0xff] }
 0x4bf   :  { %v10435_v29 = vld [vmem:[#allocation108_spill] sm:$0xff] }
 0x4c0   :  { %10430 = vst [vmem:[#allocation120_spill] sm:$0xff] %v8638_v44  ;;  %v2686_v51 = vadd.f32 %v2685_v45, %v2517_v16  ;;  %v10434_v16 = vld [vmem:[#allocation103_spill] sm:$0xff] }
 0x4c3   :  { %v2347_v5 = vpop.f32.mrf.mxu3 }
 0x4c4   :  { %v2348_v49 = vadd.f32 %v2347_v5, %v8141_v62  ;;  %v6247_v62 = vld [vmem:[%s9863_s5 + $0x20] sm:$0xff] }
 0x4c5   :  { %v2854_v7 = vpop.f32.mrf.mxu2  ;;  %v2519_v25 = vpop.f32.mrf.mxu0  ;;  %3458 = vmatpush.bf16.msrb.mxu0 %v6247_v62 }
 0x4c6   :  { %v8642_v13 = vadd.f32 %v2854_v7, %v2686_v51  ;;  %v3173_v39 = vmax.f32 %v2348_v49, 0.0  ;;  %v2520_v17 = vadd.f32 %v2519_v25, %v8470_v26  ;;  %v2688_v35 = vpop.f32.mrf.mxu1  ;;  %v6255_v7 = vld [vmem:[%s9863_s5 + $0x60] sm:$0xff] }
 0x4c7   :  { %3627 = vmatpush.bf16.msrb.mxu1 %v6255_v7 }
 0x4c8   :  { %10431 = vst [vmem:[#allocation104_spill] sm:$0xff] %v8642_v13  ;;  %v2689_v42 = vadd.f32 %v2688_v35, %v2520_v17  ;;  %2389 = vmatmul.bf16.gmra.mxu3 %v8296_v36  ;;  %2558 = vmatmul.bf16.gmra.mxu0 %v10432_v28  ;;  %v8647_v43 = vpack.c.bf16 %v3173_v39, %v3171_v30 }
 0x4c9   :  { %2727 = vmatmul.bf16.gmra.mxu1 %v10433_v3 }
 0x4ca   :  { %2896 = vmatmul.bf16.gmra.mxu2 %v10434_v16 }
 0x4cb   :  { %v2350_v25 = vpop.f32.mrf.mxu3 }
 0x4cc   :  { %v2351_v45 = vadd.f32 %v2350_v25, %v10435_v29 }
 0x4cd   :  { %v2857_v51 = vpop.f32.mrf.mxu2  ;;  %v2521_v49 = vpop.f32.mrf.mxu0 }
 0x4ce   :  { %v8658_v5 = vadd.f32 %v2857_v51, %v2689_v42  ;;  %v2522_v30 = vadd.f32 %v2521_v49, %v8470_v26  ;;  %v2690_v39 = vpop.f32.mrf.mxu1  ;;  %v3175_v13 = vmax.f32 %v2351_v45, 0.0  ;;  %v10438_v42 = vld [vmem:[#allocation17_spill] sm:$0xff]  ;;  %v10439_v51 = vld [vmem:[#allocation122_spill] sm:$0xff] }
 0x4cf   :  { %v6265_v49 = vld [vmem:[%s9865_s7 + $0x30] sm:$0xff] }
 0x4d0   :  { %10436 = vst [vmem:[#allocation77_spill] sm:$0xff] %v8658_v5  ;;  %v2691_v17 = vadd.f32 %v2690_v39, %v2522_v30  ;;  %v10441_v39 = vld [vmem:[#allocation105_spill] sm:$0xff]  ;;  %3956 = vmatpush.bf16.msrb.mxu2 %v6265_v49 }
 0x4d3   :  { %v2352_v35 = vpop.f32.mrf.mxu3 }
 0x4d4   :  { %v2353_v28 = vadd.f32 %v2352_v35, %v8162_v63  ;;  %v10440_v63 = vld [vmem:[#allocation123_spill] sm:$0xff] }
 0x4d5   :  { %v2859_v3 = vpop.f32.mrf.mxu2  ;;  %v2524_v36 = vpop.f32.mrf.mxu0 }
 0x4d6   :  { %v8662_v16 = vadd.f32 %v2859_v3, %v2691_v17  ;;  %v3177_v62 = vmax.f32 %v2353_v28, 0.0  ;;  %v2525_v7 = vadd.f32 %v2524_v36, %v8470_v26  ;;  %v2693_v25 = vpop.f32.mrf.mxu1  ;;  %v10442_v17 = vld [vmem:[#allocation68_spill] sm:$0xff] }
 0x4d8   :  { %10437 = vst [vmem:[#allocation126_spill] sm:$0xff] %v8662_v16  ;;  %v2694_v29 = vadd.f32 %v2693_v25, %v2525_v7  ;;  %2394 = vmatmul.bf16.gmra.mxu3 %v10438_v42  ;;  %2563 = vmatmul.bf16.gmra.mxu0 %v10439_v51  ;;  %v8670_v30 = vpack.c.bf16 %v3177_v62, %v3175_v13  ;;  %v10444_v16 = vld [vmem:[#allocation112_spill] sm:$0xff] }
 0x4d9   :  { %2732 = vmatmul.bf16.gmra.mxu1 %v10440_v63 }
 0x4da   :  { %2901 = vmatmul.bf16.gmra.mxu2 %v10441_v39 }
 0x4db   :  { %v2355_v45 = vpop.f32.mrf.mxu3 }
 0x4dc   :  { %v2356_v36 = vadd.f32 %v2355_v45, %v10442_v17 }
 0x4dd   :  { %v2862_v35 = vpop.f32.mrf.mxu2  ;;  %v2526_v3 = vpop.f32.mrf.mxu0 }
 0x4de   :  { %v8675_v28 = vadd.f32 %v2862_v35, %v2694_v29  ;;  %v2527_v7 = vadd.f32 %v2526_v3, %v8470_v26  ;;  %v2695_v25 = vpop.f32.mrf.mxu1  ;;  %v3179_v39 = vmax.f32 %v2356_v36, 0.0  ;;  %v10446_v29 = vld [vmem:[#allocation125_spill] sm:$0xff]  ;;  %v10447_v3 = vld [vmem:[#allocation127_spill] sm:$0xff] }
 0x4e0   :  { %10443 = vst [vmem:[#allocation106_spill] sm:$0xff] %v8675_v28  ;;  %v2696_v51 = vadd.f32 %v2695_v25, %v2527_v7  ;;  %v10448_v7 = vld [vmem:[#allocation62_spill] sm:$0xff] }
 0x4e3   :  { %v2357_v42 = vpop.f32.mrf.mxu3 }
 0x4e4   :  { %v2358_v13 = vadd.f32 %v2357_v42, %v10444_v16  ;;  %v10449_v42 = vld [vmem:[#allocation74_spill] sm:$0xff] }
 0x4e5   :  { %v2864_v62 = vpop.f32.mrf.mxu2  ;;  %v2529_v63 = vpop.f32.mrf.mxu0 }
 0x4e6   :  { %v8679_v5 = vadd.f32 %v2864_v62, %v2696_v51  ;;  %v3181_v49 = vmax.f32 %v2358_v13, 0.0  ;;  %v2530_v44 = vadd.f32 %v2529_v63, %v8470_v26  ;;  %v2698_v45 = vpop.f32.mrf.mxu1 }
 0x4e8   :  { %10445 = vst [vmem:[#allocation83_spill] sm:$0xff] %v8679_v5  ;;  %v2699_v17 = vadd.f32 %v2698_v45, %v2530_v44  ;;  %2399 = vmatmul.bf16.gmra.mxu3 %v8326_v61  ;;  %2568 = vmatmul.bf16.gmra.mxu0 %v10446_v29  ;;  %v8684_v35 = vpack.c.bf16 %v3181_v49, %v3179_v39  ;;  %v10451_v61 = vld [vmem:[#allocation114_spill] sm:$0xff] }
 0x4e9   :  { %2737 = vmatmul.bf16.gmra.mxu1 %v10447_v3 }
 0x4ea   :  { %2906 = vmatmul.bf16.gmra.mxu2 %v10448_v7 }
 0x4eb   :  { %v2360_v16 = vpop.f32.mrf.mxu3 }
 0x4ec   :  { %v2361_v25 = vadd.f32 %v2360_v16, %v10449_v42 }
 0x4ed   :  { %v2867_v51 = vpop.f32.mrf.mxu2  ;;  %v2531_v13 = vpop.f32.mrf.mxu0 }
 0x4ee   :  { %v8689_v36 = vadd.f32 %v2867_v51, %v2699_v17  ;;  %v2532_v62 = vadd.f32 %v2531_v13, %v8470_v26  ;;  %v2700_v44 = vpop.f32.mrf.mxu1  ;;  %v3183_v5 = vmax.f32 %v2361_v25, 0.0  ;;  %v10453_v17 = vld [vmem:[#allocation55_spill] sm:$0xff]  ;;  %v10454_v13 = vld [vmem:[#allocation14_spill] sm:$0xff]  ;;  %v10456_v25 = vld [vmem:[#allocation65_spill] sm:$0xff] }
 0x4f0   :  { %10450 = vst [vmem:[#allocation38_spill] sm:$0xff] %v8689_v36  ;;  %v2701_v63 = vadd.f32 %v2700_v44, %v2532_v62  ;;  %v10455_v62 = vld [vmem:[#allocation53_spill] sm:$0xff]  ;;  %v5959_v44 = vld [vmem:[#allocation3 + $0x198] sm:$0xf0] }
 0x4f3   :  { %v2362_v45 = vpop.f32.mrf.mxu3 }
 0x4f4   :  { %v2363_v29 = vadd.f32 %v2362_v45, %v10451_v61  ;;  %v6229_v61 = vld [vmem:[#allocation3 + $0x194] sm:$0xf] }
 0x4f5   :  { %v2869_v39 = vpop.f32.mrf.mxu2  ;;  %v2534_v3 = vpop.f32.mrf.mxu0 }
 0x4f6   :  { %v8693_v49 = vadd.f32 %v2869_v39, %v2701_v63  ;;  %v3185_v7 = vmax.f32 %v2363_v29, 0.0  ;;  %v2535_v28 = vadd.f32 %v2534_v3, %v8470_v26  ;;  %v2703_v16 = vpop.f32.mrf.mxu1  ;;  %v5962_v63 = vor.u32 %v6229_v61, %v5959_v44 }
 0x4f8   :  { %10452 = vst [vmem:[#allocation109_spill] sm:$0xff] %v8693_v49  ;;  %v2704_v42 = vadd.f32 %v2703_v16, %v2535_v28  ;;  %2404 = vmatmul.bf16.gmra.mxu3 %v8341_v52  ;;  %2573 = vmatmul.bf16.gmra.mxu0 %v10453_v17  ;;  %v8698_v51 = vpack.c.bf16 %v3185_v7, %v3183_v5  ;;  %v10458_v52 = vld [vmem:[#allocation80_spill] sm:$0xff] }
 0x4f9   :  { %2742 = vmatmul.bf16.gmra.mxu1 %v10454_v13  ;;  %2968 = vmatpush.bf16.msrb.mxu3 %v5962_v63 }
 0x4fa   :  { %2911 = vmatmul.bf16.gmra.mxu2 %v10455_v62 }
 0x4fb   :  { %v2365_v45 = vpop.f32.mrf.mxu3 }
 0x4fc   :  { %v2366_v29 = vadd.f32 %v2365_v45, %v10456_v25 }
 0x4fd   :  { %v2872_v39 = vpop.f32.mrf.mxu2  ;;  %v2536_v28 = vpop.f32.mrf.mxu0 }
 0x4fe   :  { %v8703_v3 = vadd.f32 %v2872_v39, %v2704_v42  ;;  %v2537_v16 = vadd.f32 %v2536_v28, %v8470_v26  ;;  %v2705_v17 = vpop.f32.mrf.mxu1  ;;  %v3187_v61 = vmax.f32 %v2366_v29, 0.0  ;;  %v10460_v42 = vld [vmem:[#allocation42_spill] sm:$0xff]  ;;  %v10461_v28 = vld [vmem:[#allocation128_spill] sm:$0xff] }
 0x4ff   :  { %v10463_v29 = vld [vmem:[#allocation90_spill] sm:$0xff] }
 0x500   :  { %10457 = vst [vmem:[#allocation124_spill] sm:$0xff] %v8703_v3  ;;  %v2706_v5 = vadd.f32 %v2705_v17, %v2537_v16  ;;  %v10462_v16 = vld [vmem:[#allocation59_spill] sm:$0xff] }
 0x503   :  { %v2367_v7 = vpop.f32.mrf.mxu3 }
 0x504   :  { %v2368_v13 = vadd.f32 %v2367_v7, %v10458_v52  ;;  %v6246_v52 = vld [vmem:[%s9863_s5 + $0x18] sm:$0xff] }
 0x505   :  { %v2874_v49 = vpop.f32.mrf.mxu2  ;;  %v2539_v36 = vpop.f32.mrf.mxu0  ;;  %3459 = vmatpush.bf16.msrb.mxu0 %v6246_v52 }
 0x506   :  { %v8707_v62 = vadd.f32 %v2874_v49, %v2706_v5  ;;  %v3189_v44 = vmax.f32 %v2368_v13, 0.0  ;;  %v2540_v45 = vadd.f32 %v2539_v36, %v8470_v26  ;;  %v2708_v25 = vpop.f32.mrf.mxu1  ;;  %v6254_v36 = vld [vmem:[%s9863_s5 + $0x58] sm:$0xff] }
 0x507   :  { %3628 = vmatpush.bf16.msrb.mxu1 %v6254_v36 }
 0x508   :  { %10459 = vst [vmem:[#allocation107_spill] sm:$0xff] %v8707_v62  ;;  %v2709_v63 = vadd.f32 %v2708_v25, %v2540_v45  ;;  %2409 = vmatmul.bf16.gmra.mxu3 %v8355_v58  ;;  %2578 = vmatmul.bf16.gmra.mxu0 %v10460_v42  ;;  %v8712_v39 = vpack.c.bf16 %v3189_v44, %v3187_v61  ;;  %v10465_v42 = vld [vmem:[#allocation131_spill] sm:$0xff] }
 0x509   :  { %2747 = vmatmul.bf16.gmra.mxu1 %v10461_v28 }
 0x50a   :  { %2916 = vmatmul.bf16.gmra.mxu2 %v10462_v16 }
 0x50b   :  { %v2370_v49 = vpop.f32.mrf.mxu3 }
 0x50c   :  { %v2371_v17 = vadd.f32 %v2370_v49, %v10463_v29 }
 0x50d   :  { %v2877_v5 = vpop.f32.mrf.mxu2  ;;  %v2541_v13 = vpop.f32.mrf.mxu0 }
 0x50e   :  { %v8723_v7 = vadd.f32 %v2877_v5, %v2709_v63  ;;  %v2542_v61 = vadd.f32 %v2541_v13, %v8470_v26  ;;  %v2710_v44 = vpop.f32.mrf.mxu1  ;;  %v3191_v3 = vmax.f32 %v2371_v17, 0.0  ;;  %v10467_v63 = vld [vmem:[#allocation26_spill] sm:$0xff]  ;;  %v6264_v5 = vld [vmem:[%s9865_s7 + $0x28] sm:$0xff] }
 0x50f   :  { %3957 = vmatpush.bf16.msrb.mxu2 %v6264_v5 }
 0x510   :  { %10464 = vst [vmem:[#allocation100_spill] sm:$0xff] %v8723_v7  ;;  %v2711_v45 = vadd.f32 %v2710_v44, %v2542_v61  ;;  %v10468_v61 = vld [vmem:[#allocation57_spill] sm:$0xff]  ;;  %v10469_v44 = vld [vmem:[#allocation8_spill] sm:$0xff] }
 0x513   :  { %v2372_v25 = vpop.f32.mrf.mxu3 }
 0x514   :  { %v2373_v28 = vadd.f32 %v2372_v25, %v10465_v42 }
 0x515   :  { %v2879_v16 = vpop.f32.mrf.mxu2  ;;  %v2544_v62 = vpop.f32.mrf.mxu0 }
 0x516   :  { %v8727_v58 = vadd.f32 %v2879_v16, %v2711_v45  ;;  %v3193_v52 = vmax.f32 %v2373_v28, 0.0  ;;  %v2545_v36 = vadd.f32 %v2544_v62, %v8470_v26  ;;  %v2713_v49 = vpop.f32.mrf.mxu1  ;;  %v10470_v45 = vld [vmem:[#allocation132_spill] sm:$0xff] }
 0x518   :  { %10466 = vst [vmem:[#allocation111_spill] sm:$0xff] %v8727_v58  ;;  %v2714_v29 = vadd.f32 %v2713_v49, %v2545_v36  ;;  %2414 = vmatmul.bf16.gmra.mxu3 %v8369_v31  ;;  %2583 = vmatmul.bf16.gmra.mxu0 %v10467_v63  ;;  %v8735_v13 = vpack.c.bf16 %v3193_v52, %v3191_v3  ;;  %v10472_v31 = vld [vmem:[#allocation133_spill] sm:$0xff] }
 0x519   :  { %2752 = vmatmul.bf16.gmra.mxu1 %v10468_v61 }
 0x51a   :  { %2921 = vmatmul.bf16.gmra.mxu2 %v10469_v44 }
 0x51b   :  { %v2375_v17 = vpop.f32.mrf.mxu3 }
 0x51c   :  { %v2376_v62 = vadd.f32 %v2375_v17, %v10470_v45 }
 0x51d   :  { %v2882_v25 = vpop.f32.mrf.mxu2  ;;  %v2546_v28 = vpop.f32.mrf.mxu0 }
 0x51e   :  { %v8740_v42 = vadd.f32 %v2882_v25, %v2714_v29  ;;  %v2547_v16 = vadd.f32 %v2546_v28, %v8470_v26  ;;  %v2715_v36 = vpop.f32.mrf.mxu1  ;;  %v3195_v44 = vmax.f32 %v2376_v62, 0.0  ;;  %v10474_v29 = vld [vmem:[#allocation29_spill] sm:$0xff]  ;;  %v10475_v28 = vld [vmem:[#allocation63_spill] sm:$0xff] }
 0x520   :  { %10471 = vst [vmem:[#allocation113_spill] sm:$0xff] %v8740_v42  ;;  %v2716_v49 = vadd.f32 %v2715_v36, %v2547_v16  ;;  %v10476_v16 = vld [vmem:[#allocation10_spill] sm:$0xff] }
 0x521   :  { %v10477_v36 = vld [vmem:[#allocation134_spill] sm:$0xff] }
 0x523   :  { %v2377_v63 = vpop.f32.mrf.mxu3 }
 0x524   :  { %v2378_v3 = vadd.f32 %v2377_v63, %v10472_v31 }
 0x525   :  { %v2884_v52 = vpop.f32.mrf.mxu2  ;;  %v2549_v61 = vpop.f32.mrf.mxu0 }
 0x526   :  { %v8744_v58 = vadd.f32 %v2884_v52, %v2716_v49  ;;  %v3197_v5 = vmax.f32 %v2378_v3, 0.0  ;;  %v2550_v7 = vadd.f32 %v2549_v61, %v8470_v26  ;;  %v2718_v17 = vpop.f32.mrf.mxu1 }
 0x528   :  { %10473 = vst [vmem:[#allocation94_spill] sm:$0xff] %v8744_v58  ;;  %v2719_v45 = vadd.f32 %v2718_v17, %v2550_v7  ;;  %2419 = vmatmul.bf16.gmra.mxu3 %v8383_v53  ;;  %2588 = vmatmul.bf16.gmra.mxu0 %v10474_v29  ;;  %v8749_v25 = vpack.c.bf16 %v3197_v5, %v3195_v44  ;;  %v10479_v53 = vld [vmem:[#allocation135_spill] sm:$0xff] }
 0x529   :  { %2757 = vmatmul.bf16.gmra.mxu1 %v10475_v28 }
 0x52a   :  { %2926 = vmatmul.bf16.gmra.mxu2 %v10476_v16 }
 0x52b   :  { %v2380_v31 = vpop.f32.mrf.mxu3 }
 0x52c   :  { %v2381_v49 = vadd.f32 %v2380_v31, %v10477_v36 }
 0x52d   :  { %v2887_v63 = vpop.f32.mrf.mxu2  ;;  %v2551_v3 = vpop.f32.mrf.mxu0 }
 0x52e   :  { %v8754_v62 = vadd.f32 %v2887_v63, %v2719_v45  ;;  %v2552_v52 = vadd.f32 %v2551_v3, %v8470_v26  ;;  %v2720_v7 = vpop.f32.mrf.mxu1  ;;  %v3199_v58 = vmax.f32 %v2381_v49, 0.0  ;;  %v10481_v45 = vld [vmem:[#allocation31_spill] sm:$0xff]  ;;  %v10482_v3 = vld [vmem:[#allocation69_spill] sm:$0xff]  ;;  %v10484_v49 = vld [vmem:[#allocation136_spill] sm:$0xff] }
 0x530   :  { %10478 = vst [vmem:[#allocation129_spill] sm:$0xff] %v8754_v62  ;;  %v2721_v61 = vadd.f32 %v2720_v7, %v2552_v52  ;;  %v10483_v52 = vld [vmem:[#allocation12_spill] sm:$0xff] }
 0x531   :  { %v5951_v7 = vld [vmem:[#allocation3 + $0x188] sm:$0xf0] }
 0x533   :  { %v2382_v17 = vpop.f32.mrf.mxu3 }
 0x534   :  { %v2383_v29 = vadd.f32 %v2382_v17, %v10479_v53  ;;  %v6227_v53 = vld [vmem:[#allocation3 + $0x184] sm:$0xf] }
 0x535   :  { %v2889_v44 = vpop.f32.mrf.mxu2  ;;  %v2554_v28 = vpop.f32.mrf.mxu0 }
 0x536   :  { %v8758_v5 = vadd.f32 %v2889_v44, %v2721_v61  ;;  %v3201_v16 = vmax.f32 %v2383_v29, 0.0  ;;  %v2555_v42 = vadd.f32 %v2554_v28, %v8470_v26  ;;  %v2723_v31 = vpop.f32.mrf.mxu1  ;;  %v5954_v61 = vor.u32 %v6227_v53, %v5951_v7 }
 0x538   :  { %10480 = vst [vmem:[#allocation102_spill] sm:$0xff] %v8758_v5  ;;  %v2724_v36 = vadd.f32 %v2723_v31, %v2555_v42  ;;  %2424 = vmatmul.bf16.gmra.mxu3 %v8397_v56  ;;  %2593 = vmatmul.bf16.gmra.mxu0 %v10481_v45  ;;  %v8763_v63 = vpack.c.bf16 %v3201_v16, %v3199_v58  ;;  %v10486_v56 = vld [vmem:[#allocation137_spill] sm:$0xff] }
 0x539   :  { %2762 = vmatmul.bf16.gmra.mxu1 %v10482_v3  ;;  %2969 = vmatpush.bf16.msrb.mxu3 %v5954_v61 }
 0x53a   :  { %2931 = vmatmul.bf16.gmra.mxu2 %v10483_v52 }
 0x53b   :  { %v2385_v17 = vpop.f32.mrf.mxu3 }
 0x53c   :  { %v2386_v29 = vadd.f32 %v2385_v17, %v10484_v49 }
 0x53d   :  { %v2892_v44 = vpop.f32.mrf.mxu2  ;;  %v2556_v42 = vpop.f32.mrf.mxu0 }
 0x53e   :  { %v8768_v28 = vadd.f32 %v2892_v44, %v2724_v36  ;;  %v2557_v31 = vadd.f32 %v2556_v42, %v8470_v26  ;;  %v2725_v45 = vpop.f32.mrf.mxu1  ;;  %v3203_v53 = vmax.f32 %v2386_v29, 0.0  ;;  %v10488_v36 = vld [vmem:[#allocation35_spill] sm:$0xff]  ;;  %v10491_v29 = vld [vmem:[#allocation138_spill] sm:$0xff] }
 0x53f   :  { %v10489_v42 = vld [vmem:[#allocation75_spill] sm:$0xff] }
 0x540   :  { %10485 = vst [vmem:[#allocation20_spill] sm:$0xff] %v8768_v28  ;;  %v2726_v58 = vadd.f32 %v2725_v45, %v2557_v31  ;;  %v10490_v31 = vld [vmem:[#allocation85_spill] sm:$0xff] }
 0x543   :  { %v2387_v16 = vpop.f32.mrf.mxu3 }
 0x544   :  { %v2388_v3 = vadd.f32 %v2387_v16, %v10486_v56  ;;  %v6245_v56 = vld [vmem:[%s9863_s5 + $0x10] sm:$0xff] }
 0x545   :  { %v2894_v5 = vpop.f32.mrf.mxu2  ;;  %v2559_v62 = vpop.f32.mrf.mxu0  ;;  %3460 = vmatpush.bf16.msrb.mxu0 %v6245_v56 }
 0x546   :  { %v8772_v52 = vadd.f32 %v2894_v5, %v2726_v58  ;;  %v3205_v7 = vmax.f32 %v2388_v3, 0.0  ;;  %v2560_v17 = vadd.f32 %v2559_v62, %v8470_v26  ;;  %v2728_v49 = vpop.f32.mrf.mxu1  ;;  %v6253_v62 = vld [vmem:[%s9863_s5 + $0x50] sm:$0xff] }
 0x547   :  { %3629 = vmatpush.bf16.msrb.mxu1 %v6253_v62 }
 0x548   :  { %10487 = vst [vmem:[#allocation115_spill] sm:$0xff] %v8772_v52  ;;  %v2729_v61 = vadd.f32 %v2728_v49, %v2560_v17  ;;  %2429 = vmatmul.bf16.gmra.mxu3 %v8411_v12  ;;  %2598 = vmatmul.bf16.gmra.mxu0 %v10488_v36  ;;  %v8777_v44 = vpack.c.bf16 %v3205_v7, %v3203_v53  ;;  %v10492_v36 = vld [vmem:[#allocation139_spill] sm:$0xff] }
 0x549   :  { %2767 = vmatmul.bf16.gmra.mxu1 %v10489_v42 }
 0x54a   :  { %2936 = vmatmul.bf16.gmra.mxu2 %v10490_v31 }
 0x54b   :  { %v2390_v5 = vpop.f32.mrf.mxu3 }
 0x54c   :  { %v2391_v45 = vadd.f32 %v2390_v5, %v10491_v29 }
 0x54d   :  { %v2897_v58 = vpop.f32.mrf.mxu2  ;;  %v2561_v3 = vpop.f32.mrf.mxu0 }
 0x54e   :  { %v8788_v16 = vadd.f32 %v2897_v58, %v2729_v61  ;;  %v2562_v53 = vadd.f32 %v2561_v3, %v8470_v26  ;;  %v2730_v7 = vpop.f32.mrf.mxu1  ;;  %v3207_v28 = vmax.f32 %v2391_v45, 0.0  ;;  %v10494_v61 = vld [vmem:[#allocation39_spill] sm:$0xff] }
 0x54f   :  { %v6263_v58 = vld [vmem:[%s9865_s7 + $0x20] sm:$0xff] }
 0x550   :  { %v2731_v17 = vadd.f32 %v2730_v7, %v2562_v53  ;;  %v10495_v53 = vld [vmem:[#allocation81_spill] sm:$0xff]  ;;  %v10496_v7 = vld [vmem:[#allocation16_spill] sm:$0xff]  ;;  %3958 = vmatpush.bf16.msrb.mxu2 %v6263_v58 }
 0x553   :  { %v2392_v49 = vpop.f32.mrf.mxu3 }
 0x554   :  { %v2393_v42 = vadd.f32 %v2392_v49, %v10492_v36 }
 0x555   :  { %v2899_v31 = vpop.f32.mrf.mxu2  ;;  %v2564_v52 = vpop.f32.mrf.mxu0 }
 0x556   :  { %v8792_v12 = vadd.f32 %v2899_v31, %v2731_v17  ;;  %v3209_v56 = vmax.f32 %v2393_v42, 0.0  ;;  %v2565_v62 = vadd.f32 %v2564_v52, %v8470_v26  ;;  %v2733_v5 = vpop.f32.mrf.mxu1  ;;  %v10497_v17 = vld [vmem:[#allocation140_spill] sm:$0xff] }
 0x558   :  { %10493 = vst [vmem:[#allocation99_spill] sm:$0xff] %v8792_v12  ;;  %v2734_v29 = vadd.f32 %v2733_v5, %v2565_v62  ;;  %2434 = vmatmul.bf16.gmra.mxu3 %v8425_v54  ;;  %2603 = vmatmul.bf16.gmra.mxu0 %v10494_v61  ;;  %v8800_v3 = vpack.c.bf16 %v3209_v56, %v3207_v28  ;;  %v10499_v5 = vld [vmem:[#allocation141_spill] sm:$0xff] }
 0x559   :  { %2772 = vmatmul.bf16.gmra.mxu1 %v10495_v53 }
 0x55a   :  { %2941 = vmatmul.bf16.gmra.mxu2 %v10496_v7 }
 0x55b   :  { %v2395_v45 = vpop.f32.mrf.mxu3 }
 0x55c   :  { %v2396_v52 = vadd.f32 %v2395_v45, %v10497_v17  ;;  %v10502_v17 = vld [vmem:[#allocation87_spill] sm:$0xff] }
 0x55d   :  { %v2902_v49 = vpop.f32.mrf.mxu2  ;;  %v8807_v42 = vpop.f32.mrf.mxu0 }
 0x55e   :  { %v8805_v36 = vadd.f32 %v2902_v49, %v2734_v29  ;;  %v8809_v31 = vpop.f32.mrf.mxu1  ;;  %v3211_v53 = vmax.f32 %v2396_v52, 0.0  ;;  %v10501_v29 = vld [vmem:[#allocation43_spill] sm:$0xff]  ;;  %v10503_v49 = vld [vmem:[#allocation18_spill] sm:$0xff] }
 0x560   :  { %10498 = vst [vmem:[#allocation130_spill] sm:$0xff] %v8805_v36 }
 0x563   :  { %v2397_v62 = vpop.f32.mrf.mxu3 }
 0x564   :  { %v2398_v61 = vadd.f32 %v2397_v62, %v10499_v5  ;;  %v10504_v5 = vld [vmem:[#allocation142_spill] sm:$0xff] }
 0x565   :  { %v8812_v28 = vpop.f32.mrf.mxu2  ;;  %v2569_v56 = vpop.f32.mrf.mxu0 }
 0x566   :  { %10500 = vst [vmem:[#allocation116_spill] sm:$0xff] %v8812_v28  ;;  %v3213_v54 = vmax.f32 %v2398_v61, 0.0  ;;  %v2570_v58 = vadd.f32 %v2569_v56, %v8470_v26  ;;  %v2738_v7 = vpop.f32.mrf.mxu1 }
 0x568   :  { %v2739_v12 = vadd.f32 %v2738_v7, %v2570_v58  ;;  %2439 = vmatmul.bf16.gmra.mxu3 %v8439_v46  ;;  %2608 = vmatmul.bf16.gmra.mxu0 %v10501_v29  ;;  %v8817_v45 = vpack.c.bf16 %v3213_v54, %v3211_v53  ;;  %v6244_v58 = vld [vmem:[%s9863_s5 + $0x8] sm:$0xff]  ;;  %v6243_v29 = vld [vmem:[%s9863_s5] sm:$0xff] }
 0x569   :  { %2777 = vmatmul.bf16.gmra.mxu1 %v10502_v17  ;;  %3461 = vmatpush.bf16.msrb.mxu0 %v6244_v58 }
 0x56a   :  { %2946 = vmatmul.bf16.gmra.mxu2 %v10503_v49 }
 0x56b   :  { %v2400_v62 = vpop.f32.mrf.mxu3 }
 0x56c   :  { %v2401_v36 = vadd.f32 %v2400_v62, %v10504_v5 }
 0x56d   :  { %v2907_v28 = vpop.f32.mrf.mxu2  ;;  %v8824_v61 = vpop.f32.mrf.mxu0  ;;  %3462 = vmatpush.bf16.msrb.mxu0 %v6243_v29 }
 0x56e   :  { %v8822_v52 = vadd.f32 %v2907_v28, %v2739_v12  ;;  %10506 = vst [vmem:[#allocation36_spill] sm:$0xff] %v8824_v61  ;;  %v8826_v56 = vpop.f32.mrf.mxu1  ;;  %v3215_v28 = vmax.f32 %v2401_v36, 0.0 }
 0x56f   :  { %10507 = vst [vmem:[#allocation56_spill] sm:$0xff] %v8826_v56 }
 0x570   :  { %10505 = vst [vmem:[#allocation118_spill] sm:$0xff] %v8822_v52 }
 0x573   :  { %v2402_v54 = vpop.f32.mrf.mxu3 }
 0x574   :  { %v2403_v53 = vadd.f32 %v2402_v54, %v8320_v22  ;;  %v10509_v22 = vld [vmem:[#allocation92_spill] sm:$0xff]  ;;  %v10510_v54 = vld [vmem:[#allocation61_spill] sm:$0xff] }
 0x575   :  { %v8832_v7 = vpop.f32.mrf.mxu2  ;;  %v2574_v12 = vpop.f32.mrf.mxu0 }
 0x576   :  { %10508 = vst [vmem:[#allocation73_spill] sm:$0xff] %v8832_v7  ;;  %v3217_v17 = vmax.f32 %v2403_v53, 0.0  ;;  %v2575_v49 = vadd.f32 %v2574_v12, %v8470_v26  ;;  %v2743_v62 = vpop.f32.mrf.mxu1  ;;  %v10511_v7 = vld [vmem:[#allocation47_spill] sm:$0xff] }
 0x578   :  { %v2744_v5 = vadd.f32 %v2743_v62, %v2575_v49  ;;  %2444 = vmatmul.bf16.gmra.mxu3 %v8453_v10  ;;  %2613 = vmatmul.bf16.gmra.mxu0 %v10327_v60  ;;  %v8840_v58 = vpack.c.bf16 %v3217_v17, %v3215_v28  ;;  %v10515_v62 = vld [vmem:[#allocation143_spill] sm:$0xff] }
 0x579   :  { %2782 = vmatmul.bf16.gmra.mxu1 %v10509_v22 }
 0x57a   :  { %2951 = vmatmul.bf16.gmra.mxu2 %v10510_v54 }
 0x57b   :  { %v2405_v52 = vpop.f32.mrf.mxu3 }
 0x57c   :  { %v2406_v56 = vadd.f32 %v2405_v52, %v10511_v7  ;;  %v10517_v52 = vld [vmem:[#allocation51_spill] sm:$0xff]  ;;  %v6252_v7 = vld [vmem:[%s9863_s5 + $0x48] sm:$0xff] }
 0x57d   :  { %v2912_v36 = vpop.f32.mrf.mxu2  ;;  %v8847_v12 = vpop.f32.mrf.mxu0  ;;  %3630 = vmatpush.bf16.msrb.mxu1 %v6252_v7 }
 0x57e   :  { %v8845_v53 = vadd.f32 %v2912_v36, %v2744_v5  ;;  %10513 = vst [vmem:[#allocation40_spill] sm:$0xff] %v8847_v12  ;;  %v8849_v29 = vpop.f32.mrf.mxu1  ;;  %v3219_v17 = vmax.f32 %v2406_v56, 0.0  ;;  %v10518_v36 = vld [vmem:[#allocation98_spill] sm:$0xff]  ;;  %v10520_v56 = vld [vmem:[#allocation144_spill] sm:$0xff] }
 0x57f   :  { %10514 = vst [vmem:[#allocation48_spill] sm:$0xff] %v8849_v29 }
 0x580   :  { %10512 = vst [vmem:[#allocation119_spill] sm:$0xff] %v8845_v53  ;;  %v10524_v53 = vld [vmem:[#allocation145_spill] sm:$0xff] }
 0x583   :  { %v2407_v49 = vpop.f32.mrf.mxu3 }
 0x584   :  { %v2408_v10 = vadd.f32 %v2407_v49, %v10515_v62  ;;  %v10519_v49 = vld [vmem:[#allocation22_spill] sm:$0xff] }
 0x585   :  { %v8852_v60 = vpop.f32.mrf.mxu2  ;;  %v2579_v28 = vpop.f32.mrf.mxu0 }
 0x586   :  { %10516 = vst [vmem:[#allocation28_spill] sm:$0xff] %v8852_v60  ;;  %v3221_v22 = vmax.f32 %v2408_v10, 0.0  ;;  %v2580_v54 = vadd.f32 %v2579_v28, %v8470_v26  ;;  %v2748_v61 = vpop.f32.mrf.mxu1 }
 0x588   :  { %v2749_v46 = vadd.f32 %v2748_v61, %v2580_v54  ;;  %2449 = vmatmul.bf16.gmra.mxu3 %v8478_v19  ;;  %2618 = vmatmul.bf16.gmra.mxu0 %v10517_v52  ;;  %v8860_v5 = vpack.c.bf16 %v3221_v22, %v3219_v17 }
 0x589   :  { %2787 = vmatmul.bf16.gmra.mxu1 %v10518_v36 }
 0x58a   :  { %2956 = vmatmul.bf16.gmra.mxu2 %v10519_v49 }
 0x58b   :  { %v2410_v10 = vpop.f32.mrf.mxu3 }
 0x58c   :  { %v2411_v62 = vadd.f32 %v2410_v10, %v10520_v56  ;;  %v10526_v10 = vld [vmem:[#allocation71_spill] sm:$0xff] }
 0x58d   :  { %v2917_v28 = vpop.f32.mrf.mxu2  ;;  %v8867_v54 = vpop.f32.mrf.mxu0 }
 0x58e   :  { %v8865_v61 = vadd.f32 %v2917_v28, %v2749_v46  ;;  %10522 = vst [vmem:[#allocation103_spill] sm:$0xff] %v8867_v54  ;;  %v8869_v52 = vpop.f32.mrf.mxu1  ;;  %v3223_v36 = vmax.f32 %v2411_v62, 0.0  ;;  %v6262_v46 = vld [vmem:[%s9865_s7 + $0x18] sm:$0xff] }
 0x58f   :  { %10523 = vst [vmem:[#allocation108_spill] sm:$0xff] %v8869_v52  ;;  %3959 = vmatpush.bf16.msrb.mxu2 %v6262_v46 }
 0x590   :  { %10521 = vst [vmem:[#allocation121_spill] sm:$0xff] %v8865_v61 }
 0x593   :  { %v2412_v19 = vpop.f32.mrf.mxu3 }
 0x594   :  { %v2413_v60 = vadd.f32 %v2412_v19, %v10524_v53  ;;  %v10527_v53 = vld [vmem:[#allocation24_spill] sm:$0xff] }
 0x595   :  { %v8872_v17 = vpop.f32.mrf.mxu2  ;;  %v2584_v22 = vpop.f32.mrf.mxu0 }
 0x596   :  { %10525 = vst [vmem:[#allocation122_spill] sm:$0xff] %v8872_v17  ;;  %v3225_v29 = vmax.f32 %v2413_v60, 0.0  ;;  %v2585_v7 = vadd.f32 %v2584_v22, %v8470_v26  ;;  %v2753_v49 = vpop.f32.mrf.mxu1 }
 0x598   :  { %v2754_v12 = vadd.f32 %v2753_v49, %v2585_v7  ;;  %2970 = vmatmul.bf16.vlgmr.msrb.gmra.mxu3 %v10526_v10  ;;  %3463 = vmatmul.bf16.vlgmr.msrb.gmra.mxu0 %v8490_v57  ;;  %v8880_v56 = vpack.c.bf16 %v3225_v29, %v3223_v36  ;;  %v10531_v10 = vld [vmem:[#allocation27_spill] sm:$0xff] }
 0x59b   :  { %v2415_v19 = vpop.f32.mrf.mxu3 }
 0x59c   :  { %v2416_v28 = vadd.f32 %v2415_v19, %v10527_v53  ;;  %v10533_v19 = vld [vmem:[#allocation79_spill] sm:$0xff] }
 0x59d   :  { %v2922_v62 = vpop.f32.mrf.mxu2  ;;  %v8885_v22 = vpop.f32.mrf.mxu0 }
 0x59e   :  { %v8883_v60 = vadd.f32 %v2922_v62, %v2754_v12  ;;  %10529 = vst [vmem:[#allocation105_spill] sm:$0xff] %v8885_v22  ;;  %v8887_v7 = vpop.f32.mrf.mxu1  ;;  %v3227_v52 = vmax.f32 %v2416_v28, 0.0  ;;  %v10534_v62 = vld [vmem:[#allocation54_spill] sm:$0xff] }
 0x59f   :  { %10530 = vst [vmem:[#allocation68_spill] sm:$0xff] %v8887_v7 }
 0x5a0   :  { %10528 = vst [vmem:[#allocation123_spill] sm:$0xff] %v8883_v60 }
 0x5a3   :  { %v2417_v49 = vpop.f32.mrf.mxu3 }
 0x5a4   :  { %v2418_v57 = vadd.f32 %v2417_v49, %v10531_v10 }
 0x5a5   :  { %v8890_v61 = vpop.f32.mrf.mxu2  ;;  %v2589_v17 = vpop.f32.mrf.mxu0 }
 0x5a6   :  { %10532 = vst [vmem:[#allocation112_spill] sm:$0xff] %v8890_v61  ;;  %v3229_v29 = vmax.f32 %v2418_v57, 0.0  ;;  %v2590_v36 = vadd.f32 %v2589_v17, %v8470_v26  ;;  %v2758_v46 = vpop.f32.mrf.mxu1  ;;  %v10538_v17 = vld [vmem:[#allocation91_spill] sm:$0xff] }
 0x5a8   :  { %v2759_v54 = vadd.f32 %v2758_v46, %v2590_v36  ;;  %2975 = vmatmul.bf16.gmra.mxu3 %v10533_v19  ;;  %3468 = vmatmul.bf16.gmra.mxu0 %v8506_v40  ;;  %v8895_v12 = vpack.c.bf16 %v3229_v29, %v3227_v52 }
 0x5ab   :  { %v2420_v53 = vpop.f32.mrf.mxu3 }
 0x5ac   :  { %v2421_v60 = vadd.f32 %v2420_v53, %v10534_v62  ;;  %v10540_v53 = vld [vmem:[#allocation30_spill] sm:$0xff]  ;;  %v10541_v62 = vld [vmem:[#allocation60_spill] sm:$0xff] }
 0x5ad   :  { %v2927_v7 = vpop.f32.mrf.mxu2  ;;  %v8900_v10 = vpop.f32.mrf.mxu0 }
 0x5ae   :  { %v8898_v49 = vadd.f32 %v2927_v7, %v2759_v54  ;;  %10536 = vst [vmem:[#allocation127_spill] sm:$0xff] %v8900_v10  ;;  %v8902_v28 = vpop.f32.mrf.mxu1  ;;  %v3231_v19 = vmax.f32 %v2421_v60, 0.0 }
 0x5af   :  { %10537 = vst [vmem:[#allocation62_spill] sm:$0xff] %v8902_v28 }
 0x5b0   :  { %10535 = vst [vmem:[#allocation125_spill] sm:$0xff] %v8898_v49 }
 0x5b3   :  { %v2422_v57 = vpop.f32.mrf.mxu3 }
 0x5b4   :  { %v2423_v61 = vadd.f32 %v2422_v57, %v10538_v17 }
 0x5b5   :  { %v8905_v36 = vpop.f32.mrf.mxu2  ;;  %v2594_v46 = vpop.f32.mrf.mxu0 }
 0x5b6   :  { %10539 = vst [vmem:[#allocation74_spill] sm:$0xff] %v8905_v36  ;;  %v3233_v40 = vmax.f32 %v2423_v61, 0.0  ;;  %v2595_v52 = vadd.f32 %v2594_v46, %v8470_v26  ;;  %v2763_v29 = vpop.f32.mrf.mxu1  ;;  %v10545_v46 = vld [vmem:[#allocation97_spill] sm:$0xff] }
 0x5b8   :  { %v2764_v22 = vadd.f32 %v2763_v29, %v2595_v52  ;;  %2980 = vmatmul.bf16.gmra.mxu3 %v10540_v53  ;;  %3473 = vmatmul.bf16.gmra.mxu0 %v8520_v48  ;;  %v8910_v54 = vpack.c.bf16 %v3233_v40, %v3231_v19 }
 0x5bb   :  { %v2425_v7 = vpop.f32.mrf.mxu3 }
 0x5bc   :  { %v2426_v49 = vadd.f32 %v2425_v7, %v10541_v62  ;;  %v10547_v7 = vld [vmem:[#allocation34_spill] sm:$0xff] }
 0x5bd   :  { %v2932_v28 = vpop.f32.mrf.mxu2  ;;  %v8915_v17 = vpop.f32.mrf.mxu0 }
 0x5be   :  { %v8913_v57 = vadd.f32 %v2932_v28, %v2764_v22  ;;  %10543 = vst [vmem:[#allocation55_spill] sm:$0xff] %v8915_v17  ;;  %v8917_v60 = vpop.f32.mrf.mxu1  ;;  %v3235_v53 = vmax.f32 %v2426_v49, 0.0  ;;  %v6251_v22 = vld [vmem:[%s9863_s5 + $0x40] sm:$0xff] }
 0x5bf   :  { %10544 = vst [vmem:[#allocation14_spill] sm:$0xff] %v8917_v60  ;;  %3631 = vmatpush.bf16.msrb.mxu1 %v6251_v22 }
 0x5c0   :  { %10542 = vst [vmem:[#allocation114_spill] sm:$0xff] %v8913_v57 }
 0x5c3   :  { %v2427_v61 = vpop.f32.mrf.mxu3 }
 0x5c4   :  { %v2428_v36 = vadd.f32 %v2427_v61, %v10545_v46  ;;  %v10548_v61 = vld [vmem:[#allocation66_spill] sm:$0xff] }
 0x5c5   :  { %v8920_v52 = vpop.f32.mrf.mxu2  ;;  %v2599_v29 = vpop.f32.mrf.mxu0 }
 0x5c6   :  { %10546 = vst [vmem:[#allocation53_spill] sm:$0xff] %v8920_v52  ;;  %v3237_v48 = vmax.f32 %v2428_v36, 0.0  ;;  %v2600_v19 = vadd.f32 %v2599_v29, %v8470_v26  ;;  %v2768_v40 = vpop.f32.mrf.mxu1 }
 0x5c8   :  { %v2769_v10 = vadd.f32 %v2768_v40, %v2600_v19  ;;  %2985 = vmatmul.bf16.gmra.mxu3 %v10547_v7  ;;  %3478 = vmatmul.bf16.gmra.mxu0 %v8540_v34  ;;  %v8928_v28 = vpack.c.bf16 %v3237_v48, %v3235_v53  ;;  %v10552_v7 = vld [vmem:[#allocation33_spill] sm:$0xff] }
 0x5cb   :  { %v2430_v62 = vpop.f32.mrf.mxu3 }
 0x5cc   :  { %v2431_v46 = vadd.f32 %v2430_v62, %v10548_v61  ;;  %v10554_v62 = vld [vmem:[#allocation96_spill] sm:$0xff] }
 0x5cd   :  { %v2937_v49 = vpop.f32.mrf.mxu2  ;;  %v8933_v29 = vpop.f32.mrf.mxu0 }
 0x5ce   :  { %v8931_v36 = vadd.f32 %v2937_v49, %v2769_v10  ;;  %10550 = vst [vmem:[#allocation80_spill] sm:$0xff] %v8933_v29  ;;  %v8935_v19 = vpop.f32.mrf.mxu1  ;;  %v3239_v60 = vmax.f32 %v2431_v46, 0.0  ;;  %v6261_v10 = vld [vmem:[%s9865_s7 + $0x10] sm:$0xff] }
 0x5cf   :  { %10551 = vst [vmem:[#allocation42_spill] sm:$0xff] %v8935_v19  ;;  %3960 = vmatpush.bf16.msrb.mxu2 %v6261_v10 }
 0x5d0   :  { %10549 = vst [vmem:[#allocation65_spill] sm:$0xff] %v8931_v36 }
 0x5d3   :  { %v2432_v40 = vpop.f32.mrf.mxu3 }
 0x5d4   :  { %v2433_v34 = vadd.f32 %v2432_v40, %v10552_v7  ;;  %v10555_v40 = vld [vmem:[#allocation72_spill] sm:$0xff] }
 0x5d5   :  { %v8938_v57 = vpop.f32.mrf.mxu2  ;;  %v2604_v52 = vpop.f32.mrf.mxu0 }
 0x5d6   :  { %10553 = vst [vmem:[#allocation128_spill] sm:$0xff] %v8938_v57  ;;  %v3241_v53 = vmax.f32 %v2433_v34, 0.0  ;;  %v2605_v48 = vadd.f32 %v2604_v52, %v8470_v26  ;;  %v2773_v22 = vpop.f32.mrf.mxu1 }
 0x5d8   :  { %v2774_v17 = vadd.f32 %v2773_v22, %v2605_v48  ;;  %2990 = vmatmul.bf16.gmra.mxu3 %v10554_v62  ;;  %3483 = vmatmul.bf16.gmra.mxu0 %v8554_v2  ;;  %v8946_v61 = vpack.c.bf16 %v3241_v53, %v3239_v60  ;;  %v10559_v62 = vld [vmem:[#allocation37_spill] sm:$0xff] }
 0x5db   :  { %v2435_v49 = vpop.f32.mrf.mxu3 }
 0x5dc   :  { %v2436_v7 = vadd.f32 %v2435_v49, %v10555_v40  ;;  %v10561_v49 = vld [vmem:[#allocation32_spill] sm:$0xff] }
 0x5dd   :  { %v2942_v46 = vpop.f32.mrf.mxu2  ;;  %v8951_v52 = vpop.f32.mrf.mxu0 }
 0x5de   :  { %v8949_v34 = vadd.f32 %v2942_v46, %v2774_v17  ;;  %10557 = vst [vmem:[#allocation90_spill] sm:$0xff] %v8951_v52  ;;  %v8953_v48 = vpop.f32.mrf.mxu1  ;;  %v3243_v19 = vmax.f32 %v2436_v7, 0.0  ;;  %v10562_v46 = vld [vmem:[#allocation78_spill] sm:$0xff] }
 0x5df   :  { %10558 = vst [vmem:[#allocation131_spill] sm:$0xff] %v8953_v48 }
 0x5e0   :  { %10556 = vst [vmem:[#allocation59_spill] sm:$0xff] %v8949_v34 }
 0x5e3   :  { %v2437_v22 = vpop.f32.mrf.mxu3 }
 0x5e4   :  { %v2438_v2 = vadd.f32 %v2437_v22, %v10559_v62 }
 0x5e5   :  { %v8956_v36 = vpop.f32.mrf.mxu2  ;;  %v2609_v57 = vpop.f32.mrf.mxu0 }
 0x5e6   :  { %10560 = vst [vmem:[#allocation26_spill] sm:$0xff] %v8956_v36  ;;  %v3245_v60 = vmax.f32 %v2438_v2, 0.0  ;;  %v2610_v53 = vadd.f32 %v2609_v57, %v8470_v26  ;;  %v2778_v10 = vpop.f32.mrf.mxu1  ;;  %v10566_v57 = vld [vmem:[#allocation41_spill] sm:$0xff] }
 0x5e8   :  { %v2779_v29 = vadd.f32 %v2778_v10, %v2610_v53  ;;  %2995 = vmatmul.bf16.gmra.mxu3 %v10561_v49  ;;  %3488 = vmatmul.bf16.gmra.mxu0 %v8568_v11  ;;  %v8961_v17 = vpack.c.bf16 %v3245_v60, %v3243_v19 }
 0x5eb   :  { %v2440_v40 = vpop.f32.mrf.mxu3 }
 0x5ec   :  { %v2441_v34 = vadd.f32 %v2440_v40, %v10562_v46  ;;  %v10568_v40 = vld [vmem:[#allocation46_spill] sm:$0xff]  ;;  %v10569_v46 = vld [vmem:[#allocation84_spill] sm:$0xff] }
 0x5ed   :  { %v2947_v48 = vpop.f32.mrf.mxu2  ;;  %v8966_v62 = vpop.f32.mrf.mxu0 }
 0x5ee   :  { %v8964_v22 = vadd.f32 %v2947_v48, %v2779_v29  ;;  %10564 = vst [vmem:[#allocation8_spill] sm:$0xff] %v8966_v62  ;;  %v8968_v7 = vpop.f32.mrf.mxu1  ;;  %v3247_v49 = vmax.f32 %v2441_v34, 0.0 }
 0x5ef   :  { %10565 = vst [vmem:[#allocation132_spill] sm:$0xff] %v8968_v7 }
 0x5f0   :  { %10563 = vst [vmem:[#allocation57_spill] sm:$0xff] %v8964_v22 }
 0x5f3   :  { %v2442_v2 = vpop.f32.mrf.mxu3 }
 0x5f4   :  { %v2443_v36 = vadd.f32 %v2442_v2, %v10566_v57 }
 0x5f5   :  { %v8971_v53 = vpop.f32.mrf.mxu2  ;;  %v2614_v10 = vpop.f32.mrf.mxu0 }
 0x5f6   :  { %10567 = vst [vmem:[#allocation133_spill] sm:$0xff] %v8971_v53  ;;  %v3249_v11 = vmax.f32 %v2443_v36, 0.0  ;;  %v2615_v19 = vadd.f32 %v2614_v10, %v8470_v26  ;;  %v2783_v60 = vpop.f32.mrf.mxu1  ;;  %v10572_v10 = vld [vmem:[#allocation45_spill] sm:$0xff] }
 0x5f8   :  { %v2784_v52 = vadd.f32 %v2783_v60, %v2615_v19  ;;  %3000 = vmatmul.bf16.gmra.mxu3 %v10568_v40  ;;  %3493 = vmatmul.bf16.gmra.mxu0 %v8582_v15  ;;  %v8976_v29 = vpack.c.bf16 %v3249_v11, %v3247_v49 }
 0x5fb   :  { %v2445_v48 = vpop.f32.mrf.mxu3 }
 0x5fc   :  { %v2446_v22 = vadd.f32 %v2445_v48, %v10569_v46  ;;  %v10574_v48 = vld [vmem:[#allocation50_spill] sm:$0xff]  ;;  %v10575_v46 = vld [vmem:[#allocation89_spill] sm:$0xff] }
 0x5fd   :  { %v2952_v7 = vpop.f32.mrf.mxu2  ;;  %v8981_v57 = vpop.f32.mrf.mxu0 }
 0x5fe   :  { %v8979_v2 = vadd.f32 %v2952_v7, %v2784_v52  ;;  %v8983_v34 = vpop.f32.mrf.mxu1  ;;  %v3251_v40 = vmax.f32 %v2446_v22, 0.0 }
 0x5ff   :  { %10571 = vst [vmem:[#allocation63_spill] sm:$0xff] %v8983_v34 }
 0x600   :  { %10570 = vst [vmem:[#allocation29_spill] sm:$0xff] %v8979_v2 }
 0x603   :  { %v2447_v36 = vpop.f32.mrf.mxu3 }
 0x604   :  { %v2448_v53 = vadd.f32 %v2447_v36, %v10572_v10 }
 0x605   :  { %v8986_v19 = vpop.f32.mrf.mxu2  ;;  %v2619_v60 = vpop.f32.mrf.mxu0 }
 0x606   :  { %10573 = vst [vmem:[#allocation10_spill] sm:$0xff] %v8986_v19  ;;  %v3253_v15 = vmax.f32 %v2448_v53, 0.0  ;;  %v2620_v49 = vadd.f32 %v2619_v60, %v8470_v26  ;;  %v2788_v11 = vpop.f32.mrf.mxu1  ;;  %v10576_v53 = vld [vmem:[#allocation49_spill] sm:$0xff] }
 0x608   :  { %v2789_v62 = vadd.f32 %v2788_v11, %v2620_v49  ;;  %3005 = vmatmul.bf16.gmra.mxu3 %v10574_v48  ;;  %3498 = vmatmul.bf16.gmra.mxu0 %v8605_v9  ;;  %v8991_v52 = vpack.c.bf16 %v3253_v15, %v3251_v40  ;;  %v6260_v9 = vld [vmem:[%s9865_s7 + $0x8] sm:$0xff] }
 0x609   :  { %v10577_v40 = vld [vmem:[#allocation44_spill] sm:$0xff]  ;;  %3961 = vmatpush.bf16.msrb.mxu2 %v6260_v9 }
 0x60b   :  { %v2450_v7 = vpop.f32.mrf.mxu3 }
 0x60c   :  { %v2451_v2 = vadd.f32 %v2450_v7, %v10575_v46 }
 0x60d   :  { %v2957_v34 = vpop.f32.mrf.mxu2  ;;  %v8996_v10 = vpop.f32.mrf.mxu0 }
 0x60e   :  { %v8994_v36 = vadd.f32 %v2957_v34, %v2789_v62  ;;  %v3255_v49 = vmax.f32 %v2451_v2, 0.0 }
 0x613   :  { %v2452_v22 = vpop.f32.mrf.mxu3 }
 0x614   :  { %v2453_v19 = vadd.f32 %v2452_v22, %v10576_v53 }
 0x615   :  { %v8999_v60 = vpop.f32.mrf.mxu0 }
 0x616   :  { %v3257_v11 = vmax.f32 %v2453_v19, 0.0 }
 0x618   :  { %3010 = vmatmul.bf16.gmra.mxu3 %v10577_v40  ;;  %3503 = vmatmul.bf16.gmra.mxu0 %v8619_v41  ;;  %v9006_v15 = vpack.c.bf16 %v3257_v11, %v3255_v49 }
 0x61b   :  { %v2971_v62 = vpop.f32.mrf.mxu3 }
 0x61c   :  { %v2972_v48 = vadd.f32 %v2971_v62, %v8483_v14 }
 0x61d   :  { %v9008_v34 = vpop.f32.mrf.mxu0 }
 0x61e   :  { %v3132_v46 = vmax.f32 %v2972_v48, 0.0 }
 0x623   :  { %v2973_v7 = vpop.f32.mrf.mxu3 }
 0x624   :  { %v2974_v2 = vadd.f32 %v2973_v7, %v8487_v33 }
 0x625   :  { %v9012_v19 = vpop.f32.mrf.mxu0 }
 0x626   :  { %v3134_v22 = vmax.f32 %v2974_v2, 0.0 }
 0x628   :  { %v3260_v53 = vpack.c.bf16 %v3134_v22, %v3132_v46  ;;  %3015 = vmatmul.bf16.gmra.mxu3 %v8128_v32  ;;  %3508 = vmatmul.bf16.gmra.mxu0 %v8633_v6 }
 0x62a   :  { %3632 = vmatmul.bf16.vlgmr.msrb.gmra.mxu1 %v3260_v53 }
 0x62b   :  { %v2976_v41 = vpop.f32.mrf.mxu3 }
 0x62c   :  { %v2977_v11 = vadd.f32 %v2976_v41, %v8497_v1 }
 0x62d   :  { %v9016_v49 = vpop.f32.mrf.mxu0 }
 0x62e   :  { %v3136_v33 = vmax.f32 %v2977_v11, 0.0 }
 0x633   :  { %v2978_v9 = vpop.f32.mrf.mxu3 }
 0x634   :  { %v2979_v14 = vadd.f32 %v2978_v9, %v8501_v4 }
 0x635   :  { %v9020_v40 = vpop.f32.mrf.mxu0 }
 0x636   :  { %v3138_v62 = vmax.f32 %v2979_v14, 0.0 }
 0x638   :  { %3020 = vmatmul.bf16.gmra.mxu3 %v8149_v8  ;;  %3513 = vmatmul.bf16.gmra.mxu0 %v8647_v43  ;;  %v3262_v32 = vpack.c.bf16 %v3138_v62, %v3136_v33 }
 0x63a   :  { %3637 = vmatmul.bf16.gmra.mxu1 %v3262_v32 }
 0x63b   :  { %v2981_v6 = vpop.f32.mrf.mxu3 }
 0x63c   :  { %v2982_v7 = vadd.f32 %v2981_v6, %v8511_v23 }
 0x63d   :  { %v9024_v48 = vpop.f32.mrf.mxu0 }
 0x63e   :  { %v3140_v4 = vmax.f32 %v2982_v7, 0.0 }
 0x643   :  { %v2983_v2 = vpop.f32.mrf.mxu3 }
 0x644   :  { %v2984_v1 = vadd.f32 %v2983_v2, %v8515_v18 }
 0x645   :  { %v9028_v46 = vpop.f32.mrf.mxu0 }
 0x646   :  { %v3142_v22 = vmax.f32 %v2984_v1, 0.0 }
 0x648   :  { %3025 = vmatmul.bf16.gmra.mxu3 %v8170_v20  ;;  %3518 = vmatmul.bf16.gmra.mxu0 %v8670_v30  ;;  %v3264_v8 = vpack.c.bf16 %v3142_v22, %v3140_v4  ;;  %v6259_v20 = vld [vmem:[%s9865_s7] sm:$0xff] }
 0x649   :  { %3962 = vmatpush.bf16.msrb.mxu2 %v6259_v20 }
 0x64a   :  { %3642 = vmatmul.bf16.gmra.mxu1 %v3264_v8 }
 0x64b   :  { %v2986_v43 = vpop.f32.mrf.mxu3 }
 0x64c   :  { %v2987_v41 = vadd.f32 %v2986_v43, %v8531_v50 }
 0x64d   :  { %v9032_v53 = vpop.f32.mrf.mxu0 }
 0x64e   :  { %v3144_v18 = vmax.f32 %v2987_v41, 0.0  ;;  %v10579_v41 = vld [vmem:[#allocation86_spill] sm:$0xff] }
 0x653   :  { %v2988_v11 = vpop.f32.mrf.mxu3 }
 0x654   :  { %v2989_v23 = vadd.f32 %v2988_v11, %v8535_v59 }
 0x655   :  { %v9036_v9 = vpop.f32.mrf.mxu0 }
 0x656   :  { %v3146_v14 = vmax.f32 %v2989_v23, 0.0  ;;  %v10580_v23 = vld [vmem:[#allocation110_spill] sm:$0xff] }
 0x658   :  { %3030 = vmatmul.bf16.gmra.mxu3 %v8191_v27  ;;  %3523 = vmatmul.bf16.gmra.mxu0 %v8684_v35  ;;  %v3266_v30 = vpack.c.bf16 %v3146_v14, %v3144_v18 }
 0x65a   :  { %3647 = vmatmul.bf16.gmra.mxu1 %v3266_v30 }
 0x65b   :  { %v2991_v33 = vpop.f32.mrf.mxu3 }
 0x65c   :  { %v2992_v59 = vadd.f32 %v2991_v33, %v8545_v38  ;;  %v10578_v38 = vld [vmem:[#allocation95_spill] sm:$0xff] }
 0x65d   :  { %v9043_v50 = vpop.f32.mrf.mxu0 }
 0x65e   :  { %v3148_v6 = vmax.f32 %v2992_v59, 0.0 }
 0x663   :  { %v2993_v62 = vpop.f32.mrf.mxu3 }
 0x664   :  { %v2994_v32 = vadd.f32 %v2993_v62, %v8549_v55  ;;  %v10582_v62 = vld [vmem:[#allocation7_spill] sm:$0xff] }
 0x665   :  { %v9047_v2 = vpop.f32.mrf.mxu0 }
 0x666   :  { %v3150_v7 = vmax.f32 %v2994_v32, 0.0 }
 0x668   :  { %3035 = vmatmul.bf16.gmra.mxu3 %v8206_v47  ;;  %3528 = vmatmul.bf16.gmra.mxu0 %v8698_v51  ;;  %v3268_v27 = vpack.c.bf16 %v3150_v7, %v3148_v6 }
 0x66a   :  { %3652 = vmatmul.bf16.gmra.mxu1 %v3268_v27 }
 0x66b   :  { %v2996_v35 = vpop.f32.mrf.mxu3 }
 0x66c   :  { %v2997_v4 = vadd.f32 %v2996_v35, %v8559_v21  ;;  %v10581_v21 = vld [vmem:[#allocation117_spill] sm:$0xff] }
 0x66d   :  { %v9051_v1 = vpop.f32.mrf.mxu0  ;;  %v10583_v35 = vld [vmem:[#allocation25_spill] sm:$0xff] }
 0x66e   :  { %v3152_v43 = vmax.f32 %v2997_v4, 0.0 }
 0x673   :  { %v2998_v22 = vpop.f32.mrf.mxu3 }
 0x674   :  { %v2999_v8 = vadd.f32 %v2998_v22, %v10578_v38 }
 0x675   :  { %v9057_v47 = vpop.f32.mrf.mxu0 }
 0x676   :  { %v3154_v55 = vmax.f32 %v2999_v8, 0.0 }
 0x678   :  { %3040 = vmatmul.bf16.gmra.mxu3 %v10579_v41  ;;  %3533 = vmatmul.bf16.gmra.mxu0 %v8712_v39  ;;  %v3270_v11 = vpack.c.bf16 %v3154_v55, %v3152_v43  ;;  %v10584_v43 = vld [vmem:[#allocation9_spill] sm:$0xff]  ;;  %v9073_v41 = vpop.f32.mrf.mxu1 }
 0x67a   :  { %3657 = vmatmul.bf16.gmra.mxu1 %v3270_v11 }
 0x67b   :  { %v3001_v51 = vpop.f32.mrf.mxu3 }
 0x67c   :  { %v3002_v18 = vadd.f32 %v3001_v51, %v10580_v23  ;;  %v10585_v23 = vld [vmem:[#allocation101_spill] sm:$0xff] }
 0x67d   :  { %v9060_v20 = vpop.f32.mrf.mxu0 }
 0x67e   :  { %v3156_v33 = vmax.f32 %v3002_v18, 0.0 }
 0x683   :  { %v3003_v14 = vpop.f32.mrf.mxu3 }
 0x684   :  { %v3004_v30 = vadd.f32 %v3003_v14, %v10581_v21 }
 0x685   :  { %v9065_v6 = vpop.f32.mrf.mxu0 }
 0x686   :  { %v3158_v59 = vmax.f32 %v3004_v30, 0.0 }
 0x688   :  { %3045 = vmatmul.bf16.gmra.mxu3 %v10582_v62  ;;  %3538 = vmatmul.bf16.gmra.mxu0 %v8735_v13  ;;  %v3272_v32 = vpack.c.bf16 %v3158_v59, %v3156_v33  ;;  %v9082_v33 = vld [vmem:[%s9864_s6] ss:$0 sm:$0xff] }
 0x68a   :  { %3662 = vmatmul.bf16.gmra.mxu1 %v3272_v32 }
 0x68b   :  { %v3006_v39 = vpop.f32.mrf.mxu3 }
 0x68c   :  { %v3007_v7 = vadd.f32 %v3006_v39, %v8593_v24  ;;  %v3467_v39 = vadd.f32 %v9082_v33, %v9008_v34 }
 0x68d   :  { %v9069_v8 = vpop.f32.mrf.mxu0 }
 0x68e   :  { %v3160_v22 = vmax.f32 %v3007_v7, 0.0 }
 0x693   :  { %v3008_v27 = vpop.f32.mrf.mxu3 }
 0x694   :  { %v3009_v4 = vadd.f32 %v3008_v27, %v10583_v35 }
 0x695   :  { %v9075_v11 = vpop.f32.mrf.mxu0 }
 0x696   :  { %v3162_v38 = vmax.f32 %v3009_v4, 0.0 }
 0x698   :  { %3050 = vmatmul.bf16.gmra.mxu3 %v10584_v43  ;;  %3543 = vmatmul.bf16.gmra.mxu0 %v8749_v25  ;;  %v3274_v55 = vpack.c.bf16 %v3162_v38, %v3160_v22  ;;  %v10586_v25 = vld [vmem:[#allocation11_spill] sm:$0xff] }
 0x69a   :  { %3667 = vmatmul.bf16.gmra.mxu1 %v3274_v55  ;;  %v10587_v55 = vld [vmem:[#allocation67_spill] sm:$0xff] }
 0x69b   :  { %v3011_v13 = vpop.f32.mrf.mxu3 }
 0x69c   :  { %v3012_v24 = vadd.f32 %v3011_v13, %v8610_v0  ;;  %v3465_v0 = vadd.f32 %v9082_v33, %v8999_v60 }
 0x69d   :  { %v9088_v32 = vpop.f32.mrf.mxu0 }
 0x69e   :  { %v3164_v14 = vmax.f32 %v3012_v24, 0.0 }
 0x6a3   :  { %v3013_v51 = vpop.f32.mrf.mxu3 }
 0x6a4   :  { %v3014_v18 = vadd.f32 %v3013_v51, %v10585_v23 }
 0x6a5   :  { %v9094_v24 = vpop.f32.mrf.mxu0 }
 0x6a6   :  { %v3166_v21 = vmax.f32 %v3014_v18, 0.0  ;;  %v10588_v18 = vld [vmem:[#allocation13_spill] sm:$0xff] }
 0x6a7   :  { %v3633_v30 = vpop.f32.mrf.mxu1 }
 0x6a8   :  { %3055 = vmatmul.bf16.gmra.mxu3 %v10586_v25  ;;  %3548 = vmatmul.bf16.gmra.mxu0 %v8763_v63  ;;  %v3276_v59 = vpack.c.bf16 %v3166_v21, %v3164_v14  ;;  %v3634_v7 = vadd.f32 %v3633_v30, %v3465_v0  ;;  %v3472_v21 = vadd.f32 %v9082_v33, %v9016_v49 }
 0x6aa   :  { %3672 = vmatmul.bf16.gmra.mxu1 %v3276_v59  ;;  %v3793_v4 = vmax.f32 %v3634_v7, 0.0 }
 0x6ab   :  { %v3016_v62 = vpop.f32.mrf.mxu3 }
 0x6ac   :  { %v3017_v22 = vadd.f32 %v3016_v62, %v8624_v37  ;;  %v3470_v37 = vadd.f32 %v9082_v33, %v9012_v19 }
 0x6ad   :  { %v9102_v59 = vpop.f32.mrf.mxu0 }
 0x6ae   :  { %v3168_v51 = vmax.f32 %v3017_v22, 0.0 }
 0x6af   :  { %v3635_v27 = vpop.f32.mrf.mxu1 }
 0x6b0   :  { %v3636_v35 = vadd.f32 %v3635_v27, %v3467_v39  ;;  %v10589_v39 = vld [vmem:[#allocation120_spill] sm:$0xff] }
 0x6b2   :  { %v3794_v38 = vmax.f32 %v3636_v35, 0.0 }
 0x6b3   :  { %v3018_v43 = vpop.f32.mrf.mxu3 }
 0x6b4   :  { %v3857_v63 = vpack.c.bf16 %v3794_v38, %v3793_v4  ;;  %v3019_v13 = vadd.f32 %v3018_v43, %v10587_v55 }
 0x6b5   :  { %v9108_v55 = vpop.f32.mrf.mxu0 }
 0x6b6   :  { %v3170_v60 = vmax.f32 %v3019_v13, 0.0  ;;  %3963 = vmatmul.bf16.vlgmr.msrb.gmra.mxu2 %v3857_v63  ;;  %v10591_v63 = vld [vmem:[#allocation15_spill] sm:$0xff] }
 0x6b7   :  { %v3638_v23 = vpop.f32.mrf.mxu1 }
 0x6b8   :  { %3060 = vmatmul.bf16.gmra.mxu3 %v10588_v18  ;;  %3553 = vmatmul.bf16.gmra.mxu0 %v8777_v44  ;;  %v3278_v34 = vpack.c.bf16 %v3170_v60, %v3168_v51  ;;  %v3639_v30 = vadd.f32 %v3638_v23, %v3470_v37  ;;  %v10590_v44 = vld [vmem:[#allocation104_spill] sm:$0xff]  ;;  %v3475_v51 = vadd.f32 %v9082_v33, %v9020_v40  ;;  %v10592_v37 = vld [vmem:[#allocation77_spill] sm:$0xff] }
 0x6b9   :  { %v3477_v60 = vadd.f32 %v9082_v33, %v9024_v48 }
 0x6ba   :  { %3677 = vmatmul.bf16.gmra.mxu1 %v3278_v34  ;;  %v3795_v0 = vmax.f32 %v3639_v30, 0.0 }
 0x6bb   :  { %v3021_v14 = vpop.f32.mrf.mxu3 }
 0x6bc   :  { %v3022_v7 = vadd.f32 %v3021_v14, %v10589_v39 }
 0x6be   :  { %v3172_v38 = vmax.f32 %v3022_v7, 0.0 }
 0x6bf   :  { %v3640_v25 = vpop.f32.mrf.mxu1 }
 0x6c0   :  { %v3641_v62 = vadd.f32 %v3640_v25, %v3472_v21 }
 0x6c2   :  { %v3796_v27 = vmax.f32 %v3641_v62, 0.0  ;;  %v10593_v62 = vld [vmem:[#allocation126_spill] sm:$0xff] }
 0x6c3   :  { %v3023_v35 = vpop.f32.mrf.mxu3 }
 0x6c4   :  { %v3024_v4 = vadd.f32 %v3023_v35, %v10590_v44  ;;  %v3858_v22 = vpack.c.bf16 %v3796_v27, %v3795_v0  ;;  %v10594_v35 = vld [vmem:[#allocation17_spill] sm:$0xff] }
 0x6c6   :  { %v3174_v43 = vmax.f32 %v3024_v4, 0.0  ;;  %3968 = vmatmul.bf16.gmra.mxu2 %v3858_v22  ;;  %v3480_v4 = vadd.f32 %v9082_v33, %v9028_v46  ;;  %v3482_v22 = vadd.f32 %v9082_v33, %v9032_v53  ;;  %v10597_v53 = vld [vmem:[#allocation19_spill] sm:$0xff] }
 0x6c7   :  { %v3643_v19 = vpop.f32.mrf.mxu1 }
 0x6c8   :  { %3065 = vmatmul.bf16.gmra.mxu3 %v10591_v63  ;;  %3558 = vmatmul.bf16.gmra.mxu0 %v8800_v3  ;;  %v3280_v49 = vpack.c.bf16 %v3174_v43, %v3172_v38  ;;  %v3644_v23 = vadd.f32 %v3643_v19, %v3475_v51  ;;  %v9115_v3 = vpop.f32.mrf.mxu0 }
 0x6ca   :  { %3682 = vmatmul.bf16.gmra.mxu1 %v3280_v49  ;;  %v3797_v14 = vmax.f32 %v3644_v23, 0.0 }
 0x6cb   :  { %v3026_v13 = vpop.f32.mrf.mxu3 }
 0x6cc   :  { %v3027_v21 = vadd.f32 %v3026_v13, %v10592_v37  ;;  %v10595_v13 = vld [vmem:[#allocation106_spill] sm:$0xff] }
 0x6ce   :  { %v3176_v7 = vmax.f32 %v3027_v21, 0.0 }
 0x6cf   :  { %v3645_v18 = vpop.f32.mrf.mxu1 }
 0x6d0   :  { %v3646_v34 = vadd.f32 %v3645_v18, %v3477_v60  ;;  %v9124_v38 = vpop.f32.mrf.mxu0 }
 0x6d2   :  { %v3798_v30 = vmax.f32 %v3646_v34, 0.0 }
 0x6d3   :  { %v3028_v25 = vpop.f32.mrf.mxu3 }
 0x6d4   :  { %v3029_v0 = vadd.f32 %v3028_v25, %v10593_v62  ;;  %v3859_v39 = vpack.c.bf16 %v3798_v30, %v3797_v14  ;;  %v3485_v62 = vadd.f32 %v9082_v33, %v9036_v9 }
 0x6d6   :  { %v3178_v27 = vmax.f32 %v3029_v0, 0.0  ;;  %3973 = vmatmul.bf16.gmra.mxu2 %v3859_v39  ;;  %v3487_v0 = vadd.f32 %v9082_v33, %v9043_v50 }
 0x6d7   :  { %v3648_v40 = vpop.f32.mrf.mxu1 }
 0x6d8   :  { %3070 = vmatmul.bf16.gmra.mxu3 %v10594_v35  ;;  %3563 = vmatmul.bf16.gmra.mxu0 %v8817_v45  ;;  %v3282_v48 = vpack.c.bf16 %v3178_v27, %v3176_v7  ;;  %v3649_v43 = vadd.f32 %v3648_v40, %v3480_v4  ;;  %v10596_v45 = vld [vmem:[#allocation83_spill] sm:$0xff]  ;;  %v9128_v21 = vpop.f32.mrf.mxu0 }
 0x6da   :  { %3687 = vmatmul.bf16.gmra.mxu1 %v3282_v48  ;;  %v3799_v49 = vmax.f32 %v3649_v43, 0.0  ;;  %v10598_v48 = vld [vmem:[#allocation38_spill] sm:$0xff] }
 0x6db   :  { %v3031_v44 = vpop.f32.mrf.mxu3 }
 0x6dc   :  { %v3032_v51 = vadd.f32 %v3031_v44, %v10595_v13  ;;  %v10600_v13 = vld [vmem:[#allocation21_spill] sm:$0xff] }
 0x6de   :  { %v3180_v14 = vmax.f32 %v3032_v51, 0.0 }
 0x6df   :  { %v3650_v19 = vpop.f32.mrf.mxu1 }
 0x6e0   :  { %v3651_v63 = vadd.f32 %v3650_v19, %v3482_v22  ;;  %v9136_v40 = vpop.f32.mrf.mxu0 }
 0x6e2   :  { %v3800_v60 = vmax.f32 %v3651_v63, 0.0 }
 0x6e3   :  { %v3033_v23 = vpop.f32.mrf.mxu3 }
 0x6e4   :  { %v3034_v18 = vadd.f32 %v3033_v23, %v10596_v45  ;;  %v3860_v34 = vpack.c.bf16 %v3800_v60, %v3799_v49  ;;  %v3490_v60 = vadd.f32 %v9082_v33, %v9047_v2  ;;  %v3492_v45 = vadd.f32 %v9082_v33, %v9051_v1 }
 0x6e6   :  { %v3182_v37 = vmax.f32 %v3034_v18, 0.0  ;;  %3978 = vmatmul.bf16.gmra.mxu2 %v3860_v34 }
 0x6e7   :  { %v3653_v46 = vpop.f32.mrf.mxu1 }
 0x6e8   :  { %3075 = vmatmul.bf16.gmra.mxu3 %v10597_v53  ;;  %3568 = vmatmul.bf16.gmra.mxu0 %v8840_v58  ;;  %v3284_v30 = vpack.c.bf16 %v3182_v37, %v3180_v14  ;;  %v3654_v39 = vadd.f32 %v3653_v46, %v3485_v62  ;;  %v10599_v58 = vld [vmem:[#allocation109_spill] sm:$0xff]  ;;  %v9144_v23 = vpop.f32.mrf.mxu0  ;;  %v10601_v46 = vld [vmem:[#allocation124_spill] sm:$0xff] }
 0x6ea   :  { %3692 = vmatmul.bf16.gmra.mxu1 %v3284_v30  ;;  %v3801_v35 = vmax.f32 %v3654_v39, 0.0 }
 0x6eb   :  { %v3036_v25 = vpop.f32.mrf.mxu3 }
 0x6ec   :  { %v3037_v44 = vadd.f32 %v3036_v25, %v10598_v48 }
 0x6ee   :  { %v3184_v63 = vmax.f32 %v3037_v44, 0.0  ;;  %v3495_v44 = vadd.f32 %v9082_v33, %v9057_v47 }
 0x6ef   :  { %v3655_v7 = vpop.f32.mrf.mxu1 }
 0x6f0   :  { %v3656_v27 = vadd.f32 %v3655_v7, %v3487_v0  ;;  %v9150_v39 = vpop.f32.mrf.mxu0 }
 0x6f2   :  { %v3802_v4 = vmax.f32 %v3656_v27, 0.0 }
 0x6f3   :  { %v3038_v22 = vpop.f32.mrf.mxu3 }
 0x6f4   :  { %v3039_v43 = vadd.f32 %v3038_v22, %v10599_v58  ;;  %v3861_v19 = vpack.c.bf16 %v3802_v4, %v3801_v35  ;;  %v10603_v35 = vld [vmem:[#allocation23_spill] sm:$0xff]  ;;  %v3497_v4 = vadd.f32 %v9082_v33, %v9060_v20 }
 0x6f6   :  { %v3186_v49 = vmax.f32 %v3039_v43, 0.0  ;;  %3983 = vmatmul.bf16.gmra.mxu2 %v3861_v19 }
 0x6f7   :  { %v3658_v9 = vpop.f32.mrf.mxu1 }
 0x6f8   :  { %3080 = vmatmul.bf16.gmra.mxu3 %v10600_v13  ;;  %3573 = vmatmul.bf16.gmra.mxu0 %v8860_v5  ;;  %v3286_v50 = vpack.c.bf16 %v3186_v49, %v3184_v63  ;;  %v3659_v18 = vadd.f32 %v3658_v9, %v3490_v60  ;;  %v10602_v5 = vld [vmem:[#allocation107_spill] sm:$0xff]  ;;  %v9158_v43 = vpop.f32.mrf.mxu0  ;;  %v10604_v49 = vld [vmem:[#allocation100_spill] sm:$0xff] }
 0x6fa   :  { %3697 = vmatmul.bf16.gmra.mxu1 %v3286_v50  ;;  %v3803_v37 = vmax.f32 %v3659_v18, 0.0 }
 0x6fb   :  { %v3041_v51 = vpop.f32.mrf.mxu3 }
 0x6fc   :  { %v3042_v53 = vadd.f32 %v3041_v51, %v10601_v46  ;;  %v3500_v46 = vadd.f32 %v9082_v33, %v9065_v6 }
 0x6fe   :  { %v3188_v7 = vmax.f32 %v3042_v53, 0.0  ;;  %v3502_v53 = vadd.f32 %v9082_v33, %v9069_v8 }
 0x6ff   :  { %v3660_v34 = vpop.f32.mrf.mxu1 }
 0x700   :  { %v3661_v14 = vadd.f32 %v3660_v34, %v3492_v45  ;;  %v10606_v34 = vld [vmem:[#allocation52_spill] sm:$0xff] }
 0x702   :  { %v3804_v30 = vmax.f32 %v3661_v14, 0.0  ;;  %v9164_v14 = vpop.f32.mrf.mxu0 }
 0x703   :  { %v3043_v25 = vpop.f32.mrf.mxu3 }
 0x704   :  { %v3044_v62 = vadd.f32 %v3043_v25, %v10602_v5  ;;  %v3862_v0 = vpack.c.bf16 %v3804_v30, %v3803_v37 }
 0x706   :  { %v3190_v2 = vmax.f32 %v3044_v62, 0.0  ;;  %3988 = vmatmul.bf16.gmra.mxu2 %v3862_v0  ;;  %v10607_v0 = vld [vmem:[#allocation113_spill] sm:$0xff] }
 0x707   :  { %v3663_v27 = vpop.f32.mrf.mxu1 }
 0x708   :  { %3085 = vmatmul.bf16.gmra.mxu3 %v10603_v35  ;;  %3578 = vmatmul.bf16.gmra.mxu0 %v8880_v56  ;;  %v3288_v1 = vpack.c.bf16 %v3190_v2, %v3188_v7  ;;  %v3664_v22 = vadd.f32 %v3663_v27, %v3495_v44  ;;  %v10605_v56 = vld [vmem:[#allocation111_spill] sm:$0xff]  ;;  %v10608_v35 = vld [vmem:[#allocation94_spill] sm:$0xff] }
 0x70a   :  { %3702 = vmatmul.bf16.gmra.mxu1 %v3288_v1  ;;  %v3805_v63 = vmax.f32 %v3664_v22, 0.0  ;;  %v10609_v22 = vld [vmem:[#allocation58_spill] sm:$0xff] }
 0x70b   :  { %v3046_v48 = vpop.f32.mrf.mxu3 }
 0x70c   :  { %v3047_v9 = vadd.f32 %v3046_v48, %v10604_v49 }
 0x70e   :  { %v3192_v45 = vmax.f32 %v3047_v9, 0.0 }
 0x70f   :  { %v3665_v58 = vpop.f32.mrf.mxu1 }
 0x710   :  { %v3666_v19 = vadd.f32 %v3665_v58, %v3497_v4 }
 0x712   :  { %v3806_v13 = vmax.f32 %v3666_v19, 0.0  ;;  %v3505_v19 = vadd.f32 %v9082_v33, %v9075_v11 }
 0x713   :  { %v3048_v50 = vpop.f32.mrf.mxu3 }
 0x714   :  { %v3049_v51 = vadd.f32 %v3048_v50, %v10605_v56  ;;  %v3863_v60 = vpack.c.bf16 %v3806_v13, %v3805_v63  ;;  %v3507_v63 = vadd.f32 %v9082_v33, %v9088_v32  ;;  %v9182_v56 = vpop.f32.mrf.mxu2  ;;  %v9189_v32 = vstv %s9866_s8 }
 0x716   :  { %v3194_v18 = vmax.f32 %v3049_v51, 0.0  ;;  %3993 = vmatmul.bf16.gmra.mxu2 %v3863_v60  ;;  %v10610_v60 = vld [vmem:[#allocation129_spill] sm:$0xff] }
 0x717   :  { %v3668_v47 = vpop.f32.mrf.mxu1 }
 0x718   :  { %3090 = vmatmul.bf16.gmra.mxu3 %v10606_v34  ;;  %3583 = vmatmul.bf16.gmra.mxu0 %v8895_v12  ;;  %v3290_v20 = vpack.c.bf16 %v3194_v18, %v3192_v45  ;;  %v3669_v30 = vadd.f32 %v3668_v47, %v3500_v46  ;;  %v9171_v12 = vpop.f32.mrf.mxu0  ;;  %v10611_v47 = vld [vmem:[#allocation102_spill] sm:$0xff] }
 0x71a   :  { %3707 = vmatmul.bf16.gmra.mxu1 %v3290_v20  ;;  %v3807_v62 = vmax.f32 %v3669_v30, 0.0  ;;  %v10612_v30 = vld [vmem:[#allocation64_spill] sm:$0xff] }
 0x71b   :  { %v3051_v37 = vpop.f32.mrf.mxu3 }
 0x71c   :  { %v3052_v7 = vadd.f32 %v3051_v37, %v10607_v0 }
 0x71e   :  { %v3196_v44 = vmax.f32 %v3052_v7, 0.0  ;;  %v3510_v7 = vadd.f32 %v9082_v33, %v9094_v24 }
 0x71f   :  { %v3670_v25 = vpop.f32.mrf.mxu1 }
 0x720   :  { %v3671_v5 = vadd.f32 %v3670_v25, %v3502_v53  ;;  %v9180_v49 = vpop.f32.mrf.mxu0 }
 0x722   :  { %v3808_v2 = vmax.f32 %v3671_v5, 0.0 }
 0x723   :  { %v3053_v27 = vpop.f32.mrf.mxu3 }
 0x724   :  { %v3054_v1 = vadd.f32 %v3053_v27, %v10608_v35  ;;  %v3864_v48 = vpack.c.bf16 %v3808_v2, %v3807_v62  ;;  %v3512_v27 = vadd.f32 %v9082_v33, %v9102_v59 }
 0x726   :  { %v3198_v4 = vmax.f32 %v3054_v1, 0.0  ;;  %3998 = vmatmul.bf16.gmra.mxu2 %v3864_v48 }
 0x727   :  { %v3673_v6 = vpop.f32.mrf.mxu1 }
 0x728   :  { %3095 = vmatmul.bf16.gmra.mxu3 %v10609_v22  ;;  %3588 = vmatmul.bf16.gmra.mxu0 %v8910_v54  ;;  %v3292_v8 = vpack.c.bf16 %v3198_v4, %v3196_v44  ;;  %v3674_v9 = vadd.f32 %v3673_v6, %v3505_v19  ;;  %v9191_v53 = vpop.f32.mrf.mxu0  ;;  %v10613_v6 = vld [vmem:[#allocation20_spill] sm:$0xff] }
 0x72a   :  { %3712 = vmatmul.bf16.gmra.mxu1 %v3292_v8  ;;  %v3809_v51 = vmax.f32 %v3674_v9, 0.0  ;;  %v10614_v9 = vld [vmem:[#allocation115_spill] sm:$0xff] }
 0x72b   :  { %v3056_v58 = vpop.f32.mrf.mxu3 }
 0x72c   :  { %v3057_v45 = vadd.f32 %v3056_v58, %v10610_v60 }
 0x72e   :  { %v3200_v37 = vmax.f32 %v3057_v45, 0.0 }
 0x72f   :  { %v3675_v13 = vpop.f32.mrf.mxu1 }
 0x730   :  { %v3676_v50 = vadd.f32 %v3675_v13, %v3507_v63  ;;  %v9200_v4 = vpop.f32.mrf.mxu0 }
 0x732   :  { %v3810_v54 = vmax.f32 %v3676_v50, 0.0 }
 0x733   :  { %v3058_v18 = vpop.f32.mrf.mxu3 }
 0x734   :  { %v3059_v34 = vadd.f32 %v3058_v18, %v10611_v47  ;;  %v3865_v20 = vpack.c.bf16 %v3810_v54, %v3809_v51  ;;  %v10615_v54 = vld [vmem:[#allocation70_spill] sm:$0xff] }
 0x736   :  { %v3202_v11 = vmax.f32 %v3059_v34, 0.0  ;;  %4003 = vmatmul.bf16.gmra.mxu2 %v3865_v20  ;;  %v3515_v20 = vadd.f32 %v9082_v33, %v9108_v55 }
 0x737   :  { %v3678_v46 = vpop.f32.mrf.mxu1 }
 0x738   :  { %3100 = vmatmul.bf16.gmra.mxu3 %v10612_v30  ;;  %3593 = vmatmul.bf16.gmra.mxu0 %v8928_v28  ;;  %v3294_v25 = vpack.c.bf16 %v3202_v11, %v3200_v37  ;;  %v3679_v35 = vadd.f32 %v3678_v46, %v3510_v7  ;;  %v9210_v46 = vpop.f32.mrf.mxu0 }
 0x739   :  { %v3964_v5 = vpop.f32.mrf.mxu2 }
 0x73a   :  { %v3965_v62 = vadd.f32 %v3964_v5, %v9189_v32  ;;  %3717 = vmatmul.bf16.gmra.mxu1 %v3294_v25  ;;  %v3811_v28 = vmax.f32 %v3679_v35, 0.0 }
 0x73b   :  { %v3061_v0 = vpop.f32.mrf.mxu3 }
 0x73c   :  { %v6107_v2 = vmul.f32 -1.442695, %v3965_v62  ;;  %v3062_v22 = vadd.f32 %v3061_v0, %v10613_v6 }
 0x73e   :  { %6281 = vpow2.f32 %v6107_v2  ;;  %v3204_v51 = vmax.f32 %v3062_v22, 0.0 }
 0x73f   :  { %v3680_v1 = vpop.f32.mrf.mxu1 }
 0x740   :  { %v3681_v48 = vadd.f32 %v3680_v1, %v3512_v27 }
 0x741   :  { %v3966_v44 = vpop.f32.mrf.mxu2 }
 0x742   :  { %v3812_v8 = vmax.f32 %v3681_v48, 0.0  ;;  %v3967_v58 = vadd.f32 %v3966_v44, %v9189_v32 }
 0x743   :  { %v3063_v19 = vpop.f32.mrf.mxu3 }
 0x744   :  { %v6282_v63 = vpop.eup %6281  ;;  %v6108_v24 = vmul.f32 -1.442695, %v3967_v58  ;;  %v3064_v13 = vadd.f32 %v3063_v19, %v10614_v9  ;;  %v3866_v50 = vpack.c.bf16 %v3812_v8, %v3811_v28 }
 0x745   :  { %v4316_v59 = vadd.f32 1.0, %v6282_v63  ;;  %v10616_v63 = vld [vmem:[#allocation99_spill] sm:$0xff] }
 0x746   :  { %6283 = vpow2.f32 %v6108_v24  ;;  %v3206_v60 = vmax.f32 %v3064_v13, 0.0  ;;  %4008 = vmatmul.bf16.gmra.mxu2 %v3866_v50 }
 0x747   :  { %6285 = vrcp.f32 %v4316_v59  ;;  %v3683_v45 = vpop.f32.mrf.mxu1  ;;  %v4389_v55 = vand.u32 2147483647, %v4316_v59  ;;  %v4391_v35 = vand.u32 2147483648, %v4316_v59  ;;  %vm4385_vm4 = vweird.f32 %v4316_v59 }
 0x748   :  { %3105 = vmatmul.bf16.gmra.mxu3 %v10615_v54  ;;  %3598 = vmatmul.bf16.gmra.mxu0 %v8946_v61  ;;  %v3296_v18 = vpack.c.bf16 %v3206_v60, %v3204_v51  ;;  %v3684_v62 = vadd.f32 %v3683_v45, %v3515_v20  ;;  %v3517_v61 = vadd.f32 %v9082_v33, %v9115_v3  ;;  %v9222_v60 = vpop.f32.mrf.mxu0  ;;  %v10617_v20 = vld [vmem:[#allocation76_spill] sm:$0xff] }
 0x749   :  { %v3969_v47 = vpop.f32.mrf.mxu2  ;;  %v4392_v50 = vor.u32 1.1754944e-38, %v4391_v35  ;;  %vm4390_vm7 = vcmp.eq.f32.partialorder %v4389_v55, 8.507059e+37  ;;  %v3520_v35 = vadd.f32 %v9082_v33, %v9124_v38 }
 0x74a   :  { %v3970_v34 = vadd.f32 %v3969_v47, %v9189_v32  ;;  %3722 = vmatmul.bf16.gmra.mxu1 %v3296_v18  ;;  %v3813_v1 = vmax.f32 %v3684_v62, 0.0 }
 0x74b   :  { %v3066_v37 = vpop.f32.mrf.mxu3 }
 0x74c   :  { %v6284_v11 = vpop.eup %6283  ;;  %v6109_v30 = vmul.f32 -1.442695, %v3970_v34  ;;  %v3067_v22 = vadd.f32 %v3066_v37, %v8788_v16  ;;  %v2567_v37 = vadd.f32 %v8807_v42, %v8470_v26 }
 0x74d   :  { %v6286_v25 = vpop.eup %6285  ;;  %v9212_v5 = vadd.f32 1.0, %v6284_v11 }
 0x74e   :  { %v4381_v0 = vmul.f32 %v6286_v25, %v4316_v59  ;;  %6287 = vpow2.f32 %v6109_v30  ;;  %vm4386_vm3 = vweird.f32 %v6286_v25  ;;  %v3208_v47 = vmax.f32 %v3067_v22, 0.0 }
 0x74f   :  { %6289 = vrcp.f32 %v9212_v5  ;;  %v3685_v7 = vpop.f32.mrf.mxu1  ;;  %vm4387_vm5 = vmor %vm4385_vm4, %vm4386_vm3  ;;  %v4404_v11 = vand.u32 2147483647, %v9212_v5  ;;  %v4406_v30 = vand.u32 2147483648, %v9212_v5  ;;  %vm4400_vm9 = vweird.f32 %v9212_v5 }
 0x750   :  { %v4382_v2 = vsub.f32 1.0, %v4381_v0  ;;  %v3686_v27 = vadd.f32 %v3685_v7, %v3517_v61  ;;  %v2736_v42 = vadd.f32 %v8809_v31, %v2567_v37 }
 0x751   :  { %v3971_v48 = vpop.f32.mrf.mxu2  ;;  %vm4405_vm11 = vcmp.eq.f32.partialorder %v4404_v11, 8.507059e+37 }
 0x752   :  { %v4383_v44 = vmul.f32 %v6286_v25, %v4382_v2  ;;  %v3814_v28 = vmax.f32 %v3686_v27, 0.0  ;;  %v3972_v6 = vadd.f32 %v3971_v48, %v9189_v32 }
 0x753   :  { %v3068_v3 = vpop.f32.mrf.mxu3 }
 0x754   :  { %v6288_v8 = vpop.eup %6287  ;;  %v4384_v58 = vadd.f32 %v6286_v25, %v4383_v44  ;;  %v6110_v19 = vmul.f32 -1.442695, %v3972_v6  ;;  %v3069_v24 = vadd.f32 %v3068_v3, %v10616_v63  ;;  %v3867_v9 = vpack.c.bf16 %v3814_v28, %v3813_v1 }
 0x755   :  { %v6290_v13 = vpop.eup %6289  ;;  %v9220_v51 = vadd.f32 1.0, %v6288_v8  ;;  %v4407_v1 = vor.u32 1.1754944e-38, %v4406_v30  ;;  %v9244_v8 = vpop.f32.mrf.mxu0 }
 0x756   :  { %v4388_v45 = vsel %vm4387_vm5, %v6286_v25, %v4384_v58  ;;  %v4396_v59 = vmul.f32 %v6290_v13, %v9212_v5  ;;  %6291 = vpow2.f32 %v6110_v19  ;;  %4013 = vmatmul.bf16.gmra.mxu2 %v3867_v9  ;;  %v3210_v34 = vmax.f32 %v3069_v24, 0.0  ;;  %v10618_v58 = vld [vmem:[#allocation116_spill] sm:$0xff] }
 0x757   :  { %v4393_v16 = vsel %vm4390_vm7, %v4392_v50, %v4388_v45  ;;  %6293 = vrcp.f32 %v9220_v51  ;;  %v3688_v54 = vpop.f32.mrf.mxu1  ;;  %vm4401_vm8 = vweird.f32 %v6290_v13  ;;  %v3522_v5 = vadd.f32 %v9082_v33, %v9128_v21 }
 0x758   :  { %5341 = vst.msk [vmem:[#allocation5] sm:$0xff] %vm5340_vm6, %v4393_v16  ;;  %v4397_v18 = vsub.f32 1.0, %v4396_v59  ;;  %3110 = vmatmul.bf16.gmra.mxu3 %v10617_v20  ;;  %3603 = vmatmul.bf16.gmra.mxu0 %v8961_v17  ;;  %v3298_v0 = vpack.c.bf16 %v3210_v34, %v3208_v47  ;;  %vm4402_vm10 = vmor %vm4400_vm9, %vm4401_vm8  ;;  %v3689_v31 = vadd.f32 %v3688_v54, %v3520_v35  ;;  %v4421_v63 = vand.u32 2147483648, %v9220_v51  ;;  %v10619_v47 = vld [vmem:[#allocation130_spill] sm:$0xff] }
 0x759   :  { %v3974_v25 = vpop.f32.mrf.mxu2  ;;  %v2905_v19 = vadd.f32 %v10618_v58, %v2736_v42  ;;  %vm4415_vm13 = vweird.f32 %v9220_v51  ;;  %v10620_v35 = vld [vmem:[#allocation82_spill] sm:$0xff] }
 0x75a   :  { %v4398_v62 = vmul.f32 %v6290_v13, %v4397_v18  ;;  %v3975_v61 = vadd.f32 %v3974_v25, %v9189_v32  ;;  %3727 = vmatmul.bf16.gmra.mxu1 %v3298_v0  ;;  %v3815_v45 = vmax.f32 %v3689_v31, 0.0  ;;  %v4422_v30 = vor.u32 1.1754944e-38, %v4421_v63 }
 0x75b   :  { %v3071_v7 = vpop.f32.mrf.mxu3 }
 0x75c   :  { %v6292_v2 = vpop.eup %6291  ;;  %v4399_v27 = vadd.f32 %v6290_v13, %v4398_v62  ;;  %v6111_v55 = vmul.f32 -1.442695, %v3975_v61  ;;  %v3072_v34 = vadd.f32 %v3071_v7, %v10619_v47 }
 0x75d   :  { %v6294_v17 = vpop.eup %6293  ;;  %v9238_v48 = vadd.f32 1.0, %v6292_v2 }
 0x75e   :  { %v4403_v44 = vsel %vm4402_vm10, %v6290_v13, %v4399_v27  ;;  %v4411_v28 = vmul.f32 %v6294_v17, %v9220_v51  ;;  %6295 = vpow2.f32 %v6111_v55  ;;  %vm4416_vm12 = vweird.f32 %v6294_v17 }
 0x75f   :  { %v5509_v6 = vld [vmem:[#allocation5] sm:$0xff]  ;;  %v4408_v22 = vsel %vm4405_vm11, %v4407_v1, %v4403_v44  ;;  %6297 = vrcp.f32 %v9238_v48  ;;  %v3690_v3 = vpop.f32.mrf.mxu1  ;;  %v4419_v13 = vand.u32 2147483647, %v9220_v51  ;;  %vm4417_vm14 = vmor %vm4415_vm13, %vm4416_vm12  ;;  %v3212_v55 = vmax.f32 %v3072_v34, 0.0  ;;  %v10623_v34 = vld [vmem:[#allocation73_spill] sm:$0xff] }
 0x760   :  { %5510 = vst [vmem:[%s9867_s9] sm:$0xff] %v5509_v6  ;;  %v4412_v38 = vsub.f32 1.0, %v4411_v28  ;;  %v3691_v21 = vadd.f32 %v3690_v3, %v3522_v5  ;;  %v4434_v44 = vand.u32 2147483647, %v9238_v48  ;;  %v4436_v28 = vand.u32 2147483648, %v9238_v48  ;;  %v9270_v6 = vpop.f32.mrf.mxu0 }
 0x761   :  { %5342 = vst.msk [vmem:[#allocation5 + $0x8] sm:$0xff] %vm5340_vm6, %v4408_v22  ;;  %v3976_v24 = vpop.f32.mrf.mxu2  ;;  %vm4420_vm15 = vcmp.eq.f32.partialorder %v4419_v13, 8.507059e+37  ;;  %vm4430_vm1 = vweird.f32 %v9238_v48 }
 0x762   :  { %v4413_v9 = vmul.f32 %v6294_v17, %v4412_v38  ;;  %v3977_v50 = vadd.f32 %v3976_v24, %v9189_v32  ;;  %v3816_v59 = vmax.f32 %v3691_v21, 0.0  ;;  %v10622_v21 = vld [vmem:[#allocation56_spill] sm:$0xff]  ;;  %v4437_v13 = vor.u32 1.1754944e-38, %v4436_v28 }
 0x763   :  { %v3073_v16 = vpop.f32.mrf.mxu3  ;;  %vm4435_vm3 = vcmp.eq.f32.partialorder %v4434_v44, 8.507059e+37 }
 0x764   :  { %v6296_v54 = vpop.eup %6295  ;;  %v4414_v18 = vadd.f32 %v6294_v17, %v4413_v9  ;;  %v6112_v20 = vmul.f32 -1.442695, %v3977_v50  ;;  %v3074_v37 = vadd.f32 %v3073_v16, %v2905_v19  ;;  %v3868_v62 = vpack.c.bf16 %v3816_v59, %v3815_v45 }
 0x765   :  { %v6298_v11 = vpop.eup %6297  ;;  %v9256_v25 = vadd.f32 1.0, %v6296_v54  ;;  %v3525_v9 = vadd.f32 %v9082_v33, %v9136_v40 }
 0x766   :  { %v4418_v61 = vsel %vm4417_vm14, %v6294_v17, %v4414_v18  ;;  %v4426_v0 = vmul.f32 %v6298_v11, %v9238_v48  ;;  %6299 = vpow2.f32 %v6112_v20  ;;  %4018 = vmatmul.bf16.gmra.mxu2 %v3868_v62  ;;  %v3214_v42 = vmax.f32 %v3074_v37, 0.0  ;;  %v10621_v17 = vld [vmem:[#allocation36_spill] sm:$0xff] }
 0x767   :  { %v4423_v51 = vsel %vm4420_vm15, %v4422_v30, %v4418_v61  ;;  %6301 = vrcp.f32 %v9256_v25  ;;  %v3693_v2 = vpop.f32.mrf.mxu1  ;;  %v2572_v1 = vadd.f32 %v10621_v17, %v8470_v26  ;;  %vm4431_vm0 = vweird.f32 %v6298_v11 }
 0x768   :  { %v5511_v27 = vld [vmem:[#allocation5 + $0x8] sm:$0xff]  ;;  %5343 = vst.msk [vmem:[#allocation5 + $0x10] sm:$0xff] %vm5340_vm6, %v4423_v51  ;;  %v4427_v7 = vsub.f32 1.0, %v4426_v0  ;;  %3115 = vmatmul.bf16.gmra.mxu3 %v10620_v35  ;;  %3608 = vmatmul.bf16.gmra.mxu0 %v8976_v29  ;;  %v3300_v31 = vpack.c.bf16 %v3214_v42, %v3212_v55  ;;  %vm4432_vm2 = vmor %vm4430_vm1, %vm4431_vm0  ;;  %v3527_v48 = vadd.f32 %v9082_v33, %v9144_v23  ;;  %v4451_v37 = vand.u32 2147483648, %v9256_v25  ;;  %v10624_v42 = vld [vmem:[#allocation118_spill] sm:$0xff] }
 0x769   :  { %5512 = vst [vmem:[%s9867_s9 + $0x8] sm:$0xff] %v5511_v27  ;;  %v3979_v5 = vpop.f32.mrf.mxu2  ;;  %v2741_v24 = vadd.f32 %v10622_v21, %v2572_v1  ;;  %v3694_v18 = vadd.f32 %v3693_v2, %v3525_v9  ;;  %v4449_v62 = vand.u32 2147483647, %v9256_v25  ;;  %vm4445_vm5 = vweird.f32 %v9256_v25 }
 0x76a   :  { %v4428_v22 = vmul.f32 %v6298_v11, %v4427_v7  ;;  %v3980_v3 = vadd.f32 %v3979_v5, %v9189_v32  ;;  %3732 = vmatmul.bf16.gmra.mxu1 %v3300_v31  ;;  %v9292_v7 = vpop.f32.mrf.mxu0  ;;  %v4452_v28 = vor.u32 1.1754944e-38, %v4451_v37 }
 0x76b   :  { %v3076_v29 = vpop.f32.mrf.mxu3  ;;  %v2910_v20 = vadd.f32 %v10623_v34, %v2741_v24  ;;  %v3817_v0 = vmax.f32 %v3694_v18, 0.0  ;;  %vm4450_vm8 = vcmp.eq.f32.partialorder %v4449_v62, 8.507059e+37  ;;  %v10625_v24 = vld [vmem:[#allocation88_spill] sm:$0xff] }
 0x76c   :  { %v6300_v38 = vpop.eup %6299  ;;  %v4429_v58 = vadd.f32 %v6298_v11, %v4428_v22  ;;  %v6113_v19 = vmul.f32 -1.442695, %v3980_v3  ;;  %v3077_v35 = vadd.f32 %v3076_v29, %v10624_v42  ;;  %v10628_v42 = vld [vmem:[#allocation28_spill] sm:$0xff] }
 0x76d   :  { %v6302_v63 = vpop.eup %6301  ;;  %v9277_v50 = vadd.f32 1.0, %v6300_v38 }
 0x76e   :  { %v4433_v45 = vsel %vm4432_vm2, %v6298_v11, %v4429_v58  ;;  %v4441_v59 = vmul.f32 %v6302_v63, %v9256_v25  ;;  %6303 = vpow2.f32 %v6113_v19  ;;  %vm4446_vm4 = vweird.f32 %v6302_v63 }
 0x76f   :  { %v5513_v16 = vld [vmem:[#allocation5 + $0x10] sm:$0xff]  ;;  %v4438_v54 = vsel %vm4435_vm3, %v4437_v13, %v4433_v45  ;;  %6305 = vrcp.f32 %v9277_v50  ;;  %v3695_v47 = vpop.f32.mrf.mxu1  ;;  %vm4447_vm7 = vmor %vm4445_vm5, %vm4446_vm4  ;;  %v3216_v19 = vmax.f32 %v3077_v35, 0.0  ;;  %v4464_v13 = vand.u32 2147483647, %v9277_v50 }
 0x770   :  { %5514 = vst [vmem:[%s9867_s9 + $0x10] sm:$0xff] %v5513_v16  ;;  %v4442_v40 = vsub.f32 1.0, %v4441_v59  ;;  %v3696_v11 = vadd.f32 %v3695_v47, %v3527_v48  ;;  %v4466_v45 = vand.u32 2147483648, %v9277_v50  ;;  %vm4460_vm10 = vweird.f32 %v9277_v50 }
 0x771   :  { %5344 = vst.msk [vmem:[#allocation5 + $0x18] sm:$0xff] %vm5340_vm6, %v4438_v54  ;;  %v3981_v30 = vpop.f32.mrf.mxu2  ;;  %vm4465_vm12 = vcmp.eq.f32.partialorder %v4464_v13, 8.507059e+37 }
 0x772   :  { %v4443_v23 = vmul.f32 %v6302_v63, %v4442_v40  ;;  %v3982_v61 = vadd.f32 %v3981_v30, %v9189_v32  ;;  %v3818_v51 = vmax.f32 %v3696_v11, 0.0  ;;  %v3530_v11 = vadd.f32 %v9082_v33, %v9150_v39  ;;  %v9316_v62 = vpop.f32.mrf.mxu0 }
 0x773   :  { %v3078_v2 = vpop.f32.mrf.mxu3  ;;  %v4467_v30 = vor.u32 1.1754944e-38, %v4466_v45 }
 0x774   :  { %v6304_v27 = vpop.eup %6303  ;;  %v4444_v55 = vadd.f32 %v6302_v63, %v4443_v23  ;;  %v6114_v17 = vmul.f32 -1.442695, %v3982_v61  ;;  %v3079_v1 = vadd.f32 %v3078_v2, %v2910_v20  ;;  %v3869_v22 = vpack.c.bf16 %v3818_v51, %v3817_v0  ;;  %v10627_v20 = vld [vmem:[#allocation48_spill] sm:$0xff] }
 0x775   :  { %v6306_v44 = vpop.eup %6305  ;;  %v9295_v5 = vadd.f32 1.0, %v6304_v27 }
 0x776   :  { %v4448_v31 = vsel %vm4447_vm7, %v6302_v63, %v4444_v55  ;;  %v4456_v25 = vmul.f32 %v6306_v44, %v9277_v50  ;;  %6307 = vpow2.f32 %v6114_v17  ;;  %4023 = vmatmul.bf16.gmra.mxu2 %v3869_v22  ;;  %v3218_v21 = vmax.f32 %v3079_v1, 0.0  ;;  %v10626_v63 = vld [vmem:[#allocation40_spill] sm:$0xff] }
 0x777   :  { %v4453_v3 = vsel %vm4450_vm8, %v4452_v28, %v4448_v31  ;;  %6309 = vrcp.f32 %v9295_v5  ;;  %v3698_v38 = vpop.f32.mrf.mxu1  ;;  %v2577_v9 = vadd.f32 %v10626_v63, %v8470_v26  ;;  %vm4461_vm9 = vweird.f32 %v6306_v44 }
 0x778   :  { %v5515_v58 = vld [vmem:[#allocation5 + $0x18] sm:$0xff]  ;;  %5345 = vst.msk [vmem:[#allocation5 + $0x20] sm:$0xff] %vm5340_vm6, %v4453_v3  ;;  %v4457_v29 = vsub.f32 1.0, %v4456_v25  ;;  %3120 = vmatmul.bf16.gmra.mxu3 %v10625_v24  ;;  %3613 = vmatmul.bf16.gmra.mxu0 %v8991_v52  ;;  %v3302_v16 = vpack.c.bf16 %v3218_v21, %v3216_v19  ;;  %vm4462_vm11 = vmor %vm4460_vm10, %vm4461_vm9  ;;  %v3532_v50 = vadd.f32 %v9082_v33, %v9158_v43  ;;  %v4481_v17 = vand.u32 2147483648, %v9295_v5 }
 0x779   :  { %5516 = vst [vmem:[%s9867_s9 + $0x18] sm:$0xff] %v5515_v58  ;;  %v3984_v59 = vpop.f32.mrf.mxu2  ;;  %v2746_v37 = vadd.f32 %v10627_v20, %v2577_v9  ;;  %v3699_v27 = vadd.f32 %v3698_v38, %v3530_v11  ;;  %v4479_v43 = vand.u32 2147483647, %v9295_v5  ;;  %vm4475_vm14 = vweird.f32 %v9295_v5  ;;  %v10629_v58 = vld [vmem:[#allocation119_spill] sm:$0xff] }
 0x77a   :  { %v4458_v48 = vmul.f32 %v6306_v44, %v4457_v29  ;;  %v3985_v54 = vadd.f32 %v3984_v59, %v9189_v32  ;;  %3737 = vmatmul.bf16.gmra.mxu1 %v3302_v16  ;;  %v4482_v63 = vor.u32 1.1754944e-38, %v4481_v17  ;;  %v9336_v16 = vpop.f32.mrf.mxu0 }
 0x77b   :  { %v3081_v18 = vpop.f32.mrf.mxu3  ;;  %v2915_v35 = vadd.f32 %v10628_v42, %v2746_v37  ;;  %v3819_v22 = vmax.f32 %v3699_v27, 0.0  ;;  %vm4480_vm0 = vcmp.eq.f32.partialorder %v4479_v43, 8.507059e+37 }
 0x77c   :  { %v6308_v47 = vpop.eup %6307  ;;  %v4459_v52 = vadd.f32 %v6306_v44, %v4458_v48  ;;  %v6115_v40 = vmul.f32 -1.442695, %v3985_v54  ;;  %v3082_v29 = vadd.f32 %v3081_v18, %v10629_v58 }
 0x77d   :  { %v6310_v34 = vpop.eup %6309  ;;  %v9314_v23 = vadd.f32 1.0, %v6308_v47 }
 0x77e   :  { %v4463_v61 = vsel %vm4462_vm11, %v6306_v44, %v4459_v52  ;;  %v4471_v0 = vmul.f32 %v6310_v34, %v9295_v5  ;;  %6311 = vpow2.f32 %v6115_v40  ;;  %vm4476_vm13 = vweird.f32 %v6310_v34  ;;  %v10630_v40 = vld [vmem:[#allocation93_spill] sm:$0xff] }
 0x77f   :  { %v5517_v51 = vld [vmem:[#allocation5 + $0x20] sm:$0xff]  ;;  %v4468_v2 = vsel %vm4465_vm12, %v4467_v30, %v4463_v61  ;;  %6313 = vrcp.f32 %v9314_v23  ;;  %v3700_v39 = vpop.f32.mrf.mxu1  ;;  %vm4477_vm15 = vmor %vm4475_vm14, %vm4476_vm13  ;;  %v3220_v47 = vmax.f32 %v3082_v29, 0.0  ;;  %v4494_v37 = vand.u32 2147483647, %v9314_v23 }
 0x780   :  { %5518 = vst [vmem:[%s9867_s9 + $0x20] sm:$0xff] %v5517_v51  ;;  %v4472_v55 = vsub.f32 1.0, %v4471_v0  ;;  %v3701_v1 = vadd.f32 %v3700_v39, %v3532_v50  ;;  %v4496_v11 = vand.u32 2147483648, %v9314_v23  ;;  %vm4490_vm2 = vweird.f32 %v9314_v23 }
 0x781   :  { %5346 = vst.msk [vmem:[#allocation5 + $0x28] sm:$0xff] %vm5340_vm6, %v4468_v2  ;;  %v3986_v44 = vpop.f32.mrf.mxu2  ;;  %vm4495_vm4 = vcmp.eq.f32.partialorder %v4494_v37, 8.507059e+37 }
 0x782   :  { %v4473_v33 = vmul.f32 %v6310_v34, %v4472_v55  ;;  %v3987_v28 = vadd.f32 %v3986_v44, %v9189_v32  ;;  %v3820_v31 = vmax.f32 %v3701_v1, 0.0  ;;  %v10632_v55 = vld [vmem:[#allocation108_spill] sm:$0xff]  ;;  %v4497_v1 = vor.u32 1.1754944e-38, %v4496_v11 }
 0x783   :  { %v3083_v25 = vpop.f32.mrf.mxu3 }
 0x784   :  { %v6312_v3 = vpop.eup %6311  ;;  %v4474_v38 = vadd.f32 %v6310_v34, %v4473_v33  ;;  %v6116_v19 = vmul.f32 -1.442695, %v3987_v28  ;;  %v3084_v21 = vadd.f32 %v3083_v25, %v2915_v35  ;;  %v3870_v13 = vpack.c.bf16 %v3820_v31, %v3819_v22  ;;  %v9354_v35 = vld [vmem:[%s9864_s6] ss:$0 sm:$0xff] }
 0x785   :  { %v6314_v24 = vpop.eup %6313  ;;  %v9332_v9 = vadd.f32 1.0, %v6312_v3  ;;  %v3535_v17 = vadd.f32 %v9354_v35, %v9164_v14  ;;  %v3537_v43 = vadd.f32 %v9354_v35, %v9171_v12  ;;  %v10633_v3 = vld [vmem:[#allocation122_spill] sm:$0xff] }
 0x786   :  { %v4478_v45 = vsel %vm4477_vm15, %v6310_v34, %v4474_v38  ;;  %v4486_v59 = vmul.f32 %v6314_v24, %v9314_v23  ;;  %6315 = vpow2.f32 %v6116_v19  ;;  %4028 = vmatmul.bf16.gmra.mxu2 %v3870_v13  ;;  %v3222_v52 = vmax.f32 %v3084_v21, 0.0  ;;  %v10631_v34 = vld [vmem:[#allocation103_spill] sm:$0xff] }
 0x787   :  { %v4483_v5 = vsel %vm4480_vm0, %v4482_v63, %v4478_v45  ;;  %6317 = vrcp.f32 %v9332_v9  ;;  %v3703_v48 = vpop.f32.mrf.mxu1  ;;  %v2582_v20 = vadd.f32 %v10631_v34, %v8470_v26  ;;  %vm4491_vm1 = vweird.f32 %v6314_v24 }
 0x788   :  { %v5519_v54 = vld [vmem:[#allocation5 + $0x28] sm:$0xff]  ;;  %5347 = vst.msk [vmem:[#allocation5 + $0x30] sm:$0xff] %vm5340_vm6, %v4483_v5  ;;  %v4487_v18 = vsub.f32 1.0, %v4486_v59  ;;  %3125 = vmatmul.bf16.gmra.mxu3 %v10630_v40  ;;  %3618 = vmatmul.bf16.gmra.mxu0 %v9006_v15  ;;  %v3304_v0 = vpack.c.bf16 %v3222_v52, %v3220_v47  ;;  %vm4492_vm3 = vmor %vm4490_vm2, %vm4491_vm1  ;;  %v3704_v31 = vadd.f32 %v3703_v48, %v3535_v17  ;;  %v4511_v58 = vand.u32 2147483648, %v9332_v9  ;;  %v10634_v48 = vld [vmem:[#allocation121_spill] sm:$0xff] }
 0x789   :  { %5520 = vst [vmem:[%s9867_s9 + $0x28] sm:$0xff] %v5519_v54  ;;  %v3989_v30 = vpop.f32.mrf.mxu2  ;;  %v2751_v42 = vadd.f32 %v10632_v55, %v2582_v20  ;;  %v4509_v21 = vand.u32 2147483647, %v9332_v9  ;;  %vm4505_vm7 = vweird.f32 %v9332_v9 }
 0x78a   :  { %v4488_v61 = vmul.f32 %v6314_v24, %v4487_v18  ;;  %v3990_v50 = vadd.f32 %v3989_v30, %v9189_v32  ;;  %3742 = vmatmul.bf16.gmra.mxu1 %v3304_v0  ;;  %v3821_v63 = vmax.f32 %v3704_v31, 0.0  ;;  %v4512_v40 = vor.u32 1.1754944e-38, %v4511_v58  ;;  %v10636_v31 = vld [vmem:[#allocation68_spill] sm:$0xff] }
 0x78b   :  { %v3086_v51 = vpop.f32.mrf.mxu3  ;;  %v2920_v38 = vadd.f32 %v10633_v3, %v2751_v42  ;;  %vm4510_vm9 = vcmp.eq.f32.partialorder %v4509_v21, 8.507059e+37 }
 0x78c   :  { %v6316_v2 = vpop.eup %6315  ;;  %v4489_v15 = vadd.f32 %v6314_v24, %v4488_v61  ;;  %v6117_v27 = vmul.f32 -1.442695, %v3990_v50  ;;  %v3087_v54 = vadd.f32 %v3086_v51, %v10634_v48 }
 0x78d   :  { %v6318_v39 = vpop.eup %6317  ;;  %v9358_v44 = vadd.f32 1.0, %v6316_v2  ;;  %v10635_v2 = vld [vmem:[#allocation105_spill] sm:$0xff] }
 0x78e   :  { %v4493_v33 = vsel %vm4492_vm3, %v6314_v24, %v4489_v15  ;;  %v4501_v23 = vmul.f32 %v6318_v39, %v9332_v9  ;;  %6319 = vpow2.f32 %v6117_v27  ;;  %vm4506_vm5 = vweird.f32 %v6318_v39 }
 0x78f   :  { %v5521_v28 = vld [vmem:[#allocation5 + $0x30] sm:$0xff]  ;;  %v4498_v22 = vsel %vm4495_vm4, %v4497_v1, %v4493_v33  ;;  %6321 = vrcp.f32 %v9358_v44  ;;  %v3705_v25 = vpop.f32.mrf.mxu1  ;;  %vm4507_vm8 = vmor %vm4505_vm7, %vm4506_vm5  ;;  %v3224_v50 = vmax.f32 %v3087_v54, 0.0  ;;  %v2587_v15 = vadd.f32 %v10635_v2, %v8470_v26 }
 0x790   :  { %5522 = vst [vmem:[%s9867_s9 + $0x30] sm:$0xff] %v5521_v28  ;;  %v4502_v14 = vsub.f32 1.0, %v4501_v23  ;;  %v3706_v29 = vadd.f32 %v3705_v25, %v3537_v43  ;;  %v4524_v27 = vand.u32 2147483647, %v9358_v44  ;;  %vm4520_vm11 = vweird.f32 %v9358_v44 }
 0x791   :  { %5348 = vst.msk [vmem:[#allocation5 + $0x38] sm:$0xff] %vm5340_vm6, %v4498_v22  ;;  %v3991_v19 = vpop.f32.mrf.mxu2  ;;  %v2756_v25 = vadd.f32 %v10636_v31, %v2587_v15 }
 0x792   :  { %v4503_v12 = vmul.f32 %v6318_v39, %v4502_v14  ;;  %v3992_v24 = vadd.f32 %v3991_v19, %v9189_v32  ;;  %v3822_v13 = vmax.f32 %v3706_v29, 0.0  ;;  %v3540_v14 = vadd.f32 %v9354_v35, %v9180_v49 }
 0x793   :  { %v3088_v45 = vpop.f32.mrf.mxu3  ;;  %vm4525_vm13 = vcmp.eq.f32.partialorder %v4524_v27, 8.507059e+37 }
 0x794   :  { %v6320_v59 = vpop.eup %6319  ;;  %v4504_v5 = vadd.f32 %v6318_v39, %v4503_v12  ;;  %v6118_v18 = vmul.f32 -1.442695, %v3992_v24  ;;  %v3089_v47 = vadd.f32 %v3088_v45, %v2920_v38  ;;  %v3871_v20 = vpack.c.bf16 %v3822_v13, %v3821_v63  ;;  %v10637_v63 = vld [vmem:[#allocation112_spill] sm:$0xff] }
 0x795   :  { %v6322_v52 = vpop.eup %6321  ;;  %v9374_v34 = vadd.f32 1.0, %v6320_v59  ;;  %v2925_v13 = vadd.f32 %v10637_v63, %v2756_v25 }
 0x796   :  { %v4508_v37 = vsel %vm4507_vm8, %v6318_v39, %v4504_v5  ;;  %v4516_v11 = vmul.f32 %v6322_v52, %v9358_v44  ;;  %6323 = vpow2.f32 %v6118_v18  ;;  %4033 = vmatmul.bf16.gmra.mxu2 %v3871_v20  ;;  %v3226_v51 = vmax.f32 %v3089_v47, 0.0 }
 0x797   :  { %v4513_v9 = vsel %vm4510_vm9, %v4512_v40, %v4508_v37  ;;  %6325 = vrcp.f32 %v9374_v34  ;;  %v3708_v30 = vpop.f32.mrf.mxu1  ;;  %v4526_v39 = vand.u32 2147483648, %v9358_v44  ;;  %vm4521_vm10 = vweird.f32 %v6322_v52  ;;  %v10638_v37 = vld [vmem:[#allocation123_spill] sm:$0xff] }
 0x798   :  { %v5523_v61 = vld [vmem:[#allocation5 + $0x38] sm:$0xff]  ;;  %5349 = vst.msk [vmem:[#allocation5 + $0x40] sm:$0xff] %vm5340_vm6, %v4513_v9  ;;  %v4517_v0 = vsub.f32 1.0, %v4516_v11  ;;  %v3306_v17 = vpack.c.bf16 %v3226_v51, %v3224_v50  ;;  %vm4522_vm12 = vmor %vm4520_vm11, %vm4521_vm10  ;;  %v3542_v44 = vadd.f32 %v9354_v35, %v9191_v53  ;;  %v3709_v21 = vadd.f32 %v3708_v30, %v3540_v14 }
 0x799   :  { %5524 = vst [vmem:[%s9867_s9 + $0x38] sm:$0xff] %v5523_v61  ;;  %v3994_v55 = vpop.f32.mrf.mxu2  ;;  %v4527_v3 = vor.u32 1.1754944e-38, %v4526_v39  ;;  %v4541_v45 = vand.u32 2147483648, %v9374_v34  ;;  %v4539_v48 = vand.u32 2147483647, %v9374_v34  ;;  %vm4535_vm15 = vweird.f32 %v9374_v34 }
 0x79a   :  { %v4518_v42 = vmul.f32 %v6322_v52, %v4517_v0  ;;  %v3995_v1 = vadd.f32 %v3994_v55, %v9189_v32  ;;  %3747 = vmatmul.bf16.gmra.mxu1 %v3306_v17  ;;  %v3823_v18 = vmax.f32 %v3709_v21, 0.0  ;;  %v3545_v21 = vadd.f32 %v9354_v35, %v9200_v4 }
 0x79b   :  { %v3091_v33 = vpop.f32.mrf.mxu3  ;;  %v4542_v0 = vor.u32 1.1754944e-38, %v4541_v45  ;;  %vm4540_vm1 = vcmp.eq.f32.partialorder %v4539_v48, 8.507059e+37  ;;  %v10641_v48 = vld [vmem:[#allocation74_spill] sm:$0xff] }
 0x79c   :  { %v6324_v23 = vpop.eup %6323  ;;  %v4519_v43 = vadd.f32 %v6322_v52, %v4518_v42  ;;  %v6119_v28 = vmul.f32 -1.442695, %v3995_v1  ;;  %v3092_v11 = vadd.f32 %v3091_v33, %v10638_v37  ;;  %v10639_v1 = vld [vmem:[#allocation127_spill] sm:$0xff] }
 0x79d   :  { %v6326_v22 = vpop.eup %6325  ;;  %v9391_v38 = vadd.f32 1.0, %v6324_v23  ;;  %v2592_v33 = vadd.f32 %v10639_v1, %v8470_v26 }
 0x79e   :  { %v4523_v58 = vsel %vm4522_vm12, %v6322_v52, %v4519_v43  ;;  %v4531_v29 = vmul.f32 %v6326_v22, %v9374_v34  ;;  %6327 = vpow2.f32 %v6119_v28  ;;  %vm4536_vm14 = vweird.f32 %v6326_v22 }
 0x79f   :  { %v5525_v19 = vld [vmem:[#allocation5 + $0x40] sm:$0xff]  ;;  %v4528_v12 = vsel %vm4525_vm13, %v4527_v3, %v4523_v58  ;;  %6329 = vrcp.f32 %v9391_v38  ;;  %v3710_v24 = vpop.f32.mrf.mxu1  ;;  %vm4537_vm0 = vmor %vm4535_vm15, %vm4536_vm14  ;;  %v3228_v42 = vmax.f32 %v3092_v11, 0.0  ;;  %v4554_v23 = vand.u32 2147483647, %v9391_v38 }
 0x7a0   :  { %5526 = vst [vmem:[%s9867_s9 + $0x40] sm:$0xff] %v5525_v19  ;;  %v4532_v49 = vsub.f32 1.0, %v4531_v29  ;;  %v3711_v59 = vadd.f32 %v3710_v24, %v3542_v44  ;;  %v4556_v43 = vand.u32 2147483648, %v9391_v38  ;;  %vm4550_vm3 = vweird.f32 %v9391_v38  ;;  %v10640_v19 = vld [vmem:[#allocation62_spill] sm:$0xff] }
 0x7a1   :  { %5350 = vst.msk [vmem:[#allocation5 + $0x48] sm:$0xff] %vm5340_vm6, %v4528_v12  ;;  %v3996_v5 = vpop.f32.mrf.mxu2  ;;  %v2761_v12 = vadd.f32 %v10640_v19, %v2592_v33  ;;  %vm4555_vm5 = vcmp.eq.f32.partialorder %v4554_v23, 8.507059e+37  ;;  %v9444_v33 = vpop.f32.mrf.mxu0 }
 0x7a2   :  { %v4533_v53 = vmul.f32 %v6326_v22, %v4532_v49  ;;  %v3997_v54 = vadd.f32 %v3996_v5, %v9189_v32  ;;  %v3824_v47 = vmax.f32 %v3711_v59, 0.0  ;;  %v4557_v24 = vor.u32 1.1754944e-38, %v4556_v43 }
 0x7a3   :  { %v3093_v52 = vpop.f32.mrf.mxu3 }
 0x7a4   :  { %v6328_v40 = vpop.eup %6327  ;;  %v4534_v20 = vadd.f32 %v6326_v22, %v4533_v53  ;;  %v6120_v9 = vmul.f32 -1.442695, %v3997_v54  ;;  %v3094_v30 = vadd.f32 %v3093_v52, %v2925_v13  ;;  %v3872_v51 = vpack.c.bf16 %v3824_v47, %v3823_v18 }
 0x7a5   :  { %v6330_v61 = vpop.eup %6329  ;;  %v9407_v50 = vadd.f32 1.0, %v6328_v40  ;;  %v2930_v54 = vadd.f32 %v10641_v48, %v2761_v12 }
 0x7a6   :  { %v4538_v2 = vsel %vm4537_vm0, %v6326_v22, %v4534_v20  ;;  %v4546_v15 = vmul.f32 %v6330_v61, %v9391_v38  ;;  %6331 = vpow2.f32 %v6120_v9  ;;  %4038 = vmatmul.bf16.gmra.mxu2 %v3872_v51  ;;  %v3230_v17 = vmax.f32 %v3094_v30, 0.0 }
 0x7a7   :  { %v4543_v34 = vsel %vm4540_vm1, %v4542_v0, %v4538_v2  ;;  %6333 = vrcp.f32 %v9407_v50  ;;  %v3713_v27 = vpop.f32.mrf.mxu1  ;;  %vm4551_vm2 = vweird.f32 %v6330_v61  ;;  %v3547_v38 = vadd.f32 %v9354_v35, %v9210_v46  ;;  %v10642_v0 = vld [vmem:[#allocation125_spill] sm:$0xff] }
 0x7a8   :  { %v5527_v39 = vld [vmem:[#allocation5 + $0x48] sm:$0xff]  ;;  %5351 = vst.msk [vmem:[#allocation5 + $0x50] sm:$0xff] %vm5340_vm6, %v4543_v34  ;;  %v4547_v55 = vsub.f32 1.0, %v4546_v15  ;;  %v3308_v31 = vpack.c.bf16 %v3230_v17, %v3228_v42  ;;  %vm4552_vm4 = vmor %vm4550_vm3, %vm4551_vm2  ;;  %v3714_v5 = vadd.f32 %v3713_v27, %v3545_v21  ;;  %v4571_v18 = vand.u32 2147483648, %v9407_v50 }
 0x7a9   :  { %5528 = vst [vmem:[%s9867_s9 + $0x48] sm:$0xff] %v5527_v39  ;;  %v3999_v28 = vpop.f32.mrf.mxu2  ;;  %v4569_v40 = vand.u32 2147483647, %v9407_v50  ;;  %vm4565_vm8 = vweird.f32 %v9407_v50 }
 0x7aa   :  { %v4548_v22 = vmul.f32 %v6330_v61, %v4547_v55  ;;  %v4000_v25 = vadd.f32 %v3999_v28, %v9189_v32  ;;  %3752 = vmatmul.bf16.gmra.mxu1 %v3308_v31  ;;  %v3825_v37 = vmax.f32 %v3714_v5, 0.0  ;;  %v4572_v27 = vor.u32 1.1754944e-38, %v4571_v18  ;;  %v10643_v31 = vld [vmem:[#allocation55_spill] sm:$0xff] }
 0x7ab   :  { %v3096_v14 = vpop.f32.mrf.mxu3  ;;  %vm4570_vm10 = vcmp.eq.f32.partialorder %v4569_v40, 8.507059e+37 }
 0x7ac   :  { %v6332_v3 = vpop.eup %6331  ;;  %v4549_v58 = vadd.f32 %v6330_v61, %v4548_v22  ;;  %v6121_v29 = vmul.f32 -1.442695, %v4000_v25  ;;  %v3097_v51 = vadd.f32 %v3096_v14, %v10642_v0  ;;  %v2597_v25 = vadd.f32 %v10643_v31, %v8470_v26 }
 0x7ad   :  { %v6334_v44 = vpop.eup %6333  ;;  %v9424_v49 = vadd.f32 1.0, %v6332_v3 }
 0x7ae   :  { %v4553_v63 = vsel %vm4552_vm4, %v6330_v61, %v4549_v58  ;;  %v4561_v13 = vmul.f32 %v6334_v44, %v9407_v50  ;;  %6335 = vpow2.f32 %v6121_v29  ;;  %vm4566_vm7 = vweird.f32 %v6334_v44 }
 0x7af   :  { %v5529_v45 = vld [vmem:[#allocation5 + $0x50] sm:$0xff]  ;;  %v4558_v59 = vsel %vm4555_vm5, %v4557_v24, %v4553_v63  ;;  %6337 = vrcp.f32 %v9424_v49  ;;  %v3715_v53 = vpop.f32.mrf.mxu1  ;;  %vm4567_vm9 = vmor %vm4565_vm8, %vm4566_vm7  ;;  %v3232_v28 = vmax.f32 %v3097_v51, 0.0  ;;  %v4584_v14 = vand.u32 2147483647, %v9424_v49 }
 0x7b0   :  { %5530 = vst [vmem:[%s9867_s9 + $0x50] sm:$0xff] %v5529_v45  ;;  %v4562_v4 = vsub.f32 1.0, %v4561_v13  ;;  %v3716_v47 = vadd.f32 %v3715_v53, %v3547_v38  ;;  %v4586_v3 = vand.u32 2147483648, %v9424_v49  ;;  %vm4580_vm12 = vweird.f32 %v9424_v49  ;;  %v10644_v38 = vld [vmem:[#allocation14_spill] sm:$0xff] }
 0x7b1   :  { %5352 = vst.msk [vmem:[#allocation5 + $0x58] sm:$0xff] %vm5340_vm6, %v4558_v59  ;;  %v4001_v52 = vpop.f32.mrf.mxu2  ;;  %v2766_v45 = vadd.f32 %v10644_v38, %v2597_v25  ;;  %v3550_v59 = vadd.f32 %v9354_v35, %v9222_v60  ;;  %vm4585_vm14 = vcmp.eq.f32.partialorder %v4584_v14, 8.507059e+37 }
 0x7b2   :  { %v4563_v46 = vmul.f32 %v6334_v44, %v4562_v4  ;;  %v4002_v20 = vadd.f32 %v4001_v52, %v9189_v32  ;;  %v3826_v11 = vmax.f32 %v3716_v47, 0.0  ;;  %v4587_v5 = vor.u32 1.1754944e-38, %v4586_v3 }
 0x7b3   :  { %v3098_v9 = vpop.f32.mrf.mxu3 }
 0x7b4   :  { %v6336_v30 = vpop.eup %6335  ;;  %v4564_v61 = vadd.f32 %v6334_v44, %v4563_v46  ;;  %v6122_v2 = vmul.f32 -1.442695, %v4002_v20  ;;  %v3099_v15 = vadd.f32 %v3098_v9, %v2930_v54  ;;  %v3873_v55 = vpack.c.bf16 %v3826_v11, %v3825_v37  ;;  %v10645_v46 = vld [vmem:[#allocation53_spill] sm:$0xff] }
 0x7b5   :  { %v6338_v34 = vpop.eup %6337  ;;  %v9440_v39 = vadd.f32 1.0, %v6336_v30  ;;  %v2935_v40 = vadd.f32 %v10645_v46, %v2766_v45 }
 0x7b6   :  { %v4568_v42 = vsel %vm4567_vm9, %v6334_v44, %v4564_v61  ;;  %v4576_v17 = vmul.f32 %v6338_v34, %v9424_v49  ;;  %6339 = vpow2.f32 %v6122_v2  ;;  %4043 = vmatmul.bf16.gmra.mxu2 %v3873_v55  ;;  %v3234_v22 = vmax.f32 %v3099_v15, 0.0 }
 0x7b7   :  { %v4573_v50 = vsel %vm4570_vm10, %v4572_v27, %v4568_v42  ;;  %6341 = vrcp.f32 %v9440_v39  ;;  %v3718_v1 = vpop.f32.mrf.mxu1  ;;  %vm4581_vm11 = vweird.f32 %v6338_v34  ;;  %v3552_v49 = vadd.f32 %v9354_v35, %v9244_v8  ;;  %v9471_v8 = vpop.f32.mrf.mxu0  ;;  %v10646_v27 = vld [vmem:[#allocation114_spill] sm:$0xff] }
 0x7b8   :  { %v5531_v23 = vld [vmem:[#allocation5 + $0x58] sm:$0xff]  ;;  %5353 = vst.msk [vmem:[#allocation5 + $0x60] sm:$0xff] %vm5340_vm6, %v4573_v50  ;;  %v4577_v43 = vsub.f32 1.0, %v4576_v17  ;;  %v3310_v44 = vpack.c.bf16 %v3234_v22, %v3232_v28  ;;  %vm4582_vm13 = vmor %vm4580_vm12, %vm4581_vm11  ;;  %v3719_v47 = vadd.f32 %v3718_v1, %v3550_v59  ;;  %v4601_v20 = vand.u32 2147483648, %v9440_v39 }
 0x7b9   :  { %5532 = vst [vmem:[%s9867_s9 + $0x58] sm:$0xff] %v5531_v23  ;;  %v4004_v58 = vpop.f32.mrf.mxu2  ;;  %v4599_v30 = vand.u32 2147483647, %v9440_v39  ;;  %vm4595_vm0 = vweird.f32 %v9440_v39 }
 0x7ba   :  { %v4578_v29 = vmul.f32 %v6338_v34, %v4577_v43  ;;  %v4005_v19 = vadd.f32 %v4004_v58, %v9189_v32  ;;  %3757 = vmatmul.bf16.gmra.mxu1 %v3310_v44  ;;  %v3827_v0 = vmax.f32 %v3719_v47, 0.0  ;;  %v4602_v1 = vor.u32 1.1754944e-38, %v4601_v20 }
 0x7bb   :  { %v3101_v12 = vpop.f32.mrf.mxu3  ;;  %vm4600_vm2 = vcmp.eq.f32.partialorder %v4599_v30, 8.507059e+37 }
 0x7bc   :  { %v6340_v21 = vpop.eup %6339  ;;  %v4579_v24 = vadd.f32 %v6338_v34, %v4578_v29  ;;  %v6123_v63 = vmul.f32 -1.442695, %v4005_v19  ;;  %v3102_v55 = vadd.f32 %v3101_v12, %v10646_v27  ;;  %v10647_v29 = vld [vmem:[#allocation80_spill] sm:$0xff] }
 0x7bd   :  { %v6342_v13 = vpop.eup %6341  ;;  %v9459_v53 = vadd.f32 1.0, %v6340_v21  ;;  %v2602_v44 = vadd.f32 %v10647_v29, %v8470_v26 }
 0x7be   :  { %v4583_v4 = vsel %vm4582_vm13, %v6338_v34, %v4579_v24  ;;  %v4591_v48 = vmul.f32 %v6342_v13, %v9440_v39  ;;  %6343 = vpow2.f32 %v6123_v63  ;;  %vm4596_vm15 = vweird.f32 %v6342_v13 }
 0x7bf   :  { %v5533_v54 = vld [vmem:[#allocation5 + $0x60] sm:$0xff]  ;;  %v4588_v18 = vsel %vm4585_vm14, %v4587_v5, %v4583_v4  ;;  %6345 = vrcp.f32 %v9459_v53  ;;  %v3720_v52 = vpop.f32.mrf.mxu1  ;;  %vm4597_vm1 = vmor %vm4595_vm0, %vm4596_vm15  ;;  %v3236_v3 = vmax.f32 %v3102_v55, 0.0  ;;  %v4614_v19 = vand.u32 2147483647, %v9459_v53  ;;  %v9490_v59 = vpop.f32.mrf.mxu0 }
 0x7c0   :  { %5534 = vst [vmem:[%s9867_s9 + $0x60] sm:$0xff] %v5533_v54  ;;  %v4592_v60 = vsub.f32 1.0, %v4591_v48  ;;  %v3721_v37 = vadd.f32 %v3720_v52, %v3552_v49  ;;  %v4616_v12 = vand.u32 2147483648, %v9459_v53  ;;  %vm4610_vm4 = vweird.f32 %v9459_v53  ;;  %v10648_v49 = vld [vmem:[#allocation42_spill] sm:$0xff] }
 0x7c1   :  { %5354 = vst.msk [vmem:[#allocation5 + $0x68] sm:$0xff] %vm5340_vm6, %v4588_v18  ;;  %v4006_v11 = vpop.f32.mrf.mxu2  ;;  %v2771_v54 = vadd.f32 %v10648_v49, %v2602_v44  ;;  %v3555_v18 = vadd.f32 %v9354_v35, %v9270_v6  ;;  %vm4615_vm7 = vcmp.eq.f32.partialorder %v4614_v19, 8.507059e+37 }
 0x7c2   :  { %v4593_v9 = vmul.f32 %v6342_v13, %v4592_v60  ;;  %v4007_v61 = vadd.f32 %v4006_v11, %v9189_v32  ;;  %v3828_v51 = vmax.f32 %v3721_v37, 0.0  ;;  %v4617_v47 = vor.u32 1.1754944e-38, %v4616_v12 }
 0x7c3   :  { %v3103_v2 = vpop.f32.mrf.mxu3 }
 0x7c4   :  { %v6344_v15 = vpop.eup %6343  ;;  %v4594_v34 = vadd.f32 %v6342_v13, %v4593_v9  ;;  %v6124_v42 = vmul.f32 -1.442695, %v4007_v61  ;;  %v3104_v17 = vadd.f32 %v3103_v2, %v2935_v40  ;;  %v3874_v43 = vpack.c.bf16 %v3828_v51, %v3827_v0  ;;  %v10649_v9 = vld [vmem:[#allocation128_spill] sm:$0xff] }
 0x7c5   :  { %v6346_v50 = vpop.eup %6345  ;;  %v9477_v23 = vadd.f32 1.0, %v6344_v15  ;;  %v2940_v30 = vadd.f32 %v10649_v9, %v2771_v54 }
 0x7c6   :  { %v4598_v28 = vsel %vm4597_vm1, %v6342_v13, %v4594_v34  ;;  %v4606_v22 = vmul.f32 %v6346_v50, %v9459_v53  ;;  %6347 = vpow2.f32 %v6124_v42  ;;  %4048 = vmatmul.bf16.gmra.mxu2 %v3874_v43  ;;  %v3238_v58 = vmax.f32 %v3104_v17, 0.0 }
 0x7c7   :  { %v4603_v39 = vsel %vm4600_vm2, %v4602_v1, %v4598_v28  ;;  %6349 = vrcp.f32 %v9477_v23  ;;  %v3723_v31 = vpop.f32.mrf.mxu1  ;;  %vm4611_vm3 = vweird.f32 %v6346_v50  ;;  %v3557_v53 = vadd.f32 %v9354_v35, %v9292_v7 }
 0x7c8   :  { %v5535_v25 = vld [vmem:[#allocation5 + $0x68] sm:$0xff]  ;;  %5355 = vst.msk [vmem:[#allocation5 + $0x70] sm:$0xff] %vm5340_vm6, %v4603_v39  ;;  %v4607_v14 = vsub.f32 1.0, %v4606_v22  ;;  %v3312_v63 = vpack.c.bf16 %v3238_v58, %v3236_v3  ;;  %vm4612_vm5 = vmor %vm4610_vm4, %vm4611_vm3  ;;  %v3724_v37 = vadd.f32 %v3723_v31, %v3555_v18  ;;  %v4631_v61 = vand.u32 2147483648, %v9477_v23 }
 0x7c9   :  { %5536 = vst [vmem:[%s9867_s9 + $0x68] sm:$0xff] %v5535_v25  ;;  %v4009_v21 = vpop.f32.mrf.mxu2  ;;  %v4629_v2 = vand.u32 2147483647, %v9477_v23  ;;  %vm4625_vm9 = vweird.f32 %v9477_v23 }
 0x7ca   :  { %v4608_v24 = vmul.f32 %v6346_v50, %v4607_v14  ;;  %v4010_v13 = vadd.f32 %v4009_v21, %v9189_v32  ;;  %3762 = vmatmul.bf16.gmra.mxu1 %v3312_v63  ;;  %v3829_v34 = vmax.f32 %v3724_v37, 0.0  ;;  %v4632_v39 = vor.u32 1.1754944e-38, %v4631_v61  ;;  %v9514_v14 = vpop.f32.mrf.mxu0  ;;  %v10652_v37 = vld [vmem:[#allocation131_spill] sm:$0xff] }
 0x7cb   :  { %v3106_v38 = vpop.f32.mrf.mxu3  ;;  %vm4630_vm11 = vcmp.eq.f32.partialorder %v4629_v2, 8.507059e+37 }
 0x7cc   :  { %v6348_v45 = vpop.eup %6347  ;;  %v4609_v5 = vadd.f32 %v6346_v50, %v4608_v24  ;;  %v6125_v4 = vmul.f32 -1.442695, %v4010_v13 }
 0x7cd   :  { %v6350_v48 = vpop.eup %6349  ;;  %v9496_v52 = vadd.f32 1.0, %v6348_v45 }
 0x7ce   :  { %v4613_v60 = vsel %vm4612_vm5, %v6346_v50, %v4609_v5  ;;  %v4621_v46 = vmul.f32 %v6350_v48, %v9477_v23  ;;  %6351 = vpow2.f32 %v6125_v4  ;;  %vm4626_vm8 = vweird.f32 %v6350_v48  ;;  %v10650_v50 = vld [vmem:[#allocation65_spill] sm:$0xff]  ;;  %v10651_v5 = vld [vmem:[#allocation90_spill] sm:$0xff] }
 0x7cf   :  { %v5537_v40 = vld [vmem:[#allocation5 + $0x70] sm:$0xff]  ;;  %v4618_v20 = vsel %vm4615_vm7, %v4617_v47, %v4613_v60  ;;  %6353 = vrcp.f32 %v9496_v52  ;;  %v3725_v11 = vpop.f32.mrf.mxu1  ;;  %v3107_v1 = vadd.f32 %v3106_v38, %v10650_v50  ;;  %vm4627_vm10 = vmor %vm4625_vm9, %vm4626_vm8  ;;  %v4646_v21 = vand.u32 2147483648, %v9496_v52 }
 0x7d0   :  { %5538 = vst [vmem:[%s9867_s9 + $0x70] sm:$0xff] %v5537_v40  ;;  %v4622_v6 = vsub.f32 1.0, %v4621_v46  ;;  %v3726_v0 = vadd.f32 %v3725_v11, %v3557_v53  ;;  %v4644_v38 = vand.u32 2147483647, %v9496_v52  ;;  %v2607_v4 = vadd.f32 %v10651_v5, %v8470_v26 }
 0x7d1   :  { %5356 = vst.msk [vmem:[#allocation5 + $0x78] sm:$0xff] %vm5340_vm6, %v4618_v20  ;;  %v4011_v51 = vpop.f32.mrf.mxu2  ;;  %v3240_v19 = vmax.f32 %v3107_v1, 0.0  ;;  %vm4640_vm13 = vweird.f32 %v9496_v52  ;;  %v4647_v60 = vor.u32 1.1754944e-38, %v4646_v21 }
 0x7d2   :  { %v4623_v7 = vmul.f32 %v6350_v48, %v4622_v6  ;;  %v4012_v15 = vadd.f32 %v4011_v51, %v9189_v32  ;;  %v3830_v27 = vmax.f32 %v3726_v0, 0.0  ;;  %vm4645_vm15 = vcmp.eq.f32.partialorder %v4644_v38, 8.507059e+37  ;;  %v9537_v61 = vpop.f32.mrf.mxu0  ;;  %v10653_v51 = vld [vmem:[#allocation26_spill] sm:$0xff] }
 0x7d3   :  { %v3108_v55 = vpop.f32.mrf.mxu3  ;;  %v2776_v11 = vadd.f32 %v10652_v37, %v2607_v4  ;;  %v3560_v6 = vadd.f32 %v9354_v35, %v9316_v62  ;;  %v3565_v37 = vadd.f32 %v9354_v35, %v9444_v33 }
 0x7d4   :  { %v6352_v42 = vpop.eup %6351  ;;  %v4624_v17 = vadd.f32 %v6350_v48, %v4623_v7  ;;  %v6126_v43 = vmul.f32 -1.442695, %v4012_v15  ;;  %v3109_v28 = vadd.f32 %v3108_v55, %v2940_v30  ;;  %v3875_v25 = vpack.c.bf16 %v3830_v27, %v3829_v34 }
 0x7d5   :  { %v6354_v22 = vpop.eup %6353  ;;  %v9512_v31 = vadd.f32 1.0, %v6352_v42  ;;  %v2945_v7 = vadd.f32 %v10653_v51, %v2776_v11 }
 0x7d6   :  { %v4628_v3 = vsel %vm4627_vm10, %v6350_v48, %v4624_v17  ;;  %v4636_v23 = vmul.f32 %v6354_v22, %v9496_v52  ;;  %6355 = vpow2.f32 %v6126_v43  ;;  %4053 = vmatmul.bf16.gmra.mxu2 %v3875_v25  ;;  %v3242_v12 = vmax.f32 %v3109_v28, 0.0  ;;  %v10654_v17 = vld [vmem:[#allocation59_spill] sm:$0xff] }
 0x7d7   :  { %v4633_v58 = vsel %vm4630_vm11, %v4632_v39, %v4628_v3  ;;  %6357 = vrcp.f32 %v9512_v31  ;;  %v3728_v24 = vpop.f32.mrf.mxu1  ;;  %vm4641_vm12 = vweird.f32 %v6354_v22  ;;  %v3562_v52 = vadd.f32 %v9354_v35, %v9336_v16 }
 0x7d8   :  { %v5539_v29 = vld [vmem:[#allocation5 + $0x78] sm:$0xff]  ;;  %5357 = vst.msk [vmem:[#allocation5 + $0x80] sm:$0xff] %vm5340_vm6, %v4633_v58  ;;  %v4637_v44 = vsub.f32 1.0, %v4636_v23  ;;  %v3314_v45 = vpack.c.bf16 %v3242_v12, %v3240_v19  ;;  %vm4642_vm14 = vmor %vm4640_vm13, %vm4641_vm12  ;;  %v4659_v62 = vand.u32 2147483647, %v9512_v31  ;;  %v4661_v2 = vand.u32 2147483648, %v9512_v31 }
 0x7d9   :  { %5540 = vst [vmem:[%s9867_s9 + $0x78] sm:$0xff] %v5539_v29  ;;  %v4014_v63 = vpop.f32.mrf.mxu2  ;;  %v3729_v15 = vadd.f32 %v3728_v24, %v3560_v6  ;;  %vm4655_vm1 = vweird.f32 %v9512_v31 }
 0x7da   :  { %v4638_v13 = vmul.f32 %v6354_v22, %v4637_v44  ;;  %v4015_v48 = vadd.f32 %v4014_v63, %v9189_v32  ;;  %3767 = vmatmul.bf16.gmra.mxu1 %v3314_v45  ;;  %vm4660_vm3 = vcmp.eq.f32.partialorder %v4659_v62, 8.507059e+37  ;;  %v4662_v3 = vor.u32 1.1754944e-38, %v4661_v2  ;;  %v9558_v5 = vpop.f32.mrf.mxu0  ;;  %v10656_v62 = vld [vmem:[#allocation132_spill] sm:$0xff] }
 0x7db   :  { %v3111_v49 = vpop.f32.mrf.mxu3  ;;  %v3831_v44 = vmax.f32 %v3729_v15, 0.0 }
 0x7dc   :  { %v6356_v54 = vpop.eup %6355  ;;  %v4639_v18 = vadd.f32 %v6354_v22, %v4638_v13  ;;  %v6127_v53 = vmul.f32 -1.442695, %v4015_v48  ;;  %v3112_v50 = vadd.f32 %v3111_v49, %v10654_v17 }
 0x7dd   :  { %v6358_v47 = vpop.eup %6357  ;;  %v9528_v46 = vadd.f32 1.0, %v6356_v54 }
 0x7de   :  { %v4643_v40 = vsel %vm4642_vm14, %v6354_v22, %v4639_v18  ;;  %v4651_v20 = vmul.f32 %v6358_v47, %v9512_v31  ;;  %vm4656_vm0 = vweird.f32 %v6358_v47  ;;  %v3244_v63 = vmax.f32 %v3112_v50, 0.0 }
 0x7df   :  { %v5541_v9 = vld [vmem:[#allocation5 + $0x80] sm:$0xff]  ;;  %v4648_v30 = vsel %vm4645_vm15, %v4647_v60, %v4643_v40  ;;  %6359 = vrcp.f32 %v9528_v46  ;;  %v3730_v34 = vpop.f32.mrf.mxu1  ;;  %vm4657_vm2 = vmor %vm4655_vm1, %vm4656_vm0  ;;  %v4676_v38 = vand.u32 2147483648, %v9528_v46  ;;  %v4674_v48 = vand.u32 2147483647, %v9528_v46 }
 0x7e0   :  { %5542 = vst [vmem:[%s9867_s9 + $0x80] sm:$0xff] %v5541_v9  ;;  %v4652_v0 = vsub.f32 1.0, %v4651_v20  ;;  %6361 = vpow2.f32 %v6127_v53  ;;  %v3731_v55 = vadd.f32 %v3730_v34, %v3562_v52  ;;  %v10655_v53 = vld [vmem:[#allocation8_spill] sm:$0xff]  ;;  %vm4670_vm5 = vweird.f32 %v9528_v46  ;;  %v10657_v34 = vld [vmem:[#allocation133_spill] sm:$0xff] }
 0x7e1   :  { %5358 = vst.msk [vmem:[#allocation5 + $0x88] sm:$0xff] %vm5340_vm6, %v4648_v30  ;;  %v4016_v27 = vpop.f32.mrf.mxu2  ;;  %v2612_v40 = vadd.f32 %v10655_v53, %v8470_v26  ;;  %v4677_v11 = vor.u32 1.1754944e-38, %v4676_v38  ;;  %vm4675_vm8 = vcmp.eq.f32.partialorder %v4674_v48, 8.507059e+37 }
 0x7e2   :  { %v4653_v16 = vmul.f32 %v6358_v47, %v4652_v0  ;;  %v4017_v42 = vadd.f32 %v4016_v27, %v9189_v32  ;;  %v3832_v28 = vmax.f32 %v3731_v55, 0.0 }
 0x7e3   :  { %v3113_v1 = vpop.f32.mrf.mxu3  ;;  %v2781_v2 = vadd.f32 %v10656_v62, %v2612_v40 }
 0x7e4   :  { %v4654_v43 = vadd.f32 %v6358_v47, %v4653_v16  ;;  %v6128_v22 = vmul.f32 -1.442695, %v4017_v42  ;;  %v3114_v39 = vadd.f32 %v3113_v1, %v2945_v7  ;;  %v3876_v13 = vpack.c.bf16 %v3832_v28, %v3831_v44  ;;  %v10658_v1 = vld [vmem:[#allocation57_spill] sm:$0xff] }
 0x7e5   :  { %v6360_v25 = vpop.eup %6359  ;;  %v2950_v27 = vadd.f32 %v10657_v34, %v2781_v2 }
 0x7e6   :  { %v6362_v23 = vpop.eup %6361  ;;  %v4658_v58 = vsel %vm4657_vm2, %v6358_v47, %v4654_v43  ;;  %v4666_v29 = vmul.f32 %v6360_v25, %v9528_v46  ;;  %6363 = vpow2.f32 %v6128_v22  ;;  %v3246_v31 = vmax.f32 %v3114_v39, 0.0  ;;  %4058 = vmatmul.bf16.gmra.mxu2 %v3876_v13  ;;  %v9583_v39 = vpop.f32.mrf.mxu0 }
 0x7e7   :  { %v4663_v19 = vsel %vm4660_vm3, %v4662_v3, %v4658_v58  ;;  %v9550_v12 = vadd.f32 1.0, %v6362_v23  ;;  %v3733_v45 = vpop.f32.mrf.mxu1  ;;  %vm4671_vm4 = vweird.f32 %v6360_v25  ;;  %v3567_v46 = vadd.f32 %v9354_v35, %v9471_v8 }
 0x7e8   :  { %v5543_v21 = vld [vmem:[#allocation5 + $0x88] sm:$0xff]  ;;  %5359 = vst.msk [vmem:[#allocation5 + $0x90] sm:$0xff] %vm5340_vm6, %v4663_v19  ;;  %v4667_v24 = vsub.f32 1.0, %v4666_v29  ;;  %v3316_v49 = vpack.c.bf16 %v3246_v31, %v3244_v63  ;;  %vm4672_vm7 = vmor %vm4670_vm5, %vm4671_vm4  ;;  %v3734_v7 = vadd.f32 %v3733_v45, %v3565_v37  ;;  %v2617_v37 = vadd.f32 %v8981_v57, %v8470_v26 }
 0x7e9   :  { %5544 = vst [vmem:[%s9867_s9 + $0x88] sm:$0xff] %v5543_v21  ;;  %6365 = vrcp.f32 %v9550_v12  ;;  %v4019_v54 = vpop.f32.mrf.mxu2  ;;  %v4689_v55 = vand.u32 2147483647, %v9550_v12  ;;  %v4691_v50 = vand.u32 2147483648, %v9550_v12  ;;  %vm4685_vm10 = vweird.f32 %v9550_v12 }
 0x7ea   :  { %v4668_v4 = vmul.f32 %v6360_v25, %v4667_v24  ;;  %v4020_v18 = vadd.f32 %v4019_v54, %v9189_v32  ;;  %3772 = vmatmul.bf16.gmra.mxu1 %v3316_v49  ;;  %v3833_v8 = vmax.f32 %v3734_v7, 0.0 }
 0x7eb   :  { %v3116_v47 = vpop.f32.mrf.mxu3  ;;  %v4692_v24 = vor.u32 1.1754944e-38, %v4691_v50  ;;  %vm4690_vm12 = vcmp.eq.f32.partialorder %v4689_v55, 8.507059e+37 }
 0x7ec   :  { %v6364_v60 = vpop.eup %6363  ;;  %v4669_v20 = vadd.f32 %v6360_v25, %v4668_v4  ;;  %v6129_v9 = vmul.f32 -1.442695, %v4020_v18  ;;  %v3117_v43 = vadd.f32 %v3116_v47, %v10658_v1  ;;  %v10661_v1 = vld [vmem:[#allocation29_spill] sm:$0xff] }
 0x7ed   :  { %v9567_v6 = vadd.f32 1.0, %v6364_v60 }
 0x7ee   :  { %v4673_v30 = vsel %vm4672_vm7, %v6360_v25, %v4669_v20  ;;  %v3248_v48 = vmax.f32 %v3117_v43, 0.0 }
 0x7ef   :  { %v6366_v52 = vpop.eup %6365  ;;  %v5545_v0 = vld [vmem:[#allocation5 + $0x90] sm:$0xff]  ;;  %v4678_v51 = vsel %vm4675_vm8, %v4677_v11, %v4673_v30  ;;  %6367 = vrcp.f32 %v9567_v6  ;;  %v3735_v15 = vpop.f32.mrf.mxu1  ;;  %v4704_v47 = vand.u32 2147483647, %v9567_v6  ;;  %vm4700_vm14 = vweird.f32 %v9567_v6 }
 0x7f0   :  { %5546 = vst [vmem:[%s9867_s9 + $0x90] sm:$0xff] %v5545_v0  ;;  %v4681_v33 = vmul.f32 %v6366_v52, %v9550_v12  ;;  %6369 = vpow2.f32 %v6129_v9  ;;  %v3736_v42 = vadd.f32 %v3735_v15, %v3567_v46  ;;  %vm4686_vm9 = vweird.f32 %v6366_v52 }
 0x7f1   :  { %5360 = vst.msk [vmem:[#allocation5 + $0x98] sm:$0xff] %vm5340_vm6, %v4678_v51  ;;  %v4021_v17 = vpop.f32.mrf.mxu2  ;;  %vm4687_vm11 = vmor %vm4685_vm10, %vm4686_vm9  ;;  %v4706_v12 = vand.u32 2147483648, %v9567_v6  ;;  %v3570_v30 = vadd.f32 %v9354_v35, %v9490_v59  ;;  %v9602_v51 = vpop.f32.mrf.mxu0  ;;  %vm4705_vm0 = vcmp.eq.f32.partialorder %v4704_v47, 8.507059e+37  ;;  %v3572_v15 = vadd.f32 %v9354_v35, %v9514_v14 }
 0x7f2   :  { %v4682_v16 = vsub.f32 1.0, %v4681_v33  ;;  %v4022_v28 = vadd.f32 %v4021_v17, %v9189_v32  ;;  %v3834_v3 = vmax.f32 %v3736_v42, 0.0  ;;  %v10659_v33 = vld [vmem:[#allocation63_spill] sm:$0xff]  ;;  %v2622_v47 = vadd.f32 %v8996_v10, %v8470_v26 }
 0x7f3   :  { %v3118_v22 = vpop.f32.mrf.mxu3 }
 0x7f4   :  { %v4683_v25 = vmul.f32 %v6366_v52, %v4682_v16  ;;  %v3119_v23 = vadd.f32 %v3118_v22, %v2950_v27  ;;  %v6130_v29 = vmul.f32 -1.442695, %v4022_v28  ;;  %v3877_v21 = vpack.c.bf16 %v3834_v3, %v3833_v8  ;;  %v10660_v16 = vld [vmem:[#allocation10_spill] sm:$0xff] }
 0x7f5   :  { %v6368_v58 = vpop.eup %6367  ;;  %v2791_v10 = vadd.f32 %v9073_v41, %v2622_v47 }
 0x7f6   :  { %v6370_v44 = vpop.eup %6369  ;;  %v4684_v19 = vadd.f32 %v6366_v52, %v4683_v25  ;;  %v4696_v31 = vmul.f32 %v6368_v58, %v9567_v6  ;;  %6371 = vpow2.f32 %v6130_v29  ;;  %v3250_v13 = vmax.f32 %v3119_v23, 0.0  ;;  %4063 = vmatmul.bf16.gmra.mxu2 %v3877_v21 }
 0x7f7   :  { %v9587_v63 = vadd.f32 1.0, %v6370_v44  ;;  %v3738_v54 = vpop.f32.mrf.mxu1  ;;  %vm4701_vm13 = vweird.f32 %v6368_v58  ;;  %v2786_v6 = vadd.f32 %v10659_v33, %v2617_v37 }
 0x7f8   :  { %v5547_v38 = vld [vmem:[#allocation5 + $0x98] sm:$0xff]  ;;  %v4688_v45 = vsel %vm4687_vm11, %v6366_v52, %v4684_v19  ;;  %v4697_v4 = vsub.f32 1.0, %v4696_v31  ;;  %v3318_v60 = vpack.c.bf16 %v3250_v13, %v3248_v48  ;;  %vm4702_vm15 = vmor %vm4700_vm14, %vm4701_vm13  ;;  %v4707_v52 = vor.u32 1.1754944e-38, %v4706_v12 }
 0x7f9   :  { %5548 = vst [vmem:[%s9867_s9 + $0x98] sm:$0xff] %v5547_v38  ;;  %v4693_v49 = vsel %vm4690_vm12, %v4692_v24, %v4688_v45  ;;  %6373 = vrcp.f32 %v9587_v63  ;;  %v4024_v53 = vpop.f32.mrf.mxu2  ;;  %v3739_v57 = vadd.f32 %v3738_v54, %v3570_v30  ;;  %v2955_v55 = vadd.f32 %v10660_v16, %v2786_v6  ;;  %v9624_v48 = vpop.f32.mrf.mxu0 }
 0x7fa   :  { %5361 = vst.msk [vmem:[#allocation5 + $0xa0] sm:$0xff] %vm5340_vm6, %v4693_v49  ;;  %v4698_v18 = vmul.f32 %v6368_v58, %v4697_v4  ;;  %v4025_v40 = vadd.f32 %v4024_v53, %v9189_v32  ;;  %3777 = vmatmul.bf16.gmra.mxu1 %v3318_v60  ;;  %v4719_v17 = vand.u32 2147483647, %v9587_v63  ;;  %v4721_v35 = vand.u32 2147483648, %v9587_v63 }
 0x7fb   :  { %v3121_v20 = vpop.f32.mrf.mxu3  ;;  %v3835_v14 = vmax.f32 %v3739_v57, 0.0  ;;  %vm4715_vm2 = vweird.f32 %v9587_v63 }
 0x7fc   :  { %v4699_v11 = vadd.f32 %v6368_v58, %v4698_v18  ;;  %v6372_v9 = vpop.eup %6371  ;;  %v6131_v0 = vmul.f32 -1.442695, %v4025_v40  ;;  %v3122_v43 = vadd.f32 %v3121_v20, %v10661_v1  ;;  %v4722_v38 = vor.u32 1.1754944e-38, %v4721_v35 }
 0x7fd   :  { %v9604_v62 = vadd.f32 1.0, %v6372_v9  ;;  %vm4720_vm4 = vcmp.eq.f32.partialorder %v4719_v17, 8.507059e+37 }
 0x7fe   :  { %v4703_v7 = vsel %vm4702_vm15, %v6368_v58, %v4699_v11  ;;  %6375 = vpow2.f32 %v6131_v0  ;;  %v3252_v4 = vmax.f32 %v3122_v43, 0.0  ;;  %v9641_v0 = vld [vmem:[%s9864_s6] ss:$0 sm:$0xff] }
 0x7ff   :  { %v6374_v2 = vpop.eup %6373  ;;  %v4708_v46 = vsel %vm4705_vm0, %v4707_v52, %v4703_v7  ;;  %6377 = vrcp.f32 %v9604_v62  ;;  %v3740_v27 = vpop.f32.mrf.mxu1  ;;  %v4736_v60 = vand.u32 2147483648, %v9604_v62  ;;  %v4734_v20 = vand.u32 2147483647, %v9604_v62 }
 0x800   :  { %5362 = vst.msk [vmem:[#allocation5 + $0xa8] sm:$0xff] %vm5340_vm6, %v4708_v46  ;;  %v4711_v59 = vmul.f32 %v6374_v2, %v9587_v63  ;;  %v3741_v50 = vadd.f32 %v3740_v27, %v3572_v15  ;;  %vm4716_vm1 = vweird.f32 %v6374_v2  ;;  %vm4730_vm7 = vweird.f32 %v9604_v62 }
 0x801   :  { %v5549_v34 = vld [vmem:[#allocation5 + $0xa0] sm:$0xff]  ;;  %v4026_v8 = vpop.f32.mrf.mxu2  ;;  %vm4717_vm3 = vmor %vm4715_vm2, %vm4716_vm1  ;;  %v3575_v7 = vadd.f32 %v9641_v0, %v9537_v61  ;;  %vm4735_vm9 = vcmp.eq.f32.partialorder %v4734_v20, 8.507059e+37  ;;  %v3577_v41 = vadd.f32 %v9641_v0, %v9558_v5  ;;  %v2960_v27 = vadd.f32 %v9182_v56, %v2791_v10  ;;  %v9654_v16 = vpop.f32.mrf.mxu0 }
 0x802   :  { %5550 = vst [vmem:[%s9867_s9 + $0xa0] sm:$0xff] %v5549_v34  ;;  %v4712_v42 = vsub.f32 1.0, %v4711_v59  ;;  %v4027_v28 = vadd.f32 %v4026_v8, %v9189_v32  ;;  %v3836_v3 = vmax.f32 %v3741_v50, 0.0 }
 0x803   :  { %v3123_v22 = vpop.f32.mrf.mxu3 }
 0x804   :  { %v4713_v25 = vmul.f32 %v6374_v2, %v4712_v42  ;;  %v3124_v23 = vadd.f32 %v3123_v22, %v2955_v55  ;;  %v6376_v58 = vpop.eup %6375  ;;  %v6132_v29 = vmul.f32 -1.442695, %v4027_v28  ;;  %v3878_v21 = vpack.c.bf16 %v3836_v3, %v3835_v14 }
 0x805   :  { %v6378_v44 = vpop.eup %6377  ;;  %v9621_v31 = vadd.f32 1.0, %v6376_v58 }
 0x806   :  { %v4714_v19 = vadd.f32 %v6374_v2, %v4713_v25  ;;  %v3254_v24 = vmax.f32 %v3124_v23, 0.0  ;;  %v4726_v45 = vmul.f32 %v6378_v44, %v9604_v62  ;;  %6379 = vpow2.f32 %v6132_v29  ;;  %4068 = vmatmul.bf16.gmra.mxu2 %v3878_v21 }
 0x807   :  { %v5551_v13 = vld [vmem:[#allocation5 + $0xa8] sm:$0xff]  ;;  %6381 = vrcp.f32 %v9621_v31  ;;  %v3743_v18 = vpop.f32.mrf.mxu1  ;;  %vm4731_vm5 = vweird.f32 %v6378_v44  ;;  %v4749_v59 = vand.u32 2147483647, %v9621_v31  ;;  %v4751_v5 = vand.u32 2147483648, %v9621_v31 }
 0x808   :  { %5552 = vst [vmem:[%s9867_s9 + $0xa8] sm:$0xff] %v5551_v13  ;;  %v4718_v63 = vsel %vm4717_vm3, %v6374_v2, %v4714_v19  ;;  %v4727_v12 = vsub.f32 1.0, %v4726_v45  ;;  %v3320_v54 = vpack.c.bf16 %v3254_v24, %v3252_v4  ;;  %vm4732_vm8 = vmor %vm4730_vm7, %vm4731_vm5  ;;  %v4737_v2 = vor.u32 1.1754944e-38, %v4736_v60 }
 0x809   :  { %v4723_v49 = vsel %vm4720_vm4, %v4722_v38, %v4718_v63  ;;  %v4029_v53 = vpop.f32.mrf.mxu2  ;;  %v3744_v6 = vadd.f32 %v3743_v18, %v3575_v7  ;;  %vm4745_vm11 = vweird.f32 %v9621_v31  ;;  %vm4750_vm12 = vcmp.eq.f32.partialorder %v4749_v59, 8.507059e+37 }
 0x80a   :  { %5363 = vst.msk [vmem:[#allocation5 + $0xb0] sm:$0xff] %vm5340_vm6, %v4723_v49  ;;  %v4728_v40 = vmul.f32 %v6378_v44, %v4727_v12  ;;  %v4030_v37 = vadd.f32 %v4029_v53, %v9189_v32  ;;  %3782 = vmatmul.bf16.gmra.mxu1 %v3320_v54  ;;  %v4752_v3 = vor.u32 1.1754944e-38, %v4751_v5  ;;  %v9674_v54 = vpop.f32.mrf.mxu0 }
 0x80b   :  { %v3126_v11 = vpop.f32.mrf.mxu3  ;;  %v3837_v14 = vmax.f32 %v3744_v6, 0.0 }
 0x80c   :  { %v6380_v9 = vpop.eup %6379  ;;  %v4729_v30 = vadd.f32 %v6378_v44, %v4728_v40  ;;  %v6133_v52 = vmul.f32 -1.442695, %v4030_v37  ;;  %v3127_v50 = vadd.f32 %v3126_v11, %v8994_v36  ;;  %v3580_v40 = vadd.f32 %v9641_v0, %v9583_v39 }
 0x80d   :  { %v6382_v26 = vpop.eup %6381  ;;  %v9645_v46 = vadd.f32 1.0, %v6380_v9 }
 0x80e   :  { %v4733_v57 = vsel %vm4732_vm8, %v6378_v44, %v4729_v30  ;;  %v4741_v62 = vmul.f32 %v6382_v26, %v9621_v31  ;;  %6383 = vpow2.f32 %v6133_v52  ;;  %vm4746_vm10 = vweird.f32 %v6382_v26 }
 0x80f   :  { %v4738_v33 = vsel %vm4735_vm9, %v4737_v2, %v4733_v57  ;;  %6385 = vrcp.f32 %v9645_v46  ;;  %v3745_v34 = vpop.f32.mrf.mxu1  ;;  %vm4747_vm13 = vmor %vm4745_vm11, %vm4746_vm10  ;;  %v3256_v19 = vmax.f32 %v3127_v50, 0.0  ;;  %v4766_v45 = vand.u32 2147483648, %v9645_v46 }
 0x810   :  { %5364 = vst.msk [vmem:[#allocation5 + $0xb8] sm:$0xff] %vm5340_vm6, %v4738_v33  ;;  %v4742_v61 = vsub.f32 1.0, %v4741_v62  ;;  %v3746_v55 = vadd.f32 %v3745_v34, %v3577_v41  ;;  %v4764_v49 = vand.u32 2147483647, %v9645_v46  ;;  %vm4760_vm15 = vweird.f32 %v9645_v46 }
 0x811   :  { %v5553_v15 = vld [vmem:[#allocation5 + $0xb0] sm:$0xff]  ;;  %v4031_v42 = vpop.f32.mrf.mxu2  ;;  %v4767_v20 = vor.u32 1.1754944e-38, %v4766_v45  ;;  %v3582_v30 = vadd.f32 %v9641_v0, %v9602_v51 }
 0x812   :  { %5554 = vst [vmem:[%s9867_s9 + $0xb0] sm:$0xff] %v5553_v15  ;;  %v4743_v17 = vmul.f32 %v6382_v26, %v4742_v61  ;;  %v4032_v8 = vadd.f32 %v4031_v42, %v9189_v32  ;;  %v3838_v1 = vmax.f32 %v3746_v55, 0.0  ;;  %vm4765_vm1 = vcmp.eq.f32.partialorder %v4764_v49, 8.507059e+37 }
 0x813   :  { %v3128_v35 = vpop.f32.mrf.mxu3 }
 0x814   :  { %v3129_v56 = vadd.f32 %v3128_v35, %v2960_v27  ;;  %v6384_v43 = vpop.eup %6383  ;;  %v4744_v28 = vadd.f32 %v6382_v26, %v4743_v17  ;;  %v6134_v22 = vmul.f32 -1.442695, %v4032_v8  ;;  %v3879_v58 = vpack.c.bf16 %v3838_v1, %v3837_v14  ;;  %v9690_v27 = vpop.f32.mrf.mxu0 }
 0x815   :  { %v6386_v25 = vpop.eup %6385  ;;  %v9663_v23 = vadd.f32 1.0, %v6384_v43 }
 0x816   :  { %v3258_v29 = vmax.f32 %v3129_v56, 0.0  ;;  %v4748_v36 = vsel %vm4747_vm13, %v6382_v26, %v4744_v28  ;;  %v4756_v44 = vmul.f32 %v6386_v25, %v9645_v46  ;;  %6387 = vpow2.f32 %v6134_v22  ;;  %4073 = vmatmul.bf16.gmra.mxu2 %v3879_v58 }
 0x817   :  { %v5555_v21 = vld [vmem:[#allocation5 + $0xb8] sm:$0xff]  ;;  %v4753_v24 = vsel %vm4750_vm12, %v4752_v3, %v4748_v36  ;;  %6389 = vrcp.f32 %v9663_v23  ;;  %v3748_v38 = vpop.f32.mrf.mxu1  ;;  %vm4761_vm14 = vweird.f32 %v6386_v25  ;;  %v4781_v39 = vand.u32 2147483648, %v9663_v23 }
 0x818   :  { %5556 = vst [vmem:[%s9867_s9 + $0xb8] sm:$0xff] %v5555_v21  ;;  %v4757_v31 = vsub.f32 1.0, %v4756_v44  ;;  %v3322_v13 = vpack.c.bf16 %v3258_v29, %v3256_v19  ;;  %vm4762_vm0 = vmor %vm4760_vm15, %vm4761_vm14  ;;  %v3749_v26 = vadd.f32 %v3748_v38, %v3580_v40  ;;  %v4779_v51 = vand.u32 2147483647, %v9663_v23 }
 0x819   :  { %5365 = vst.msk [vmem:[#allocation5 + $0xc0] sm:$0xff] %vm5340_vm6, %v4753_v24  ;;  %v4034_v4 = vpop.f32.mrf.mxu2  ;;  %vm4775_vm3 = vweird.f32 %v9663_v23  ;;  %v4782_v5 = vor.u32 1.1754944e-38, %v4781_v39  ;;  %v3585_v36 = vadd.f32 %v9641_v0, %v9624_v48 }
 0x81a   :  { %v4758_v63 = vmul.f32 %v6386_v25, %v4757_v31  ;;  %v4035_v12 = vadd.f32 %v4034_v4, %v9189_v32  ;;  %3787 = vmatmul.bf16.gmra.mxu1 %v3322_v13  ;;  %v3839_v33 = vmax.f32 %v3749_v26, 0.0  ;;  %vm4780_vm5 = vcmp.eq.f32.partialorder %v4779_v51, 8.507059e+37 }
 0x81b   :  { %v3587_v31 = vadd.f32 %v9641_v0, %v9654_v16 }
 0x81c   :  { %v6388_v18 = vpop.eup %6387  ;;  %v4759_v47 = vadd.f32 %v6386_v25, %v4758_v63  ;;  %v6135_v60 = vmul.f32 -1.442695, %v4035_v12  ;;  %v9707_v13 = vpop.f32.mrf.mxu0 }
 0x81d   :  { %v6390_v53 = vpop.eup %6389  ;;  %v4343_v37 = vadd.f32 1.0, %v6388_v18 }
 0x81e   :  { %v4763_v11 = vsel %vm4762_vm0, %v6386_v25, %v4759_v47  ;;  %v4771_v9 = vmul.f32 %v6390_v53, %v9663_v23  ;;  %6391 = vpow2.f32 %v6135_v60  ;;  %vm4776_vm2 = vweird.f32 %v6390_v53 }
 0x81f   :  { %v4768_v52 = vsel %vm4765_vm1, %v4767_v20, %v4763_v11  ;;  %6393 = vrcp.f32 %v4343_v37  ;;  %v3750_v2 = vpop.f32.mrf.mxu1  ;;  %vm4777_vm4 = vmor %vm4775_vm3, %vm4776_vm2  ;;  %v4796_v56 = vand.u32 2147483648, %v4343_v37  ;;  %v4794_v22 = vand.u32 2147483647, %v4343_v37 }
 0x820   :  { %v5557_v10 = vld [vmem:[#allocation5 + $0xc0] sm:$0xff]  ;;  %5366 = vst.msk [vmem:[#allocation5 + $0xc8] sm:$0xff] %vm5340_vm6, %v4768_v52  ;;  %v4772_v7 = vsub.f32 1.0, %v4771_v9  ;;  %v3751_v46 = vadd.f32 %v3750_v2, %v3582_v30  ;;  %vm4790_vm8 = vweird.f32 %v4343_v37 }
 0x821   :  { %5558 = vst [vmem:[%s9867_s9 + $0xc0] sm:$0xff] %v5557_v10  ;;  %v4036_v57 = vpop.f32.mrf.mxu2  ;;  %v4797_v44 = vor.u32 1.1754944e-38, %v4796_v56  ;;  %vm4795_vm10 = vcmp.eq.f32.partialorder %v4794_v22, 8.507059e+37 }
 0x822   :  { %v4773_v62 = vmul.f32 %v6390_v53, %v4772_v7  ;;  %v4037_v41 = vadd.f32 %v4036_v57, %v9189_v32  ;;  %v3840_v6 = vmax.f32 %v3751_v46, 0.0 }
 0x824   :  { %v6392_v15 = vpop.eup %6391  ;;  %v4774_v61 = vadd.f32 %v6390_v53, %v4773_v62  ;;  %v6136_v59 = vmul.f32 -1.442695, %v4037_v41  ;;  %v3880_v42 = vpack.c.bf16 %v3840_v6, %v3839_v33  ;;  %v9725_v62 = vpop.f32.mrf.mxu0 }
 0x825   :  { %v6394_v34 = vpop.eup %6393  ;;  %v9692_v55 = vadd.f32 1.0, %v6392_v15 }
 0x826   :  { %v4778_v17 = vsel %vm4777_vm4, %v6390_v53, %v4774_v61  ;;  %v4786_v50 = vmul.f32 %v6394_v34, %v4343_v37  ;;  %6395 = vpow2.f32 %v6136_v59  ;;  %4078 = vmatmul.bf16.gmra.mxu2 %v3880_v42  ;;  %vm4791_vm7 = vweird.f32 %v6394_v34 }
 0x827   :  { %v5559_v8 = vld [vmem:[#allocation5 + $0xc8] sm:$0xff]  ;;  %v4783_v35 = vsel %vm4780_vm5, %v4782_v5, %v4778_v17  ;;  %6397 = vrcp.f32 %v9692_v55  ;;  %v3753_v1 = vpop.f32.mrf.mxu1  ;;  %vm4792_vm9 = vmor %vm4790_vm8, %vm4791_vm7  ;;  %v4811_v49 = vand.u32 2147483648, %v9692_v55  ;;  %v4809_v47 = vand.u32 2147483647, %v9692_v55 }
 0x828   :  { %5560 = vst [vmem:[%s9867_s9 + $0xc8] sm:$0xff] %v5559_v8  ;;  %v4787_v14 = vsub.f32 1.0, %v4786_v50  ;;  %v3754_v45 = vadd.f32 %v3753_v1, %v3585_v36  ;;  %vm4805_vm12 = vweird.f32 %v9692_v55 }
 0x829   :  { %5367 = vst.msk [vmem:[#allocation5 + $0xd0] sm:$0xff] %vm5340_vm6, %v4783_v35  ;;  %v4039_v43 = vpop.f32.mrf.mxu2  ;;  %v4812_v30 = vor.u32 1.1754944e-38, %v4811_v49  ;;  %vm4810_vm14 = vcmp.eq.f32.partialorder %v4809_v47, 8.507059e+37  ;;  %v3592_v35 = vadd.f32 %v9641_v0, %v9690_v27 }
 0x82a   :  { %v4788_v28 = vmul.f32 %v6394_v34, %v4787_v14  ;;  %v4040_v25 = vadd.f32 %v4039_v43, %v9189_v32  ;;  %v3841_v53 = vmax.f32 %v3754_v45, 0.0 }
 0x82c   :  { %v6396_v3 = vpop.eup %6395  ;;  %v4789_v23 = vadd.f32 %v6394_v34, %v4788_v28  ;;  %v6137_v58 = vmul.f32 -1.442695, %v4040_v25 }
 0x82d   :  { %v6398_v29 = vpop.eup %6397  ;;  %v9702_v19 = vadd.f32 1.0, %v6396_v3 }
 0x82e   :  { %v4793_v21 = vsel %vm4792_vm9, %v6394_v34, %v4789_v23  ;;  %v4801_v24 = vmul.f32 %v6398_v29, %v9692_v55  ;;  %6399 = vpow2.f32 %v6137_v58  ;;  %vm4806_vm11 = vweird.f32 %v6398_v29  ;;  %v9747_v58 = vpop.f32.mrf.mxu0 }
 0x82f   :  { %v4798_v38 = vsel %vm4795_vm10, %v4797_v44, %v4793_v21  ;;  %6401 = vrcp.f32 %v9702_v19  ;;  %v3755_v63 = vpop.f32.mrf.mxu1  ;;  %vm4807_vm13 = vmor %vm4805_vm12, %vm4806_vm11  ;;  %v4826_v51 = vand.u32 2147483648, %v9702_v19  ;;  %v4824_v6 = vand.u32 2147483647, %v9702_v19 }
 0x830   :  { %v5561_v4 = vld [vmem:[#allocation5 + $0xd0] sm:$0xff]  ;;  %5368 = vst.msk [vmem:[#allocation5 + $0xd8] sm:$0xff] %vm5340_vm6, %v4798_v38  ;;  %v4802_v48 = vsub.f32 1.0, %v4801_v24  ;;  %v3756_v12 = vadd.f32 %v3755_v63, %v3587_v31  ;;  %vm4820_vm0 = vweird.f32 %v9702_v19  ;;  %v3590_v55 = vadd.f32 %v9641_v0, %v9674_v54 }
 0x831   :  { %5562 = vst [vmem:[%s9867_s9 + $0xd0] sm:$0xff] %v5561_v4  ;;  %v4041_v18 = vpop.f32.mrf.mxu2  ;;  %v4827_v42 = vor.u32 1.1754944e-38, %v4826_v51  ;;  %vm4825_vm2 = vcmp.eq.f32.partialorder %v4824_v6, 8.507059e+37 }
 0x832   :  { %v4803_v16 = vmul.f32 %v6398_v29, %v4802_v48  ;;  %v4042_v60 = vadd.f32 %v4041_v18, %v9189_v32  ;;  %v3842_v40 = vmax.f32 %v3756_v12, 0.0 }
 0x834   :  { %v6400_v20 = vpop.eup %6399  ;;  %v4804_v37 = vadd.f32 %v6398_v29, %v4803_v16  ;;  %v6138_v11 = vmul.f32 -1.442695, %v4042_v60  ;;  %v3881_v26 = vpack.c.bf16 %v3842_v40, %v3841_v53 }
 0x835   :  { %v6402_v9 = vpop.eup %6401  ;;  %v9718_v52 = vadd.f32 1.0, %v6400_v20 }
 0x836   :  { %v4808_v10 = vsel %vm4807_vm13, %v6398_v29, %v4804_v37  ;;  %v4816_v7 = vmul.f32 %v6402_v9, %v9702_v19  ;;  %6403 = vpow2.f32 %v6138_v11  ;;  %4083 = vmatmul.bf16.gmra.mxu2 %v3881_v26  ;;  %vm4821_vm15 = vweird.f32 %v6402_v9 }
 0x837   :  { %v5563_v2 = vld [vmem:[#allocation5 + $0xd8] sm:$0xff]  ;;  %v4813_v39 = vsel %vm4810_vm14, %v4812_v30, %v4808_v10  ;;  %6405 = vrcp.f32 %v9718_v52  ;;  %v3758_v57 = vpop.f32.mrf.mxu1  ;;  %vm4822_vm1 = vmor %vm4820_vm0, %vm4821_vm15  ;;  %v4841_v28 = vand.u32 2147483648, %v9718_v52  ;;  %v4839_v27 = vand.u32 2147483647, %v9718_v52 }
 0x838   :  { %5564 = vst [vmem:[%s9867_s9 + $0xd8] sm:$0xff] %v5563_v2  ;;  %v4817_v46 = vsub.f32 1.0, %v4816_v7  ;;  %v3759_v1 = vadd.f32 %v3758_v57, %v3590_v55  ;;  %vm4835_vm4 = vweird.f32 %v9718_v52  ;;  %v3595_v30 = vadd.f32 %v9641_v0, %v9707_v13 }
 0x839   :  { %5369 = vst.msk [vmem:[#allocation5 + $0xe0] sm:$0xff] %vm5340_vm6, %v4813_v39  ;;  %v4044_v41 = vpop.f32.mrf.mxu2  ;;  %v4842_v31 = vor.u32 1.1754944e-38, %v4841_v28  ;;  %vm4840_vm7 = vcmp.eq.f32.partialorder %v4839_v27, 8.507059e+37  ;;  %v3597_v39 = vadd.f32 %v9641_v0, %v9725_v62 }
 0x83a   :  { %v4818_v33 = vmul.f32 %v6402_v9, %v4817_v46  ;;  %v4045_v15 = vadd.f32 %v4044_v41, %v9189_v32  ;;  %v3843_v29 = vmax.f32 %v3759_v1, 0.0 }
 0x83c   :  { %v6404_v61 = vpop.eup %6403  ;;  %v4819_v59 = vadd.f32 %v6402_v9, %v4818_v33  ;;  %v6139_v34 = vmul.f32 -1.442695, %v4045_v15 }
 0x83d   :  { %v6406_v5 = vpop.eup %6405  ;;  %v9734_v17 = vadd.f32 1.0, %v6404_v61 }
 0x83e   :  { %v4823_v50 = vsel %vm4822_vm1, %v6402_v9, %v4819_v59  ;;  %v4831_v8 = vmul.f32 %v6406_v5, %v9718_v52  ;;  %6407 = vpow2.f32 %v6139_v34  ;;  %vm4836_vm3 = vweird.f32 %v6406_v5  ;;  %v9764_v52 = vpop.f32.mrf.mxu0 }
 0x83f   :  { %v4828_v14 = vsel %vm4825_vm2, %v4827_v42, %v4823_v50  ;;  %6409 = vrcp.f32 %v9734_v17  ;;  %v3760_v43 = vpop.f32.mrf.mxu1  ;;  %vm4837_vm5 = vmor %vm4835_vm4, %vm4836_vm3  ;;  %v4856_v16 = vand.u32 2147483648, %v9734_v17  ;;  %v4854_v53 = vand.u32 2147483647, %v9734_v17 }
 0x840   :  { %v5565_v56 = vld [vmem:[#allocation5 + $0xe0] sm:$0xff]  ;;  %5370 = vst.msk [vmem:[#allocation5 + $0xe8] sm:$0xff] %vm5340_vm6, %v4828_v14  ;;  %v4832_v54 = vsub.f32 1.0, %v4831_v8  ;;  %v3761_v22 = vadd.f32 %v3760_v43, %v3592_v35  ;;  %vm4850_vm9 = vweird.f32 %v9734_v17 }
 0x841   :  { %5566 = vst [vmem:[%s9867_s9 + $0xe0] sm:$0xff] %v5565_v56  ;;  %v4046_v25 = vpop.f32.mrf.mxu2  ;;  %v4857_v26 = vor.u32 1.1754944e-38, %v4856_v16  ;;  %vm4855_vm11 = vcmp.eq.f32.partialorder %v4854_v53, 8.507059e+37 }
 0x842   :  { %v4833_v3 = vmul.f32 %v6406_v5, %v4832_v54  ;;  %v4047_v23 = vadd.f32 %v4046_v25, %v9189_v32  ;;  %v3844_v36 = vmax.f32 %v3761_v22, 0.0 }
 0x844   :  { %v6408_v44 = vpop.eup %6407  ;;  %v4834_v19 = vadd.f32 %v6406_v5, %v4833_v3  ;;  %v6140_v21 = vmul.f32 -1.442695, %v4047_v23  ;;  %v3882_v45 = vpack.c.bf16 %v3844_v36, %v3843_v29 }
 0x845   :  { %v6410_v24 = vpop.eup %6409  ;;  %v9750_v38 = vadd.f32 1.0, %v6408_v44 }
 0x846   :  { %v4838_v4 = vsel %vm4837_vm5, %v6406_v5, %v4834_v19  ;;  %v4846_v48 = vmul.f32 %v6410_v24, %v9734_v17  ;;  %6411 = vpow2.f32 %v6140_v21  ;;  %4088 = vmatmul.bf16.gmra.mxu2 %v3882_v45  ;;  %vm4851_vm8 = vweird.f32 %v6410_v24  ;;  %v9779_v54 = vpop.f32.mrf.mxu0 }
 0x847   :  { %v5567_v63 = vld [vmem:[#allocation5 + $0xe8] sm:$0xff]  ;;  %v4843_v49 = vsel %vm4840_vm7, %v4842_v31, %v4838_v4  ;;  %6413 = vrcp.f32 %v9750_v38  ;;  %v3763_v18 = vpop.f32.mrf.mxu1  ;;  %vm4852_vm10 = vmor %vm4850_vm9, %vm4851_vm8  ;;  %v4871_v33 = vand.u32 2147483648, %v9750_v38  ;;  %v4869_v62 = vand.u32 2147483647, %v9750_v38 }
 0x848   :  { %5568 = vst [vmem:[%s9867_s9 + $0xe8] sm:$0xff] %v5567_v63  ;;  %v4847_v12 = vsub.f32 1.0, %v4846_v48  ;;  %v3764_v57 = vadd.f32 %v3763_v18, %v3595_v30  ;;  %vm4865_vm13 = vweird.f32 %v9750_v38  ;;  %v3600_v31 = vadd.f32 %v9641_v0, %v9747_v58 }
 0x849   :  { %5371 = vst.msk [vmem:[#allocation5 + $0xf0] sm:$0xff] %vm5340_vm6, %v4843_v49  ;;  %v4049_v47 = vpop.f32.mrf.mxu2  ;;  %v4872_v8 = vor.u32 1.1754944e-38, %v4871_v33  ;;  %vm4870_vm15 = vcmp.eq.f32.partialorder %v4869_v62, 8.507059e+37  ;;  %v3602_v63 = vadd.f32 %v9641_v0, %v9764_v52 }
 0x84a   :  { %v4848_v60 = vmul.f32 %v6410_v24, %v4847_v12  ;;  %v4050_v40 = vadd.f32 %v4049_v47, %v9189_v32  ;;  %v3845_v34 = vmax.f32 %v3764_v57, 0.0 }
 0x84c   :  { %v6412_v20 = vpop.eup %6411  ;;  %v4849_v37 = vadd.f32 %v6410_v24, %v4848_v60  ;;  %v6141_v11 = vmul.f32 -1.442695, %v4050_v40 }
 0x84d   :  { %v6414_v9 = vpop.eup %6413  ;;  %v4349_v10 = vadd.f32 1.0, %v6412_v20 }
 0x84e   :  { %v4853_v7 = vsel %vm4852_vm10, %v6410_v24, %v4849_v37  ;;  %v4861_v2 = vmul.f32 %v6414_v9, %v9750_v38  ;;  %6415 = vpow2.f32 %v6141_v11  ;;  %vm4866_vm12 = vweird.f32 %v6414_v9  ;;  %v3606_v58 = vpop.f32.mrf.mxu0 }
 0x84f   :  { %v4858_v46 = vsel %vm4855_vm11, %v4857_v26, %v4853_v7  ;;  %6417 = vrcp.f32 %v4349_v10  ;;  %v3765_v41 = vpop.f32.mrf.mxu1  ;;  %vm4867_vm14 = vmor %vm4865_vm13, %vm4866_vm12  ;;  %v4886_v3 = vand.u32 2147483648, %v4349_v10  ;;  %v4884_v29 = vand.u32 2147483647, %v4349_v10 }
 0x850   :  { %v5569_v51 = vld [vmem:[#allocation5 + $0xf0] sm:$0xff]  ;;  %5372 = vst.msk [vmem:[#allocation5 + $0xf8] sm:$0xff] %vm5340_vm6, %v4858_v46  ;;  %v4862_v13 = vsub.f32 1.0, %v4861_v2  ;;  %v3766_v6 = vadd.f32 %v3765_v41, %v3597_v39  ;;  %vm4880_vm1 = vweird.f32 %v4349_v10 }
 0x851   :  { %5570 = vst [vmem:[%s9867_s9 + $0xf0] sm:$0xff] %v5569_v51  ;;  %v4051_v15 = vpop.f32.mrf.mxu2  ;;  %v4887_v38 = vor.u32 1.1754944e-38, %v4886_v3  ;;  %vm4885_vm3 = vcmp.eq.f32.partialorder %v4884_v29, 8.507059e+37 }
 0x852   :  { %v4863_v61 = vmul.f32 %v6414_v9, %v4862_v13  ;;  %v4052_v59 = vadd.f32 %v4051_v15, %v9189_v32  ;;  %v3846_v5 = vmax.f32 %v3766_v6, 0.0 }
 0x854   :  { %v6416_v55 = vpop.eup %6415  ;;  %v4864_v42 = vadd.f32 %v6414_v9, %v4863_v61  ;;  %v6142_v17 = vmul.f32 -1.442695, %v4052_v59  ;;  %v3883_v14 = vpack.c.bf16 %v3846_v5, %v3845_v34 }
 0x855   :  { %v6418_v50 = vpop.eup %6417  ;;  %v9777_v35 = vadd.f32 1.0, %v6416_v55 }
 0x856   :  { %v4868_v1 = vsel %vm4867_vm14, %v6414_v9, %v4864_v42  ;;  %v4876_v56 = vmul.f32 %v6418_v50, %v4349_v10  ;;  %6419 = vpow2.f32 %v6142_v17  ;;  %4093 = vmatmul.bf16.gmra.mxu2 %v3883_v14  ;;  %vm4881_vm0 = vweird.f32 %v6418_v50  ;;  %v9804_v59 = vpop.f32.mrf.mxu0 }
 0x857   :  { %v5571_v43 = vld [vmem:[#allocation5 + $0xf8] sm:$0xff]  ;;  %v4873_v28 = vsel %vm4870_vm15, %v4872_v8, %v4868_v1  ;;  %6421 = vrcp.f32 %v9777_v35  ;;  %v3768_v25 = vpop.f32.mrf.mxu1  ;;  %vm4882_vm2 = vmor %vm4880_vm1, %vm4881_vm0  ;;  %v4901_v60 = vand.u32 2147483648, %v9777_v35  ;;  %v4899_v37 = vand.u32 2147483647, %v9777_v35 }
 0x858   :  { %5572 = vst [vmem:[%s9867_s9 + $0xf8] sm:$0xff] %v5571_v43  ;;  %v4877_v22 = vsub.f32 1.0, %v4876_v56  ;;  %v3769_v12 = vadd.f32 %v3768_v25, %v3600_v31  ;;  %vm4895_vm5 = vweird.f32 %v9777_v35  ;;  %v3605_v17 = vadd.f32 %v9641_v0, %v9779_v54 }
 0x859   :  { %5373 = vst.msk [vmem:[#allocation5 + $0x100] sm:$0xff] %vm5340_vm6, %v4873_v28  ;;  %v4054_v27 = vpop.f32.mrf.mxu2  ;;  %v4902_v2 = vor.u32 1.1754944e-38, %v4901_v60  ;;  %vm4900_vm8 = vcmp.eq.f32.partialorder %v4899_v37, 8.507059e+37  ;;  %v3607_v56 = vadd.f32 %v9641_v0, %v3606_v58 }
 0x85a   :  { %v4878_v23 = vmul.f32 %v6418_v50, %v4877_v22  ;;  %v4055_v36 = vadd.f32 %v4054_v27, %v9189_v32  ;;  %v3847_v9 = vmax.f32 %v3769_v12, 0.0 }
 0x85c   :  { %v6420_v44 = vpop.eup %6419  ;;  %v4879_v19 = vadd.f32 %v6418_v50, %v4878_v23  ;;  %v6143_v21 = vmul.f32 -1.442695, %v4055_v36 }
 0x85d   :  { %v6422_v24 = vpop.eup %6421  ;;  %v4351_v45 = vadd.f32 1.0, %v6420_v44 }
 0x85e   :  { %v4883_v4 = vsel %vm4882_vm2, %v6418_v50, %v4879_v19  ;;  %v4891_v48 = vmul.f32 %v6422_v24, %v9777_v35  ;;  %6423 = vpow2.f32 %v6143_v21  ;;  %vm4896_vm4 = vweird.f32 %v6422_v24 }
 0x85f   :  { %v4888_v49 = vsel %vm4885_vm3, %v4887_v38, %v4883_v4  ;;  %6425 = vrcp.f32 %v4351_v45  ;;  %v3770_v47 = vpop.f32.mrf.mxu1  ;;  %vm4897_vm7 = vmor %vm4895_vm5, %vm4896_vm4  ;;  %v4916_v15 = vand.u32 2147483648, %v4351_v45  ;;  %v4914_v62 = vand.u32 2147483647, %v4351_v45  ;;  %v3611_v38 = vpop.f32.mrf.mxu0 }
 0x860   :  { %v5573_v18 = vld [vmem:[#allocation5 + $0x100] sm:$0xff]  ;;  %5374 = vst.msk [vmem:[#allocation5 + $0x108] sm:$0xff] %vm5340_vm6, %v4888_v49  ;;  %v4892_v16 = vsub.f32 1.0, %v4891_v48  ;;  %v3771_v53 = vadd.f32 %v3770_v47, %v3602_v63  ;;  %vm4910_vm10 = vweird.f32 %v4351_v45 }
 0x861   :  { %5574 = vst [vmem:[%s9867_s9 + $0x100] sm:$0xff] %v5573_v18  ;;  %v4056_v40 = vpop.f32.mrf.mxu2  ;;  %v4917_v50 = vor.u32 1.1754944e-38, %v4916_v15  ;;  %vm4915_vm12 = vcmp.eq.f32.partialorder %v4914_v62, 8.507059e+37 }
 0x862   :  { %v4893_v20 = vmul.f32 %v6422_v24, %v4892_v16  ;;  %v4057_v11 = vadd.f32 %v4056_v40, %v9189_v32  ;;  %v3848_v30 = vmax.f32 %v3771_v53, 0.0 }
 0x864   :  { %v6424_v52 = vpop.eup %6423  ;;  %v4894_v26 = vadd.f32 %v6422_v24, %v4893_v20  ;;  %v6144_v10 = vmul.f32 -1.442695, %v4057_v11  ;;  %v3884_v46 = vpack.c.bf16 %v3848_v30, %v3847_v9  ;;  %v3610_v30 = vadd.f32 %v9641_v0, %v9804_v59 }
 0x865   :  { %v6426_v7 = vpop.eup %6425  ;;  %v4352_v39 = vadd.f32 1.0, %v6424_v52 }
 0x866   :  { %v4898_v57 = vsel %vm4897_vm7, %v6422_v24, %v4894_v26  ;;  %v4906_v51 = vmul.f32 %v6426_v7, %v4351_v45  ;;  %6427 = vpow2.f32 %v6144_v10  ;;  %4098 = vmatmul.bf16.gmra.mxu2 %v3884_v46  ;;  %vm4911_vm9 = vweird.f32 %v6426_v7 }
 0x867   :  { %v5575_v13 = vld [vmem:[#allocation5 + $0x108] sm:$0xff]  ;;  %v4903_v41 = vsel %vm4900_vm8, %v4902_v2, %v4898_v57  ;;  %6429 = vrcp.f32 %v4352_v39  ;;  %v3773_v6 = vpop.f32.mrf.mxu1  ;;  %vm4912_vm11 = vmor %vm4910_vm10, %vm4911_vm9  ;;  %v4931_v54 = vand.u32 2147483648, %v4352_v39  ;;  %v4929_v36 = vand.u32 2147483647, %v4352_v39 }
 0x868   :  { %5576 = vst [vmem:[%s9867_s9 + $0x108] sm:$0xff] %v5575_v13  ;;  %v4907_v33 = vsub.f32 1.0, %v4906_v51  ;;  %v3774_v28 = vadd.f32 %v3773_v6, %v3605_v17  ;;  %vm4925_vm14 = vweird.f32 %v4352_v39  ;;  %v3612_v2 = vadd.f32 %v9641_v0, %v3611_v38 }
 0x869   :  { %5375 = vst.msk [vmem:[#allocation5 + $0x110] sm:$0xff] %vm5340_vm6, %v4903_v41  ;;  %v4059_v55 = vpop.f32.mrf.mxu2  ;;  %v4932_v45 = vor.u32 1.1754944e-38, %v4931_v54  ;;  %vm4930_vm0 = vcmp.eq.f32.partialorder %v4929_v36, 8.507059e+37 }
 0x86a   :  { %v4908_v61 = vmul.f32 %v6426_v7, %v4907_v33  ;;  %v4060_v35 = vadd.f32 %v4059_v55, %v9189_v32  ;;  %v3849_v44 = vmax.f32 %v3774_v28, 0.0 }
 0x86c   :  { %v6428_v34 = vpop.eup %6427  ;;  %v4909_v5 = vadd.f32 %v6426_v7, %v4908_v61  ;;  %v6145_v3 = vmul.f32 -1.442695, %v4060_v35 }
 0x86d   :  { %v6430_v42 = vpop.eup %6429  ;;  %v4353_v8 = vadd.f32 1.0, %v6428_v34 }
 0x86e   :  { %v4913_v14 = vsel %vm4912_vm11, %v6426_v7, %v4909_v5  ;;  %v4921_v1 = vmul.f32 %v6430_v42, %v4352_v39  ;;  %vm4926_vm13 = vweird.f32 %v6430_v42  ;;  %v3614_v39 = vpop.f32.mrf.mxu0 }
 0x86f   :  { %v4918_v43 = vsel %vm4915_vm12, %v4917_v50, %v4913_v14  ;;  %6431 = vrcp.f32 %v4353_v8  ;;  %v3775_v27 = vpop.f32.mrf.mxu1  ;;  %vm4927_vm15 = vmor %vm4925_vm14, %vm4926_vm13  ;;  %v4946_v53 = vand.u32 2147483648, %v4353_v8  ;;  %v4944_v37 = vand.u32 2147483647, %v4353_v8 }
 0x870   :  { %v5577_v22 = vld [vmem:[#allocation5 + $0x110] sm:$0xff]  ;;  %5376 = vst.msk [vmem:[#allocation5 + $0x118] sm:$0xff] %vm5340_vm6, %v4918_v43  ;;  %v4922_v25 = vsub.f32 1.0, %v4921_v1  ;;  %v3776_v23 = vadd.f32 %v3775_v27, %v3607_v56  ;;  %6433 = vpow2.f32 %v6145_v3  ;;  %vm4940_vm2 = vweird.f32 %v4353_v8 }
 0x871   :  { %5578 = vst [vmem:[%s9867_s9 + $0x110] sm:$0xff] %v5577_v22  ;;  %v4061_v24 = vpop.f32.mrf.mxu2  ;;  %v4947_v52 = vor.u32 1.1754944e-38, %v4946_v53  ;;  %vm4945_vm4 = vcmp.eq.f32.partialorder %v4944_v37, 8.507059e+37  ;;  %v3615_v43 = vadd.f32 %v9641_v0, %v3614_v39 }
 0x872   :  { %v4923_v29 = vmul.f32 %v6430_v42, %v4922_v25  ;;  %v3850_v19 = vmax.f32 %v3776_v23, 0.0  ;;  %v4062_v48 = vadd.f32 %v4061_v24, %v9189_v32 }
 0x874   :  { %v4924_v21 = vadd.f32 %v6430_v42, %v4923_v29  ;;  %v3885_v4 = vpack.c.bf16 %v3850_v19, %v3849_v44  ;;  %v6146_v16 = vmul.f32 -1.442695, %v4062_v48 }
 0x875   :  { %v6432_v31 = vpop.eup %6431 }
 0x876   :  { %v4928_v63 = vsel %vm4927_vm15, %v6430_v42, %v4924_v21  ;;  %v4936_v49 = vmul.f32 %v6432_v31, %v4353_v8  ;;  %v6434_v47 = vpop.eup %6433  ;;  %6435 = vpow2.f32 %v6146_v16  ;;  %4103 = vmatmul.bf16.gmra.mxu2 %v3885_v4  ;;  %vm4941_vm1 = vweird.f32 %v6432_v31  ;;  %v3616_v14 = vpop.f32.mrf.mxu0 }
 0x877   :  { %v5579_v12 = vld [vmem:[#allocation5 + $0x118] sm:$0xff]  ;;  %v4933_v18 = vsel %vm4930_vm0, %v4932_v45, %v4928_v63  ;;  %v3778_v60 = vpop.f32.mrf.mxu1  ;;  %v4354_v40 = vadd.f32 1.0, %v6434_v47  ;;  %vm4942_vm3 = vmor %vm4940_vm2, %vm4941_vm1  ;;  %v3617_v3 = vadd.f32 %v9641_v0, %v3616_v14 }
 0x878   :  { %5580 = vst [vmem:[%s9867_s9 + $0x118] sm:$0xff] %v5579_v12  ;;  %v4937_v58 = vsub.f32 1.0, %v4936_v49  ;;  %v3779_v57 = vadd.f32 %v3778_v60, %v3610_v30 }
 0x879   :  { %5377 = vst.msk [vmem:[#allocation5 + $0x120] sm:$0xff] %vm5340_vm6, %v4933_v18  ;;  %6437 = vrcp.f32 %v4354_v40  ;;  %v4064_v9 = vpop.f32.mrf.mxu2  ;;  %v6541_v18 = vld [vmem:[%s9864_s6] ss:$0 sm:$0xff] }
 0x87a   :  { %v4938_v20 = vmul.f32 %v6432_v31, %v4937_v58  ;;  %v4065_v26 = vadd.f32 %v4064_v9, %v9189_v32  ;;  %v3851_v61 = vmax.f32 %v3779_v57, 0.0 }
 0x87c   :  { %v4939_v11 = vadd.f32 %v6432_v31, %v4938_v20  ;;  %v6436_v7 = vpop.eup %6435  ;;  %v6147_v51 = vmul.f32 -1.442695, %v4065_v26 }
 0x87d   :  { %v4355_v41 = vadd.f32 1.0, %v6436_v7 }
 0x87e   :  { %v4943_v10 = vsel %vm4942_vm3, %v6432_v31, %v4939_v11  ;;  %6439 = vpow2.f32 %v6147_v51  ;;  %v3619_v29 = vpop.f32.mrf.mxu0 }
 0x87f   :  { %v4948_v46 = vsel %vm4945_vm4, %v4947_v52, %v4943_v10  ;;  %v3780_v33 = vpop.f32.mrf.mxu1  ;;  %v6438_v6 = vpop.eup %6437  ;;  %6441 = vrcp.f32 %v4355_v41  ;;  %v3620_v16 = vadd.f32 %v6541_v18, %v3619_v29 }
 0x880   :  { %v5581_v13 = vld [vmem:[#allocation5 + $0x120] sm:$0xff]  ;;  %5378 = vst.msk [vmem:[#allocation5 + $0x128] sm:$0xff] %vm5340_vm6, %v4948_v46  ;;  %v3781_v15 = vadd.f32 %v3780_v33, %v3612_v2 }
 0x881   :  { %5582 = vst [vmem:[%s9867_s9 + $0x120] sm:$0xff] %v5581_v13  ;;  %v4066_v59 = vpop.f32.mrf.mxu2 }
 0x882   :  { %v3852_v62 = vmax.f32 %v3781_v15, 0.0  ;;  %v4067_v5 = vadd.f32 %v4066_v59, %v9189_v32 }
 0x884   :  { %v3886_v34 = vpack.c.bf16 %v3852_v62, %v3851_v61  ;;  %v6440_v55 = vpop.eup %6439  ;;  %v6148_v17 = vmul.f32 -1.442695, %v4067_v5 }
 0x885   :  { %v6442_v50 = vpop.eup %6441  ;;  %v4356_v8 = vadd.f32 1.0, %v6440_v55 }
 0x886   :  { %6443 = vpow2.f32 %v6148_v17  ;;  %4108 = vmatmul.bf16.gmra.mxu2 %v3886_v34  ;;  %v3621_v49 = vpop.f32.mrf.mxu0 }
 0x887   :  { %v5583_v42 = vld [vmem:[#allocation5 + $0x128] sm:$0xff]  ;;  %v3783_v35 = vpop.f32.mrf.mxu1  ;;  %6445 = vrcp.f32 %v4356_v8  ;;  %v3622_v53 = vadd.f32 %v6541_v18, %v3621_v49 }
 0x888   :  { %5584 = vst [vmem:[%s9867_s9 + $0x128] sm:$0xff] %v5583_v42  ;;  %v3784_v54 = vadd.f32 %v3783_v35, %v3615_v43 }
 0x889   :  { %v4069_v1 = vpop.f32.mrf.mxu2 }
 0x88a   :  { %v4070_v56 = vadd.f32 %v4069_v1, %v9189_v32  ;;  %v3853_v44 = vmax.f32 %v3784_v54, 0.0 }
 0x88c   :  { %v6444_v28 = vpop.eup %6443  ;;  %v6149_v22 = vmul.f32 -1.442695, %v4070_v56 }
 0x88d   :  { %v6446_v25 = vpop.eup %6445  ;;  %v4357_v27 = vadd.f32 1.0, %v6444_v28 }
 0x88e   :  { %6447 = vpow2.f32 %v6149_v22 }
 0x88f   :  { %v3785_v23 = vpop.f32.mrf.mxu1  ;;  %6449 = vrcp.f32 %v4357_v27 }
 0x890   :  { %v3786_v36 = vadd.f32 %v3785_v23, %v3617_v3 }
 0x891   :  { %v4071_v19 = vpop.f32.mrf.mxu2 }
 0x892   :  { %v3854_v21 = vmax.f32 %v3786_v36, 0.0  ;;  %v4072_v24 = vadd.f32 %v4071_v19, %v9189_v32 }
 0x894   :  { %v6448_v31 = vpop.eup %6447  ;;  %v3887_v38 = vpack.c.bf16 %v3854_v21, %v3853_v44  ;;  %v6150_v45 = vmul.f32 -1.442695, %v4072_v24 }
 0x895   :  { %v6450_v4 = vpop.eup %6449  ;;  %v4358_v48 = vadd.f32 1.0, %v6448_v31 }
 0x896   :  { %6451 = vpow2.f32 %v6150_v45  ;;  %4113 = vmatmul.bf16.gmra.mxu2 %v3887_v38 }
 0x897   :  { %v3788_v63 = vpop.f32.mrf.mxu1  ;;  %6453 = vrcp.f32 %v4358_v48 }
 0x898   :  { %v3789_v20 = vadd.f32 %v3788_v63, %v3620_v16 }
 0x899   :  { %v4074_v0 = vpop.f32.mrf.mxu2 }
 0x89a   :  { %v4075_v12 = vadd.f32 %v4074_v0, %v9189_v32  ;;  %v3855_v9 = vmax.f32 %v3789_v20, 0.0 }
 0x89c   :  { %v6452_v47 = vpop.eup %6451  ;;  %v6151_v58 = vmul.f32 -1.442695, %v4075_v12 }
 0x89d   :  { %v6454_v60 = vpop.eup %6453  ;;  %v4359_v40 = vadd.f32 1.0, %v6452_v47 }
 0x89e   :  { %6455 = vpow2.f32 %v6151_v58 }
 0x89f   :  { %v3790_v37 = vpop.f32.mrf.mxu1  ;;  %6457 = vrcp.f32 %v4359_v40 }
 0x8a0   :  { %v3791_v11 = vadd.f32 %v3790_v37, %v3622_v53 }
 0x8a1   :  { %v4076_v30 = vpop.f32.mrf.mxu2 }
 0x8a2   :  { %v3856_v52 = vmax.f32 %v3791_v11, 0.0  ;;  %v4077_v26 = vadd.f32 %v4076_v30, %v9189_v32 }
 0x8a4   :  { %v6456_v10 = vpop.eup %6455  ;;  %v3888_v7 = vpack.c.bf16 %v3856_v52, %v3855_v9  ;;  %v6152_v2 = vmul.f32 -1.442695, %v4077_v26 }
 0x8a5   :  { %v6458_v39 = vpop.eup %6457  ;;  %v4360_v46 = vadd.f32 1.0, %v6456_v10 }
 0x8a6   :  { %6459 = vpow2.f32 %v6152_v2  ;;  %4118 = vmatmul.bf16.gmra.mxu2 %v3888_v7 }
 0x8a7   :  { %6461 = vrcp.f32 %v4360_v46 }
 0x8a9   :  { %v4079_v57 = vpop.f32.mrf.mxu2 }
 0x8aa   :  { %v4080_v51 = vadd.f32 %v4079_v57, %v9189_v32 }
 0x8ac   :  { %v6460_v13 = vpop.eup %6459  ;;  %v6153_v41 = vmul.f32 -1.442695, %v4080_v51 }
 0x8ad   :  { %v6462_v33 = vpop.eup %6461  ;;  %v4361_v6 = vadd.f32 1.0, %v6460_v13 }
 0x8ae   :  { %6463 = vpow2.f32 %v6153_v41 }
 0x8af   :  { %6465 = vrcp.f32 %v4361_v6 }
 0x8b1   :  { %v4081_v15 = vpop.f32.mrf.mxu2 }
 0x8b2   :  { %v4082_v61 = vadd.f32 %v4081_v15, %v9189_v32 }
 0x8b4   :  { %v6464_v62 = vpop.eup %6463  ;;  %v6154_v59 = vmul.f32 -1.442695, %v4082_v61 }
 0x8b5   :  { %v6466_v34 = vpop.eup %6465  ;;  %v4362_v5 = vadd.f32 1.0, %v6464_v62 }
 0x8b6   :  { %6467 = vpow2.f32 %v6154_v59 }
 0x8b7   :  { %6469 = vrcp.f32 %v4362_v5 }
 0x8b9   :  { %v4084_v55 = vpop.f32.mrf.mxu2 }
 0x8ba   :  { %v4085_v42 = vadd.f32 %v4084_v55, %v9189_v32 }
 0x8bc   :  { %v6468_v17 = vpop.eup %6467  ;;  %v6155_v50 = vmul.f32 -1.442695, %v4085_v42 }
 0x8bd   :  { %v6470_v8 = vpop.eup %6469  ;;  %v4363_v35 = vadd.f32 1.0, %v6468_v17 }
 0x8be   :  { %6471 = vpow2.f32 %v6155_v50 }
 0x8bf   :  { %6473 = vrcp.f32 %v4363_v35 }
 0x8c1   :  { %v4086_v14 = vpop.f32.mrf.mxu2 }
 0x8c2   :  { %v4087_v1 = vadd.f32 %v4086_v14, %v9189_v32 }
 0x8c4   :  { %v6472_v56 = vpop.eup %6471  ;;  %v6156_v43 = vmul.f32 -1.442695, %v4087_v1 }
 0x8c5   :  { %v6474_v28 = vpop.eup %6473  ;;  %v4364_v22 = vadd.f32 1.0, %v6472_v56 }
 0x8c6   :  { %6475 = vpow2.f32 %v6156_v43 }
 0x8c7   :  { %6477 = vrcp.f32 %v4364_v22 }
 0x8c9   :  { %v4089_v25 = vpop.f32.mrf.mxu2 }
 0x8ca   :  { %v4090_v3 = vadd.f32 %v4089_v25, %v9189_v32 }
 0x8cc   :  { %v6476_v27 = vpop.eup %6475  ;;  %v6157_v54 = vmul.f32 -1.442695, %v4090_v3 }
 0x8cd   :  { %v6478_v23 = vpop.eup %6477  ;;  %v4365_v29 = vadd.f32 1.0, %v6476_v27 }
 0x8ce   :  { %6479 = vpow2.f32 %v6157_v54 }
 0x8cf   :  { %6481 = vrcp.f32 %v4365_v29 }
 0x8d1   :  { %v4091_v36 = vpop.f32.mrf.mxu2 }
 0x8d2   :  { %v4092_v44 = vadd.f32 %v4091_v36, %v9189_v32 }
 0x8d4   :  { %v6480_v19 = vpop.eup %6479  ;;  %v6158_v21 = vmul.f32 -1.442695, %v4092_v44 }
 0x8d5   :  { %v6482_v24 = vpop.eup %6481  ;;  %v4366_v31 = vadd.f32 1.0, %v6480_v19 }
 0x8d6   :  { %6483 = vpow2.f32 %v6158_v21 }
 0x8d7   :  { %6485 = vrcp.f32 %v4366_v31 }
 0x8d9   :  { %v4094_v38 = vpop.f32.mrf.mxu2 }
 0x8da   :  { %v4095_v45 = vadd.f32 %v4094_v38, %v9189_v32 }
 0x8dc   :  { %v6484_v4 = vpop.eup %6483  ;;  %v6159_v48 = vmul.f32 -1.442695, %v4095_v45 }
 0x8dd   :  { %v6486_v63 = vpop.eup %6485  ;;  %v4367_v0 = vadd.f32 1.0, %v6484_v4 }
 0x8de   :  { %6487 = vpow2.f32 %v6159_v48 }
 0x8df   :  { %6489 = vrcp.f32 %v4367_v0 }
 0x8e1   :  { %v4096_v49 = vpop.f32.mrf.mxu2 }
 0x8e2   :  { %v4097_v12 = vadd.f32 %v4096_v49, %v9189_v32 }
 0x8e4   :  { %v6488_v18 = vpop.eup %6487  ;;  %v6160_v16 = vmul.f32 -1.442695, %v4097_v12 }
 0x8e5   :  { %v6490_v47 = vpop.eup %6489  ;;  %v4368_v58 = vadd.f32 1.0, %v6488_v18 }
 0x8e6   :  { %6491 = vpow2.f32 %v6160_v16 }
 0x8e7   :  { %6493 = vrcp.f32 %v4368_v58 }
 0x8e9   :  { %v4099_v60 = vpop.f32.mrf.mxu2 }
 0x8ea   :  { %v4100_v53 = vadd.f32 %v4099_v60, %v9189_v32 }
 0x8ec   :  { %v6492_v40 = vpop.eup %6491  ;;  %v6161_v20 = vmul.f32 -1.442695, %v4100_v53 }
 0x8ed   :  { %v6494_v37 = vpop.eup %6493  ;;  %v4369_v11 = vadd.f32 1.0, %v6492_v40 }
 0x8ee   :  { %6495 = vpow2.f32 %v6161_v20 }
 0x8ef   :  { %6497 = vrcp.f32 %v4369_v11 }
 0x8f1   :  { %v4101_v9 = vpop.f32.mrf.mxu2 }
 0x8f2   :  { %v4102_v30 = vadd.f32 %v4101_v9, %v9189_v32 }
 0x8f4   :  { %v6496_v52 = vpop.eup %6495  ;;  %v6162_v26 = vmul.f32 -1.442695, %v4102_v30 }
 0x8f5   :  { %v6498_v10 = vpop.eup %6497  ;;  %v4370_v7 = vadd.f32 1.0, %v6496_v52 }
 0x8f6   :  { %6499 = vpow2.f32 %v6162_v26 }
 0x8f7   :  { %6501 = vrcp.f32 %v4370_v7 }
 0x8f9   :  { %v4104_v2 = vpop.f32.mrf.mxu2 }
 0x8fa   :  { %v4105_v39 = vadd.f32 %v4104_v2, %v9189_v32 }
 0x8fc   :  { %v6500_v46 = vpop.eup %6499  ;;  %v6163_v57 = vmul.f32 -1.442695, %v4105_v39 }
 0x8fd   :  { %v6502_v51 = vpop.eup %6501  ;;  %v4371_v13 = vadd.f32 1.0, %v6500_v46 }
 0x8fe   :  { %6503 = vpow2.f32 %v6163_v57 }
 0x8ff   :  { %6505 = vrcp.f32 %v4371_v13 }
 0x901   :  { %v4106_v41 = vpop.f32.mrf.mxu2 }
 0x902   :  { %v4107_v33 = vadd.f32 %v4106_v41, %v9189_v32 }
 0x904   :  { %v6504_v6 = vpop.eup %6503  ;;  %v6164_v15 = vmul.f32 -1.442695, %v4107_v33 }
 0x905   :  { %v6506_v61 = vpop.eup %6505  ;;  %v4372_v62 = vadd.f32 1.0, %v6504_v6 }
 0x906   :  { %6507 = vpow2.f32 %v6164_v15 }
 0x907   :  { %6509 = vrcp.f32 %v4372_v62 }
 0x909   :  { %v4109_v59 = vpop.f32.mrf.mxu2 }
 0x90a   :  { %v4110_v34 = vadd.f32 %v4109_v59, %v9189_v32 }
 0x90c   :  { %v6508_v5 = vpop.eup %6507  ;;  %v6165_v55 = vmul.f32 -1.442695, %v4110_v34 }
 0x90d   :  { %v6510_v42 = vpop.eup %6509  ;;  %v4373_v17 = vadd.f32 1.0, %v6508_v5 }
 0x90e   :  { %6511 = vpow2.f32 %v6165_v55 }
 0x90f   :  { %6513 = vrcp.f32 %v4373_v17 }
 0x911   :  { %v4111_v50 = vpop.f32.mrf.mxu2 }
 0x912   :  { %v4112_v8 = vadd.f32 %v4111_v50, %v9189_v32 }
 0x914   :  { %v6512_v35 = vpop.eup %6511  ;;  %v6166_v14 = vmul.f32 -1.442695, %v4112_v8 }
 0x915   :  { %v6514_v1 = vpop.eup %6513  ;;  %v4374_v56 = vadd.f32 1.0, %v6512_v35 }
 0x916   :  { %6515 = vpow2.f32 %v6166_v14 }
 0x917   :  { %6517 = vrcp.f32 %v4374_v56 }
 0x919   :  { %v4114_v43 = vpop.f32.mrf.mxu2 }
 0x91a   :  { %v4115_v28 = vadd.f32 %v4114_v43, %v9189_v32 }
 0x91c   :  { %v6516_v22 = vpop.eup %6515  ;;  %v6167_v25 = vmul.f32 -1.442695, %v4115_v28 }
 0x91d   :  { %v6518_v3 = vpop.eup %6517  ;;  %v4375_v27 = vadd.f32 1.0, %v6516_v22 }
 0x91e   :  { %6519 = vpow2.f32 %v6167_v25 }
 0x91f   :  { %6521 = vrcp.f32 %v4375_v27 }
 0x921   :  { %v4116_v54 = vpop.f32.mrf.mxu2 }
 0x922   :  { %v4117_v23 = vadd.f32 %v4116_v54, %v9189_v32 }
 0x924   :  { %v6520_v29 = vpop.eup %6519  ;;  %v6168_v36 = vmul.f32 -1.442695, %v4117_v23 }
 0x925   :  { %v6522_v44 = vpop.eup %6521  ;;  %v4376_v19 = vadd.f32 1.0, %v6520_v29 }
 0x926   :  { %6523 = vpow2.f32 %v6168_v36 }
 0x927   :  { %6525 = vrcp.f32 %v4376_v19 }
 0x929   :  { %v4119_v21 = vpop.f32.mrf.mxu2 }
 0x92a   :  { %v4120_v24 = vadd.f32 %v4119_v21, %v9189_v32 }
 0x92c   :  { %v6524_v31 = vpop.eup %6523  ;;  %v6169_v38 = vmul.f32 -1.442695, %v4120_v24 }
 0x92d   :  { %v6526_v45 = vpop.eup %6525  ;;  %v4377_v4 = vadd.f32 1.0, %v6524_v31 }
 0x92e   :  { %6527 = vpow2.f32 %v6169_v38 }
 0x92f   :  { %6529 = vrcp.f32 %v4377_v4 }
 0x931   :  { %v4121_v48 = vpop.f32.mrf.mxu2 }
 0x932   :  { %v4122_v63 = vadd.f32 %v4121_v48, %v9189_v32 }
 0x934   :  { %v6528_v0 = vpop.eup %6527  ;;  %v6170_v49 = vmul.f32 -1.442695, %v4122_v63 }
 0x935   :  { %v6530_v12 = vpop.eup %6529  ;;  %v4378_v18 = vadd.f32 1.0, %v6528_v0 }
 0x936   :  { %6531 = vpow2.f32 %v6170_v49 }
 0x937   :  { %6533 = vrcp.f32 %v4378_v18 }
 0x93c   :  { %v6532_v16 = vpop.eup %6531 }
 0x93d   :  { %v6534_v47 = vpop.eup %6533  ;;  %v4379_v58 = vadd.f32 1.0, %v6532_v16 }
 0x93f   :  { %6535 = vrcp.f32 %v4379_v58 }
 0x945   :  { %v6536_v60 = vpop.eup %6535 }
 0x946   :  { %5590 = vsyncpa [#allocation4], 1 }

</bundles_post_ra>
